<compile_context>
chip_gen: v5e
topology: v5e:2x2
jax: 0.10.0
libtpu: 0.0.40
codegen_flags: <defaults>
</compile_context>

<pallas_src>
import jax
import jax.numpy as jnp
from jax import lax
from jax.experimental import pallas as pl
from jax.experimental.pallas import tpu as pltpu

BN_EPS = 1e-5
LANE = 128

# K-stack the 3 dx taps (K = 3*Cin) - fills v6e/v7x's 256-deep MXU. On v5e the 128-deep MXU
# is already filled by Cin=128, so set this to False there to save the VMEM copies.
STACK_DX_TAPS = True


def _round_up(x, m):
    return ((x + m - 1) // m) * m


def _vmem_estimate(tile_h, w, c_in, c_out):
    bf16, f32, db = 2, 4, 2                       # db = double-buffered pipeline buffers
    band_in = tile_h * w * c_in * bf16 * db
    halos = 2 * w * c_in * bf16 * db
    weights = 9 * c_in * c_out * bf16 * db
    y_out = tile_h * w * c_out * bf16 * db
    stats = 2 * c_out * f32 * db
    pad_scratch = (tile_h + 2) * (w + 2) * c_in * bf16
    tmp = (tile_h * w * 3 * c_in * bf16           # K-stacked LHS
           + tile_h * w * c_out * f32             # f32 accumulator
           + (tile_h + 2) * w * c_in * f32)       # fused-BN intermediate
    return band_in + halos + weights + y_out + stats + pad_scratch + tmp


def _pick_tile_h(h, w, c_in, c_out, budget=18 * 2**20, max_m=4096):
    # Largest divisor of H whose working set fits the VMEM budget: bigger bands raise the
    # MXU M dim and amortize the ~0.35us per-grid-step overhead.
    # TODO(synk): support non-divisible H (pad H or ragged last tile) instead of divisors.
    best = 1
    for t in range(1, h + 1):
        if h % t == 0 and t * w <= max_m and _vmem_estimate(t, w, c_in, c_out) <= budget:
            best = t
    return best


def _vmem_limit(est_bytes):
    # Explicit scoped-VMEM limit: at least the 32 MiB default, capped at v7x's 64 MiB physical.
    return int(min(64 * 2**20, max(32 * 2**20, 2 * est_bytes)))


# --------------------------------------------------------------------------------------
# Conv kernel: 3x3 conv over a tile_h-row band, spatial padding built in VMEM scratch,
# optional fused BN+ReLU of the *input* (previous layer's normalization), plus per-tile
# BN partial stats (sum, sum_sq) of this layer's output.
# --------------------------------------------------------------------------------------
def _make_conv_kernel(*, tile_h, w, c_in, c_out, n_tiles, fuse_input_bn_relu, stack_dx):
    def kernel(*refs):
        if fuse_input_bn_relu:
            (top_ref, mid_ref, bot_ref, w_ref, scale_ref, shift_ref,
             y_ref, stats_ref, pad_ref) = refs
        else:
            top_ref, mid_ref, bot_ref, w_ref, y_ref, stats_ref, pad_ref = refs

        t = pl.program_id(1)

        if fuse_input_bn_relu:
            scale = scale_ref[...][None]          # (1, 1, Cin) f32, loaded once per step
            shift = shift_ref[...][None]

            def act(v):                           # previous layer's BN + ReLU, fused here
                return jnp.maximum(v.astype(jnp.float32) * scale + shift,
                                   0.0).astype(jnp.bfloat16)
        else:
            def act(v):
                return v

        top = act(top_ref[...][None])             # (1, W, Cin)
        mid = act(mid_ref[...])                   # (tile_h, W, Cin)
        bot = act(bot_ref[...][None])             # (1, W, Cin)
        # Halo rows fall outside the image for the first / last row band.
        top = jnp.where(t == 0, jnp.zeros_like(top), top)
        bot = jnp.where(t == n_tiles - 1, jnp.zeros_like(bot), bot)

        # Assemble the spatially zero-padded band in VMEM scratch (no HBM pad round trip).
        zcol = jnp.zeros((tile_h + 2, 1, c_in), jnp.bfloat16)
        pad_ref[:, 0:1, :] = zcol
        pad_ref[:, w + 1:w + 2, :] = zcol
        pad_ref[0:1, 1:w + 1, :] = top
        pad_ref[1:tile_h + 1, 1:w + 1, :] = mid
        pad_ref[tile_h + 1:tile_h + 2, 1:w + 1, :] = bot

        m = tile_h * w
        acc = jnp.zeros((m, c_out), jnp.float32)
        if stack_dx:
            # 3 matmuls of (M, 3*Cin) @ (3*Cin, Cout); dx taps stacked along K.
            for dy in range(3):
                lhs = jnp.concatenate(
                    [pad_ref[dy:dy + tile_h, dx:dx + w, :].reshape(m, c_in)
                     for dx in range(3)], axis=-1)
                acc = acc + jnp.dot(lhs, w_ref[dy], preferred_element_type=jnp.float32)
        else:
            # 9 matmuls of (M, Cin) @ (Cin, Cout).
            for dy in range(3):
                for dx in range(3):
                    acc = acc + jnp.dot(
                        pad_ref[dy:dy + tile_h, dx:dx + w, :].reshape(m, c_in),
                        w_ref[dy * 3 + dx], preferred_element_type=jnp.float32)

        # One lane-dense store of the whole tile + one pass of BN partial stats.
        y_ref[...] = acc.reshape(tile_h, w, c_out).astype(y_ref.dtype)
        stats_ref[0:1, :] = jnp.sum(acc, axis=0, keepdims=True)
        stats_ref[1:2, :] = jnp.sum(acc * acc, axis=0, keepdims=True)

    return kernel


def _conv_layer(x, w_folded, pre_scale=None, pre_shift=None, *, stack_dx=STACK_DX_TAPS):
    """x: (N, H, W, Cin) bf16, spatially UNPADDED (channels lane-padded).
    w_folded: (3, 3*Cin, Cout) bf16 if stack_dx else (9, Cin, Cout) bf16.
    pre_scale/pre_shift (1, Cin) f32: if given, relu(x*scale+shift) is applied in-kernel
    to the input rows (fused BN+ReLU of the previous layer).
    Returns conv output (N, H, W, Cout) bf16 and reduced (sum, sum_sq) stats (2, Cout) f32."""
    n, h, w, c_in = x.shape
    c_out = w_folded.shape[-1]
    tile_h = _pick_tile_h(h, w, c_in, c_out)
    n_tiles = h // tile_h
    fuse = pre_scale is not None

    kernel = _make_conv_kernel(tile_h=tile_h, w=w, c_in=c_in, c_out=c_out,
                               n_tiles=n_tiles, fuse_input_bn_relu=fuse,
                               stack_dx=stack_dx)

    in_specs = [
        # top halo row (clamped index; zeroed in-kernel when t == 0)
        pl.BlockSpec((None, None, w, c_in),
                     lambda nn, tt: (nn, jnp.maximum(tt * tile_h - 1, 0), 0, 0)),
        # main band: one large contiguous DMA per grid step
        pl.BlockSpec((None, tile_h, w, c_in), lambda nn, tt: (nn, tt, 0, 0)),
        # bottom halo row (clamped index; zeroed in-kernel when t == n_tiles - 1)
        pl.BlockSpec((None, None, w, c_in),
                     lambda nn, tt: (nn, jnp.minimum(tt * tile_h + tile_h, h - 1), 0, 0)),
        # weights: constant index map -> DMA'd once, resident in VMEM for the whole grid
        pl.BlockSpec(w_folded.shape, lambda nn, tt: (0, 0, 0)),
    ]
    inputs = [x, x, x, w_folded]
    if fuse:
        in_specs += [pl.BlockSpec((1, c_in), lambda nn, tt: (0, 0)),
                     pl.BlockSpec((1, c_in), lambda nn, tt: (0, 0))]
        inputs += [pre_scale, pre_shift]

    out_shape = (jax.ShapeDtypeStruct((n, h, w, c_out), jnp.bfloat16),
                 jax.ShapeDtypeStruct((n, n_tiles, 2, c_out), jnp.float32))
    out_specs = (pl.BlockSpec((None, tile_h, w, c_out), lambda nn, tt: (nn, tt, 0, 0)),
                 pl.BlockSpec((None, None, 2, c_out), lambda nn, tt: (nn, tt, 0, 0)))

    flops = 2 * n * h * w * (9 * c_in) * c_out
    bytes_accessed = (n * (h + 2 * n_tiles) * w * c_in * 2     # band + halo reads (bf16)
                      + w_folded.size * 2                      # weights
                      + n * h * w * c_out * 2                  # conv output (bf16)
                      + n * n_tiles * 2 * c_out * 4)           # partial stats
    est = _vmem_estimate(tile_h, w, c_in, c_out)

    y_raw, stats = pl.pallas_call(
        kernel,
        grid=(n, n_tiles),
        in_specs=in_specs,
        out_specs=out_specs,
        out_shape=out_shape,
        scratch_shapes=[pltpu.VMEM((tile_h + 2, w + 2, c_in), jnp.bfloat16)],
        compiler_params=pltpu.CompilerParams(
            dimension_semantics=("parallel", "parallel"),
            vmem_limit_bytes=_vmem_limit(est)),
        cost_estimate=pl.CostEstimate(flops=flops, transcendentals=0,
                                      bytes_accessed=bytes_accessed),
    )(*inputs)

    return y_raw, jnp.sum(stats, axis=(0, 1))                  # (2, Cout): [sum, sum_sq]


# --------------------------------------------------------------------------------------
# Final-layer epilogue: y -> relu(y*scale + shift). (Kept f32 output to match the module's
# float32 interface; write bf16 here if the downstream consumer accepts it.)
# --------------------------------------------------------------------------------------
def _bn_relu_kernel(y_ref, scale_ref, shift_ref, o_ref):
    y = y_ref[...].astype(jnp.float32)
    o_ref[...] = jnp.maximum(y * scale_ref[...][None] + shift_ref[...][None], 0.0)


def _bn_relu(y_raw, scale, shift):
    n, h, w, c = y_raw.shape
    tile_h = _pick_tile_h(h, w, c, c)
    return pl.pallas_call(
        _bn_relu_kernel,
        grid=(n, h // tile_h),
        in_specs=[pl.BlockSpec((None, tile_h, w, c), lambda nn, tt: (nn, tt, 0, 0)),
                  pl.BlockSpec((1, c), lambda nn, tt: (0, 0)),
                  pl.BlockSpec((1, c), lambda nn, tt: (0, 0))],
        out_specs=pl.BlockSpec((None, tile_h, w, c), lambda nn, tt: (nn, tt, 0, 0)),
        out_shape=jax.ShapeDtypeStruct((n, h, w, c), jnp.float32),
        compiler_params=pltpu.CompilerParams(
            dimension_semantics=("parallel", "parallel")),
    )(y_raw, scale, shift)


# --------------------------------------------------------------------------------------
# JAX glue: layout/padding plumbing and the tiny per-channel stats math.
# --------------------------------------------------------------------------------------
def _bn_affine(stats, gamma, beta, m_count):
    """(sum, sum_sq) per channel -> (scale, shift) = (g*inv_std, b - mean*g*inv_std)."""
    total, total_sq = stats[0], stats[1]
    mean = total / m_count
    var = jnp.maximum(total_sq / m_count - mean * mean, 0.0)    # biased var (train-mode BN)
    inv_std = lax.rsqrt(var + BN_EPS)
    scale = gamma * inv_std
    shift = beta - mean * scale
    return (scale.reshape(1, -1).astype(jnp.float32),
            shift.reshape(1, -1).astype(jnp.float32))


def _fold_weight(w_oihw, c_in_pad, c_out_pad, stack_dx=STACK_DX_TAPS):
    """(Cout, Cin, 3, 3) -> (3, 3*Cin_pad, Cout_pad) (dx-stacked K) or (9, Cin_pad, Cout_pad)."""
    c_out, c_in, kh, kw = w_oihw.shape
    w = jnp.transpose(w_oihw, (2, 3, 1, 0)).reshape(kh * kw, c_in, c_out)
    w = jnp.pad(w, ((0, 0), (0, c_in_pad - c_in), (0, c_out_pad - c_out)))
    if stack_dx:
        w = w.reshape(kh, kw * c_in_pad, c_out_pad)             # K index = dx*Cin_pad + c
    return w.astype(jnp.bfloat16)


def double_conv(x_nchw, w1, g1, b1, w2, g2, b2):
    """Forward pass of DoubleConv (train-mode batch stats). NCHW in / NCHW out, f32."""
    x = jnp.transpose(x_nchw, (0, 2, 3, 1))                     # NHWC
    n, h, w, c_in = x.shape
    c_mid, c_out = w1.shape[0], w2.shape[0]
    c_in_p, c_mid_p, c_out_p = (_round_up(c, LANE) for c in (c_in, c_mid, c_out))
    m_count = n * h * w

    # NOTE: gamma/beta are ZERO-padded in the lane-padded channels, so padded lanes get
    # scale=0/shift=0 and stay zero through the fused path (padded activations/weights are
    # zero anyway, but keep the padding value at 0).
    g1p = jnp.pad(g1, (0, c_mid_p - c_mid)).astype(jnp.float32)
    b1p = jnp.pad(b1, (0, c_mid_p - c_mid)).astype(jnp.float32)
    g2p = jnp.pad(g2, (0, c_out_p - c_out)).astype(jnp.float32)
    b2p = jnp.pad(b2, (0, c_out_p - c_out)).astype(jnp.float32)

    # Layer 1: conv1 + BN1 partial stats. Input is only channel-padded (spatial padding is
    # built in VMEM inside the kernel - no padded HBM copy of x).
    x_p = jnp.pad(x, ((0, 0), (0, 0), (0, 0), (0, c_in_p - c_in))).astype(jnp.bfloat16)
    y1_raw, stats1 = _conv_layer(x_p, _fold_weight(w1, c_in_p, c_mid_p))
    scale1, shift1 = _bn_affine(stats1, g1p, b1p, m_count)

    # Layer 2: BN1+ReLU fused into conv2's input read; y1_raw goes straight back in
    # (no jnp.pad round trip of the intermediate activation through HBM).
    y2_raw, stats2 = _conv_layer(y1_raw, _fold_weight(w2, c_mid_p, c_out_p),
                                 pre_scale=scale1, pre_shift=shift1)
    scale2, shift2 = _bn_affine(stats2, g2p, b2p, m_count)

    # Final BN2+ReLU epilogue for the last layer.
    y2 = _bn_relu(y2_raw, scale2, shift2)
    return jnp.transpose(y2[..., :c_out], (0, 3, 1, 2))         # back to NCHW, f32


def init_params(key, in_channels, out_channels, mid_channels=None):
    if mid_channels is None:
        mid_channels = out_channels
    k1, k2 = jax.random.split(key, 2)
    fan1 = in_channels * 9
    fan2 = mid_channels * 9
    w1 = jax.random.normal(k1, (mid_channels, in_channels, 3, 3), jnp.float32) / jnp.sqrt(fan1)
    w2 = jax.random.normal(k2, (out_channels, mid_channels, 3, 3), jnp.float32) / jnp.sqrt(fan2)
    g1 = jnp.ones((mid_channels,), jnp.float32)
    b1 = jnp.zeros((mid_channels,), jnp.float32)
    g2 = jnp.ones((out_channels,), jnp.float32)
    b2 = jnp.zeros((out_channels,), jnp.float32)
    return w1, g1, b1, w2, g2, b2


if __name__ == "__main__":
    key = jax.random.PRNGKey(0)
    kx, kp = jax.random.split(key)

    N, C_IN, C_OUT, HW = 2, 4, 8, 16
    x = jax.random.normal(kx, (N, C_IN, HW, HW), jnp.float32)    # NCHW like PyTorch
    params = init_params(kp, C_IN, C_OUT)

    out = jax.block_until_ready(jax.jit(double_conv)(x, *params))

    assert out.shape == (N, C_OUT, HW, HW), out.shape
    assert bool(jnp.all(jnp.isfinite(out)))
    assert bool(jnp.all(out >= 0.0))   # ReLU output
    print("KERNEL_OK")
</pallas_src>

<mosaic_0001>
module attributes {stable_mosaic.version = 11 : i64} {
  func.func @kernel(%arg0: i32, %arg1: i32, %arg2: memref<1x1x16x128xbf16, #tpu.memory_space<vmem>>, %arg3: memref<1x16x16x128xbf16, #tpu.memory_space<vmem>>, %arg4: memref<1x1x16x128xbf16, #tpu.memory_space<vmem>>, %arg5: memref<3x384x128xbf16, #tpu.memory_space<vmem>>, %arg6: memref<1x16x16x128xbf16, #tpu.memory_space<vmem>>, %arg7: memref<1x1x2x128xf32, #tpu.memory_space<vmem>>, %arg8: memref<18x18x128xbf16, #tpu.memory_space<vmem>>) attributes {dimension_semantics = [#tpu.dimension_semantics<parallel>, #tpu.dimension_semantics<parallel>], iteration_bounds = array<i64: 2, 1>, scalar_prefetch = 0 : i64, scratch_operands = 1 : i64, tpu.core_type = #tpu.core_type<tc>, window_params = [{transform_indices = @transform_0, window_bounds = array<i64: 1, 1, 16, 128>}, {transform_indices = @transform_1, window_bounds = array<i64: 1, 16, 16, 128>}, {transform_indices = @transform_2, window_bounds = array<i64: 1, 1, 16, 128>}, {pipeline_mode = #tpu.pipeline_mode<synchronous>, transform_indices = @transform_3, window_bounds = array<i64: 3, 384, 128>}, {transform_indices = @transform_4, window_bounds = array<i64: 1, 16, 16, 128>}, {transform_indices = @transform_5, window_bounds = array<i64: 1, 1, 2, 128>}]} {
    %c0 = arith.constant 0 : index
    %c0_0 = arith.constant 0 : index
    %c0_1 = arith.constant 0 : index
    %c0_2 = arith.constant 0 : index
    %0 = vector.load %arg2[%c0, %c0_0, %c0_1, %c0_2] : memref<1x1x16x128xbf16, #tpu.memory_space<vmem>>, vector<1x1x16x128xbf16>
    %1 = vector.shape_cast %0 : vector<1x1x16x128xbf16> to vector<16x128xbf16>
    %2 = vector.shape_cast %1 : vector<16x128xbf16> to vector<1x16x128xbf16>
    %c0_3 = arith.constant 0 : index
    %c0_4 = arith.constant 0 : index
    %c0_5 = arith.constant 0 : index
    %c0_6 = arith.constant 0 : index
    %3 = vector.load %arg3[%c0_3, %c0_4, %c0_5, %c0_6] : memref<1x16x16x128xbf16, #tpu.memory_space<vmem>>, vector<1x16x16x128xbf16>
    %4 = vector.shape_cast %3 : vector<1x16x16x128xbf16> to vector<16x16x128xbf16>
    %c0_7 = arith.constant 0 : index
    %c0_8 = arith.constant 0 : index
    %c0_9 = arith.constant 0 : index
    %c0_10 = arith.constant 0 : index
    %5 = vector.load %arg4[%c0_7, %c0_8, %c0_9, %c0_10] : memref<1x1x16x128xbf16, #tpu.memory_space<vmem>>, vector<1x1x16x128xbf16>
    %6 = vector.shape_cast %5 : vector<1x1x16x128xbf16> to vector<16x128xbf16>
    %7 = vector.shape_cast %6 : vector<16x128xbf16> to vector<1x16x128xbf16>
    %c0_i32 = arith.constant 0 : i32
    %8 = arith.cmpi eq, %arg1, %c0_i32 : i32
    %cst = arith.constant 0.000000e+00 : bf16
    %9 = vector.broadcast %cst : bf16 to vector<1x16x128xbf16>
    %10 = arith.select %8, %9, %2 : vector<1x16x128xbf16>
    %c0_i32_11 = arith.constant 0 : i32
    %11 = arith.cmpi eq, %arg1, %c0_i32_11 : i32
    %cst_12 = arith.constant 0.000000e+00 : bf16
    %12 = vector.broadcast %cst_12 : bf16 to vector<1x16x128xbf16>
    %13 = arith.select %11, %12, %7 : vector<1x16x128xbf16>
    %cst_13 = arith.constant 0.000000e+00 : bf16
    %14 = vector.broadcast %cst_13 : bf16 to vector<18x1x128xbf16>
    %c0_14 = arith.constant 0 : index
    %c0_15 = arith.constant 0 : index
    %c0_16 = arith.constant 0 : index
    %15 = vector.load %arg8[%c0_14, %c0_15, %c0_16] : memref<18x18x128xbf16, #tpu.memory_space<vmem>>, vector<18x1x128xbf16>
    tpu.vector_store %arg8[%c0_14, %c0_15, %c0_16], %14 {strides = array<i32>} : memref<18x18x128xbf16, #tpu.memory_space<vmem>>, vector<18x1x128xbf16>,
    %c0_17 = arith.constant 0 : index
    %c17 = arith.constant 17 : index
    %c0_18 = arith.constant 0 : index
    %16 = vector.load %arg8[%c0_17, %c17, %c0_18] : memref<18x18x128xbf16, #tpu.memory_space<vmem>>, vector<18x1x128xbf16>
    tpu.vector_store %arg8[%c0_17, %c17, %c0_18], %14 {strides = array<i32>} : memref<18x18x128xbf16, #tpu.memory_space<vmem>>, vector<18x1x128xbf16>,
    %c0_19 = arith.constant 0 : index
    %c1 = arith.constant 1 : index
    %c0_20 = arith.constant 0 : index
    %17 = vector.load %arg8[%c0_19, %c1, %c0_20] : memref<18x18x128xbf16, #tpu.memory_space<vmem>>, vector<1x16x128xbf16>
    tpu.vector_store %arg8[%c0_19, %c1, %c0_20], %10 {strides = array<i32>} : memref<18x18x128xbf16, #tpu.memory_space<vmem>>, vector<1x16x128xbf16>,
    %c1_21 = arith.constant 1 : index
    %c1_22 = arith.constant 1 : index
    %c0_23 = arith.constant 0 : index
    %18 = vector.load %arg8[%c1_21, %c1_22, %c0_23] : memref<18x18x128xbf16, #tpu.memory_space<vmem>>, vector<16x16x128xbf16>
    tpu.vector_store %arg8[%c1_21, %c1_22, %c0_23], %4 {strides = array<i32>} : memref<18x18x128xbf16, #tpu.memory_space<vmem>>, vector<16x16x128xbf16>,
    %c17_24 = arith.constant 17 : index
    %c1_25 = arith.constant 1 : index
    %c0_26 = arith.constant 0 : index
    %19 = vector.load %arg8[%c17_24, %c1_25, %c0_26] : memref<18x18x128xbf16, #tpu.memory_space<vmem>>, vector<1x16x128xbf16>
    tpu.vector_store %arg8[%c17_24, %c1_25, %c0_26], %13 {strides = array<i32>} : memref<18x18x128xbf16, #tpu.memory_space<vmem>>, vector<1x16x128xbf16>,
    %cst_27 = arith.constant 0.000000e+00 : f32
    %20 = vector.broadcast %cst_27 : f32 to vector<256x128xf32>
    %c0_28 = arith.constant 0 : index
    %c0_29 = arith.constant 0 : index
    %c0_30 = arith.constant 0 : index
    %21 = vector.load %arg8[%c0_28, %c0_29, %c0_30] : memref<18x18x128xbf16, #tpu.memory_space<vmem>>, vector<16x16x128xbf16>
    %22 = vector.shape_cast %21 : vector<16x16x128xbf16> to vector<256x128xbf16>
    %c0_31 = arith.constant 0 : index
    %c1_32 = arith.constant 1 : index
    %c0_33 = arith.constant 0 : index
    %23 = vector.load %arg8[%c0_31, %c1_32, %c0_33] : memref<18x18x128xbf16, #tpu.memory_space<vmem>>, vector<16x16x128xbf16>
    %24 = vector.shape_cast %23 : vector<16x16x128xbf16> to vector<256x128xbf16>
    %c0_34 = arith.constant 0 : index
    %c2 = arith.constant 2 : index
    %c0_35 = arith.constant 0 : index
    %25 = vector.load %arg8[%c0_34, %c2, %c0_35] : memref<18x18x128xbf16, #tpu.memory_space<vmem>>, vector<16x16x128xbf16>
    %26 = vector.shape_cast %25 : vector<16x16x128xbf16> to vector<256x128xbf16>
    %27 = tpu.concatenate %22, %24, %26 in 1 : vector<256x128xbf16>, vector<256x128xbf16>, vector<256x128xbf16> -> vector<256x384xbf16>
    %c0_36 = arith.constant 0 : index
    %c0_37 = arith.constant 0 : index
    %c0_38 = arith.constant 0 : index
    %28 = vector.load %arg5[%c0_36, %c0_37, %c0_38] : memref<3x384x128xbf16, #tpu.memory_space<vmem>>, vector<1x384x128xbf16>
    %29 = vector.shape_cast %28 : vector<1x384x128xbf16> to vector<384x128xbf16>
    %cst_39 = arith.constant dense<0.000000e+00> : vector<256x128xf32>
    %30 = tpu.matmul %27, %29, %cst_39 {dimension_numbers = #tpu.dot_dimension_numbers<[1], [0], [0], [1], [0, 0, 1, 1], [], []>} : vector<256x384xbf16>, vector<384x128xbf16>, vector<256x128xf32> -> vector<256x128xf32>
    %31 = arith.addf %20, %30 : vector<256x128xf32>
    %c1_40 = arith.constant 1 : index
    %c0_41 = arith.constant 0 : index
    %c0_42 = arith.constant 0 : index
    %32 = vector.load %arg8[%c1_40, %c0_41, %c0_42] : memref<18x18x128xbf16, #tpu.memory_space<vmem>>, vector<16x16x128xbf16>
    %33 = vector.shape_cast %32 : vector<16x16x128xbf16> to vector<256x128xbf16>
    %c1_43 = arith.constant 1 : index
    %c1_44 = arith.constant 1 : index
    %c0_45 = arith.constant 0 : index
    %34 = vector.load %arg8[%c1_43, %c1_44, %c0_45] : memref<18x18x128xbf16, #tpu.memory_space<vmem>>, vector<16x16x128xbf16>
    %35 = vector.shape_cast %34 : vector<16x16x128xbf16> to vector<256x128xbf16>
    %c1_46 = arith.constant 1 : index
    %c2_47 = arith.constant 2 : index
    %c0_48 = arith.constant 0 : index
    %36 = vector.load %arg8[%c1_46, %c2_47, %c0_48] : memref<18x18x128xbf16, #tpu.memory_space<vmem>>, vector<16x16x128xbf16>
    %37 = vector.shape_cast %36 : vector<16x16x128xbf16> to vector<256x128xbf16>
    %38 = tpu.concatenate %33, %35, %37 in 1 : vector<256x128xbf16>, vector<256x128xbf16>, vector<256x128xbf16> -> vector<256x384xbf16>
    %c1_49 = arith.constant 1 : index
    %c0_50 = arith.constant 0 : index
    %c0_51 = arith.constant 0 : index
    %39 = vector.load %arg5[%c1_49, %c0_50, %c0_51] : memref<3x384x128xbf16, #tpu.memory_space<vmem>>, vector<1x384x128xbf16>
    %40 = vector.shape_cast %39 : vector<1x384x128xbf16> to vector<384x128xbf16>
    %cst_52 = arith.constant dense<0.000000e+00> : vector<256x128xf32>
    %41 = tpu.matmul %38, %40, %cst_52 {dimension_numbers = #tpu.dot_dimension_numbers<[1], [0], [0], [1], [0, 0, 1, 1], [], []>} : vector<256x384xbf16>, vector<384x128xbf16>, vector<256x128xf32> -> vector<256x128xf32>
    %42 = arith.addf %31, %41 : vector<256x128xf32>
    %c2_53 = arith.constant 2 : index
    %c0_54 = arith.constant 0 : index
    %c0_55 = arith.constant 0 : index
    %43 = vector.load %arg8[%c2_53, %c0_54, %c0_55] : memref<18x18x128xbf16, #tpu.memory_space<vmem>>, vector<16x16x128xbf16>
    %44 = vector.shape_cast %43 : vector<16x16x128xbf16> to vector<256x128xbf16>
    %c2_56 = arith.constant 2 : index
    %c1_57 = arith.constant 1 : index
    %c0_58 = arith.constant 0 : index
    %45 = vector.load %arg8[%c2_56, %c1_57, %c0_58] : memref<18x18x128xbf16, #tpu.memory_space<vmem>>, vector<16x16x128xbf16>
    %46 = vector.shape_cast %45 : vector<16x16x128xbf16> to vector<256x128xbf16>
    %c2_59 = arith.constant 2 : index
    %c2_60 = arith.constant 2 : index
    %c0_61 = arith.constant 0 : index
    %47 = vector.load %arg8[%c2_59, %c2_60, %c0_61] : memref<18x18x128xbf16, #tpu.memory_space<vmem>>, vector<16x16x128xbf16>
    %48 = vector.shape_cast %47 : vector<16x16x128xbf16> to vector<256x128xbf16>
    %49 = tpu.concatenate %44, %46, %48 in 1 : vector<256x128xbf16>, vector<256x128xbf16>, vector<256x128xbf16> -> vector<256x384xbf16>
    %c2_62 = arith.constant 2 : index
    %c0_63 = arith.constant 0 : index
    %c0_64 = arith.constant 0 : index
    %50 = vector.load %arg5[%c2_62, %c0_63, %c0_64] : memref<3x384x128xbf16, #tpu.memory_space<vmem>>, vector<1x384x128xbf16>
    %51 = vector.shape_cast %50 : vector<1x384x128xbf16> to vector<384x128xbf16>
    %cst_65 = arith.constant dense<0.000000e+00> : vector<256x128xf32>
    %52 = tpu.matmul %49, %51, %cst_65 {dimension_numbers = #tpu.dot_dimension_numbers<[1], [0], [0], [1], [0, 0, 1, 1], [], []>} : vector<256x384xbf16>, vector<384x128xbf16>, vector<256x128xf32> -> vector<256x128xf32>
    %53 = arith.addf %42, %52 : vector<256x128xf32>
    %54 = vector.shape_cast %53 : vector<256x128xf32> to vector<16x16x128xf32>
    %55 = arith.truncf %54 : vector<16x16x128xf32> to vector<16x16x128xbf16>
    %c0_66 = arith.constant 0 : index
    %c0_67 = arith.constant 0 : index
    %c0_68 = arith.constant 0 : index
    %c0_69 = arith.constant 0 : index
    %56 = vector.load %arg6[%c0_66, %c0_67, %c0_68, %c0_69] : memref<1x16x16x128xbf16, #tpu.memory_space<vmem>>, vector<1x16x16x128xbf16>
    %57 = vector.shape_cast %56 : vector<1x16x16x128xbf16> to vector<16x16x128xbf16>
    %58 = vector.shape_cast %55 : vector<16x16x128xbf16> to vector<1x16x16x128xbf16>
    tpu.vector_store %arg6[%c0_66, %c0_67, %c0_68, %c0_69], %58 {strides = array<i32>} : memref<1x16x16x128xbf16, #tpu.memory_space<vmem>>, vector<1x16x16x128xbf16>,
    %cst_70 = arith.constant dense<0.000000e+00> : vector<128xf32>
    %59 = vector.multi_reduction <add>, %53, %cst_70 [0] : vector<256x128xf32> to vector<128xf32>
    %60 = vector.shape_cast %59 : vector<128xf32> to vector<1x128xf32>
    %c0_71 = arith.constant 0 : index
    %c0_72 = arith.constant 0 : index
    %c0_73 = arith.constant 0 : index
    %c0_74 = arith.constant 0 : index
    %61 = vector.load %arg7[%c0_71, %c0_72, %c0_73, %c0_74] : memref<1x1x2x128xf32, #tpu.memory_space<vmem>>, vector<1x1x1x128xf32>
    %62 = vector.shape_cast %61 : vector<1x1x1x128xf32> to vector<1x128xf32>
    %63 = vector.shape_cast %60 : vector<1x128xf32> to vector<1x1x1x128xf32>
    tpu.vector_store %arg7[%c0_71, %c0_72, %c0_73, %c0_74], %63 {strides = array<i32>} : memref<1x1x2x128xf32, #tpu.memory_space<vmem>>, vector<1x1x1x128xf32>,
    %64 = arith.mulf %53, %53 : vector<256x128xf32>
    %cst_75 = arith.constant dense<0.000000e+00> : vector<128xf32>
    %65 = vector.multi_reduction <add>, %64, %cst_75 [0] : vector<256x128xf32> to vector<128xf32>
    %66 = vector.shape_cast %65 : vector<128xf32> to vector<1x128xf32>
    %c0_76 = arith.constant 0 : index
    %c0_77 = arith.constant 0 : index
    %c1_78 = arith.constant 1 : index
    %c0_79 = arith.constant 0 : index
    %67 = vector.load %arg7[%c0_76, %c0_77, %c1_78, %c0_79] : memref<1x1x2x128xf32, #tpu.memory_space<vmem>>, vector<1x1x1x128xf32>
    %68 = vector.shape_cast %67 : vector<1x1x1x128xf32> to vector<1x128xf32>
    %69 = vector.shape_cast %66 : vector<1x128xf32> to vector<1x1x1x128xf32>
    tpu.vector_store %arg7[%c0_76, %c0_77, %c1_78, %c0_79], %69 {strides = array<i32>} : memref<1x1x2x128xf32, #tpu.memory_space<vmem>>, vector<1x1x1x128xf32>,
    return
  }
  func.func @transform_0(%arg0: i32, %arg1: i32) -> (i32, i32, i32, i32) {
    %c16_i32 = arith.constant 16 : i32
    %0 = arith.muli %arg1, %c16_i32 : i32
    %c1_i32 = arith.constant 1 : i32
    %1 = arith.subi %0, %c1_i32 : i32
    %c0_i32 = arith.constant 0 : i32
    %2 = arith.maxsi %1, %c0_i32 : i32
    %c0_i32_0 = arith.constant 0 : i32
    %c0_i32_1 = arith.constant 0 : i32
    %c0_i32_2 = arith.constant 0 : i32
    return %arg0, %2, %c0_i32_0, %c0_i32_1 : i32, i32, i32, i32
  }
  func.func @transform_1(%arg0: i32, %arg1: i32) -> (i32, i32, i32, i32) {
    %c0_i32 = arith.constant 0 : i32
    %c0_i32_0 = arith.constant 0 : i32
    %c0_i32_1 = arith.constant 0 : i32
    return %arg0, %arg1, %c0_i32, %c0_i32_0 : i32, i32, i32, i32
  }
  func.func @transform_2(%arg0: i32, %arg1: i32) -> (i32, i32, i32, i32) {
    %c16_i32 = arith.constant 16 : i32
    %0 = arith.muli %arg1, %c16_i32 : i32
    %c16_i32_0 = arith.constant 16 : i32
    %1 = arith.addi %0, %c16_i32_0 : i32
    %c15_i32 = arith.constant 15 : i32
    %2 = arith.minsi %1, %c15_i32 : i32
    %c0_i32 = arith.constant 0 : i32
    %c0_i32_1 = arith.constant 0 : i32
    %c0_i32_2 = arith.constant 0 : i32
    return %arg0, %2, %c0_i32, %c0_i32_1 : i32, i32, i32, i32
  }
  func.func @transform_3(%arg0: i32, %arg1: i32) -> (i32, i32, i32) {
    %c0_i32 = arith.constant 0 : i32
    %c0_i32_0 = arith.constant 0 : i32
    %c0_i32_1 = arith.constant 0 : i32
    %c0_i32_2 = arith.constant 0 : i32
    return %c0_i32, %c0_i32_0, %c0_i32_1 : i32, i32, i32
  }
  func.func @transform_4(%arg0: i32, %arg1: i32) -> (i32, i32, i32, i32) {
    %c0_i32 = arith.constant 0 : i32
    %c0_i32_0 = arith.constant 0 : i32
    %c0_i32_1 = arith.constant 0 : i32
    return %arg0, %arg1, %c0_i32, %c0_i32_0 : i32, i32, i32, i32
  }
  func.func @transform_5(%arg0: i32, %arg1: i32) -> (i32, i32, i32, i32) {
    %c0_i32 = arith.constant 0 : i32
    %c0_i32_0 = arith.constant 0 : i32
    %c0_i32_1 = arith.constant 0 : i32
    return %arg0, %arg1, %c0_i32, %c0_i32_0 : i32, i32, i32, i32
  }
}

module attributes {stable_mosaic.version = 11 : i64} {
  func.func @kernel(%arg0: i32, %arg1: i32, %arg2: memref<1x1x16x128xbf16, #tpu.memory_space<vmem>>, %arg3: memref<1x16x16x128xbf16, #tpu.memory_space<vmem>>, %arg4: memref<1x1x16x128xbf16, #tpu.memory_space<vmem>>, %arg5: memref<3x384x128xbf16, #tpu.memory_space<vmem>>, %arg6: memref<1x128xf32, #tpu.memory_space<vmem>>, %arg7: memref<1x128xf32, #tpu.memory_space<vmem>>, %arg8: memref<1x16x16x128xbf16, #tpu.memory_space<vmem>>, %arg9: memref<1x1x2x128xf32, #tpu.memory_space<vmem>>, %arg10: memref<18x18x128xbf16, #tpu.memory_space<vmem>>) attributes {dimension_semantics = [#tpu.dimension_semantics<parallel>, #tpu.dimension_semantics<parallel>], iteration_bounds = array<i64: 2, 1>, scalar_prefetch = 0 : i64, scratch_operands = 1 : i64, tpu.core_type = #tpu.core_type<tc>, window_params = [{transform_indices = @transform_0, window_bounds = array<i64: 1, 1, 16, 128>}, {transform_indices = @transform_1, window_bounds = array<i64: 1, 16, 16, 128>}, {transform_indices = @transform_2, window_bounds = array<i64: 1, 1, 16, 128>}, {pipeline_mode = #tpu.pipeline_mode<synchronous>, transform_indices = @transform_3, window_bounds = array<i64: 3, 384, 128>}, {pipeline_mode = #tpu.pipeline_mode<synchronous>, transform_indices = @transform_4, window_bounds = array<i64: 1, 128>}, {pipeline_mode = #tpu.pipeline_mode<synchronous>, transform_indices = @transform_5, window_bounds = array<i64: 1, 128>}, {transform_indices = @transform_6, window_bounds = array<i64: 1, 16, 16, 128>}, {transform_indices = @transform_7, window_bounds = array<i64: 1, 1, 2, 128>}]} {
    %c0 = arith.constant 0 : index
    %c0_0 = arith.constant 0 : index
    %0 = vector.load %arg6[%c0, %c0_0] : memref<1x128xf32, #tpu.memory_space<vmem>>, vector<1x128xf32>
    %1 = vector.shape_cast %0 : vector<1x128xf32> to vector<1x1x128xf32>
    %c0_1 = arith.constant 0 : index
    %c0_2 = arith.constant 0 : index
    %2 = vector.load %arg7[%c0_1, %c0_2] : memref<1x128xf32, #tpu.memory_space<vmem>>, vector<1x128xf32>
    %3 = vector.shape_cast %2 : vector<1x128xf32> to vector<1x1x128xf32>
    %c0_3 = arith.constant 0 : index
    %c0_4 = arith.constant 0 : index
    %c0_5 = arith.constant 0 : index
    %c0_6 = arith.constant 0 : index
    %4 = vector.load %arg2[%c0_3, %c0_4, %c0_5, %c0_6] : memref<1x1x16x128xbf16, #tpu.memory_space<vmem>>, vector<1x1x16x128xbf16>
    %5 = vector.shape_cast %4 : vector<1x1x16x128xbf16> to vector<16x128xbf16>
    %6 = vector.shape_cast %5 : vector<16x128xbf16> to vector<1x16x128xbf16>
    %7 = arith.extf %6 : vector<1x16x128xbf16> to vector<1x16x128xf32>
    %8 = vector.broadcast %1 : vector<1x1x128xf32> to vector<1x16x128xf32>
    %9 = arith.mulf %7, %8 : vector<1x16x128xf32>
    %10 = vector.broadcast %3 : vector<1x1x128xf32> to vector<1x16x128xf32>
    %11 = arith.addf %9, %10 : vector<1x16x128xf32>
    %cst = arith.constant 0.000000e+00 : f32
    %12 = vector.broadcast %cst : f32 to vector<1x16x128xf32>
    %13 = arith.maximumf %11, %12 : vector<1x16x128xf32>
    %14 = arith.truncf %13 : vector<1x16x128xf32> to vector<1x16x128xbf16>
    %c0_7 = arith.constant 0 : index
    %c0_8 = arith.constant 0 : index
    %c0_9 = arith.constant 0 : index
    %c0_10 = arith.constant 0 : index
    %15 = vector.load %arg3[%c0_7, %c0_8, %c0_9, %c0_10] : memref<1x16x16x128xbf16, #tpu.memory_space<vmem>>, vector<1x16x16x128xbf16>
    %16 = vector.shape_cast %15 : vector<1x16x16x128xbf16> to vector<16x16x128xbf16>
    %17 = arith.extf %16 : vector<16x16x128xbf16> to vector<16x16x128xf32>
    %18 = vector.broadcast %1 : vector<1x1x128xf32> to vector<16x16x128xf32>
    %19 = arith.mulf %17, %18 : vector<16x16x128xf32>
    %20 = vector.broadcast %3 : vector<1x1x128xf32> to vector<16x16x128xf32>
    %21 = arith.addf %19, %20 : vector<16x16x128xf32>
    %cst_11 = arith.constant 0.000000e+00 : f32
    %22 = vector.broadcast %cst_11 : f32 to vector<16x16x128xf32>
    %23 = arith.maximumf %21, %22 : vector<16x16x128xf32>
    %24 = arith.truncf %23 : vector<16x16x128xf32> to vector<16x16x128xbf16>
    %c0_12 = arith.constant 0 : index
    %c0_13 = arith.constant 0 : index
    %c0_14 = arith.constant 0 : index
    %c0_15 = arith.constant 0 : index
    %25 = vector.load %arg4[%c0_12, %c0_13, %c0_14, %c0_15] : memref<1x1x16x128xbf16, #tpu.memory_space<vmem>>, vector<1x1x16x128xbf16>
    %26 = vector.shape_cast %25 : vector<1x1x16x128xbf16> to vector<16x128xbf16>
    %27 = vector.shape_cast %26 : vector<16x128xbf16> to vector<1x16x128xbf16>
    %28 = arith.extf %27 : vector<1x16x128xbf16> to vector<1x16x128xf32>
    %29 = vector.broadcast %1 : vector<1x1x128xf32> to vector<1x16x128xf32>
    %30 = arith.mulf %28, %29 : vector<1x16x128xf32>
    %31 = vector.broadcast %3 : vector<1x1x128xf32> to vector<1x16x128xf32>
    %32 = arith.addf %30, %31 : vector<1x16x128xf32>
    %cst_16 = arith.constant 0.000000e+00 : f32
    %33 = vector.broadcast %cst_16 : f32 to vector<1x16x128xf32>
    %34 = arith.maximumf %32, %33 : vector<1x16x128xf32>
    %35 = arith.truncf %34 : vector<1x16x128xf32> to vector<1x16x128xbf16>
    %c0_i32 = arith.constant 0 : i32
    %36 = arith.cmpi eq, %arg1, %c0_i32 : i32
    %cst_17 = arith.constant 0.000000e+00 : bf16
    %37 = vector.broadcast %cst_17 : bf16 to vector<1x16x128xbf16>
    %38 = arith.select %36, %37, %14 : vector<1x16x128xbf16>
    %c0_i32_18 = arith.constant 0 : i32
    %39 = arith.cmpi eq, %arg1, %c0_i32_18 : i32
    %cst_19 = arith.constant 0.000000e+00 : bf16
    %40 = vector.broadcast %cst_19 : bf16 to vector<1x16x128xbf16>
    %41 = arith.select %39, %40, %35 : vector<1x16x128xbf16>
    %cst_20 = arith.constant 0.000000e+00 : bf16
    %42 = vector.broadcast %cst_20 : bf16 to vector<18x1x128xbf16>
    %c0_21 = arith.constant 0 : index
    %c0_22 = arith.constant 0 : index
    %c0_23 = arith.constant 0 : index
    %43 = vector.load %arg10[%c0_21, %c0_22, %c0_23] : memref<18x18x128xbf16, #tpu.memory_space<vmem>>, vector<18x1x128xbf16>
    tpu.vector_store %arg10[%c0_21, %c0_22, %c0_23], %42 {strides = array<i32>} : memref<18x18x128xbf16, #tpu.memory_space<vmem>>, vector<18x1x128xbf16>,
    %c0_24 = arith.constant 0 : index
    %c17 = arith.constant 17 : index
    %c0_25 = arith.constant 0 : index
    %44 = vector.load %arg10[%c0_24, %c17, %c0_25] : memref<18x18x128xbf16, #tpu.memory_space<vmem>>, vector<18x1x128xbf16>
    tpu.vector_store %arg10[%c0_24, %c17, %c0_25], %42 {strides = array<i32>} : memref<18x18x128xbf16, #tpu.memory_space<vmem>>, vector<18x1x128xbf16>,
    %c0_26 = arith.constant 0 : index
    %c1 = arith.constant 1 : index
    %c0_27 = arith.constant 0 : index
    %45 = vector.load %arg10[%c0_26, %c1, %c0_27] : memref<18x18x128xbf16, #tpu.memory_space<vmem>>, vector<1x16x128xbf16>
    tpu.vector_store %arg10[%c0_26, %c1, %c0_27], %38 {strides = array<i32>} : memref<18x18x128xbf16, #tpu.memory_space<vmem>>, vector<1x16x128xbf16>,
    %c1_28 = arith.constant 1 : index
    %c1_29 = arith.constant 1 : index
    %c0_30 = arith.constant 0 : index
    %46 = vector.load %arg10[%c1_28, %c1_29, %c0_30] : memref<18x18x128xbf16, #tpu.memory_space<vmem>>, vector<16x16x128xbf16>
    tpu.vector_store %arg10[%c1_28, %c1_29, %c0_30], %24 {strides = array<i32>} : memref<18x18x128xbf16, #tpu.memory_space<vmem>>, vector<16x16x128xbf16>,
    %c17_31 = arith.constant 17 : index
    %c1_32 = arith.constant 1 : index
    %c0_33 = arith.constant 0 : index
    %47 = vector.load %arg10[%c17_31, %c1_32, %c0_33] : memref<18x18x128xbf16, #tpu.memory_space<vmem>>, vector<1x16x128xbf16>
    tpu.vector_store %arg10[%c17_31, %c1_32, %c0_33], %41 {strides = array<i32>} : memref<18x18x128xbf16, #tpu.memory_space<vmem>>, vector<1x16x128xbf16>,
    %cst_34 = arith.constant 0.000000e+00 : f32
    %48 = vector.broadcast %cst_34 : f32 to vector<256x128xf32>
    %c0_35 = arith.constant 0 : index
    %c0_36 = arith.constant 0 : index
    %c0_37 = arith.constant 0 : index
    %49 = vector.load %arg10[%c0_35, %c0_36, %c0_37] : memref<18x18x128xbf16, #tpu.memory_space<vmem>>, vector<16x16x128xbf16>
    %50 = vector.shape_cast %49 : vector<16x16x128xbf16> to vector<256x128xbf16>
    %c0_38 = arith.constant 0 : index
    %c1_39 = arith.constant 1 : index
    %c0_40 = arith.constant 0 : index
    %51 = vector.load %arg10[%c0_38, %c1_39, %c0_40] : memref<18x18x128xbf16, #tpu.memory_space<vmem>>, vector<16x16x128xbf16>
    %52 = vector.shape_cast %51 : vector<16x16x128xbf16> to vector<256x128xbf16>
    %c0_41 = arith.constant 0 : index
    %c2 = arith.constant 2 : index
    %c0_42 = arith.constant 0 : index
    %53 = vector.load %arg10[%c0_41, %c2, %c0_42] : memref<18x18x128xbf16, #tpu.memory_space<vmem>>, vector<16x16x128xbf16>
    %54 = vector.shape_cast %53 : vector<16x16x128xbf16> to vector<256x128xbf16>
    %55 = tpu.concatenate %50, %52, %54 in 1 : vector<256x128xbf16>, vector<256x128xbf16>, vector<256x128xbf16> -> vector<256x384xbf16>
    %c0_43 = arith.constant 0 : index
    %c0_44 = arith.constant 0 : index
    %c0_45 = arith.constant 0 : index
    %56 = vector.load %arg5[%c0_43, %c0_44, %c0_45] : memref<3x384x128xbf16, #tpu.memory_space<vmem>>, vector<1x384x128xbf16>
    %57 = vector.shape_cast %56 : vector<1x384x128xbf16> to vector<384x128xbf16>
    %cst_46 = arith.constant dense<0.000000e+00> : vector<256x128xf32>
    %58 = tpu.matmul %55, %57, %cst_46 {dimension_numbers = #tpu.dot_dimension_numbers<[1], [0], [0], [1], [0, 0, 1, 1], [], []>} : vector<256x384xbf16>, vector<384x128xbf16>, vector<256x128xf32> -> vector<256x128xf32>
    %59 = arith.addf %48, %58 : vector<256x128xf32>
    %c1_47 = arith.constant 1 : index
    %c0_48 = arith.constant 0 : index
    %c0_49 = arith.constant 0 : index
    %60 = vector.load %arg10[%c1_47, %c0_48, %c0_49] : memref<18x18x128xbf16, #tpu.memory_space<vmem>>, vector<16x16x128xbf16>
    %61 = vector.shape_cast %60 : vector<16x16x128xbf16> to vector<256x128xbf16>
    %c1_50 = arith.constant 1 : index
    %c1_51 = arith.constant 1 : index
    %c0_52 = arith.constant 0 : index
    %62 = vector.load %arg10[%c1_50, %c1_51, %c0_52] : memref<18x18x128xbf16, #tpu.memory_space<vmem>>, vector<16x16x128xbf16>
    %63 = vector.shape_cast %62 : vector<16x16x128xbf16> to vector<256x128xbf16>
    %c1_53 = arith.constant 1 : index
    %c2_54 = arith.constant 2 : index
    %c0_55 = arith.constant 0 : index
    %64 = vector.load %arg10[%c1_53, %c2_54, %c0_55] : memref<18x18x128xbf16, #tpu.memory_space<vmem>>, vector<16x16x128xbf16>
    %65 = vector.shape_cast %64 : vector<16x16x128xbf16> to vector<256x128xbf16>
    %66 = tpu.concatenate %61, %63, %65 in 1 : vector<256x128xbf16>, vector<256x128xbf16>, vector<256x128xbf16> -> vector<256x384xbf16>
    %c1_56 = arith.constant 1 : index
    %c0_57 = arith.constant 0 : index
    %c0_58 = arith.constant 0 : index
    %67 = vector.load %arg5[%c1_56, %c0_57, %c0_58] : memref<3x384x128xbf16, #tpu.memory_space<vmem>>, vector<1x384x128xbf16>
    %68 = vector.shape_cast %67 : vector<1x384x128xbf16> to vector<384x128xbf16>
    %cst_59 = arith.constant dense<0.000000e+00> : vector<256x128xf32>
    %69 = tpu.matmul %66, %68, %cst_59 {dimension_numbers = #tpu.dot_dimension_numbers<[1], [0], [0], [1], [0, 0, 1, 1], [], []>} : vector<256x384xbf16>, vector<384x128xbf16>, vector<256x128xf32> -> vector<256x128xf32>
    %70 = arith.addf %59, %69 : vector<256x128xf32>
    %c2_60 = arith.constant 2 : index
    %c0_61 = arith.constant 0 : index
    %c0_62 = arith.constant 0 : index
    %71 = vector.load %arg10[%c2_60, %c0_61, %c0_62] : memref<18x18x128xbf16, #tpu.memory_space<vmem>>, vector<16x16x128xbf16>
    %72 = vector.shape_cast %71 : vector<16x16x128xbf16> to vector<256x128xbf16>
    %c2_63 = arith.constant 2 : index
    %c1_64 = arith.constant 1 : index
    %c0_65 = arith.constant 0 : index
    %73 = vector.load %arg10[%c2_63, %c1_64, %c0_65] : memref<18x18x128xbf16, #tpu.memory_space<vmem>>, vector<16x16x128xbf16>
    %74 = vector.shape_cast %73 : vector<16x16x128xbf16> to vector<256x128xbf16>
    %c2_66 = arith.constant 2 : index
    %c2_67 = arith.constant 2 : index
    %c0_68 = arith.constant 0 : index
    %75 = vector.load %arg10[%c2_66, %c2_67, %c0_68] : memref<18x18x128xbf16, #tpu.memory_space<vmem>>, vector<16x16x128xbf16>
    %76 = vector.shape_cast %75 : vector<16x16x128xbf16> to vector<256x128xbf16>
    %77 = tpu.concatenate %72, %74, %76 in 1 : vector<256x128xbf16>, vector<256x128xbf16>, vector<256x128xbf16> -> vector<256x384xbf16>
    %c2_69 = arith.constant 2 : index
    %c0_70 = arith.constant 0 : index
    %c0_71 = arith.constant 0 : index
    %78 = vector.load %arg5[%c2_69, %c0_70, %c0_71] : memref<3x384x128xbf16, #tpu.memory_space<vmem>>, vector<1x384x128xbf16>
    %79 = vector.shape_cast %78 : vector<1x384x128xbf16> to vector<384x128xbf16>
    %cst_72 = arith.constant dense<0.000000e+00> : vector<256x128xf32>
    %80 = tpu.matmul %77, %79, %cst_72 {dimension_numbers = #tpu.dot_dimension_numbers<[1], [0], [0], [1], [0, 0, 1, 1], [], []>} : vector<256x384xbf16>, vector<384x128xbf16>, vector<256x128xf32> -> vector<256x128xf32>
    %81 = arith.addf %70, %80 : vector<256x128xf32>
    %82 = vector.shape_cast %81 : vector<256x128xf32> to vector<16x16x128xf32>
    %83 = arith.truncf %82 : vector<16x16x128xf32> to vector<16x16x128xbf16>
    %c0_73 = arith.constant 0 : index
    %c0_74 = arith.constant 0 : index
    %c0_75 = arith.constant 0 : index
    %c0_76 = arith.constant 0 : index
    %84 = vector.load %arg8[%c0_73, %c0_74, %c0_75, %c0_76] : memref<1x16x16x128xbf16, #tpu.memory_space<vmem>>, vector<1x16x16x128xbf16>
    %85 = vector.shape_cast %84 : vector<1x16x16x128xbf16> to vector<16x16x128xbf16>
    %86 = vector.shape_cast %83 : vector<16x16x128xbf16> to vector<1x16x16x128xbf16>
    tpu.vector_store %arg8[%c0_73, %c0_74, %c0_75, %c0_76], %86 {strides = array<i32>} : memref<1x16x16x128xbf16, #tpu.memory_space<vmem>>, vector<1x16x16x128xbf16>,
    %cst_77 = arith.constant dense<0.000000e+00> : vector<128xf32>
    %87 = vector.multi_reduction <add>, %81, %cst_77 [0] : vector<256x128xf32> to vector<128xf32>
    %88 = vector.shape_cast %87 : vector<128xf32> to vector<1x128xf32>
    %c0_78 = arith.constant 0 : index
    %c0_79 = arith.constant 0 : index
    %c0_80 = arith.constant 0 : index
    %c0_81 = arith.constant 0 : index
    %89 = vector.load %arg9[%c0_78, %c0_79, %c0_80, %c0_81] : memref<1x1x2x128xf32, #tpu.memory_space<vmem>>, vector<1x1x1x128xf32>
    %90 = vector.shape_cast %89 : vector<1x1x1x128xf32> to vector<1x128xf32>
    %91 = vector.shape_cast %88 : vector<1x128xf32> to vector<1x1x1x128xf32>
    tpu.vector_store %arg9[%c0_78, %c0_79, %c0_80, %c0_81], %91 {strides = array<i32>} : memref<1x1x2x128xf32, #tpu.memory_space<vmem>>, vector<1x1x1x128xf32>,
    %92 = arith.mulf %81, %81 : vector<256x128xf32>
    %cst_82 = arith.constant dense<0.000000e+00> : vector<128xf32>
    %93 = vector.multi_reduction <add>, %92, %cst_82 [0] : vector<256x128xf32> to vector<128xf32>
    %94 = vector.shape_cast %93 : vector<128xf32> to vector<1x128xf32>
    %c0_83 = arith.constant 0 : index
    %c0_84 = arith.constant 0 : index
    %c1_85 = arith.constant 1 : index
    %c0_86 = arith.constant 0 : index
    %95 = vector.load %arg9[%c0_83, %c0_84, %c1_85, %c0_86] : memref<1x1x2x128xf32, #tpu.memory_space<vmem>>, vector<1x1x1x128xf32>
    %96 = vector.shape_cast %95 : vector<1x1x1x128xf32> to vector<1x128xf32>
    %97 = vector.shape_cast %94 : vector<1x128xf32> to vector<1x1x1x128xf32>
    tpu.vector_store %arg9[%c0_83, %c0_84, %c1_85, %c0_86], %97 {strides = array<i32>} : memref<1x1x2x128xf32, #tpu.memory_space<vmem>>, vector<1x1x1x128xf32>,
    return
  }
  func.func @transform_0(%arg0: i32, %arg1: i32) -> (i32, i32, i32, i32) {
    %c16_i32 = arith.constant 16 : i32
    %0 = arith.muli %arg1, %c16_i32 : i32
    %c1_i32 = arith.constant 1 : i32
    %1 = arith.subi %0, %c1_i32 : i32
    %c0_i32 = arith.constant 0 : i32
    %2 = arith.maxsi %1, %c0_i32 : i32
    %c0_i32_0 = arith.constant 0 : i32
    %c0_i32_1 = arith.constant 0 : i32
    %c0_i32_2 = arith.constant 0 : i32
    return %arg0, %2, %c0_i32_0, %c0_i32_1 : i32, i32, i32, i32
  }
  func.func @transform_1(%arg0: i32, %arg1: i32) -> (i32, i32, i32, i32) {
    %c0_i32 = arith.constant 0 : i32
    %c0_i32_0 = arith.constant 0 : i32
    %c0_i32_1 = arith.constant 0 : i32
    return %arg0, %arg1, %c0_i32, %c0_i32_0 : i32, i32, i32, i32
  }
  func.func @transform_2(%arg0: i32, %arg1: i32) -> (i32, i32, i32, i32) {
    %c16_i32 = arith.constant 16 : i32
    %0 = arith.muli %arg1, %c16_i32 : i32
    %c16_i32_0 = arith.constant 16 : i32
    %1 = arith.addi %0, %c16_i32_0 : i32
    %c15_i32 = arith.constant 15 : i32
    %2 = arith.minsi %1, %c15_i32 : i32
    %c0_i32 = arith.constant 0 : i32
    %c0_i32_1 = arith.constant 0 : i32
    %c0_i32_2 = arith.constant 0 : i32
    return %arg0, %2, %c0_i32, %c0_i32_1 : i32, i32, i32, i32
  }
  func.func @transform_3(%arg0: i32, %arg1: i32) -> (i32, i32, i32) {
    %c0_i32 = arith.constant 0 : i32
    %c0_i32_0 = arith.constant 0 : i32
    %c0_i32_1 = arith.constant 0 : i32
    %c0_i32_2 = arith.constant 0 : i32
    return %c0_i32, %c0_i32_0, %c0_i32_1 : i32, i32, i32
  }
  func.func @transform_4(%arg0: i32, %arg1: i32) -> (i32, i32) {
    %c0_i32 = arith.constant 0 : i32
    %c0_i32_0 = arith.constant 0 : i32
    %c0_i32_1 = arith.constant 0 : i32
    return %c0_i32, %c0_i32_0 : i32, i32
  }
  func.func @transform_5(%arg0: i32, %arg1: i32) -> (i32, i32) {
    %c0_i32 = arith.constant 0 : i32
    %c0_i32_0 = arith.constant 0 : i32
    %c0_i32_1 = arith.constant 0 : i32
    return %c0_i32, %c0_i32_0 : i32, i32
  }
  func.func @transform_6(%arg0: i32, %arg1: i32) -> (i32, i32, i32, i32) {
    %c0_i32 = arith.constant 0 : i32
    %c0_i32_0 = arith.constant 0 : i32
    %c0_i32_1 = arith.constant 0 : i32
    return %arg0, %arg1, %c0_i32, %c0_i32_0 : i32, i32, i32, i32
  }
  func.func @transform_7(%arg0: i32, %arg1: i32) -> (i32, i32, i32, i32) {
    %c0_i32 = arith.constant 0 : i32
    %c0_i32_0 = arith.constant 0 : i32
    %c0_i32_1 = arith.constant 0 : i32
    return %arg0, %arg1, %c0_i32, %c0_i32_0 : i32, i32, i32, i32
  }
}

module attributes {stable_mosaic.version = 11 : i64} {
  func.func @_bn_relu_kernel(%arg0: i32, %arg1: i32, %arg2: memref<1x16x16x128xbf16, #tpu.memory_space<vmem>>, %arg3: memref<1x128xf32, #tpu.memory_space<vmem>>, %arg4: memref<1x128xf32, #tpu.memory_space<vmem>>, %arg5: memref<1x16x16x128xf32, #tpu.memory_space<vmem>>) attributes {dimension_semantics = [#tpu.dimension_semantics<parallel>, #tpu.dimension_semantics<parallel>], iteration_bounds = array<i64: 2, 1>, scalar_prefetch = 0 : i64, scratch_operands = 0 : i64, tpu.core_type = #tpu.core_type<tc>, window_params = [{transform_indices = @transform_0, window_bounds = array<i64: 1, 16, 16, 128>}, {pipeline_mode = #tpu.pipeline_mode<synchronous>, transform_indices = @transform_1, window_bounds = array<i64: 1, 128>}, {pipeline_mode = #tpu.pipeline_mode<synchronous>, transform_indices = @transform_2, window_bounds = array<i64: 1, 128>}, {transform_indices = @transform_3, window_bounds = array<i64: 1, 16, 16, 128>}]} {
    %c0 = arith.constant 0 : index
    %c0_0 = arith.constant 0 : index
    %c0_1 = arith.constant 0 : index
    %c0_2 = arith.constant 0 : index
    %0 = vector.load %arg2[%c0, %c0_0, %c0_1, %c0_2] : memref<1x16x16x128xbf16, #tpu.memory_space<vmem>>, vector<1x16x16x128xbf16>
    %1 = vector.shape_cast %0 : vector<1x16x16x128xbf16> to vector<16x16x128xbf16>
    %2 = arith.extf %1 : vector<16x16x128xbf16> to vector<16x16x128xf32>
    %c0_3 = arith.constant 0 : index
    %c0_4 = arith.constant 0 : index
    %3 = vector.load %arg3[%c0_3, %c0_4] : memref<1x128xf32, #tpu.memory_space<vmem>>, vector<1x128xf32>
    %4 = vector.shape_cast %3 : vector<1x128xf32> to vector<1x1x128xf32>
    %5 = vector.broadcast %4 : vector<1x1x128xf32> to vector<16x16x128xf32>
    %6 = arith.mulf %2, %5 : vector<16x16x128xf32>
    %c0_5 = arith.constant 0 : index
    %c0_6 = arith.constant 0 : index
    %7 = vector.load %arg4[%c0_5, %c0_6] : memref<1x128xf32, #tpu.memory_space<vmem>>, vector<1x128xf32>
    %8 = vector.shape_cast %7 : vector<1x128xf32> to vector<1x1x128xf32>
    %9 = vector.broadcast %8 : vector<1x1x128xf32> to vector<16x16x128xf32>
    %10 = arith.addf %6, %9 : vector<16x16x128xf32>
    %cst = arith.constant 0.000000e+00 : f32
    %11 = vector.broadcast %cst : f32 to vector<16x16x128xf32>
    %12 = arith.maximumf %10, %11 : vector<16x16x128xf32>
    %c0_7 = arith.constant 0 : index
    %c0_8 = arith.constant 0 : index
    %c0_9 = arith.constant 0 : index
    %c0_10 = arith.constant 0 : index
    %13 = vector.load %arg5[%c0_7, %c0_8, %c0_9, %c0_10] : memref<1x16x16x128xf32, #tpu.memory_space<vmem>>, vector<1x16x16x128xf32>
    %14 = vector.shape_cast %13 : vector<1x16x16x128xf32> to vector<16x16x128xf32>
    %15 = vector.shape_cast %12 : vector<16x16x128xf32> to vector<1x16x16x128xf32>
    tpu.vector_store %arg5[%c0_7, %c0_8, %c0_9, %c0_10], %15 {strides = array<i32>} : memref<1x16x16x128xf32, #tpu.memory_space<vmem>>, vector<1x16x16x128xf32>,
    return
  }
  func.func @transform_0(%arg0: i32, %arg1: i32) -> (i32, i32, i32, i32) {
    %c0_i32 = arith.constant 0 : i32
    %c0_i32_0 = arith.constant 0 : i32
    %c0_i32_1 = arith.constant 0 : i32
    return %arg0, %arg1, %c0_i32, %c0_i32_0 : i32, i32, i32, i32
  }
  func.func @transform_1(%arg0: i32, %arg1: i32) -> (i32, i32) {
    %c0_i32 = arith.constant 0 : i32
    %c0_i32_0 = arith.constant 0 : i32
    %c0_i32_1 = arith.constant 0 : i32
    return %c0_i32, %c0_i32_0 : i32, i32
  }
  func.func @transform_2(%arg0: i32, %arg1: i32) -> (i32, i32) {
    %c0_i32 = arith.constant 0 : i32
    %c0_i32_0 = arith.constant 0 : i32
    %c0_i32_1 = arith.constant 0 : i32
    return %c0_i32, %c0_i32_0 : i32, i32
  }
  func.func @transform_3(%arg0: i32, %arg1: i32) -> (i32, i32, i32, i32) {
    %c0_i32 = arith.constant 0 : i32
    %c0_i32_0 = arith.constant 0 : i32
    %c0_i32_1 = arith.constant 0 : i32
    return %arg0, %arg1, %c0_i32, %c0_i32_0 : i32, i32, i32, i32
  }
}

</mosaic_0001>

<bundles_post_ra>
// kernel: double_conv.5
= control target key start
LH: loop header
LB: loop body
LE: loop exit
PB: predicated region body
PF: predicated region fallthrough
CT: control target
= control target key end

     0   :  { %s673_s12 = smov 0   ;;  %s675_s13 = smov 0   ;;  %s836_s0 = inlined_call_operand.vmem [shape: bf16[2,16,16,128], index: 0, kind: input, shape index: {}]   ;;  %s837_s1 = inlined_call_operand.vmem [shape: f32[1,128], index: 1, kind: input, shape index: {}]   ;;  %s838_s2 = inlined_call_operand.vmem [shape: f32[1,128], index: 2, kind: input, shape index: {}]   ;;  %s839_s3 = inlined_call_operand.vmem [shape: f32[2,16,16,128], index: 3, kind: output, shape index: {}]  }
   0x1   :  { %s677_s14 = smov 0  }
   0x2 LB: > { %s25_s15 = sadd.s32 1, %s647_s13  ;;  %p515_p0 = scmp.ge.s32.totalorder %s651_s14, 1  ;;  %s651_s14 = sphi %s677_s14, %s13_s14   ;;  %s647_s13 = sphi %s675_s13, %s841_s13   ;;  %s643_s12 = sphi %s673_s12, %s840_s12  }
   0x3   : > { %p27_p1 = scmp.ge.s32.totalorder %s25_s15, 2  ;;  %p159_p2 = scmp.lt.s32.totalorder %s651_s14, 3 }
   0x5   : > { %s843_s15 = smov (%p27_p1, %s25_s15), 0  ;;  %p160_p3 = pnand %p515_p0, %p159_p2 }
   0x6   : > { %p194_p4 = scmp.lt.s32.totalorder (!%p160_p3), %s643_s12, 1 }
   0x7   : > { %163 = sbr.rel (%p160_p3) target bundleno = 56 (0x38), region = 32 }
   0xc   : > { %s845_s12 = smov (!%p194_p4, %s643_s12), 1  ;;  %v702_v0 = vld [vmem:[%s837_s1] ss:$0 sm:$0xff] }
   0xd   : > { %s522_s16 = sshll.u32 %s845_s12, 7  ;;  %v710_v5 = vld [vmem:[%s838_s2] ss:$0 sm:$0xff]  ;;  %s523_s24 = sshll.u32 %s845_s12, 8 }
   0xe   : > { %s697_s19 = scalar_lea.vmem %s836_s0, %s522_s16  ;;  %s729_s27 = scalar_lea.vmem %s839_s3, %s523_s24 }
   0xf   : > { %v525_v1 = vld [vmem:[%s697_s19] sm:$0xff]   ;;  %v588_v2 = vld [vmem:[%s697_s19 + $0x8] sm:$0xff]   ;;  %v589_v3 = vld [vmem:[%s697_s19 + $0x10] sm:$0xff]  }
  0x10   : > { %v526_v4 = vunpack.c.l.bf16 %v525_v1  ;;  %v527_v6 = vunpack.c.h.bf16 %v525_v1  ;;  %v530_v7 = vunpack.c.l.bf16 %v588_v2  ;;  %v531_v8 = vunpack.c.h.bf16 %v588_v2  ;;  %v590_v9 = vld [vmem:[%s697_s19 + $0x18] sm:$0xff]   ;;  %v591_v30 = vld [vmem:[%s697_s19 + $0x20] sm:$0xff]   ;;  %v592_v31 = vld [vmem:[%s697_s19 + $0x28] sm:$0xff]  }
  0x11   : > { %v534_v10 = vunpack.c.l.bf16 %v589_v3  ;;  %v535_v11 = vunpack.c.h.bf16 %v589_v3  ;;  %v538_v12 = vunpack.c.l.bf16 %v590_v9  ;;  %v539_v13 = vunpack.c.h.bf16 %v590_v9  ;;  %v593_v36 = vld [vmem:[%s697_s19 + $0x30] sm:$0xff]   ;;  %v594_v37 = vld [vmem:[%s697_s19 + $0x38] sm:$0xff]   ;;  %v595_v3 = vld [vmem:[%s697_s19 + $0x40] sm:$0xff]  }
  0x12   : > { %v283_v14 = vmul.f32 %v702_v0, %v526_v4  ;;  %v284_v15 = vmul.f32 %v702_v0, %v527_v6  ;;  %v285_v16 = vmul.f32 %v702_v0, %v530_v7  ;;  %v286_v17 = vmul.f32 %v702_v0, %v531_v8  ;;  %v596_v4 = vld [vmem:[%s697_s19 + $0x48] sm:$0xff]   ;;  %v597_v6 = vld [vmem:[%s697_s19 + $0x50] sm:$0xff]  }
  0x13   : > { %v287_v18 = vmul.f32 %v702_v0, %v534_v10  ;;  %v288_v19 = vmul.f32 %v702_v0, %v535_v11  ;;  %v289_v20 = vmul.f32 %v702_v0, %v538_v12  ;;  %v290_v21 = vmul.f32 %v702_v0, %v539_v13  ;;  %v598_v11 = vld [vmem:[%s697_s19 + $0x58] sm:$0xff]  }
  0x14   : > { %v319_v22 = vadd.f32 %v710_v5, %v283_v14  ;;  %v320_v23 = vadd.f32 %v710_v5, %v284_v15  ;;  %v321_v24 = vadd.f32 %v710_v5, %v285_v16  ;;  %v322_v25 = vadd.f32 %v710_v5, %v286_v17 }
  0x15   : > { %v323_v26 = vadd.f32 %v710_v5, %v287_v18  ;;  %v324_v27 = vadd.f32 %v710_v5, %v288_v19  ;;  %v325_v28 = vadd.f32 %v710_v5, %v289_v20  ;;  %v326_v29 = vadd.f32 %v710_v5, %v290_v21 }
  0x16   : > { %v351_v32 = vmax.f32 %v319_v22, 0.0  ;;  %v352_v33 = vmax.f32 %v320_v23, 0.0  ;;  %v353_v34 = vmax.f32 %v321_v24, 0.0  ;;  %v354_v35 = vmax.f32 %v322_v25, 0.0 }
  0x17   : > { %v355_v38 = vmax.f32 %v323_v26, 0.0  ;;  %v356_v39 = vmax.f32 %v324_v27, 0.0  ;;  %v357_v40 = vmax.f32 %v325_v28, 0.0  ;;  %v358_v41 = vmax.f32 %v326_v29, 0.0 }
  0x18   : > { %383 = vst [vmem:[%s729_s27] sm:$0xff] %v351_v32  ;;  %v542_v42 = vunpack.c.l.bf16 %v591_v30  ;;  %v543_v43 = vunpack.c.h.bf16 %v591_v30  ;;  %v546_v44 = vunpack.c.l.bf16 %v592_v31  ;;  %v547_v45 = vunpack.c.h.bf16 %v592_v31 }
  0x19   : > { %384 = vst [vmem:[%s729_s27 + $0x8] sm:$0xff] %v352_v33  ;;  %v550_v46 = vunpack.c.l.bf16 %v593_v36  ;;  %v551_v47 = vunpack.c.h.bf16 %v593_v36  ;;  %v554_v48 = vunpack.c.l.bf16 %v594_v37  ;;  %v555_v49 = vunpack.c.h.bf16 %v594_v37 }
  0x1a   : > { %385 = vst [vmem:[%s729_s27 + $0x10] sm:$0xff] %v353_v34  ;;  %v291_v50 = vmul.f32 %v702_v0, %v542_v42  ;;  %v292_v51 = vmul.f32 %v702_v0, %v543_v43  ;;  %v293_v52 = vmul.f32 %v702_v0, %v546_v44  ;;  %v294_v53 = vmul.f32 %v702_v0, %v547_v45  ;;  %v601_v42 = vld [vmem:[%s697_s19 + $0x70] sm:$0xff]  }
  0x1b   : > { %386 = vst [vmem:[%s729_s27 + $0x18] sm:$0xff] %v354_v35  ;;  %v295_v54 = vmul.f32 %v702_v0, %v550_v46  ;;  %v296_v55 = vmul.f32 %v702_v0, %v551_v47  ;;  %v297_v56 = vmul.f32 %v702_v0, %v554_v48  ;;  %v298_v57 = vmul.f32 %v702_v0, %v555_v49  ;;  %v602_v47 = vld [vmem:[%s697_s19 + $0x78] sm:$0xff]  }
  0x1c   : > { %387 = vst [vmem:[%s729_s27 + $0x20] sm:$0xff] %v355_v38  ;;  %v327_v58 = vadd.f32 %v710_v5, %v291_v50  ;;  %v328_v59 = vadd.f32 %v710_v5, %v292_v51  ;;  %v329_v60 = vadd.f32 %v710_v5, %v293_v52  ;;  %v330_v61 = vadd.f32 %v710_v5, %v294_v53 }
  0x1d   : > { %388 = vst [vmem:[%s729_s27 + $0x28] sm:$0xff] %v356_v39  ;;  %v331_v62 = vadd.f32 %v710_v5, %v295_v54  ;;  %v332_v63 = vadd.f32 %v710_v5, %v296_v55  ;;  %v333_v1 = vadd.f32 %v710_v5, %v297_v56  ;;  %v334_v2 = vadd.f32 %v710_v5, %v298_v57 }
  0x1e   : > { %389 = vst [vmem:[%s729_s27 + $0x30] sm:$0xff] %v357_v40  ;;  %v359_v7 = vmax.f32 %v327_v58, 0.0  ;;  %v360_v8 = vmax.f32 %v328_v59, 0.0  ;;  %v361_v9 = vmax.f32 %v329_v60, 0.0  ;;  %v362_v10 = vmax.f32 %v330_v61, 0.0  ;;  %v599_v40 = vld [vmem:[%s697_s19 + $0x60] sm:$0xff]  }
  0x1f   : > { %390 = vst [vmem:[%s729_s27 + $0x38] sm:$0xff] %v358_v41  ;;  %v363_v12 = vmax.f32 %v331_v62, 0.0  ;;  %v364_v13 = vmax.f32 %v332_v63, 0.0  ;;  %v365_v14 = vmax.f32 %v333_v1, 0.0  ;;  %v366_v15 = vmax.f32 %v334_v2, 0.0  ;;  %v600_v41 = vld [vmem:[%s697_s19 + $0x68] sm:$0xff]  }
  0x20   : > { %391 = vst [vmem:[%s729_s27 + $0x40] sm:$0xff] %v359_v7  ;;  %v558_v16 = vunpack.c.l.bf16 %v595_v3  ;;  %v559_v17 = vunpack.c.h.bf16 %v595_v3  ;;  %v562_v18 = vunpack.c.l.bf16 %v596_v4  ;;  %v563_v19 = vunpack.c.h.bf16 %v596_v4 }
  0x21   : > { %392 = vst [vmem:[%s729_s27 + $0x48] sm:$0xff] %v360_v8  ;;  %v566_v20 = vunpack.c.l.bf16 %v597_v6  ;;  %v567_v21 = vunpack.c.h.bf16 %v597_v6  ;;  %v570_v22 = vunpack.c.l.bf16 %v598_v11  ;;  %v571_v23 = vunpack.c.h.bf16 %v598_v11 }
  0x22   : > { %393 = vst [vmem:[%s729_s27 + $0x50] sm:$0xff] %v361_v9  ;;  %v299_v24 = vmul.f32 %v702_v0, %v558_v16  ;;  %v300_v25 = vmul.f32 %v702_v0, %v559_v17  ;;  %v301_v26 = vmul.f32 %v702_v0, %v562_v18  ;;  %v302_v27 = vmul.f32 %v702_v0, %v563_v19 }
  0x23   : > { %394 = vst [vmem:[%s729_s27 + $0x58] sm:$0xff] %v362_v10  ;;  %v303_v28 = vmul.f32 %v702_v0, %v566_v20  ;;  %v304_v29 = vmul.f32 %v702_v0, %v567_v21  ;;  %v305_v30 = vmul.f32 %v702_v0, %v570_v22  ;;  %v306_v31 = vmul.f32 %v702_v0, %v571_v23 }
  0x24   : > { %395 = vst [vmem:[%s729_s27 + $0x60] sm:$0xff] %v363_v12  ;;  %v335_v32 = vadd.f32 %v710_v5, %v299_v24  ;;  %v336_v33 = vadd.f32 %v710_v5, %v300_v25  ;;  %v337_v34 = vadd.f32 %v710_v5, %v301_v26  ;;  %v338_v35 = vadd.f32 %v710_v5, %v302_v27 }
  0x25   : > { %396 = vst [vmem:[%s729_s27 + $0x68] sm:$0xff] %v364_v13  ;;  %v339_v36 = vadd.f32 %v710_v5, %v303_v28  ;;  %v340_v37 = vadd.f32 %v710_v5, %v304_v29  ;;  %v341_v38 = vadd.f32 %v710_v5, %v305_v30  ;;  %v342_v39 = vadd.f32 %v710_v5, %v306_v31 }
  0x26   : > { %397 = vst [vmem:[%s729_s27 + $0x70] sm:$0xff] %v365_v14  ;;  %v367_v43 = vmax.f32 %v335_v32, 0.0  ;;  %v368_v44 = vmax.f32 %v336_v33, 0.0  ;;  %v369_v45 = vmax.f32 %v337_v34, 0.0  ;;  %v370_v46 = vmax.f32 %v338_v35, 0.0 }
  0x27   : > { %398 = vst [vmem:[%s729_s27 + $0x78] sm:$0xff] %v366_v15  ;;  %v371_v48 = vmax.f32 %v339_v36, 0.0  ;;  %v372_v49 = vmax.f32 %v340_v37, 0.0  ;;  %v373_v50 = vmax.f32 %v341_v38, 0.0  ;;  %v374_v51 = vmax.f32 %v342_v39, 0.0 }
  0x28   : > { %399 = vst [vmem:[%s729_s27 + $0x80] sm:$0xff] %v367_v43  ;;  %v574_v52 = vunpack.c.l.bf16 %v599_v40  ;;  %v575_v53 = vunpack.c.h.bf16 %v599_v40  ;;  %v578_v54 = vunpack.c.l.bf16 %v600_v41  ;;  %v579_v55 = vunpack.c.h.bf16 %v600_v41 }
  0x29   : > { %400 = vst [vmem:[%s729_s27 + $0x88] sm:$0xff] %v368_v44  ;;  %v582_v56 = vunpack.c.l.bf16 %v601_v42  ;;  %v583_v57 = vunpack.c.h.bf16 %v601_v42  ;;  %v586_v58 = vunpack.c.l.bf16 %v602_v47  ;;  %v587_v59 = vunpack.c.h.bf16 %v602_v47 }
  0x2a   : > { %401 = vst [vmem:[%s729_s27 + $0x90] sm:$0xff] %v369_v45  ;;  %v307_v60 = vmul.f32 %v702_v0, %v574_v52  ;;  %v308_v61 = vmul.f32 %v702_v0, %v575_v53  ;;  %v309_v62 = vmul.f32 %v702_v0, %v578_v54  ;;  %v310_v63 = vmul.f32 %v702_v0, %v579_v55 }
  0x2b   : > { %402 = vst [vmem:[%s729_s27 + $0x98] sm:$0xff] %v370_v46  ;;  %v311_v1 = vmul.f32 %v702_v0, %v582_v56  ;;  %v312_v2 = vmul.f32 %v702_v0, %v583_v57  ;;  %v313_v3 = vmul.f32 %v702_v0, %v586_v58  ;;  %v314_v4 = vmul.f32 %v702_v0, %v587_v59 }
  0x2c   : > { %403 = vst [vmem:[%s729_s27 + $0xa0] sm:$0xff] %v371_v48  ;;  %v343_v6 = vadd.f32 %v710_v5, %v307_v60  ;;  %v344_v7 = vadd.f32 %v710_v5, %v308_v61  ;;  %v345_v8 = vadd.f32 %v710_v5, %v309_v62  ;;  %v346_v9 = vadd.f32 %v710_v5, %v310_v63 }
  0x2d   : > { %404 = vst [vmem:[%s729_s27 + $0xa8] sm:$0xff] %v372_v49  ;;  %v347_v10 = vadd.f32 %v710_v5, %v311_v1  ;;  %v348_v11 = vadd.f32 %v710_v5, %v312_v2  ;;  %v349_v14 = vadd.f32 %v710_v5, %v313_v3  ;;  %v350_v16 = vadd.f32 %v710_v5, %v314_v4 }
  0x2e   : > { %405 = vst [vmem:[%s729_s27 + $0xb0] sm:$0xff] %v373_v50  ;;  %v375_v0 = vmax.f32 %v343_v6, 0.0  ;;  %v376_v12 = vmax.f32 %v344_v7, 0.0  ;;  %v377_v13 = vmax.f32 %v345_v8, 0.0  ;;  %v378_v15 = vmax.f32 %v346_v9, 0.0 }
  0x2f   : > { %406 = vst [vmem:[%s729_s27 + $0xb8] sm:$0xff] %v374_v51  ;;  %v379_v17 = vmax.f32 %v347_v10, 0.0  ;;  %v380_v18 = vmax.f32 %v348_v11, 0.0  ;;  %v381_v19 = vmax.f32 %v349_v14, 0.0  ;;  %v382_v20 = vmax.f32 %v350_v16, 0.0 }
  0x30   : > { %407 = vst [vmem:[%s729_s27 + $0xc0] sm:$0xff] %v375_v0 }
  0x31   : > { %408 = vst [vmem:[%s729_s27 + $0xc8] sm:$0xff] %v376_v12 }
  0x32   : > { %409 = vst [vmem:[%s729_s27 + $0xd0] sm:$0xff] %v377_v13 }
  0x33   : > { %410 = vst [vmem:[%s729_s27 + $0xd8] sm:$0xff] %v378_v15 }
  0x34   : > { %411 = vst [vmem:[%s729_s27 + $0xe0] sm:$0xff] %v379_v17 }
  0x35   : > { %412 = vst [vmem:[%s729_s27 + $0xe8] sm:$0xff] %v380_v18 }
  0x36   : > { %413 = vst [vmem:[%s729_s27 + $0xf0] sm:$0xff] %v381_v19 }
  0x37   : > { %414 = vst [vmem:[%s729_s27 + $0xf8] sm:$0xff] %v382_v20 }
  0x38 PF: > { %s13_s14 = sadd.s32 1, %s651_s14   ;;  %s840_s12 = smov %s647_s13 }
  0x39   : > { %p10_p5 = scmp.ge.s32.totalorder %s13_s14, 4   ;;  %s841_s13 = smov %s843_s15 }
  0x3b   :  { %12 = sbr.rel (!%p10_p5) target bundleno = 2 (0x2), region = 62 }

// kernel: double_conv.3
= control target key start
LH: loop header
LB: loop body
LE: loop exit
PB: predicated region body
PF: predicated region fallthrough
CT: control target
= control target key end

     0   :  { %s6275_s18 = smov 0   ;;  %s6277_s19 = smov 0   ;;  %s7854_s0 = inlined_call_operand.vmem [shape: bf16[2,16,16,128], index: 0, kind: input, shape index: {}, may-alias: {0,1,2}]   ;;  %s7855_s1 = inlined_call_operand.vmem [shape: bf16[2,16,16,128], index: 1, kind: input, shape index: {}, may-alias: {0,1,2}]   ;;  %s7856_s2 = inlined_call_operand.vmem [shape: bf16[2,16,16,128], index: 2, kind: input, shape index: {}, may-alias: {0,1,2}]   ;;  %s7857_s3 = inlined_call_operand.vmem [shape: bf16[3,384,128], index: 3, kind: input, shape index: {}]   ;;  %s7858_s4 = inlined_call_operand.vmem [shape: bf16[2,16,16,128], index: 4, kind: output, shape index: {0}]   ;;  %s7859_s5 = inlined_call_operand.vmem [shape: f32[2,1,2,128], index: 5, kind: output, shape index: {1}]  }
   0x1   :  { %s6279_s0 = smov 0  }
   0x2 LB: > { %s28_s2 = sadd.s32 1, %s6238_s19  ;;  %p5283_p0 = scmp.ge.s32.totalorder %s6242_s0, 1  ;;  %s6242_s0 = sphi %s6279_s0, %s16_s0   ;;  %s6238_s19 = sphi %s6277_s19, %s7904_s19   ;;  %s6234_s18 = sphi %s6275_s18, %s7903_s18  }
   0x3   : > { %p30_p1 = scmp.ge.s32.totalorder %s28_s2, 2  ;;  %p278_p2 = scmp.lt.s32.totalorder %s6242_s0, 3 }
   0x5   : > { %s7906_s2 = smov (%p30_p1, %s28_s2), 0  ;;  %p279_p3 = pnand %p5283_p0, %p278_p2 }
   0x7   : > { %282 = sbr.rel (%p279_p3) target bundleno = 785 (0x311), region = 36 }
   0xc   : > { %v5987_v0 = vld [vmem:[%s7857_s3 + $0xf8] sm:$0xff]  ;;  %p367_p4 = scmp.lt.s32.totalorder %s6234_s18, 1  ;;  %vm457_vm0 = vcmask 1040384   ;;  %vm458_vm1 = vsmask.f32 256  ;;  %v5986_v1 = vld [vmem:[%s7857_s3 + $0xf0] sm:$0xff] }
   0xd   : > { %2941 = vmatpush.bf16.msra.mxu0 %v5987_v0  ;;  %6139 = vmatpush.bf16.msra.mxu1 %v5987_v0  ;;  %vm6302_vm2 = vmand %vm457_vm0, %vm458_vm1  ;;  %v7863_v2 = vmov 0  ;;  %vm514_vm3 = vsmask.f32 7938  ;;  %v463_v3 = vld [vmem:[#allocation2 + $0xc] sm:$0x1]  ;;  %vm592_vm6 = vcmask 1043456  }
   0xe   : > { %s7908_s18 = smov (!%p367_p4, %s6234_s18), 1  ;;  %v7864_v2 = vsel %vm6302_vm2, 4294967295, %v7863_v2  ;;  %6140 = vmatpush.bf16.msra.mxu2 %v5987_v0  ;;  %6141 = vmatpush.bf16.msra.mxu3 %v5987_v0  ;;  %vm6307_vm4 = vmand %vm457_vm0, %vm514_vm3  ;;  %v519_v5 = vld [vmem:[#allocation2 + $0x14] sm:$0x1]  ;;  %vm570_vm5 = vsmask.f32 4368 }
   0xf   : > { %7865 = vst [vmem:[#allocation3_spill] sm:$0xff] %v7864_v2  ;;  %v5985_v6 = vld [vmem:[%s7857_s3 + $0xe8] sm:$0xff]  ;;  %s5920_s26 = sshll.u32 %s7908_s18, 7  ;;  %v464_v7 = vsel %vm6302_vm2, 0, %v463_v3  ;;  %v520_v8 = vsel %vm6307_vm4, 0, %v519_v5  ;;  %v5984_v19 = vld [vmem:[%s7857_s3 + $0xe0] sm:$0xff]  ;;  %vm6337_vm7 = vmor %vm458_vm1, %vm570_vm5 }
  0x10   : > { %v475_v9 = vld [vmem:[#allocation2 + $0x3c] sm:$0x1]  ;;  %s6324_s29 = scalar_lea.vmem %s7855_s1, %s5920_s26  ;;  %465 = vst [vmem:[#allocation2 + $0xc] sm:$0x1] %v464_v7  ;;  %v487_v11 = vld [vmem:[#allocation2 + $0x6c] sm:$0x1]  ;;  %vm6344_vm8 = vmand %vm592_vm6, %vm514_vm3  ;;  %s7632_s15 = scalar_lea.vmem %s7858_s4, %s5920_s26 }
  0x11   : > { %v476_v10 = vsel %vm6302_vm2, 0, %v475_v9  ;;  %2942 = vmatpush.bf16.msra.mxu0 %v5986_v1  ;;  %6142 = vmatpush.bf16.msra.mxu1 %v5986_v1  ;;  %v415_v12 = vld [vmem:[%s6324_s29] sm:$0xf]  ;;  %v416_v13 = vld [vmem:[%s6324_s29 + $0x4] sm:$0xf]  ;;  %v7870_v29 = vmov 0 }
  0x12   : > { %521 = vst [vmem:[#allocation2 + $0x14] sm:$0x1] %v520_v8  ;;  %6143 = vmatpush.bf16.msra.mxu2 %v5986_v1  ;;  %6144 = vmatpush.bf16.msra.mxu3 %v5986_v1  ;;  %v602_v14 = vshrl.u32 %v415_v12, 16  ;;  %v605_v15 = vshll.u32 %v415_v12, 16  ;;  %v610_v16 = vshrl.u32 %v416_v13, 16  ;;  %v613_v17 = vshll.u32 %v416_v13, 16 }
  0x13   : > { %v423_v18 = vld [vmem:[%s6324_s29 + $0x20] sm:$0xf]  ;;  %v424_v20 = vld [vmem:[%s6324_s29 + $0x24] sm:$0xf]  ;;  %477 = vst [vmem:[#allocation2 + $0x3c] sm:$0x1] %v476_v10 }
  0x14   : > { %v670_v21 = vshrl.u32 %v423_v18, 16  ;;  %v673_v22 = vshll.u32 %v423_v18, 16  ;;  %v604_v24 = vrot.slane %v602_v14, 7  ;;  %v612_v25 = vrot.slane %v610_v16, 7  ;;  %v431_v28 = vld [vmem:[%s6324_s29 + $0x40] sm:$0xf] }
  0x15   : > { %v678_v26 = vshrl.u32 %v424_v20, 16  ;;  %v681_v27 = vshll.u32 %v424_v20, 16  ;;  %2943 = vmatpush.bf16.msra.mxu0 %v5985_v6  ;;  %6145 = vmatpush.bf16.msra.mxu1 %v5985_v6  ;;  %v7871_v29 = vsel %vm6344_vm8, 4294967295, %v7870_v29  ;;  %v432_v31 = vld [vmem:[%s6324_s29 + $0x44] sm:$0xf]  ;;  %v488_v32 = vsel %vm6302_vm2, 0, %v487_v11 }
  0x16   : > { %7872 = vst [vmem:[#allocation4_spill] sm:$0xff] %v7871_v29  ;;  %v672_v30 = vrot.slane %v670_v21, 7  ;;  %v543_v33 = vld [vmem:[#allocation2 + $0x74] sm:$0x1]  ;;  %6146 = vmatpush.bf16.msra.mxu2 %v5985_v6  ;;  %6147 = vmatpush.bf16.msra.mxu3 %v5985_v6  ;;  %v607_v34 = vor.u32 %v605_v15, %v604_v24  ;;  %v608_v35 = vrot.slane %v604_v24, 4  ;;  %v615_v36 = vor.u32 %v613_v17, %v612_v25  ;;  %v5983_v49 = vld [vmem:[%s7857_s3 + $0xd8] sm:$0xff] }
  0x17   : > { %v617_v37 = vrot.slane %v612_v25, 4  ;;  %489 = vst [vmem:[#allocation2 + $0x6c] sm:$0x1] %v488_v32  ;;  %v6352_v38 = vld [vmem:[%s6324_s29 + $0x60] sm:$0xf]  ;;  %v6354_v42 = vrot.slane %v678_v26, 7 }
  0x18   : > { %v922_v39 = vld [vmem:[#allocation2 + $0xc] sm:$0xf]  ;;  %v675_v40 = vor.u32 %v673_v22, %v672_v30  ;;  %v676_v41 = vrot.slane %v672_v30, 4  ;;  %v544_v43 = vsel %vm6307_vm4, 0, %v543_v33  ;;  %v616_v44 = vsel %vm6337_vm7, %v608_v35, %v615_v36  ;;  %v440_v53 = vld [vmem:[%s6324_s29 + $0x64] sm:$0xf] }
  0x19   : > { %v923_v45 = vsel %vm6344_vm8, %v607_v34, %v922_v39  ;;  %v926_v46 = vld [vmem:[#allocation2 + $0x14] sm:$0x1]  ;;  %545 = vst [vmem:[#allocation2 + $0x74] sm:$0x1] %v544_v43  ;;  %v738_v47 = vshrl.u32 %v431_v28, 16  ;;  %v741_v48 = vshll.u32 %v431_v28, 16  ;;  %2944 = vmatpush.bf16.msra.mxu0 %v5984_v19  ;;  %6148 = vmatpush.bf16.msra.mxu1 %v5984_v19  ;;  %v683_v51 = vor.u32 %v681_v27, %v6354_v42 }
  0x1a   : > { %924 = vst [vmem:[#allocation2 + $0xc] sm:$0xf] %v923_v45  ;;  %v927_v50 = vsel %vm6302_vm2, %v617_v37, %v926_v46  ;;  %v746_v52 = vshrl.u32 %v432_v31, 16  ;;  %6149 = vmatpush.bf16.msra.mxu2 %v5984_v19  ;;  %6150 = vmatpush.bf16.msra.mxu3 %v5984_v19  ;;  %v950_v54 = vld [vmem:[#allocation2 + $0x3c] sm:$0xf]  ;;  %v749_v56 = vshll.u32 %v432_v31, 16 }
  0x1b   : > { %925 = vst [vmem:[#allocation2 + $0x10] sm:$0xf] %v616_v44  ;;  %v740_v55 = vrot.slane %v738_v47, 7  ;;  %v684_v57 = vsel %vm6337_vm7, %v676_v41, %v683_v51  ;;  %v951_v58 = vsel %vm6344_vm8, %v675_v40, %v950_v54  ;;  %v499_v60 = vld [vmem:[#allocation2 + $0x9c] sm:$0x1]  ;;  %v806_v61 = vshrl.u32 %v6352_v38, 16 }
  0x1c   : > { %928 = vst [vmem:[#allocation2 + $0x14] sm:$0x1] %v927_v50  ;;  %v748_v59 = vrot.slane %v746_v52, 7  ;;  %v500_v0 = vsel %vm6302_vm2, 0, %v499_v60  ;;  %v555_v1 = vld [vmem:[#allocation2 + $0xa4] sm:$0x1] }
  0x1d   : > { %952 = vst [vmem:[#allocation2 + $0x3c] sm:$0xf] %v951_v58  ;;  %v743_v62 = vor.u32 %v741_v48, %v740_v55  ;;  %v744_v63 = vrot.slane %v740_v55, 4  ;;  %2945 = vmatpush.bf16.msra.mxu0 %v5983_v49  ;;  %6151 = vmatpush.bf16.msra.mxu1 %v5983_v49  ;;  %v5982_v3 = vld [vmem:[%s7857_s3 + $0xd0] sm:$0xff]  ;;  %v808_v9 = vrot.slane %v806_v61, 7  ;;  %v809_v10 = vshll.u32 %v6352_v38, 16 }
  0x1e   : > { %953 = vst [vmem:[#allocation2 + $0x40] sm:$0xf] %v684_v57  ;;  %v751_v5 = vor.u32 %v749_v56, %v748_v59  ;;  %v753_v6 = vrot.slane %v748_v59, 4  ;;  %v978_v7 = vld [vmem:[#allocation2 + $0x6c] sm:$0xf]  ;;  %6152 = vmatpush.bf16.msra.mxu2 %v5983_v49  ;;  %6153 = vmatpush.bf16.msra.mxu3 %v5983_v49  ;;  %v814_v11 = vshrl.u32 %v440_v53, 16 }
  0x1f   : > { %v979_v8 = vsel %vm6344_vm8, %v743_v62, %v978_v7  ;;  %501 = vst [vmem:[#allocation2 + $0x9c] sm:$0x1] %v500_v0  ;;  %v556_v14 = vsel %vm6307_vm4, 0, %v555_v1  ;;  %v817_v15 = vshll.u32 %v440_v53, 16  ;;  %v812_v17 = vrot.slane %v808_v9, 4  ;;  %v5981_v19 = vld [vmem:[%s7857_s3 + $0xc8] sm:$0xff] }
  0x20   : > { %v752_v12 = vsel %vm6337_vm7, %v744_v63, %v751_v5  ;;  %980 = vst [vmem:[#allocation2 + $0x6c] sm:$0xf] %v979_v8  ;;  %v982_v13 = vld [vmem:[#allocation2 + $0x74] sm:$0x1]  ;;  %v6388_v18 = vrot.slane %v814_v11, 7  ;;  %v811_v21 = vor.u32 %v809_v10, %v808_v9  ;;  %v5980_v31 = vld [vmem:[%s7857_s3 + $0xc0] sm:$0xff] }
  0x21   : > { %981 = vst [vmem:[#allocation2 + $0x70] sm:$0xf] %v752_v12  ;;  %v983_v16 = vsel %vm6302_vm2, %v753_v6, %v982_v13  ;;  %2946 = vmatpush.bf16.msra.mxu0 %v5982_v3  ;;  %6154 = vmatpush.bf16.msra.mxu1 %v5982_v3  ;;  %v417_v20 = vld [vmem:[%s6324_s29 + $0x8] sm:$0xf]  ;;  %v418_v24 = vld [vmem:[%s6324_s29 + $0xc] sm:$0xf] }
  0x22   : > { %984 = vst [vmem:[#allocation2 + $0x74] sm:$0x1] %v983_v16  ;;  %6155 = vmatpush.bf16.msra.mxu2 %v5982_v3  ;;  %6156 = vmatpush.bf16.msra.mxu3 %v5982_v3  ;;  %v819_v22 = vor.u32 %v817_v15, %v6388_v18  ;;  %v619_v25 = vshrl.u32 %v417_v20, 16  ;;  %v821_v26 = vrot.slane %v6388_v18, 4  ;;  %v466_v27 = vld [vmem:[#allocation2 + $0x18] sm:$0x1] }
  0x23   : > { %557 = vst [vmem:[#allocation2 + $0xa4] sm:$0x1] %v556_v14  ;;  %v627_v28 = vshrl.u32 %v418_v24, 16  ;;  %v630_v30 = vshll.u32 %v418_v24, 16  ;;  %v467_v33 = vsel %vm6302_vm2, 0, %v466_v27  ;;  %v622_v35 = vshll.u32 %v417_v20, 16 }
  0x24   : > { %v820_v32 = vsel %vm6337_vm7, %v812_v17, %v819_v22  ;;  %v621_v34 = vrot.slane %v619_v25, 7  ;;  %v425_v36 = vld [vmem:[%s6324_s29 + $0x28] sm:$0xf]  ;;  %v6003_v38 = vld [vmem:[%s7857_s3 + $0x178] sm:$0xff]  ;;  %v5964_v43 = vld [vmem:[#allocation2 + $0xc] sm:$0xff]  ;;  %vm1561_vm9 = vcmask 1042432  }
  0x25   : > { %2947 = vmatpush.bf16.msra.mxu0 %v5981_v19  ;;  %6157 = vmatpush.bf16.msra.mxu1 %v5981_v19  ;;  %1009 = vst [vmem:[#allocation2 + $0xa0] sm:$0xf] %v820_v32  ;;  %v5947_v39 = vld [vmem:[%s7857_s3 + $0x38] sm:$0xff]  ;;  %v6411_v40 = vrot.slane %v627_v28, 7  ;;  %v687_v41 = vshrl.u32 %v425_v36, 16  ;;  %v690_v52 = vshll.u32 %v425_v36, 16 }
  0x26   : > { %v1006_v37 = vld [vmem:[#allocation2 + $0x9c] sm:$0xf]  ;;  %6158 = vmatpush.bf16.msra.mxu2 %v5981_v19  ;;  %6159 = vmatpush.bf16.msra.mxu3 %v5981_v19  ;;  %468 = vst [vmem:[#allocation2 + $0x18] sm:$0x1] %v467_v33  ;;  %v625_v46 = vrot.slane %v621_v34, 4  ;;  %v6002_v60 = vld [vmem:[%s7857_s3 + $0x170] sm:$0xff]  ;;  %v624_v1 = vor.u32 %v622_v35, %v621_v34 }
  0x27   : > { %v5968_v44 = vld [vmem:[#allocation2 + $0x3c] sm:$0xff]  ;;  %v1007_v45 = vsel %vm6344_vm8, %v811_v21, %v1006_v37  ;;  %v426_v47 = vld [vmem:[%s6324_s29 + $0x2c] sm:$0xf]  ;;  %v632_v50 = vor.u32 %v630_v30, %v6411_v40  ;;  %v478_v51 = vld [vmem:[#allocation2 + $0x48] sm:$0x1]  ;;  %v689_v55 = vrot.slane %v687_v41, 7 }
  0x28   : > { %v5972_v48 = vld [vmem:[#allocation2 + $0x6c] sm:$0xff]  ;;  %1008 = vst [vmem:[#allocation2 + $0x9c] sm:$0xf] %v1007_v45  ;;  %v5995_v49 = vld [vmem:[%s7857_s3 + $0x138] sm:$0xff]  ;;  %v479_v54 = vsel %vm6302_vm2, 0, %v478_v51  ;;  %v695_v56 = vshrl.u32 %v426_v47, 16 }
  0x29   : > { %v5955_v53 = vld [vmem:[%s7857_s3 + $0x78] sm:$0xff]  ;;  %v698_v57 = vshll.u32 %v426_v47, 16  ;;  %v433_v58 = vld [vmem:[%s6324_s29 + $0x48] sm:$0xf]  ;;  %2948 = vmatpush.bf16.msra.mxu0 %v5980_v31  ;;  %6160 = vmatpush.bf16.msra.mxu1 %v5980_v31  ;;  %v5946_v61 = vld [vmem:[%s7857_s3 + $0x30] sm:$0xff]  ;;  %v633_v62 = vsel %vm6337_vm7, %v625_v46, %v632_v50  ;;  %v693_v3 = vrot.slane %v689_v55, 4  ;;  %v692_v15 = vor.u32 %v690_v52, %v689_v55 }
  0x2a   : > { %v1010_v59 = vld [vmem:[#allocation2 + $0xa4] sm:$0x1]  ;;  %480 = vst [vmem:[#allocation2 + $0x48] sm:$0x1] %v479_v54  ;;  %v434_v63 = vld [vmem:[%s6324_s29 + $0x4c] sm:$0xf]  ;;  %6161 = vmatpush.bf16.msra.mxu2 %v5980_v31  ;;  %6162 = vmatpush.bf16.msra.mxu3 %v5980_v31 }
  0x2b   : > { %v1011_v0 = vsel %vm6302_vm2, %v821_v26, %v1010_v59  ;;  %932 = vst [vmem:[#allocation2 + $0x1c] sm:$0xf] %v633_v62  ;;  %v6437_v5 = vrot.slane %v695_v56, 7  ;;  %v490_v6 = vld [vmem:[#allocation2 + $0x78] sm:$0x1]  ;;  %v755_v9 = vshrl.u32 %v433_v58, 16 }
  0x2c   : > { %1012 = vst [vmem:[#allocation2 + $0xa4] sm:$0x1] %v1011_v0  ;;  %v491_v7 = vsel %vm6302_vm2, 0, %v490_v6  ;;  %v546_v8 = vld [vmem:[#allocation2 + $0x80] sm:$0x1]  ;;  %2949 = vmatmul.bf16.vlgmr.msra.gmra.mxu0 %v5964_v43  ;;  %2969 = vmatmul.bf16.vlgmr.msra.gmra.mxu1 %v5968_v44  ;;  %v758_v12 = vshll.u32 %v433_v58, 16 }
  0x2d   : > { %v700_v10 = vor.u32 %v698_v57, %v6437_v5  ;;  %492 = vst [vmem:[#allocation2 + $0x78] sm:$0x1] %v491_v7  ;;  %v547_v11 = vsel %vm6307_vm4, 0, %v546_v8  ;;  %v5994_v13 = vld [vmem:[%s7857_s3 + $0x130] sm:$0xff]  ;;  %2989 = vmatmul.bf16.vlgmr.msra.gmra.mxu2 %v5972_v48  ;;  %3030 = vmatpush.bf16.msrb.mxu1 %v5995_v49  ;;  %v929_v14 = vld [vmem:[#allocation2 + $0x18] sm:$0xf] }
  0x2e   : > { %3119 = vmatpush.bf16.msrb.mxu2 %v6003_v38  ;;  %3352 = vmatpush.bf16.msrb.mxu3 %v5947_v39  ;;  %548 = vst [vmem:[#allocation2 + $0x80] sm:$0x1] %v547_v11  ;;  %v757_v16 = vrot.slane %v755_v9, 7  ;;  %v763_v17 = vshrl.u32 %v434_v63, 16  ;;  %v6001_v18 = vld [vmem:[%s7857_s3 + $0x168] sm:$0xff]  ;;  %v930_v21 = vsel %vm6344_vm8, %v624_v1, %v929_v14  ;;  %v766_v24 = vshll.u32 %v434_v63, 16 }
  0x2f   : > { %v5945_v19 = vld [vmem:[%s7857_s3 + $0x28] sm:$0xff]  ;;  %v5976_v20 = vld [vmem:[#allocation2 + $0x9c] sm:$0xff]  ;;  %3441 = vmatpush.bf16.msrb.mxu0 %v5955_v53  ;;  %v701_v22 = vsel %vm6337_vm7, %v693_v3, %v700_v10  ;;  %931 = vst [vmem:[#allocation2 + $0x18] sm:$0xf] %v930_v21  ;;  %v558_v38 = vld [vmem:[#allocation2 + $0xb0] sm:$0x1] }
  0x30   : > { %v441_v25 = vld [vmem:[%s6324_s29 + $0x68] sm:$0xf]  ;;  %v442_v26 = vld [vmem:[%s6324_s29 + $0x6c] sm:$0xf]  ;;  %v761_v27 = vrot.slane %v757_v16, 4  ;;  %v765_v28 = vrot.slane %v763_v17, 7  ;;  %3009 = vmatmul.bf16.vlgmr.msra.gmra.mxu3 %v5976_v20  ;;  %v760_v32 = vor.u32 %v758_v12, %v757_v16 }
  0x31   : > { %v502_v30 = vld [vmem:[#allocation2 + $0xa8] sm:$0x1]  ;;  %960 = vst [vmem:[#allocation2 + $0x4c] sm:$0xf] %v701_v22  ;;  %v823_v34 = vshrl.u32 %v441_v25, 16  ;;  %v826_v39 = vshll.u32 %v441_v25, 16  ;;  %3031 = vmatpush.bf16.msrb.mxu1 %v5994_v13 }
  0x32   : > { %3120 = vmatpush.bf16.msrb.mxu2 %v6002_v60  ;;  %3353 = vmatpush.bf16.msrb.mxu3 %v5946_v61  ;;  %v957_v31 = vld [vmem:[#allocation2 + $0x48] sm:$0xf]  ;;  %v503_v33 = vsel %vm6302_vm2, 0, %v502_v30  ;;  %v768_v36 = vor.u32 %v766_v24, %v765_v28  ;;  %v770_v37 = vrot.slane %v765_v28, 4  ;;  %v559_v41 = vsel %vm6307_vm4, 0, %v558_v38  ;;  %v5954_v48 = vld [vmem:[%s7857_s3 + $0x70] sm:$0xff] }
  0x33   : > { %v958_v35 = vsel %vm6344_vm8, %v692_v15, %v957_v31  ;;  %504 = vst [vmem:[#allocation2 + $0xa8] sm:$0x1] %v503_v33  ;;  %v825_v43 = vrot.slane %v823_v34, 7  ;;  %v831_v44 = vshrl.u32 %v442_v26, 16  ;;  %v834_v45 = vshll.u32 %v442_v26, 16  ;;  %v5993_v49 = vld [vmem:[%s7857_s3 + $0x128] sm:$0xff]  ;;  %3442 = vmatpush.bf16.msrb.mxu0 %v5954_v48 }
  0x34   : > { %959 = vst [vmem:[#allocation2 + $0x48] sm:$0xf] %v958_v35  ;;  %v769_v46 = vsel %vm6337_vm7, %v761_v27, %v768_v36  ;;  %v985_v47 = vld [vmem:[#allocation2 + $0x78] sm:$0xf]  ;;  %v6000_v56 = vld [vmem:[%s7857_s3 + $0x160] sm:$0xff]  ;;  %v5953_v58 = vld [vmem:[%s7857_s3 + $0x68] sm:$0xff] }
  0x35   : > { %560 = vst [vmem:[#allocation2 + $0xb0] sm:$0x1] %v559_v41  ;;  %v986_v50 = vsel %vm6344_vm8, %v760_v32, %v985_v47  ;;  %v989_v51 = vld [vmem:[#allocation2 + $0x80] sm:$0x1]  ;;  %v829_v52 = vrot.slane %v825_v43, 4  ;;  %v833_v53 = vrot.slane %v831_v44, 7  ;;  %v828_v55 = vor.u32 %v826_v39, %v825_v43  ;;  %3032 = vmatpush.bf16.msrb.mxu1 %v5993_v49 }
  0x36   : > { %3121 = vmatpush.bf16.msrb.mxu2 %v6001_v18  ;;  %3354 = vmatpush.bf16.msrb.mxu3 %v5945_v19  ;;  %988 = vst [vmem:[#allocation2 + $0x7c] sm:$0xf] %v769_v46  ;;  %v990_v54 = vsel %vm6302_vm2, %v770_v37, %v989_v51  ;;  %v5944_v57 = vld [vmem:[%s7857_s3 + $0x20] sm:$0xff]  ;;  %v5965_v59 = vld [vmem:[#allocation2 + $0x18] sm:$0xff]  ;;  %v419_v61 = vld [vmem:[%s6324_s29 + $0x10] sm:$0xf] }
  0x37   : > { %987 = vst [vmem:[#allocation2 + $0x78] sm:$0xf] %v986_v50  ;;  %v836_v60 = vor.u32 %v834_v45, %v833_v53  ;;  %v838_v62 = vrot.slane %v833_v53, 4  ;;  %v420_v63 = vld [vmem:[%s6324_s29 + $0x14] sm:$0xf]  ;;  %v636_v1 = vshrl.u32 %v419_v61, 16  ;;  %3443 = vmatpush.bf16.msrb.mxu0 %v5953_v58 }
  0x38   : > { %991 = vst [vmem:[#allocation2 + $0x80] sm:$0x1] %v990_v54  ;;  %v469_v0 = vld [vmem:[#allocation2 + $0x24] sm:$0x1]  ;;  %v644_v8 = vshrl.u32 %v420_v63, 16  ;;  %v647_v9 = vshll.u32 %v420_v63, 16 }
  0x39   : > { %v837_v3 = vsel %vm6337_vm7, %v829_v52, %v836_v60  ;;  %v470_v7 = vsel %vm6302_vm2, 0, %v469_v0  ;;  %v5992_v10 = vld [vmem:[%s7857_s3 + $0x120] sm:$0xff]  ;;  %v638_v13 = vrot.slane %v636_v1, 7  ;;  %v427_v14 = vld [vmem:[%s6324_s29 + $0x30] sm:$0xf]  ;;  %v639_v19 = vshll.u32 %v419_v61, 16 }
  0x3a   : > { %3122 = vmatpush.bf16.msrb.mxu2 %v6000_v56  ;;  %3355 = vmatpush.bf16.msrb.mxu3 %v5944_v57  ;;  %v1013_v6 = vld [vmem:[#allocation2 + $0xa8] sm:$0xf]  ;;  %1016 = vst [vmem:[#allocation2 + $0xac] sm:$0xf] %v837_v3  ;;  %v6498_v16 = vrot.slane %v644_v8, 7  ;;  %v704_v17 = vshrl.u32 %v427_v14, 16 }
  0x3b   : > { %v5969_v11 = vld [vmem:[#allocation2 + $0x48] sm:$0xff]  ;;  %v1014_v12 = vsel %vm6344_vm8, %v828_v55, %v1013_v6  ;;  %3033 = vmatpush.bf16.msrb.mxu1 %v5992_v10  ;;  %471 = vst [vmem:[#allocation2 + $0x24] sm:$0x1] %v470_v7  ;;  %v642_v20 = vrot.slane %v638_v13, 4  ;;  %v428_v21 = vld [vmem:[%s6324_s29 + $0x34] sm:$0xf]  ;;  %v641_v36 = vor.u32 %v639_v19, %v638_v13 }
  0x3c   : > { %1015 = vst [vmem:[#allocation2 + $0xa8] sm:$0xf] %v1014_v12  ;;  %v1017_v15 = vld [vmem:[#allocation2 + $0xb0] sm:$0x1]  ;;  %2954 = vmatmul.bf16.gmra.mxu0 %v5965_v59  ;;  %2974 = vmatmul.bf16.gmra.mxu1 %v5969_v11  ;;  %v649_v24 = vor.u32 %v647_v9, %v6498_v16  ;;  %v481_v25 = vld [vmem:[#allocation2 + $0x54] sm:$0x1] }
  0x3d   : > { %v1018_v18 = vsel %vm6302_vm2, %v838_v62, %v1017_v15  ;;  %v707_v26 = vshll.u32 %v427_v14, 16  ;;  %v482_v27 = vsel %vm6302_vm2, 0, %v481_v25  ;;  %v706_v28 = vrot.slane %v704_v17, 7  ;;  %v435_v32 = vld [vmem:[%s6324_s29 + $0x50] sm:$0xf]  ;;  %v5999_v41 = vld [vmem:[%s7857_s3 + $0x158] sm:$0xff] }
  0x3e   : > { %v5973_v22 = vld [vmem:[#allocation2 + $0x78] sm:$0xff]  ;;  %1019 = vst [vmem:[#allocation2 + $0xb0] sm:$0x1] %v1018_v18  ;;  %v712_v30 = vshrl.u32 %v428_v21, 16  ;;  %v715_v31 = vshll.u32 %v428_v21, 16  ;;  %v650_v33 = vsel %vm6337_vm7, %v642_v20, %v649_v24  ;;  %v772_v44 = vshrl.u32 %v435_v32, 16  ;;  %3123 = vmatpush.bf16.msrb.mxu2 %v5999_v41 }
  0x3f   : > { %2994 = vmatmul.bf16.gmra.mxu2 %v5973_v22  ;;  %483 = vst [vmem:[#allocation2 + $0x54] sm:$0x1] %v482_v27  ;;  %v436_v34 = vld [vmem:[%s6324_s29 + $0x54] sm:$0xf]  ;;  %v493_v35 = vld [vmem:[#allocation2 + $0x84] sm:$0x1]  ;;  %v709_v52 = vor.u32 %v707_v26, %v706_v28 }
  0x40   : > { %939 = vst [vmem:[#allocation2 + $0x28] sm:$0xf] %v650_v33  ;;  %v710_v37 = vrot.slane %v706_v28, 4  ;;  %v6510_v38 = vrot.slane %v712_v30, 7  ;;  %v494_v39 = vsel %vm6302_vm2, 0, %v493_v35  ;;  %v775_v45 = vshll.u32 %v435_v32, 16 }
  0x41   : > { %495 = vst [vmem:[#allocation2 + $0x84] sm:$0x1] %v494_v39  ;;  %v549_v43 = vld [vmem:[#allocation2 + $0x8c] sm:$0x1]  ;;  %v780_v49 = vshrl.u32 %v436_v34, 16  ;;  %v774_v53 = vrot.slane %v772_v44, 7 }
  0x42   : > { %v717_v47 = vor.u32 %v715_v31, %v6510_v38  ;;  %v550_v48 = vsel %vm6307_vm4, 0, %v549_v43  ;;  %v443_v50 = vld [vmem:[%s6324_s29 + $0x70] sm:$0xf]  ;;  %v936_v51 = vld [vmem:[#allocation2 + $0x24] sm:$0xf]  ;;  %v783_v54 = vshll.u32 %v436_v34, 16 }
  0x43   : > { %v5977_v46 = vld [vmem:[#allocation2 + $0xa8] sm:$0xff]  ;;  %551 = vst [vmem:[#allocation2 + $0x8c] sm:$0x1] %v550_v48  ;;  %v937_v55 = vsel %vm6344_vm8, %v641_v36, %v936_v51  ;;  %v782_v57 = vrot.slane %v780_v49, 7  ;;  %v444_v58 = vld [vmem:[%s6324_s29 + $0x74] sm:$0xf]  ;;  %v777_v61 = vor.u32 %v775_v45, %v774_v53 }
  0x44   : > { %3014 = vmatmul.bf16.gmra.mxu3 %v5977_v46  ;;  %v718_v56 = vsel %vm6337_vm7, %v710_v37, %v717_v47  ;;  %v505_v59 = vld [vmem:[#allocation2 + $0xb4] sm:$0x1]  ;;  %v840_v60 = vshrl.u32 %v443_v50, 16  ;;  %938 = vst [vmem:[#allocation2 + $0x24] sm:$0xf] %v937_v55  ;;  %v778_v62 = vrot.slane %v774_v53, 4 }
  0x45   : > { %v506_v63 = vsel %vm6302_vm2, 0, %v505_v59  ;;  %v561_v0 = vld [vmem:[#allocation2 + $0xbc] sm:$0x1]  ;;  %967 = vst [vmem:[#allocation2 + $0x58] sm:$0xf] %v718_v56  ;;  %v785_v3 = vor.u32 %v783_v54, %v782_v57  ;;  %v787_v6 = vrot.slane %v782_v57, 4 }
  0x46   : > { %v964_v1 = vld [vmem:[#allocation2 + $0x54] sm:$0xf]  ;;  %v562_v7 = vsel %vm6307_vm4, 0, %v561_v0  ;;  %507 = vst [vmem:[#allocation2 + $0xb4] sm:$0x1] %v506_v63  ;;  %v842_v9 = vrot.slane %v840_v60, 7 }
  0x47   : > { %v965_v8 = vsel %vm6344_vm8, %v709_v52, %v964_v1  ;;  %v843_v10 = vshll.u32 %v443_v50, 16  ;;  %v848_v11 = vshrl.u32 %v444_v58, 16  ;;  %v5943_v12 = vld [vmem:[%s7857_s3 + $0x18] sm:$0xff]  ;;  %v786_v13 = vsel %vm6337_vm7, %v778_v62, %v785_v3  ;;  %v5952_v17 = vld [vmem:[%s7857_s3 + $0x60] sm:$0xff]  ;;  %v5998_v22 = vld [vmem:[%s7857_s3 + $0x150] sm:$0xff]  ;;  %s5292_s26 = sshll.u32 %s7908_s18, 1 }
  0x48   : > { %966 = vst [vmem:[#allocation2 + $0x54] sm:$0xf] %v965_v8  ;;  %v992_v14 = vld [vmem:[#allocation2 + $0x84] sm:$0xf]  ;;  %v851_v15 = vshll.u32 %v444_v58, 16  ;;  %v846_v19 = vrot.slane %v842_v9, 4  ;;  %3356 = vmatpush.bf16.msrb.mxu3 %v5943_v12  ;;  %3444 = vmatpush.bf16.msrb.mxu0 %v5952_v17  ;;  %s411_s20 = scalar_lea.vmem %s7859_s5, %s5292_s26 }
  0x49   : > { %v993_v18 = vsel %vm6344_vm8, %v777_v61, %v992_v14  ;;  %995 = vst [vmem:[#allocation2 + $0x88] sm:$0xf] %v786_v13  ;;  %v850_v20 = vrot.slane %v848_v11, 7  ;;  %v5991_v21 = vld [vmem:[%s7857_s3 + $0x118] sm:$0xff]  ;;  %v845_v25 = vor.u32 %v843_v10, %v842_v9  ;;  %v5942_v26 = vld [vmem:[%s7857_s3 + $0x10] sm:$0xff]  ;;  %3124 = vmatpush.bf16.msrb.mxu2 %v5998_v22  ;;  %v5997_v8 = vld [vmem:[%s7857_s3 + $0x148] sm:$0xff] }
  0x4a   : > { %994 = vst [vmem:[#allocation2 + $0x84] sm:$0xf] %v993_v18  ;;  %v996_v24 = vld [vmem:[#allocation2 + $0x8c] sm:$0x1]  ;;  %3034 = vmatpush.bf16.msrb.mxu1 %v5991_v21  ;;  %v5951_v31 = vld [vmem:[%s7857_s3 + $0x58] sm:$0xff]  ;;  %v5990_v63 = vld [vmem:[%s7857_s3 + $0x110] sm:$0xff] }
  0x4b   : > { %v997_v27 = vsel %vm6302_vm2, %v787_v6, %v996_v24  ;;  %563 = vst [vmem:[#allocation2 + $0xbc] sm:$0x1] %v562_v7  ;;  %v853_v28 = vor.u32 %v851_v15, %v850_v20  ;;  %v855_v30 = vrot.slane %v850_v20, 4  ;;  %v421_v32 = vld [vmem:[%s6324_s29 + $0x18] sm:$0xf]  ;;  %v5966_v33 = vld [vmem:[#allocation2 + $0x24] sm:$0xff] }
  0x4c   : > { %998 = vst [vmem:[#allocation2 + $0x8c] sm:$0x1] %v997_v27  ;;  %v422_v34 = vld [vmem:[%s6324_s29 + $0x1c] sm:$0xf]  ;;  %v653_v35 = vshrl.u32 %v421_v32, 16  ;;  %3357 = vmatpush.bf16.msrb.mxu3 %v5942_v26  ;;  %v656_v39 = vshll.u32 %v421_v32, 16  ;;  %2959 = vmatmul.bf16.gmra.mxu0 %v5966_v33 }
  0x4d   : > { %v854_v36 = vsel %vm6337_vm7, %v846_v19, %v853_v28  ;;  %v472_v37 = vld [vmem:[#allocation2 + $0x30] sm:$0x1]  ;;  %v661_v41 = vshrl.u32 %v422_v34, 16  ;;  %v664_v43 = vshll.u32 %v422_v34, 16  ;;  %v1020_v44 = vld [vmem:[#allocation2 + $0xb4] sm:$0xf]  ;;  %3445 = vmatpush.bf16.msrb.mxu0 %v5951_v31  ;;  %3125 = vmatpush.bf16.msrb.mxu2 %v5997_v8 }
  0x4e   : > { %1023 = vst [vmem:[#allocation2 + $0xb8] sm:$0xf] %v854_v36  ;;  %v473_v45 = vsel %vm6302_vm2, 0, %v472_v37  ;;  %v655_v46 = vrot.slane %v653_v35, 7  ;;  %v1021_v48 = vsel %vm6344_vm8, %v845_v25, %v1020_v44  ;;  %v429_v50 = vld [vmem:[%s6324_s29 + $0x38] sm:$0xf]  ;;  %3035 = vmatpush.bf16.msrb.mxu1 %v5990_v63 }
  0x4f   : > { %v5970_v47 = vld [vmem:[#allocation2 + $0x54] sm:$0xff]  ;;  %474 = vst [vmem:[#allocation2 + $0x30] sm:$0x1] %v473_v45  ;;  %v6564_v49 = vrot.slane %v661_v41, 7  ;;  %v430_v52 = vld [vmem:[%s6324_s29 + $0x3c] sm:$0xf] }
  0x50   : > { %1022 = vst [vmem:[#allocation2 + $0xb4] sm:$0xf] %v1021_v48  ;;  %v659_v51 = vrot.slane %v655_v46, 4  ;;  %v721_v53 = vshrl.u32 %v429_v50, 16  ;;  %2979 = vmatmul.bf16.gmra.mxu1 %v5970_v47  ;;  %v484_v56 = vld [vmem:[#allocation2 + $0x60] sm:$0x1]  ;;  %v658_v1 = vor.u32 %v656_v39, %v655_v46 }
  0x51   : > { %v5974_v54 = vld [vmem:[#allocation2 + $0x84] sm:$0xff]  ;;  %v666_v55 = vor.u32 %v664_v43, %v6564_v49  ;;  %v724_v57 = vshll.u32 %v429_v50, 16  ;;  %v729_v58 = vshrl.u32 %v430_v52, 16  ;;  %v485_v60 = vsel %vm6302_vm2, 0, %v484_v56  ;;  %v437_v7 = vld [vmem:[%s6324_s29 + $0x58] sm:$0xf] }
  0x52   : > { %v1024_v59 = vld [vmem:[#allocation2 + $0xbc] sm:$0x1]  ;;  %v723_v61 = vrot.slane %v721_v53, 7  ;;  %v732_v62 = vshll.u32 %v430_v52, 16  ;;  %2999 = vmatmul.bf16.gmra.mxu2 %v5974_v54  ;;  %486 = vst [vmem:[#allocation2 + $0x60] sm:$0x1] %v485_v60 }
  0x53   : > { %v1025_v0 = vsel %vm6302_vm2, %v855_v30, %v1024_v59  ;;  %v667_v3 = vsel %vm6337_vm7, %v659_v51, %v666_v55  ;;  %v6578_v6 = vrot.slane %v729_v58, 7  ;;  %v438_v10 = vld [vmem:[%s6324_s29 + $0x5c] sm:$0xf]  ;;  %v789_v11 = vshrl.u32 %v437_v7, 16  ;;  %v496_v13 = vld [vmem:[#allocation2 + $0x90] sm:$0x1] }
  0x54   : > { %1026 = vst [vmem:[#allocation2 + $0xbc] sm:$0x1] %v1025_v0  ;;  %v727_v9 = vrot.slane %v723_v61, 4  ;;  %v792_v14 = vshll.u32 %v437_v7, 16  ;;  %v726_v17 = vor.u32 %v724_v57, %v723_v61  ;;  %v497_v18 = vsel %vm6302_vm2, 0, %v496_v13  ;;  %v5941_v27 = vld [vmem:[%s7857_s3 + $0x8] sm:$0xff] }
  0x55   : > { %946 = vst [vmem:[#allocation2 + $0x34] sm:$0xf] %v667_v3  ;;  %v734_v12 = vor.u32 %v732_v62, %v6578_v6  ;;  %v552_v19 = vld [vmem:[#allocation2 + $0x98] sm:$0x1]  ;;  %v791_v20 = vrot.slane %v789_v11, 7  ;;  %v797_v26 = vshrl.u32 %v438_v10, 16  ;;  %3358 = vmatpush.bf16.msrb.mxu3 %v5941_v27 }
  0x56   : > { %v943_v15 = vld [vmem:[#allocation2 + $0x30] sm:$0xf]  ;;  %498 = vst [vmem:[#allocation2 + $0x90] sm:$0x1] %v497_v18  ;;  %v553_v25 = vsel %vm6307_vm4, 0, %v552_v19  ;;  %v800_v30 = vshll.u32 %v438_v10, 16 }
  0x57   : > { %v5978_v21 = vld [vmem:[#allocation2 + $0xb4] sm:$0xff]  ;;  %v944_v22 = vsel %vm6344_vm8, %v658_v1, %v943_v15  ;;  %v735_v24 = vsel %vm6337_vm7, %v727_v9, %v734_v12  ;;  %v795_v28 = vrot.slane %v791_v20, 4  ;;  %v799_v32 = vrot.slane %v797_v26, 7  ;;  %v446_v33 = vld [vmem:[%s6324_s29 + $0x7c] sm:$0xf]  ;;  %v5989_v47 = vld [vmem:[%s7857_s3 + $0x108] sm:$0xff] }
  0x58   : > { %945 = vst [vmem:[#allocation2 + $0x30] sm:$0xf] %v944_v22  ;;  %v445_v31 = vld [vmem:[%s6324_s29 + $0x78] sm:$0xf]  ;;  %3019 = vmatmul.bf16.gmra.mxu3 %v5978_v21  ;;  %v794_v36 = vor.u32 %v792_v14, %v791_v20  ;;  %v508_v37 = vld [vmem:[#allocation2 + $0xc0] sm:$0x1]  ;;  %3036 = vmatpush.bf16.msrb.mxu1 %v5989_v47 }
  0x59   : > { %974 = vst [vmem:[#allocation2 + $0x64] sm:$0xf] %v735_v24  ;;  %v857_v34 = vshrl.u32 %v445_v31, 16  ;;  %v971_v35 = vld [vmem:[#allocation2 + $0x60] sm:$0xf]  ;;  %v802_v41 = vor.u32 %v800_v30, %v799_v32  ;;  %v804_v43 = vrot.slane %v799_v32, 4 }
  0x5a   : > { %554 = vst [vmem:[#allocation2 + $0x98] sm:$0x1] %v553_v25  ;;  %v972_v39 = vsel %vm6344_vm8, %v726_v17, %v971_v35  ;;  %v509_v44 = vsel %vm6302_vm2, 0, %v508_v37  ;;  %v564_v45 = vld [vmem:[#allocation2 + $0xc8] sm:$0x1]  ;;  %v5950_v46 = vld [vmem:[%s7857_s3 + $0x50] sm:$0xff] }
  0x5b   : > { %973 = vst [vmem:[#allocation2 + $0x60] sm:$0xf] %v972_v39  ;;  %v565_v48 = vsel %vm6307_vm4, 0, %v564_v45  ;;  %v859_v50 = vrot.slane %v857_v34, 7  ;;  %v860_v51 = vshll.u32 %v445_v31, 16  ;;  %v865_v52 = vshrl.u32 %v446_v33, 16  ;;  %3446 = vmatpush.bf16.msrb.mxu0 %v5950_v46 }
  0x5c   : > { %v803_v53 = vsel %vm6337_vm7, %v795_v28, %v802_v41  ;;  %510 = vst [vmem:[#allocation2 + $0xc0] sm:$0x1] %v509_v44  ;;  %v868_v54 = vshll.u32 %v446_v33, 16  ;;  %v5996_v55 = vld [vmem:[%s7857_s3 + $0x140] sm:$0xff]  ;;  %v5949_v57 = vld [vmem:[%s7857_s3 + $0x48] sm:$0xff]  ;;  %vm1562_vm11 = vcmask 1046532  }
  0x5d   : > { %v5940_v56 = vld [vmem:[%s7857_s3] sm:$0xff]  ;;  %v999_v58 = vld [vmem:[#allocation2 + $0x90] sm:$0xf]  ;;  %1002 = vst [vmem:[#allocation2 + $0x94] sm:$0xf] %v803_v53  ;;  %v863_v59 = vrot.slane %v859_v50, 4  ;;  %3126 = vmatpush.bf16.msrb.mxu2 %v5996_v55  ;;  %v862_v8 = vor.u32 %v860_v51, %v859_v50  ;;  %vm6651_vm14 = vmor %vm1561_vm9, %vm1562_vm11 }
  0x5e   : > { %v867_v60 = vrot.slane %v865_v52, 7  ;;  %v1000_v62 = vsel %vm6344_vm8, %v794_v36, %v999_v58  ;;  %566 = vst [vmem:[#allocation2 + $0xc8] sm:$0x1] %v565_v48  ;;  %3359 = vmatpush.bf16.msrb.mxu3 %v5940_v56  ;;  %v5988_v63 = vld [vmem:[%s7857_s3 + $0x100] sm:$0xff]  ;;  %vm1110_vm10 = vsmask.f32 3328 }
  0x5f   : > { %v5967_v61 = vld [vmem:[#allocation2 + $0x30] sm:$0xff]  ;;  %1001 = vst [vmem:[#allocation2 + $0x90] sm:$0xf] %v1000_v62  ;;  %v5948_v3 = vld [vmem:[%s7857_s3 + $0x40] sm:$0xff]  ;;  %3037 = vmatpush.bf16.msrb.mxu1 %v5988_v63  ;;  %vm1111_vm12 = vsmask.f32 7440  ;;  %3447 = vmatpush.bf16.msrb.mxu0 %v5949_v57 }
  0x60   : > { %v870_v0 = vor.u32 %v868_v54, %v867_v60  ;;  %v872_v1 = vrot.slane %v867_v60, 4  ;;  %2964 = vmatmul.bf16.gmra.mxu0 %v5967_v61  ;;  %v1932_v9 = vld [vmem:[#allocation2 + $0xc] sm:$0xf]  ;;  %v1933_v12 = vld [vmem:[#allocation2 + $0x10] sm:$0xf]  ;;  %vm6638_vm13 = vmor %vm1110_vm10, %vm1111_vm12 }
  0x61   : > { %v1003_v7 = vld [vmem:[#allocation2 + $0x98] sm:$0x1]  ;;  %v1964_v13 = vld [vmem:[#allocation2 + $0x14] sm:$0x1]  ;;  %v1981_v14 = vshrl.u32 %v1932_v9, 16  ;;  %v1984_v15 = vshll.u32 %v1932_v9, 16 }
  0x62   : > { %v1004_v10 = vsel %vm6302_vm2, %v804_v43, %v1003_v7  ;;  %v871_v11 = vsel %vm6337_vm7, %v863_v59, %v870_v0  ;;  %v5971_v17 = vld [vmem:[#allocation2 + $0x60] sm:$0xff]  ;;  %v1990_v18 = vshll.u32 %v1933_v12, 16  ;;  %v1994_v19 = vshrl.u32 %v1933_v12, 16  ;;  %v2364_v30 = vld [vmem:[#allocation2 + $0xc] sm:$0xe]  ;;  %v6027_v48 = vld [vmem:[%s7857_s3 + $0x1b8] sm:$0xff] }
  0x63   : > { %1005 = vst [vmem:[#allocation2 + $0x98] sm:$0x1] %v1004_v10  ;;  %v2000_v20 = vshll.u32 %v1964_v13, 16  ;;  %v1027_v21 = vld [vmem:[#allocation2 + $0xc0] sm:$0xf]  ;;  %v1983_v22 = vrot.slane %v1981_v14, 4  ;;  %2984 = vmatmul.bf16.gmra.mxu1 %v5971_v17  ;;  %3448 = vmatpush.bf16.msrb.mxu0 %v5948_v3 }
  0x64   : > { %1030 = vst [vmem:[#allocation2 + $0xc4] sm:$0xf] %v871_v11  ;;  %v1986_v24 = vrot.slane %v1984_v15, 5  ;;  %v1028_v25 = vsel %vm6344_vm8, %v862_v8, %v1027_v21  ;;  %v1992_v26 = vrot.slane %v1990_v18, 5  ;;  %v1996_v27 = vrot.slane %v1994_v19, 4  ;;  %4629 = vmatpush.bf16.msra.mxu2 %v6027_v48  ;;  %v6035_v56 = vld [vmem:[%s7857_s3 + $0x1f8] sm:$0xff] }
  0x65   : > { %v2002_v28 = vrot.slane %v2000_v20, 5  ;;  %1029 = vst [vmem:[#allocation2 + $0xc0] sm:$0xf] %v1028_v25  ;;  %v1031_v31 = vld [vmem:[#allocation2 + $0xc8] sm:$0x1]  ;;  %v5373_v34 = vrot.slane %v2364_v30, 9  ;;  %4718 = vmatpush.bf16.msra.mxu3 %v6035_v56 }
  0x66   : > { %v1987_v33 = vor.u32 %v1986_v24, %v1983_v22  ;;  %v2430_v35 = vrot.slane %v1933_v12, 5  ;;  %v5975_v36 = vld [vmem:[#allocation2 + $0x90] sm:$0xff]  ;;  %v1032_v37 = vsel %vm6302_vm2, %v872_v1, %v1031_v31  ;;  %v1997_v39 = vor.u32 %v1996_v27, %v1992_v26  ;;  %v460_v43 = vld [vmem:[#allocation2] sm:$0x1]  ;;  %v516_v44 = vld [vmem:[#allocation2 + $0x8] sm:$0x1] }
  0x67   : > { %v2433_v41 = vrot.slane %v1964_v13, 5  ;;  %1033 = vst [vmem:[#allocation2 + $0xc8] sm:$0x1] %v1032_v37  ;;  %v461_v47 = vsel %vm6302_vm2, 0, %v460_v43  ;;  %3004 = vmatmul.bf16.gmra.mxu2 %v5975_v36  ;;  %v517_v52 = vsel %vm6307_vm4, 0, %v516_v44  ;;  %v5963_v57 = vld [vmem:[%s7857_s3 + $0xb8] sm:$0xff] }
  0x68   : > { %v1988_v45 = vrot.slane %v1987_v33, 4  ;;  %v2432_v46 = vrot.slane %v2430_v35, 4  ;;  %v1998_v50 = vrot.slane %v1997_v39, 4  ;;  %462 = vst [vmem:[#allocation2] sm:$0x1] %v461_v47  ;;  %v6244_v59 = vmov 0   ;;  %3530 = vmatpush.bf16.msra.mxu1 %v5963_v57 }
  0x69   : > { %v567_v53 = vld [vmem:[#allocation2 + $0xd4] sm:$0x1]  ;;  %518 = vst [vmem:[#allocation2 + $0x8] sm:$0x1] %v517_v52  ;;  %v6669_v60 = vrot.slane %v6244_v59, 7  ;;  %v6043_v61 = vld [vmem:[%s7857_s3 + $0x238] sm:$0xff]  ;;  %v2431_v0 = vsel %vm6651_vm14, %v5373_v34, %v2430_v35 }
  0x6a   : > { %v1993_v54 = vsel %vm6638_vm13, %v1988_v45, %v1992_v26  ;;  %v568_v55 = vsel %vm6307_vm4, 0, %v567_v53  ;;  %v2003_v58 = vsel %vm6638_vm13, %v1998_v50, %v2002_v28  ;;  %v522_v62 = vld [vmem:[#allocation2 + $0x20] sm:$0x1]  ;;  %v2434_v1 = vsel %vm6651_vm14, %v2432_v46, %v2433_v41  ;;  %v1934_v7 = vld [vmem:[#allocation2 + $0x18] sm:$0xf]  ;;  %4807 = vmatpush.bf16.msra.mxu0 %v6043_v61 }
  0x6b   : > { %569 = vst [vmem:[#allocation2 + $0xd4] sm:$0x1] %v568_v55  ;;  %v2620_v63 = vunpack.c.l.b16 %v1993_v54  ;;  %v523_v3 = vsel %vm6307_vm4, 0, %v522_v62  ;;  %v1935_v8 = vld [vmem:[#allocation2 + $0x1c] sm:$0xf]  ;;  %v2621_v10 = vunpack.c.l.b16 %v2003_v58  ;;  %v579_v11 = vrot.slane %v6669_v60, 4 }
  0x6c   : > { %7877 = vst [vmem:[#allocation5_spill] sm:$0xff] %v6669_v60  ;;  %v5979_v9 = vld [vmem:[#allocation2 + $0xc0] sm:$0xff]  ;;  %v2005_v12 = vshrl.u32 %v1934_v7, 16  ;;  %v2008_v13 = vshll.u32 %v1934_v7, 16  ;;  %v2014_v14 = vshll.u32 %v1935_v8, 16  ;;  %v2018_v15 = vshrl.u32 %v1935_v8, 16 }
  0x6d   : > { %524 = vst [vmem:[#allocation2 + $0x20] sm:$0x1] %v523_v3  ;;  %v2365_v17 = vld [vmem:[#allocation2 + $0x18] sm:$0xe]  ;;  %v634_v18 = vrot.slane %v6411_v40, 4  ;;  %3024 = vmatmul.bf16.gmra.mxu3 %v5979_v9  ;;  %v587_v19 = vsel %vm6337_vm7, %v579_v11, %v6669_v60  ;;  %v2684_v22 = vunpack.c.l.b16 %v2431_v0  ;;  %v2685_v24 = vunpack.c.l.b16 %v2434_v1 }
  0x6e   : > { %v2007_v20 = vrot.slane %v2005_v12, 4  ;;  %v2010_v21 = vrot.slane %v2008_v13, 5  ;;  %597 = vst [vmem:[#allocation2 + $0x4] sm:$0xf] %v587_v19  ;;  %v5374_v26 = vrot.slane %v2365_v17, 9  ;;  %v2437_v27 = vrot.slane %v1935_v8, 5 }
  0x6f   : > { %v594_v25 = vld [vmem:[#allocation2] sm:$0xf]  ;;  %v2652_v28 = vpack.c.b16 %v2621_v10, %v2620_v63  ;;  %1058 = vst [vmem:[#allocation2 + $0xd0] sm:$0xf] %v587_v19  ;;  %v6688_v40 = vrot.slane %v2014_v14, 5  ;;  %v2020_v33 = vrot.slane %v2018_v15, 4  ;;  %v2716_v39 = vpack.c.b16 %v2685_v24, %v2684_v22 }
  0x70   : > { %v595_v30 = vsel %vm6344_vm8, %v6669_v60, %v594_v25  ;;  %v598_v31 = vld [vmem:[#allocation2 + $0x8] sm:$0x1]  ;;  %v1064_v35 = vld [vmem:[#allocation2 + $0xc] sm:$0xf]  ;;  %v2011_v37 = vor.u32 %v2010_v21, %v2007_v20  ;;  %v1065_v43 = vld [vmem:[#allocation2 + $0x10] sm:$0xf]  ;;  %v6700_v52 = vsel %vm6651_vm14, %v5374_v26, %v2437_v27 }
  0x71   : > { %596 = vst [vmem:[#allocation2] sm:$0xf] %v595_v30  ;;  %v599_v23 = vsel %vm6302_vm2, %v579_v11, %v598_v31  ;;  %v2021_v45 = vor.u32 %v2020_v33, %v6688_v40  ;;  %v1138_v46 = vshrl.u32 %v1064_v35, 16  ;;  %v1141_v47 = vshll.u32 %v1064_v35, 16  ;;  %v525_v48 = vld [vmem:[#allocation2 + $0x2c] sm:$0x1] }
  0x72   : > { %v1059_v34 = vld [vmem:[#allocation2 + $0xd4] sm:$0x1]  ;;  %600 = vst [vmem:[#allocation2 + $0x8] sm:$0x1] %v599_v23  ;;  %v651_v50 = vrot.slane %v6498_v16, 4  ;;  %v2439_v53 = vrot.slane %v2437_v27, 4  ;;  %v2686_v1 = vunpack.c.l.b16 %v6700_v52 }
  0x73   : > { %v1060_v36 = vsel %vm6302_vm2, %v579_v11, %v1059_v34  ;;  %3038 = vmatmul.bf16.vlgmr.msrb.gmra.mxu1 %v2652_v28  ;;  %v2012_v55 = vrot.slane %v2011_v37, 4  ;;  %v1147_v56 = vshll.u32 %v1065_v43, 16  ;;  %v1151_v57 = vshrl.u32 %v1065_v43, 16  ;;  %v1095_v62 = vld [vmem:[#allocation2 + $0x14] sm:$0x1] }
  0x74   : > { %1061 = vst [vmem:[#allocation2 + $0xd4] sm:$0x1] %v1060_v36  ;;  %v933_v41 = vld [vmem:[#allocation2 + $0x20] sm:$0x1]  ;;  %v526_v58 = vsel %vm6307_vm4, 0, %v525_v48  ;;  %v2022_v0 = vrot.slane %v2021_v45, 4 }
  0x75   : > { %v934_v44 = vsel %vm6302_vm2, %v634_v18, %v933_v41  ;;  %v1063_v54 = vld [vmem:[#allocation2 + $0x4] sm:$0xf]  ;;  %527 = vst [vmem:[#allocation2 + $0x2c] sm:$0x1] %v526_v58  ;;  %v1140_v3 = vrot.slane %v1138_v46, 4  ;;  %v1143_v7 = vrot.slane %v1141_v47, 5  ;;  %v2017_v22 = vsel %vm6638_vm13, %v2012_v55, %v6688_v40 }
  0x76   : > { %935 = vst [vmem:[#allocation2 + $0x20] sm:$0x1] %v934_v44  ;;  %v1123_v59 = vshll.u32 %v1063_v54, 16  ;;  %v1127_v61 = vshrl.u32 %v1063_v54, 16  ;;  %v1936_v63 = vld [vmem:[#allocation2 + $0x24] sm:$0xf]  ;;  %v2622_v47 = vunpack.c.l.b16 %v2017_v22 }
  0x77   : > { %3127 = vmatmul.bf16.vlgmr.msrb.gmra.mxu2 %v2716_v39  ;;  %v6705_v15 = vrot.slane %v1147_v56, 5  ;;  %v1153_v17 = vrot.slane %v1151_v57, 4  ;;  %v2029_v18 = vshrl.u32 %v1936_v63, 16  ;;  %v6710_v24 = vld [vmem:[#allocation2 + $0x28] sm:$0xf]  ;;  %v1144_v27 = vor.u32 %v1143_v7, %v1140_v3 }
  0x78   : > { %v1062_v16 = vld [vmem:[#allocation2] sm:$0xf]  ;;  %v1125_v11 = vrot.slane %v1123_v59, 5  ;;  %v1129_v12 = vrot.slane %v1127_v61, 4  ;;  %v1157_v28 = vshll.u32 %v1095_v62, 16  ;;  %v2032_v30 = vshll.u32 %v1936_v63, 16 }
  0x79   : > { %v1094_v8 = vld [vmem:[#allocation2 + $0x8] sm:$0x1]  ;;  %v1114_v9 = vshrl.u32 %v1062_v16, 16  ;;  %v1117_v10 = vshll.u32 %v1062_v16, 16  ;;  %v5924_v13 = vld [vmem:[#allocation2] sm:$0xff]  ;;  %v1154_v35 = vor.u32 %v1153_v17, %v6705_v15  ;;  %v2031_v37 = vrot.slane %v2029_v18, 4 }
  0x7a   : > { %v1133_v14 = vshll.u32 %v1094_v8, 16  ;;  %v1130_v21 = vor.u32 %v1129_v12, %v1125_v11  ;;  %v2034_v39 = vrot.slane %v2032_v30, 5  ;;  %v2038_v41 = vshll.u32 %v6710_v24, 16  ;;  %v2366_v16 = vld [vmem:[#allocation2 + $0x24] sm:$0xe]  ;;  %v6026_v17 = vld [vmem:[%s7857_s3 + $0x1b0] sm:$0xff] }
  0x7b   : > { %v1116_v19 = vrot.slane %v1114_v9, 4  ;;  %v1119_v20 = vrot.slane %v1117_v10, 5  ;;  %v1145_v58 = vrot.slane %v1144_v27, 4  ;;  %v1155_v61 = vrot.slane %v1154_v35, 4  ;;  %v1066_v9 = vld [vmem:[#allocation2 + $0x18] sm:$0xf]  ;;  %4630 = vmatpush.bf16.msra.mxu2 %v6026_v17 }
  0x7c   : > { %v1135_v25 = vrot.slane %v1133_v14, 5  ;;  %v1131_v33 = vrot.slane %v1130_v21, 4  ;;  %v940_v36 = vld [vmem:[#allocation2 + $0x2c] sm:$0x1]  ;;  %v2035_v59 = vor.u32 %v2034_v39, %v2031_v37  ;;  %v1159_v62 = vrot.slane %v1157_v28, 5  ;;  %v5962_v18 = vld [vmem:[%s7857_s3 + $0xb0] sm:$0xff] }
  0x7d   : > { %v1965_v26 = vld [vmem:[#allocation2 + $0x20] sm:$0x1]  ;;  %v1120_v31 = vor.u32 %v1119_v20, %v1116_v19  ;;  %3360 = vmatmul.bf16.vlgmr.msrb.gmra.mxu3 %v5924_v13  ;;  %v941_v52 = vsel %vm6302_vm2, %v651_v50, %v940_v36  ;;  %v2042_v63 = vshrl.u32 %v6710_v24, 16  ;;  %v2444_v8 = vrot.slane %v6710_v24, 5  ;;  %v1067_v10 = vld [vmem:[#allocation2 + $0x1c] sm:$0xf]  ;;  %3531 = vmatpush.bf16.msra.mxu1 %v5962_v18 }
  0x7e   : > { %v2024_v23 = vshll.u32 %v1965_v26, 16  ;;  %v2440_v34 = vrot.slane %v1965_v26, 5  ;;  %v1136_v43 = vsel %vm6638_vm13, %v1131_v33, %v1135_v25  ;;  %942 = vst [vmem:[#allocation2 + $0x2c] sm:$0x1] %v941_v52  ;;  %v1150_v12 = vsel %vm6638_vm13, %v1145_v58, %v6705_v15  ;;  %v6042_v15 = vld [vmem:[%s7857_s3 + $0x230] sm:$0xff] }
  0x7f   : > { %v1121_v40 = vrot.slane %v1120_v31, 4  ;;  %v1757_v46 = vunpack.c.l.b16 %v1136_v43  ;;  %v2036_v13 = vrot.slane %v2035_v59, 4  ;;  %v5375_v14 = vrot.slane %v2366_v16, 9  ;;  %v1938_v28 = vld [vmem:[#allocation2 + $0x30] sm:$0xf]  ;;  %4808 = vmatpush.bf16.msra.mxu0 %v6042_v15 }
  0x80   : > { %v2026_v44 = vrot.slane %v2024_v23, 5  ;;  %v2441_v45 = vsel %vm6651_vm14, %v2439_v53, %v2440_v34  ;;  %v2040_v53 = vrot.slane %v2038_v41, 5  ;;  %v1162_v20 = vshrl.u32 %v1066_v9, 16  ;;  %v5925_v35 = vld [vmem:[#allocation2 + $0xc] sm:$0xff]  ;;  %v6748_v41 = vld [vmem:[#allocation2 + $0x34] sm:$0xf] }
  0x81   : > { %v2687_v48 = vunpack.c.l.b16 %v2441_v45  ;;  %v1126_v54 = vsel %vm6638_vm13, %v1121_v40, %v1125_v11  ;;  %v2044_v11 = vrot.slane %v2042_v63, 4  ;;  %v1165_v21 = vshll.u32 %v1066_v9, 16  ;;  %v1096_v52 = vld [vmem:[#allocation2 + $0x20] sm:$0x1]  ;;  %v1068_v9 = vld [vmem:[#allocation2 + $0x24] sm:$0xf] }
  0x82   : > { %v2027_v55 = vsel %vm6638_vm13, %v2022_v0, %v2026_v44  ;;  %v1756_v56 = vunpack.c.l.b16 %v1126_v54  ;;  %v528_v0 = vld [vmem:[#allocation2 + $0x38] sm:$0x1]  ;;  %v1171_v22 = vshll.u32 %v1067_v10, 16  ;;  %v1160_v24 = vsel %vm6638_vm13, %v1155_v61, %v1159_v62 }
  0x83   : > { %v2623_v57 = vunpack.c.l.b16 %v2027_v55  ;;  %v2717_v50 = vpack.c.b16 %v2687_v48, %v2686_v1  ;;  %v6034_v1 = vld [vmem:[%s7857_s3 + $0x1f0] sm:$0xff]  ;;  %v2045_v19 = vor.u32 %v2044_v11, %v2040_v53  ;;  %v2446_v26 = vrot.slane %v2444_v8, 4 }
  0x84   : > { %v1788_v3 = vpack.c.b16 %v1757_v46, %v1756_v56  ;;  %4719 = vmatpush.bf16.msra.mxu3 %v6034_v1  ;;  %v529_v27 = vsel %vm6307_vm4, 0, %v528_v0  ;;  %v1175_v23 = vshrl.u32 %v1067_v10, 16  ;;  %v668_v34 = vrot.slane %v6564_v49, 4 }
  0x85   : > { %v2653_v7 = vpack.c.b16 %v2623_v57, %v2622_v47  ;;  %v1966_v25 = vld [vmem:[#allocation2 + $0x2c] sm:$0x1]  ;;  %v2046_v30 = vrot.slane %v2045_v19, 4  ;;  %530 = vst [vmem:[#allocation2 + $0x38] sm:$0x1] %v529_v27  ;;  %v1758_v36 = vunpack.c.l.b16 %v1150_v12  ;;  %v2041_v37 = vsel %vm6638_vm13, %v2036_v13, %v2040_v53 }
  0x86   : > { %3449 = vmatmul.bf16.vlgmr.msrb.gmra.mxu0 %v1788_v3  ;;  %v2048_v31 = vshll.u32 %v1966_v25, 16  ;;  %v2447_v33 = vrot.slane %v1966_v25, 5  ;;  %v2053_v40 = vshrl.u32 %v1938_v28, 16  ;;  %v2056_v43 = vshll.u32 %v1938_v28, 16  ;;  %v531_v13 = vld [vmem:[#allocation2 + $0x44] sm:$0x1] }
  0x87   : > { %3043 = vmatmul.bf16.gmra.mxu1 %v2653_v7  ;;  %3132 = vmatmul.bf16.gmra.mxu2 %v2717_v50  ;;  %v1759_v44 = vunpack.c.l.b16 %v1160_v24  ;;  %v2445_v45 = vsel %vm6651_vm14, %v5375_v14, %v2444_v8  ;;  %v1164_v46 = vrot.slane %v1162_v20, 4  ;;  %v1167_v47 = vrot.slane %v1165_v21, 5  ;;  %v1069_v19 = vld [vmem:[#allocation2 + $0x28] sm:$0xf]  ;;  %v2367_v21 = vld [vmem:[#allocation2 + $0x30] sm:$0xe] }
  0x88   : > { %v2050_v39 = vrot.slane %v2048_v31, 5  ;;  %v2448_v48 = vsel %vm6651_vm14, %v2446_v26, %v2447_v33  ;;  %v6756_v54 = vrot.slane %v1171_v22, 5  ;;  %v1177_v55 = vrot.slane %v1175_v23, 4  ;;  %v1940_v27 = vld [vmem:[#allocation2 + $0x3c] sm:$0xf] }
  0x89   : > { %v2624_v56 = vunpack.c.l.b16 %v2041_v37  ;;  %v2062_v58 = vshll.u32 %v6748_v41, 16  ;;  %v2066_v59 = vshrl.u32 %v6748_v41, 16  ;;  %v2055_v61 = vrot.slane %v2053_v40, 4 }
  0x8a   : > { %v2051_v49 = vsel %vm6638_vm13, %v2046_v30, %v2050_v39  ;;  %v2058_v62 = vrot.slane %v2056_v43, 5  ;;  %v2688_v53 = vunpack.c.l.b16 %v2445_v45  ;;  %v2689_v63 = vunpack.c.l.b16 %v2448_v48  ;;  %v1097_v48 = vld [vmem:[#allocation2 + $0x2c] sm:$0x1] }
  0x8b   : > { %v2625_v57 = vunpack.c.l.b16 %v2051_v49  ;;  %v1168_v16 = vor.u32 %v1167_v47, %v1164_v46  ;;  %v1181_v3 = vshll.u32 %v1096_v52, 16  ;;  %v1178_v50 = vor.u32 %v1177_v55, %v6756_v54 }
  0x8c   : > { %v947_v7 = vld [vmem:[#allocation2 + $0x38] sm:$0x1]  ;;  %v1789_v10 = vpack.c.b16 %v1759_v44, %v1758_v36  ;;  %v2064_v0 = vrot.slane %v2062_v58, 5  ;;  %v2068_v12 = vrot.slane %v2066_v59, 4  ;;  %v2059_v14 = vor.u32 %v2058_v62, %v2055_v61 }
  0x8d   : > { %3365 = vmatmul.bf16.gmra.mxu3 %v5925_v35  ;;  %v948_v8 = vsel %vm6302_vm2, %v668_v34, %v947_v7  ;;  %v2654_v11 = vpack.c.b16 %v2625_v57, %v2624_v56  ;;  %v2718_v17 = vpack.c.b16 %v2689_v63, %v2688_v53  ;;  %v1169_v1 = vrot.slane %v1168_v16, 4  ;;  %v6770_v34 = vld [vmem:[#allocation2 + $0x40] sm:$0xf] }
  0x8e   : > { %949 = vst [vmem:[#allocation2 + $0x38] sm:$0x1] %v948_v8  ;;  %v1183_v18 = vrot.slane %v1181_v3, 5  ;;  %v1179_v20 = vrot.slane %v1178_v50, 4  ;;  %v2451_v22 = vrot.slane %v6748_v41, 5  ;;  %v1186_v15 = vshrl.u32 %v1068_v9, 16 }
  0x8f   : > { %v532_v24 = vsel %vm6307_vm4, 0, %v531_v13  ;;  %v2069_v25 = vor.u32 %v2068_v12, %v2064_v0  ;;  %v1189_v26 = vshll.u32 %v1068_v9, 16  ;;  %v685_v28 = vrot.slane %v6354_v42, 4  ;;  %v5926_v42 = vld [vmem:[#allocation2 + $0x18] sm:$0xff]  ;;  %v534_v12 = vld [vmem:[#allocation2 + $0x50] sm:$0x1] }
  0x90   : > { %533 = vst [vmem:[#allocation2 + $0x44] sm:$0x1] %v532_v24  ;;  %v2060_v30 = vrot.slane %v2059_v14, 4  ;;  %v1195_v31 = vshll.u32 %v1069_v19, 16  ;;  %v1174_v33 = vsel %vm6638_vm13, %v1169_v1, %v6756_v54  ;;  %v1199_v23 = vshrl.u32 %v1069_v19, 16 }
  0x91   : > { %v2077_v35 = vshrl.u32 %v1940_v27, 16  ;;  %v2080_v36 = vshll.u32 %v1940_v27, 16  ;;  %v1184_v37 = vsel %vm6638_vm13, %v1179_v20, %v1183_v18  ;;  %v5376_v41 = vrot.slane %v2367_v21, 9  ;;  %v1070_v20 = vld [vmem:[#allocation2 + $0x30] sm:$0xf] }
  0x92   : > { %v2453_v40 = vrot.slane %v2451_v22, 4  ;;  %v1188_v43 = vrot.slane %v1186_v15, 4  ;;  %v2070_v44 = vrot.slane %v2069_v25, 4  ;;  %v1191_v47 = vrot.slane %v1189_v26, 5  ;;  %v1071_v25 = vld [vmem:[#allocation2 + $0x34] sm:$0xf] }
  0x93   : > { %v2065_v49 = vsel %vm6638_vm13, %v2060_v30, %v2064_v0  ;;  %v6776_v52 = vrot.slane %v1195_v31, 5  ;;  %v2086_v54 = vshll.u32 %v6770_v34, 16  ;;  %v2090_v55 = vshrl.u32 %v6770_v34, 16 }
  0x94   : > { %v1201_v57 = vrot.slane %v1199_v23, 4  ;;  %v2079_v58 = vrot.slane %v2077_v35, 4  ;;  %v2082_v59 = vrot.slane %v2080_v36, 5  ;;  %v1760_v61 = vunpack.c.l.b16 %v1174_v33  ;;  %v2368_v33 = vld [vmem:[#allocation2 + $0x3c] sm:$0xe] }
  0x95   : > { %v1967_v39 = vld [vmem:[#allocation2 + $0x38] sm:$0x1]  ;;  %v1761_v62 = vunpack.c.l.b16 %v1184_v37  ;;  %v2452_v53 = vsel %vm6651_vm14, %v5376_v41, %v2451_v22  ;;  %v2626_v7 = vunpack.c.l.b16 %v2065_v49  ;;  %v1205_v50 = vshll.u32 %v1097_v48, 16  ;;  %v6033_v41 = vld [vmem:[%s7857_s3 + $0x1e8] sm:$0xff] }
  0x96   : > { %3454 = vmatmul.bf16.gmra.mxu0 %v1789_v10  ;;  %v2072_v45 = vshll.u32 %v1967_v39, 16  ;;  %v2454_v46 = vrot.slane %v1967_v39, 5  ;;  %v1192_v10 = vor.u32 %v1191_v47, %v1188_v43  ;;  %v2092_v0 = vrot.slane %v2090_v55, 4  ;;  %v6025_v39 = vld [vmem:[%s7857_s3 + $0x1a8] sm:$0xff]  ;;  %4720 = vmatpush.bf16.msra.mxu3 %v6033_v41 }
  0x97   : > { %3048 = vmatmul.bf16.gmra.mxu1 %v2654_v11  ;;  %3137 = vmatmul.bf16.gmra.mxu2 %v2718_v17  ;;  %v954_v16 = vld [vmem:[#allocation2 + $0x44] sm:$0x1]  ;;  %v6788_v11 = vrot.slane %v2086_v54, 5  ;;  %v2690_v13 = vunpack.c.l.b16 %v2452_v53  ;;  %v1202_v17 = vor.u32 %v1201_v57, %v6776_v52  ;;  %v2083_v1 = vor.u32 %v2082_v59, %v2079_v58  ;;  %v1942_v48 = vld [vmem:[#allocation2 + $0x48] sm:$0xf] }
  0x98   : > { %v2074_v56 = vrot.slane %v2072_v45, 5  ;;  %v2455_v63 = vsel %vm6651_vm14, %v2453_v40, %v2454_v46  ;;  %v955_v8 = vsel %vm6302_vm2, %v685_v28, %v954_v16  ;;  %v1790_v18 = vpack.c.b16 %v1761_v62, %v1760_v61  ;;  %v5927_v54 = vld [vmem:[#allocation2 + $0x24] sm:$0xff]  ;;  %4631 = vmatpush.bf16.msra.mxu2 %v6025_v39 }
  0x99   : > { %956 = vst [vmem:[#allocation2 + $0x44] sm:$0x1] %v955_v8  ;;  %v2691_v14 = vunpack.c.l.b16 %v2455_v63  ;;  %v535_v21 = vsel %vm6307_vm4, 0, %v534_v12  ;;  %v1193_v22 = vrot.slane %v1192_v10, 4  ;;  %v1207_v15 = vrot.slane %v1205_v50, 5 }
  0x9a   : > { %v2075_v3 = vsel %vm6638_vm13, %v2070_v44, %v2074_v56  ;;  %v2093_v24 = vor.u32 %v2092_v0, %v6788_v11  ;;  %536 = vst [vmem:[#allocation2 + $0x50] sm:$0x1] %v535_v21  ;;  %v1203_v27 = vrot.slane %v1202_v17, 4  ;;  %v2084_v28 = vrot.slane %v2083_v1, 4  ;;  %v6041_v44 = vld [vmem:[%s7857_s3 + $0x228] sm:$0xff] }
  0x9b   : > { %v2627_v9 = vunpack.c.l.b16 %v2075_v3  ;;  %v2719_v26 = vpack.c.b16 %v2691_v14, %v2690_v13  ;;  %v2458_v30 = vrot.slane %v6770_v34, 5  ;;  %v702_v31 = vrot.slane %v6437_v5, 4  ;;  %4809 = vmatpush.bf16.msra.mxu0 %v6041_v44 }
  0x9c   : > { %v1210_v23 = vshrl.u32 %v1070_v20, 16  ;;  %v1213_v36 = vshll.u32 %v1070_v20, 16  ;;  %v1219_v37 = vshll.u32 %v1071_v25, 16  ;;  %v1198_v34 = vsel %vm6638_vm13, %v1193_v22, %v6776_v52  ;;  %v6816_v52 = vld [vmem:[#allocation2 + $0x4c] sm:$0xf] }
  0x9d   : > { %3370 = vmatmul.bf16.gmra.mxu3 %v5926_v42  ;;  %v2655_v19 = vpack.c.b16 %v2627_v9, %v2626_v7  ;;  %v2094_v5 = vrot.slane %v2093_v24, 4  ;;  %v1223_v43 = vshrl.u32 %v1071_v25, 16  ;;  %v5961_v42 = vld [vmem:[%s7857_s3 + $0xa8] sm:$0xff]  ;;  %v1208_v45 = vsel %vm6638_vm13, %v1203_v27, %v1207_v15  ;;  %v1098_v7 = vld [vmem:[#allocation2 + $0x38] sm:$0x1] }
  0x9e   : > { %v2089_v46 = vsel %vm6638_vm13, %v2084_v28, %v6788_v11  ;;  %v5377_v47 = vrot.slane %v2368_v33, 9  ;;  %v2460_v49 = vrot.slane %v2458_v30, 4  ;;  %v1212_v58 = vrot.slane %v1210_v23, 4  ;;  %3532 = vmatpush.bf16.msra.mxu1 %v5961_v42  ;;  %v537_v15 = vld [vmem:[#allocation2 + $0x5c] sm:$0x1] }
  0x9f   : > { %v2101_v59 = vshrl.u32 %v1942_v48, 16  ;;  %v1215_v61 = vrot.slane %v1213_v36, 5  ;;  %v6820_v62 = vrot.slane %v1219_v37, 5  ;;  %v2104_v63 = vshll.u32 %v1942_v48, 16  ;;  %v1944_v48 = vld [vmem:[#allocation2 + $0x54] sm:$0xf] }
  0xa0   : > { %v1968_v35 = vld [vmem:[#allocation2 + $0x44] sm:$0x1]  ;;  %v2110_v16 = vshll.u32 %v6816_v52, 16  ;;  %v1225_v50 = vrot.slane %v1223_v43, 4  ;;  %v2114_v9 = vshrl.u32 %v6816_v52, 16  ;;  %v1762_v10 = vunpack.c.l.b16 %v1198_v34 }
  0xa1   : > { %v2096_v40 = vshll.u32 %v1968_v35, 16  ;;  %v2461_v57 = vrot.slane %v1968_v35, 5  ;;  %v961_v53 = vld [vmem:[#allocation2 + $0x50] sm:$0x1]  ;;  %v1763_v11 = vunpack.c.l.b16 %v1208_v45  ;;  %v2459_v0 = vsel %vm6651_vm14, %v5377_v47, %v2458_v30  ;;  %v1072_v45 = vld [vmem:[#allocation2 + $0x3c] sm:$0xf] }
  0xa2   : > { %v962_v8 = vsel %vm6302_vm2, %v702_v31, %v961_v53  ;;  %v2628_v12 = vunpack.c.l.b16 %v2089_v46  ;;  %v2103_v14 = vrot.slane %v2101_v59, 4  ;;  %v2106_v17 = vrot.slane %v2104_v63, 5  ;;  %v1073_v46 = vld [vmem:[#allocation2 + $0x40] sm:$0xf] }
  0xa3   : > { %v2098_v56 = vrot.slane %v2096_v40, 5  ;;  %963 = vst [vmem:[#allocation2 + $0x50] sm:$0x1] %v962_v8  ;;  %v2462_v13 = vsel %vm6651_vm14, %v2460_v49, %v2461_v57  ;;  %v2116_v20 = vrot.slane %v2114_v9, 4  ;;  %v1216_v21 = vor.u32 %v1215_v61, %v1212_v58  ;;  %v2369_v40 = vld [vmem:[#allocation2 + $0x48] sm:$0xe] }
  0xa4   : > { %v1226_v22 = vor.u32 %v1225_v50, %v6820_v62  ;;  %v2692_v24 = vunpack.c.l.b16 %v2459_v0  ;;  %v2693_v25 = vunpack.c.l.b16 %v2462_v13  ;;  %v1791_v27 = vpack.c.b16 %v1763_v11, %v1762_v10  ;;  %v6853_v58 = vld [vmem:[#allocation2 + $0x58] sm:$0xf]  ;;  %v5928_v8 = vld [vmem:[#allocation2 + $0x30] sm:$0xff] }
  0xa5   : > { %v2099_v3 = vsel %vm6638_vm13, %v2094_v5, %v2098_v56  ;;  %v2107_v30 = vor.u32 %v2106_v17, %v2103_v14  ;;  %v538_v35 = vsel %vm6307_vm4, 0, %v537_v15  ;;  %v1217_v37 = vrot.slane %v1216_v21, 4 }
  0xa6   : > { %3459 = vmatmul.bf16.gmra.mxu0 %v1790_v18  ;;  %v2629_v1 = vunpack.c.l.b16 %v2099_v3  ;;  %v1229_v18 = vshll.u32 %v1098_v7, 16  ;;  %v1227_v39 = vrot.slane %v1226_v22, 4  ;;  %539 = vst [vmem:[#allocation2 + $0x5c] sm:$0x1] %v538_v35  ;;  %v2720_v34 = vpack.c.b16 %v2693_v25, %v2692_v24 }
  0xa7   : > { %3053 = vmatmul.bf16.gmra.mxu1 %v2655_v19  ;;  %3142 = vmatmul.bf16.gmra.mxu2 %v2719_v26  ;;  %v6832_v19 = vrot.slane %v2110_v16, 5  ;;  %v2465_v43 = vrot.slane %v6816_v52, 5  ;;  %v2108_v44 = vrot.slane %v2107_v30, 4  ;;  %v1222_v56 = vsel %vm6638_vm13, %v1217_v37, %v6820_v62  ;;  %v1099_v30 = vld [vmem:[#allocation2 + $0x44] sm:$0x1] }
  0xa8   : > { %v2656_v31 = vpack.c.b16 %v2629_v1, %v2628_v12  ;;  %v1231_v33 = vrot.slane %v1229_v18, 5  ;;  %v5378_v52 = vrot.slane %v2369_v40, 9  ;;  %v1234_v61 = vshrl.u32 %v1072_v45, 16 }
  0xa9   : > { %v6818_v55 = vpop.f32.mrf.mxu1  ;;  %v2117_v23 = vor.u32 %v2116_v20, %v6832_v19  ;;  %v6842_v36 = vpop.f32.mrf.mxu0  ;;  %v2467_v59 = vrot.slane %v2465_v43, 4  ;;  %v1237_v53 = vshll.u32 %v1072_v45, 16  ;;  %v1243_v63 = vshll.u32 %v1073_v46, 16 }
  0xaa   : > { %v1969_v41 = vld [vmem:[#allocation2 + $0x50] sm:$0x1]  ;;  %v1232_v57 = vsel %vm6638_vm13, %v1227_v39, %v1231_v33  ;;  %v1247_v7 = vshrl.u32 %v1073_v46, 16  ;;  %v2125_v50 = vshrl.u32 %v1944_v48, 16  ;;  %v2128_v11 = vshll.u32 %v1944_v48, 16 }
  0xab   : > { %v2120_v5 = vshll.u32 %v1969_v41, 16  ;;  %v2118_v47 = vrot.slane %v2117_v23, 4  ;;  %v2468_v62 = vrot.slane %v1969_v41, 5  ;;  %v2134_v0 = vshll.u32 %v6853_v58, 16 }
  0xac   : > { %v2138_v12 = vshrl.u32 %v6853_v58, 16  ;;  %v1764_v13 = vunpack.c.l.b16 %v1222_v56  ;;  %v1765_v14 = vunpack.c.l.b16 %v1232_v57  ;;  %v2466_v1 = vsel %vm6651_vm14, %v5378_v52, %v2465_v43 }
  0xad   : > { %3375 = vmatmul.bf16.gmra.mxu3 %v5927_v54  ;;  %v2122_v49 = vrot.slane %v2120_v5, 5  ;;  %v719_v54 = vrot.slane %v6510_v38, 4  ;;  %v2113_v38 = vsel %vm6638_vm13, %v2108_v44, %v6832_v19  ;;  %v968_v10 = vld [vmem:[#allocation2 + $0x5c] sm:$0x1]  ;;  %v1236_v18 = vrot.slane %v1234_v61, 4 }
  0xae   : > { %v1239_v19 = vrot.slane %v1237_v53, 5  ;;  %v6870_v20 = vrot.slane %v1243_v63, 5  ;;  %v2630_v22 = vunpack.c.l.b16 %v2113_v38  ;;  %v2469_v24 = vsel %vm6651_vm14, %v2467_v59, %v2468_v62  ;;  %v2370_v59 = vld [vmem:[#allocation2 + $0x54] sm:$0xe]  ;;  %v1074_v61 = vld [vmem:[#allocation2 + $0x48] sm:$0xf] }
  0xaf   : > { %v2123_v9 = vsel %vm6638_vm13, %v2118_v47, %v2122_v49  ;;  %v969_v17 = vsel %vm6302_vm2, %v719_v54, %v968_v10  ;;  %v1249_v25 = vrot.slane %v1247_v7, 4  ;;  %v2130_v33 = vrot.slane %v2128_v11, 5  ;;  %v1075_v62 = vld [vmem:[#allocation2 + $0x4c] sm:$0xf] }
  0xb0   : > { %v6835_v26 = vpop.f32.mrf.mxu2  ;;  %970 = vst [vmem:[#allocation2 + $0x5c] sm:$0x1] %v969_v17  ;;  %v2631_v15 = vunpack.c.l.b16 %v2123_v9  ;;  %v6876_v23 = vrot.slane %v2134_v0, 5  ;;  %v2140_v35 = vrot.slane %v2138_v12, 4  ;;  %v2694_v39 = vunpack.c.l.b16 %v2466_v1  ;;  %v6024_v9 = vld [vmem:[%s7857_s3 + $0x1a0] sm:$0xff] }
  0xb1   : > { %v6837_v28 = vpop.f32.mrf.mxu1  ;;  %v6872_v21 = vpop.f32.mrf.mxu0  ;;  %v2695_v41 = vunpack.c.l.b16 %v2469_v24  ;;  %v1250_v40 = vor.u32 %v1249_v25, %v6870_v20  ;;  %v1253_v43 = vshll.u32 %v1099_v30, 16  ;;  %v1792_v44 = vpack.c.b16 %v1765_v14, %v1764_v13  ;;  %v6040_v14 = vld [vmem:[%s7857_s3 + $0x220] sm:$0xff]  ;;  %4632 = vmatpush.bf16.msra.mxu2 %v6024_v9 }
  0xb2   : > { %v2657_v45 = vpack.c.b16 %v2631_v15, %v2630_v22  ;;  %v2141_v47 = vor.u32 %v2140_v35, %v6876_v23  ;;  %v2472_v56 = vrot.slane %v6853_v58, 5  ;;  %v736_v53 = vrot.slane %v6578_v6, 4  ;;  %v6032_v58 = vld [vmem:[%s7857_s3 + $0x1e0] sm:$0xff]  ;;  %4810 = vmatpush.bf16.msra.mxu0 %v6040_v14 }
  0xb3   : > { %v6845_v42 = vpop.f32.mrf.mxu3  ;;  %v2721_v57 = vpack.c.b16 %v2695_v41, %v2694_v39  ;;  %v1251_v63 = vrot.slane %v1250_v40, 4  ;;  %v1255_v38 = vrot.slane %v1253_v43, 5  ;;  %v5960_v6 = vld [vmem:[%s7857_s3 + $0xa0] sm:$0xff]  ;;  %v5379_v11 = vrot.slane %v2370_v59, 9  ;;  %4721 = vmatpush.bf16.msra.mxu3 %v6032_v58  ;;  %v1100_v59 = vld [vmem:[#allocation2 + $0x50] sm:$0x1] }
  0xb4   : > { %v2474_v0 = vrot.slane %v2472_v56, 4  ;;  %v1258_v12 = vshrl.u32 %v1074_v61, 16  ;;  %v1261_v13 = vshll.u32 %v1074_v61, 16  ;;  %v1267_v24 = vshll.u32 %v1075_v62, 16  ;;  %3533 = vmatpush.bf16.msra.mxu1 %v5960_v6  ;;  %v5929_v30 = vld [vmem:[#allocation2 + $0x3c] sm:$0xff] }
  0xb5   : > { %v1271_v25 = vshrl.u32 %v1075_v62, 16  ;;  %v1277_v9 = vshll.u32 %v1100_v59, 16  ;;  %v5930_v59 = vld [vmem:[#allocation2 + $0x48] sm:$0xff] }
  0xb6   : > { %3464 = vmatmul.bf16.gmra.mxu0 %v1791_v27  ;;  %v540_v27 = vld [vmem:[#allocation2 + $0x68] sm:$0x1]  ;;  %v1260_v40 = vrot.slane %v1258_v12, 4 }
  0xb7   : > { %3058 = vmatmul.bf16.gmra.mxu1 %v2656_v31  ;;  %3147 = vmatmul.bf16.gmra.mxu2 %v2720_v34  ;;  %v2127_v31 = vrot.slane %v2125_v50, 4  ;;  %v1240_v34 = vor.u32 %v1239_v19, %v1236_v18  ;;  %v541_v5 = vsel %vm6307_vm4, 0, %v540_v27  ;;  %v1970_v54 = vld [vmem:[#allocation2 + $0x5c] sm:$0x1]  ;;  %v2142_v50 = vrot.slane %v2141_v47, 4 }
  0xb8   : > { %v6855_v16 = vpop.f32.mrf.mxu2  ;;  %542 = vst [vmem:[#allocation2 + $0x68] sm:$0x1] %v541_v5  ;;  %v2144_v4 = vshll.u32 %v1970_v54, 16  ;;  %v1946_v18 = vld [vmem:[#allocation2 + $0x60] sm:$0xf]  ;;  %v2475_v15 = vrot.slane %v1970_v54, 5  ;;  %v2473_v5 = vsel %vm6651_vm14, %v5379_v11, %v2472_v56 }
  0xb9   : > { %v6857_v3 = vpop.f32.mrf.mxu1  ;;  %v2131_v46 = vor.u32 %v2130_v33, %v2127_v31  ;;  %v1241_v52 = vrot.slane %v1240_v34, 4  ;;  %v6899_v10 = vpop.f32.mrf.mxu0  ;;  %v6907_v19 = vld [vmem:[#allocation2 + $0x64] sm:$0xf]  ;;  %v1256_v31 = vsel %vm6638_vm13, %v1251_v63, %v1255_v38  ;;  %v2149_v35 = vshrl.u32 %v1946_v18, 16 }
  0xba   : > { %v2152_v39 = vshll.u32 %v1946_v18, 16  ;;  %v2158_v41 = vshll.u32 %v6907_v19, 16  ;;  %v2162_v34 = vshrl.u32 %v6907_v19, 16  ;;  %v1273_v47 = vrot.slane %v1271_v25, 4  ;;  %v1076_v18 = vld [vmem:[#allocation2 + $0x54] sm:$0xf] }
  0xbb   : > { %v6878_v37 = vpop.f32.mrf.mxu3  ;;  %v2132_v7 = vrot.slane %v2131_v46, 4  ;;  %v1246_v17 = vsel %vm6638_vm13, %v1241_v52, %v6870_v20  ;;  %v6930_v46 = vrot.slane %v1267_v24, 5  ;;  %v2151_v61 = vrot.slane %v2149_v35, 4  ;;  %v1077_v24 = vld [vmem:[#allocation2 + $0x58] sm:$0xf] }
  0xbc   : > { %v1766_v54 = vunpack.c.l.b16 %v1246_v17  ;;  %v2154_v56 = vrot.slane %v2152_v39, 5  ;;  %v2164_v63 = vrot.slane %v2162_v34, 4  ;;  %v2696_v38 = vunpack.c.l.b16 %v2473_v5 }
  0xbd   : > { %3380 = vmatmul.bf16.gmra.mxu3 %v5928_v8  ;;  %v2146_v8 = vrot.slane %v2144_v4, 5  ;;  %v2137_v20 = vsel %vm6638_vm13, %v2132_v7, %v6876_v23  ;;  %v2476_v23 = vsel %vm6651_vm14, %v2474_v0, %v2475_v15  ;;  %v2479_v0 = vrot.slane %v6907_v19, 5 }
  0xbe   : > { %v2632_v52 = vunpack.c.l.b16 %v2137_v20  ;;  %v2697_v62 = vunpack.c.l.b16 %v2476_v23  ;;  %v1285_v35 = vshll.u32 %v1076_v18, 16 }
  0xbf   : > { %v975_v1 = vld [vmem:[#allocation2 + $0x68] sm:$0x1]  ;;  %v2147_v33 = vsel %vm6638_vm13, %v2142_v50, %v2146_v8  ;;  %v1274_v8 = vor.u32 %v1273_v47, %v6930_v46  ;;  %v2481_v20 = vrot.slane %v2479_v0, 4  ;;  %v1948_v47 = vld [vmem:[#allocation2 + $0x6c] sm:$0xf] }
  0xc0   : > { %v976_v27 = vsel %vm6302_vm2, %v736_v53, %v975_v1  ;;  %v2633_v4 = vunpack.c.l.b16 %v2147_v33  ;;  %v6932_v53 = vrot.slane %v2158_v41, 5  ;;  %v2371_v1 = vld [vmem:[#allocation2 + $0x60] sm:$0xe]  ;;  %v2722_v15 = vpack.c.b16 %v2697_v62, %v2696_v38 }
  0xc1   : > { %v6886_v48 = vpop.f32.mrf.mxu1  ;;  %977 = vst [vmem:[#allocation2 + $0x68] sm:$0x1] %v976_v27  ;;  %v6934_v7 = vpop.f32.mrf.mxu0  ;;  %v1275_v27 = vrot.slane %v1274_v8, 4  ;;  %v1282_v33 = vshrl.u32 %v1076_v18, 16 }
  0xc2   : > { %v6884_v49 = vpop.f32.mrf.mxu2  ;;  %v2658_v11 = vpack.c.b16 %v2633_v4, %v2632_v52  ;;  %v2165_v14 = vor.u32 %v2164_v63, %v6932_v53  ;;  %v2176_v52 = vshll.u32 %v1948_v47, 16 }
  0xc4   : > { %v2166_v34 = vrot.slane %v2165_v14, 4 }
  0xc6   : > { %3469 = vmatmul.bf16.gmra.mxu0 %v1792_v44 }
  0xc7   : > { %3063 = vmatmul.bf16.gmra.mxu1 %v2657_v45  ;;  %3152 = vmatmul.bf16.gmra.mxu2 %v2721_v57  ;;  %v6909_v22 = vpop.f32.mrf.mxu3  ;;  %v1263_v45 = vrot.slane %v1261_v13, 5  ;;  %v1767_v57 = vunpack.c.l.b16 %v1256_v31  ;;  %v2155_v13 = vor.u32 %v2154_v56, %v2151_v61  ;;  %v5380_v31 = vrot.slane %v2371_v1, 9 }
  0xc8   : > { %v1971_v58 = vld [vmem:[#allocation2 + $0x68] sm:$0x1]  ;;  %v2178_v1 = vrot.slane %v2176_v52, 5 }
  0xc9   : > { %v1264_v50 = vor.u32 %v1263_v45, %v1260_v40  ;;  %v1793_v6 = vpack.c.b16 %v1767_v57, %v1766_v54  ;;  %v2168_v17 = vshll.u32 %v1971_v58, 16  ;;  %v2156_v41 = vrot.slane %v2155_v13, 4  ;;  %v6945_v54 = vld [vmem:[#allocation2 + $0x70] sm:$0xf]  ;;  %v6954_v38 = vpop.f32.mrf.mxu0 }
  0xca   : > { %v6924_v43 = vpop.f32.mrf.mxu2  ;;  %v1291_v40 = vshll.u32 %v1077_v24, 16  ;;  %v2482_v23 = vrot.slane %v1971_v58, 5  ;;  %v1295_v45 = vshrl.u32 %v1077_v24, 16  ;;  %v2173_v57 = vshrl.u32 %v1948_v47, 16  ;;  %v1101_v58 = vld [vmem:[#allocation2 + $0x5c] sm:$0x1] }
  0xcb   : > { %v1265_v25 = vrot.slane %v1264_v50, 4  ;;  %v2170_v5 = vrot.slane %v2168_v17, 5  ;;  %v2182_v4 = vshll.u32 %v6945_v54, 16  ;;  %v2186_v63 = vshrl.u32 %v6945_v54, 16 }
  0xcc   : > { %v2161_v62 = vsel %vm6638_vm13, %v2156_v41, %v6932_v53  ;;  %v2480_v8 = vsel %vm6651_vm14, %v5380_v31, %v2479_v0  ;;  %v1297_v13 = vrot.slane %v1295_v45, 4  ;;  %v2175_v17 = vrot.slane %v2173_v57, 4  ;;  %v1078_v41 = vld [vmem:[#allocation2 + $0x60] sm:$0xf] }
  0xcd   : > { %v6926_v44 = vpop.f32.mrf.mxu1  ;;  %3385 = vmatmul.bf16.gmra.mxu3 %v5929_v30  ;;  %v1279_v30 = vrot.slane %v1277_v9, 5  ;;  %v1270_v61 = vsel %vm6638_vm13, %v1265_v25, %v6930_v46  ;;  %v2171_v50 = vsel %vm6638_vm13, %v2166_v34, %v2170_v5  ;;  %v1284_v9 = vrot.slane %v1282_v33, 4 }
  0xce   : > { %v2483_v46 = vsel %vm6651_vm14, %v2481_v20, %v2482_v23  ;;  %v6969_v53 = vrot.slane %v2182_v4, 5  ;;  %v2188_v18 = vrot.slane %v2186_v63, 4  ;;  %v2634_v0 = vunpack.c.l.b16 %v2161_v62  ;;  %v1079_v63 = vld [vmem:[#allocation2 + $0x64] sm:$0xf] }
  0xcf   : > { %v6938_v12 = vpop.f32.mrf.mxu3  ;;  %v1280_v56 = vsel %vm6638_vm13, %v1275_v27, %v1279_v30  ;;  %v2635_v25 = vunpack.c.l.b16 %v2171_v50  ;;  %v6971_v27 = vld [vmem:[#allocation2 + $0x74] sm:$0x1]  ;;  %v1301_v30 = vshll.u32 %v1101_v58, 16  ;;  %v2698_v31 = vunpack.c.l.b16 %v2480_v8  ;;  %v2372_v58 = vld [vmem:[#allocation2 + $0x6c] sm:$0xe] }
  0xd0   : > { %7878 = vst [vmem:[#allocation6_spill] sm:$0xff] %v6938_v12  ;;  %v1769_v24 = vunpack.c.l.b16 %v1280_v56  ;;  %v2699_v20 = vunpack.c.l.b16 %v2483_v46  ;;  %v2189_v23 = vor.u32 %v2188_v18, %v6969_v53  ;;  %v2192_v45 = vshll.u32 %v6971_v27, 16 }
  0xd1   : > { %v2659_v57 = vpack.c.b16 %v2635_v25, %v2634_v0  ;;  %v1303_v52 = vrot.slane %v1301_v30, 5  ;;  %v1306_v4 = vshrl.u32 %v1078_v41, 16  ;;  %v1309_v62 = vshll.u32 %v1078_v41, 16  ;;  %v6980_v50 = vpop.f32.mrf.mxu0 }
  0xd2   : > { %v2194_v46 = vrot.slane %v2192_v45, 5  ;;  %v5381_v25 = vrot.slane %v2372_v58, 9 }
  0xd3   : > { %v1308_v18 = vrot.slane %v1306_v4, 4  ;;  %v1311_v30 = vrot.slane %v1309_v62, 5  ;;  %v1102_v62 = vld [vmem:[#allocation2 + $0x68] sm:$0x1] }
  0xd5   : > { %v6941_v19 = vpop.f32.mrf.mxu2  ;;  %v6943_v39 = vpop.f32.mrf.mxu1 }
  0xd6   : > { %3474 = vmatmul.bf16.gmra.mxu0 %v1793_v6  ;;  %v1287_v6 = vrot.slane %v1285_v35, 5 }
  0xd7   : > { %3068 = vmatmul.bf16.gmra.mxu1 %v2658_v11  ;;  %3157 = vmatmul.bf16.gmra.mxu2 %v2722_v15  ;;  %v6965_v11 = vrot.slane %v1291_v40, 5  ;;  %v1768_v15 = vunpack.c.l.b16 %v1270_v61  ;;  %v2179_v40 = vor.u32 %v2178_v1, %v2175_v17  ;;  %v6031_v17 = vld [vmem:[%s7857_s3 + $0x1d8] sm:$0xff] }
  0xd8   : > { %v1288_v33 = vor.u32 %v1287_v6, %v1284_v9  ;;  %v2190_v9 = vrot.slane %v2189_v23, 4  ;;  %v2486_v6 = vrot.slane %v6945_v54, 5  ;;  %4722 = vmatpush.bf16.msra.mxu3 %v6031_v17  ;;  %v5931_v23 = vld [vmem:[#allocation2 + $0x54] sm:$0xff] }
  0xd9   : > { %v1298_v35 = vor.u32 %v1297_v13, %v6965_v11  ;;  %v1794_v47 = vpack.c.b16 %v1769_v24, %v1768_v15  ;;  %v2180_v8 = vrot.slane %v2179_v40, 4  ;;  %v6023_v13 = vld [vmem:[%s7857_s3 + $0x198] sm:$0xff]  ;;  %v1315_v15 = vshll.u32 %v1079_v63, 16 }
  0xda   : > { %v1289_v61 = vrot.slane %v1288_v33, 4  ;;  %v1319_v24 = vshrl.u32 %v1079_v63, 16  ;;  %v2195_v41 = vsel %vm6638_vm13, %v2190_v9, %v2194_v46  ;;  %v2488_v40 = vrot.slane %v2486_v6, 4  ;;  %4633 = vmatpush.bf16.msra.mxu2 %v6023_v13 }
  0xdb   : > { %v6967_v14 = vpop.f32.mrf.mxu3  ;;  %v1299_v56 = vrot.slane %v1298_v35, 4  ;;  %v2185_v35 = vsel %vm6638_vm13, %v2180_v8, %v6969_v53  ;;  %v5959_v53 = vld [vmem:[%s7857_s3 + $0x98] sm:$0xff]  ;;  %v1312_v8 = vor.u32 %v1311_v30, %v1308_v18  ;;  %v2637_v46 = vunpack.c.l.b16 %v2195_v41  ;;  %v7024_v30 = vld [vmem:[#allocation2 + $0x80] sm:$0x1] }
  0xdc   : > { %7879 = vst [vmem:[#allocation7_spill] sm:$0xff] %v6967_v14  ;;  %v1294_v54 = vsel %vm6638_vm13, %v1289_v61, %v6965_v11  ;;  %v2489_v11 = vrot.slane %v6971_v27, 5  ;;  %v1321_v61 = vrot.slane %v1319_v24, 4  ;;  %v6039_v27 = vld [vmem:[%s7857_s3 + $0x218] sm:$0xff]  ;;  %v2636_v9 = vunpack.c.l.b16 %v2185_v35  ;;  %3534 = vmatpush.bf16.msra.mxu1 %v5959_v53 }
  0xdd   : > { %3390 = vmatmul.bf16.gmra.mxu3 %v5930_v59  ;;  %v6974_v34 = vpop.f32.mrf.mxu2  ;;  %v2723_v59 = vpack.c.b16 %v2699_v20, %v2698_v31  ;;  %v1304_v0 = vsel %vm6638_vm13, %v1299_v56, %v1303_v52  ;;  %v1950_v31 = vld [vmem:[#allocation2 + $0x78] sm:$0xf]  ;;  %v6996_v20 = vld [vmem:[#allocation2 + $0x7c] sm:$0xf]  ;;  %v1770_v56 = vunpack.c.l.b16 %v1294_v54  ;;  %v2487_v58 = vsel %vm6651_vm14, %v5381_v25, %v2486_v6  ;;  %4811 = vmatpush.bf16.msra.mxu0 %v6039_v27  ;;  %v7022_v54 = vpop.f32.mrf.mxu0  ;;  %v1080_v6 = vld [vmem:[#allocation2 + $0x6c] sm:$0xf] }
  0xde   : > { %v2197_v45 = vshrl.u32 %v1950_v31, 16  ;;  %v2210_v52 = vshrl.u32 %v6996_v20, 16  ;;  %v1771_v63 = vunpack.c.l.b16 %v1304_v0  ;;  %v2490_v13 = vsel %vm6651_vm14, %v2488_v40, %v2489_v11  ;;  %v1082_v14 = vld [vmem:[#allocation2 + $0x78] sm:$0xf] }
  0xdf   : > { %v1325_v18 = vshll.u32 %v1102_v62, 16  ;;  %v2700_v35 = vunpack.c.l.b16 %v2487_v58  ;;  %v2701_v41 = vunpack.c.l.b16 %v2490_v13  ;;  %v1313_v11 = vrot.slane %v1312_v8, 4 }
  0xe0   : > { %v6976_v5 = vpop.f32.mrf.mxu1  ;;  %v2199_v17 = vrot.slane %v2197_v45, 4  ;;  %v1795_v25 = vpack.c.b16 %v1771_v63, %v1770_v56  ;;  %v2660_v45 = vpack.c.b16 %v2637_v46, %v2636_v9  ;;  %v1330_v62 = vshrl.u32 %v1080_v6, 16 }
  0xe1   : > { %v1327_v27 = vrot.slane %v1325_v18, 5  ;;  %v1333_v58 = vshll.u32 %v1080_v6, 16  ;;  %v2724_v13 = vpack.c.b16 %v2701_v41, %v2700_v35  ;;  %v2493_v63 = vrot.slane %v6996_v20, 5  ;;  %v1952_v6 = vld [vmem:[#allocation2 + $0x84] sm:$0xf] }
  0xe3   : > { %v6989_v1 = vpop.f32.mrf.mxu3  ;;  %v1335_v18 = vrot.slane %v1333_v58, 5 }
  0xe4   : > { %7880 = vst [vmem:[#allocation8_spill] sm:$0xff] %v6989_v1 }
  0xe6   : > { %3479 = vmatmul.bf16.gmra.mxu0 %v1794_v47  ;;  %v2200_v47 = vshll.u32 %v1950_v31, 16  ;;  %v2212_v31 = vrot.slane %v2210_v52, 4  ;;  %v2216_v52 = vshll.u32 %v7024_v30, 16 }
  0xe7   : > { %3073 = vmatmul.bf16.gmra.mxu1 %v2659_v57  ;;  %3162 = vmatmul.bf16.gmra.mxu2 %v2723_v59  ;;  %v2206_v57 = vshll.u32 %v6996_v20, 16  ;;  %v1317_v59 = vrot.slane %v1315_v15, 5  ;;  %v7039_v20 = vld [vmem:[#allocation2 + $0x88] sm:$0xf] }
  0xe8   : > { %v6998_v33 = vpop.f32.mrf.mxu1  ;;  %v2202_v15 = vrot.slane %v2200_v47, 5 }
  0xe9   : > { %v7020_v24 = vrot.slane %v2206_v57, 5  ;;  %v1322_v0 = vor.u32 %v1321_v61, %v1317_v59  ;;  %v1318_v8 = vsel %vm6638_vm13, %v1313_v11, %v1317_v59 }
  0xea   : > { %v7008_v4 = vpop.f32.mrf.mxu2  ;;  %v2203_v47 = vor.u32 %v2202_v15, %v2199_v17  ;;  %v2218_v17 = vrot.slane %v2216_v52, 5  ;;  %v2373_v15 = vld [vmem:[#allocation2 + $0x78] sm:$0xe]  ;;  %v1772_v59 = vunpack.c.l.b16 %v1318_v8  ;;  %v2224_v8 = vshll.u32 %v1952_v6, 16 }
  0xeb   : > { %v2213_v57 = vor.u32 %v2212_v31, %v7020_v24  ;;  %v1323_v61 = vrot.slane %v1322_v0, 4  ;;  %v1332_v0 = vrot.slane %v1330_v62, 4  ;;  %v5382_v11 = vrot.slane %v2373_v15, 9 }
  0xec   : > { %v2204_v9 = vrot.slane %v2203_v47, 4  ;;  %v2496_v47 = vrot.slane %v7024_v30, 5  ;;  %v2230_v15 = vshll.u32 %v7039_v20, 16  ;;  %v2234_v30 = vshrl.u32 %v7039_v20, 16 }
  0xed   : > { %3395 = vmatmul.bf16.gmra.mxu3 %v5931_v23  ;;  %v1081_v23 = vld [vmem:[#allocation2 + $0x70] sm:$0xf]  ;;  %v2214_v46 = vrot.slane %v2213_v57, 4  ;;  %v1328_v31 = vsel %vm6638_vm13, %v1323_v61, %v1327_v27  ;;  %v1103_v57 = vld [vmem:[#allocation2 + $0x74] sm:$0x1]  ;;  %v5932_v61 = vld [vmem:[#allocation2 + $0x60] sm:$0xff] }
  0xee   : > { %v1339_v60 = vshll.u32 %v1081_v23, 16  ;;  %v1343_v56 = vshrl.u32 %v1081_v23, 16  ;;  %v1773_v27 = vunpack.c.l.b16 %v1328_v31  ;;  %v2209_v62 = vsel %vm6638_vm13, %v2204_v9, %v7020_v24 }
  0xef   : > { %v2219_v58 = vsel %vm6638_vm13, %v2214_v46, %v2218_v17  ;;  %v2638_v31 = vunpack.c.l.b16 %v2209_v62  ;;  %v2494_v24 = vsel %vm6651_vm14, %v5382_v11, %v2493_v63  ;;  %v2226_v17 = vrot.slane %v2224_v8, 5 }
  0xf0   : > { %v7026_v29 = vpop.f32.mrf.mxu3  ;;  %v3039_v40 = vpop.f32.mrf.mxu1  ;;  %v7037_v35 = vrot.slane %v1339_v60, 5  ;;  %v1345_v41 = vrot.slane %v1343_v56, 4  ;;  %v2221_v56 = vshrl.u32 %v1952_v6, 16  ;;  %v7059_v6 = vrot.slane %v2230_v15, 5 }
  0xf1   : > { %7881 = vst [vmem:[#allocation9_spill] sm:$0xff] %v7026_v29  ;;  %v3040_v52 = vadd.f32 %v3039_v40, %v6842_v36  ;;  %v1349_v40 = vshll.u32 %v1103_v57, 16  ;;  %v2639_v29 = vunpack.c.l.b16 %v2219_v58  ;;  %v2236_v1 = vrot.slane %v2234_v30, 4 }
  0xf2   : > { %v7030_v53 = vpop.f32.mrf.mxu2  ;;  %v1346_v36 = vor.u32 %v1345_v41, %v7037_v35  ;;  %v2223_v46 = vrot.slane %v2221_v56, 4  ;;  %v7061_v41 = vld [vmem:[#allocation2 + $0x8c] sm:$0x1] }
  0xf3   : > { %v2661_v62 = vpack.c.b16 %v2639_v29, %v2638_v31  ;;  %v2237_v30 = vor.u32 %v2236_v1, %v7059_v6  ;;  %v2374_v29 = vld [vmem:[#allocation2 + $0x84] sm:$0xe]  ;;  %v6022_v31 = vld [vmem:[%s7857_s3 + $0x190] sm:$0xff] }
  0xf4   : > { %v2227_v15 = vor.u32 %v2226_v17, %v2223_v46  ;;  %4634 = vmatpush.bf16.msra.mxu2 %v6022_v31 }
  0xf5   : > { %v2238_v17 = vrot.slane %v2237_v30, 4 }
  0xf6   : > { %3484 = vmatmul.bf16.gmra.mxu0 %v1795_v25  ;;  %v7041_v25 = vpop.f32.mrf.mxu0  ;;  %v2228_v46 = vrot.slane %v2227_v15, 4  ;;  %v5933_v15 = vld [vmem:[#allocation2 + $0x6c] sm:$0xff] }
  0xf7   : > { %3078 = vmatmul.bf16.gmra.mxu1 %v2660_v45  ;;  %3167 = vmatmul.bf16.gmra.mxu2 %v2724_v13  ;;  %v2495_v45 = vrot.slane %v2493_v63, 4  ;;  %v1351_v63 = vrot.slane %v1349_v40, 5 }
  0xf8   : > { %v7043_v23 = vpop.f32.mrf.mxu3  ;;  %v3041_v60 = vpop.f32.mrf.mxu1 }
  0xf9   : > { %7882 = vst [vmem:[#allocation10_spill] sm:$0xff] %v7043_v23  ;;  %v1336_v23 = vor.u32 %v1335_v18, %v1332_v0  ;;  %v2497_v9 = vsel %vm6651_vm14, %v2495_v45, %v2496_v47  ;;  %v2702_v0 = vunpack.c.l.b16 %v2494_v24  ;;  %v3042_v45 = vadd.f32 %v3041_v60, %v6872_v21 }
  0xfa   : > { %v3128_v13 = vpop.f32.mrf.mxu2  ;;  %v2703_v18 = vunpack.c.l.b16 %v2497_v9  ;;  %v1354_v47 = vshrl.u32 %v1082_v14, 16 }
  0xfb   : > { %v3129_v2 = vadd.f32 %v3128_v13, %v3040_v52  ;;  %v1796_v52 = vpack.c.b16 %v1773_v27, %v1772_v59  ;;  %v1337_v58 = vrot.slane %v1336_v23, 4  ;;  %v1347_v13 = vrot.slane %v1346_v36, 4  ;;  %v1083_v27 = vld [vmem:[#allocation2 + $0x7c] sm:$0xf] }
  0xfc   : > { %v2240_v59 = vshll.u32 %v7061_v41, 16  ;;  %v2725_v12 = vpack.c.b16 %v2703_v18, %v2702_v0  ;;  %v2500_v23 = vrot.slane %v7039_v20, 5  ;;  %v1363_v60 = vshll.u32 %v1083_v27, 16  ;;  %v6030_v20 = vld [vmem:[%s7857_s3 + $0x1d0] sm:$0xff]  ;;  %v1104_v18 = vld [vmem:[#allocation2 + $0x80] sm:$0x1] }
  0xfd   : > { %3400 = vmatmul.bf16.gmra.mxu3 %v5932_v61  ;;  %v1357_v61 = vshll.u32 %v1082_v14, 16  ;;  %v1352_v21 = vsel %vm6638_vm13, %v1347_v13, %v1351_v63  ;;  %v1356_v14 = vrot.slane %v1354_v47, 4  ;;  %v1367_v40 = vshrl.u32 %v1083_v27, 16  ;;  %v1954_v13 = vld [vmem:[#allocation2 + $0x90] sm:$0xf] }
  0xfe   : > { %v5383_v0 = vrot.slane %v2374_v29, 9  ;;  %4723 = vmatpush.bf16.msra.mxu3 %v6030_v20  ;;  %v7085_v63 = vld [vmem:[#allocation2 + $0x94] sm:$0xf]  ;;  %v2248_v47 = vshll.u32 %v1954_v13, 16  ;;  %v2233_v29 = vsel %vm6638_vm13, %v2228_v46, %v7059_v6  ;;  %v1373_v31 = vshll.u32 %v1104_v18, 16 }
  0xff   : > { %v1359_v1 = vrot.slane %v1357_v61, 5  ;;  %v2254_v61 = vshll.u32 %v7085_v63, 16 }
 0x100   : > { %v3361_v57 = vpop.f32.mrf.mxu3  ;;  %v2250_v20 = vrot.slane %v2248_v47, 5 }
 0x101   : > { %v3362_v11 = vadd.f32 %v3361_v57, %v3129_v2  ;;  %v1342_v2 = vsel %vm6638_vm13, %v1337_v58, %v7037_v35  ;;  %v2242_v35 = vrot.slane %v2240_v59, 5  ;;  %v7082_v57 = vunpack.c.l.b16 %v1352_v21 }
 0x102   : > { %v3130_v8 = vpop.f32.mrf.mxu2  ;;  %v2503_v58 = vrot.slane %v7061_v41, 5  ;;  %v1360_v30 = vor.u32 %v1359_v1, %v1356_v14  ;;  %v7090_v59 = vrot.slane %v1363_v60, 5  ;;  %v1369_v21 = vrot.slane %v1367_v40, 4 }
 0x103   : > { %v3450_v56 = vpop.f32.mrf.mxu0  ;;  %v3131_v24 = vadd.f32 %v3130_v8, %v3042_v45  ;;  %v2245_v45 = vshrl.u32 %v1954_v13, 16  ;;  %v2501_v1 = vsel %vm6651_vm14, %v5383_v0, %v2500_v23  ;;  %v7109_v46 = vrot.slane %v2254_v61, 5 }
 0x104   : > { %v3044_v9 = vpop.f32.mrf.mxu1  ;;  %v7067_v36 = vadd.f32 %v3450_v56, %v3362_v11  ;;  %v2258_v56 = vshrl.u32 %v7085_v63, 16  ;;  %v1361_v13 = vrot.slane %v1360_v30, 4  ;;  %v1370_v0 = vor.u32 %v1369_v21, %v7090_v59 }
 0x105   : > { %v3045_v8 = vadd.f32 %v3044_v9, %v6899_v10  ;;  %v6038_v10 = vld [vmem:[%s7857_s3 + $0x210] sm:$0xff]  ;;  %v2247_v40 = vrot.slane %v2245_v45, 4  ;;  %v1375_v45 = vrot.slane %v1373_v31, 5 }
 0x106   : > { %3489 = vmatmul.bf16.gmra.mxu0 %v1796_v52  ;;  %v7080_v52 = vunpack.c.l.b16 %v1342_v2  ;;  %v2243_v2 = vsel %vm6638_vm13, %v2238_v17, %v2242_v35  ;;  %v2260_v17 = vrot.slane %v2258_v56, 4  ;;  %v2640_v35 = vunpack.c.l.b16 %v2233_v29 }
 0x107   : > { %3083 = vmatmul.bf16.gmra.mxu1 %v2661_v62  ;;  %3172 = vmatmul.bf16.gmra.mxu2 %v2725_v12  ;;  %v2502_v62 = vrot.slane %v2500_v23, 4  ;;  %v2641_v18 = vunpack.c.l.b16 %v2243_v2  ;;  %v2251_v47 = vor.u32 %v2250_v20, %v2247_v40  ;;  %v1366_v29 = vsel %vm6638_vm13, %v1361_v13, %v7090_v59 }
 0x108   : > { %v3363_v11 = vpop.f32.mrf.mxu3  ;;  %4812 = vmatpush.bf16.msra.mxu0 %v6038_v10  ;;  %v2261_v61 = vor.u32 %v2260_v17, %v7109_v46  ;;  %v2507_v40 = vrot.slane %v7085_v63, 5 }
 0x109   : > { %v3364_v12 = vadd.f32 %v3363_v11, %v3131_v24  ;;  %v5958_v24 = vld [vmem:[%s7857_s3 + $0x90] sm:$0xff]  ;;  %v2504_v6 = vsel %vm6651_vm14, %v2502_v62, %v2503_v58  ;;  %v7111_v11 = vld [vmem:[#allocation2 + $0x98] sm:$0x1]  ;;  %v1797_v62 = vpack.c.b16 %v7082_v57, %v7080_v52  ;;  %v1084_v58 = vld [vmem:[#allocation2 + $0x84] sm:$0xf]  ;;  %v1371_v57 = vrot.slane %v1370_v0, 4 }
 0x10a   : > { %v3133_v27 = vpop.f32.mrf.mxu2  ;;  %3535 = vmatpush.bf16.msra.mxu1 %v5958_v24  ;;  %v2705_v23 = vunpack.c.l.b16 %v2504_v6  ;;  %v2264_v56 = vshll.u32 %v7111_v11, 16  ;;  %v1378_v24 = vshrl.u32 %v1084_v58, 16  ;;  %v1381_v31 = vshll.u32 %v1084_v58, 16  ;;  %v2375_v6 = vld [vmem:[#allocation2 + $0x90] sm:$0xe] }
 0x10b   : > { %v3452_v41 = vpop.f32.mrf.mxu0  ;;  %v3134_v9 = vadd.f32 %v3133_v27, %v3045_v8  ;;  %v2704_v8 = vunpack.c.l.b16 %v2501_v1  ;;  %v2662_v27 = vpack.c.b16 %v2641_v18, %v2640_v35  ;;  %v2252_v17 = vrot.slane %v2251_v47, 4  ;;  %v1956_v58 = vld [vmem:[#allocation2 + $0x9c] sm:$0xf] }
 0x10c   : > { %v3046_v14 = vpop.f32.mrf.mxu1  ;;  %v7107_v60 = vadd.f32 %v3452_v41, %v3364_v12  ;;  %v5384_v59 = vrot.slane %v2375_v6, 9  ;;  %v1380_v18 = vrot.slane %v1378_v24, 4  ;;  %v1383_v13 = vrot.slane %v1381_v31, 5 }
 0x10d   : > { %3405 = vmatmul.bf16.gmra.mxu3 %v5933_v15  ;;  %v1085_v15 = vld [vmem:[#allocation2 + $0x88] sm:$0xf]  ;;  %v3047_v30 = vadd.f32 %v3046_v14, %v6934_v7  ;;  %v2726_v52 = vpack.c.b16 %v2705_v23, %v2704_v8  ;;  %v2262_v7 = vrot.slane %v2261_v61, 4  ;;  %v2266_v14 = vrot.slane %v2264_v56, 5 }
 0x10e   : > { %v1387_v20 = vshll.u32 %v1085_v15, 16  ;;  %v1376_v8 = vsel %vm6638_vm13, %v1371_v57, %v1375_v45  ;;  %v7127_v23 = vunpack.c.l.b16 %v1366_v29  ;;  %v2509_v0 = vrot.slane %v2507_v40, 4 }
 0x10f   : > { %v2510_v63 = vrot.slane %v7111_v11, 5  ;;  %v2267_v61 = vsel %vm6638_vm13, %v2262_v7, %v2266_v14  ;;  %v2269_v11 = vshrl.u32 %v1956_v58, 16  ;;  %v2272_v29 = vshll.u32 %v1956_v58, 16  ;;  %v7150_v58 = vld [vmem:[#allocation2 + $0xa4] sm:$0x1] }
 0x110   : > { %v3366_v12 = vpop.f32.mrf.mxu3  ;;  %v7137_v56 = vrot.slane %v1387_v20, 5  ;;  %v1384_v57 = vor.u32 %v1383_v13, %v1380_v18  ;;  %v1086_v13 = vld [vmem:[#allocation2 + $0x90] sm:$0xf] }
 0x111   : > { %v3367_v41 = vadd.f32 %v3366_v12, %v3134_v9  ;;  %v1391_v9 = vshrl.u32 %v1085_v15, 16  ;;  %v7130_v12 = vld [vmem:[#allocation2 + $0xa0] sm:$0xf]  ;;  %v2271_v14 = vrot.slane %v2269_v11, 4  ;;  %v2274_v18 = vrot.slane %v2272_v29, 5 }
 0x112   : > { %v3135_v21 = vpop.f32.mrf.mxu2  ;;  %v2278_v24 = vshll.u32 %v7130_v12, 16 }
 0x113   : > { %v3455_v2 = vpop.f32.mrf.mxu0  ;;  %v3136_v10 = vadd.f32 %v3135_v21, %v3047_v30  ;;  %v1393_v15 = vrot.slane %v1391_v9, 4  ;;  %v5934_v30 = vld [vmem:[#allocation2 + $0x78] sm:$0xff]  ;;  %v1777_v21 = vunpack.c.l.b16 %v1376_v8  ;;  %v2275_v29 = vor.u32 %v2274_v18, %v2271_v14 }
 0x114   : > { %v3049_v1 = vpop.f32.mrf.mxu1  ;;  %v7123_v35 = vadd.f32 %v3455_v2, %v3367_v41 }
 0x115   : > { %v3050_v41 = vadd.f32 %v3049_v1, %v6954_v38  ;;  %v2508_v38 = vsel %vm6651_vm14, %v5384_v59, %v2507_v40  ;;  %v1394_v1 = vor.u32 %v1393_v15, %v7137_v56  ;;  %v1798_v8 = vpack.c.b16 %v1777_v21, %v7127_v23 }
 0x116   : > { %3494 = vmatmul.bf16.gmra.mxu0 %v1797_v62  ;;  %v2257_v62 = vsel %vm6638_vm13, %v2252_v17, %v7109_v46  ;;  %v2282_v46 = vshrl.u32 %v7130_v12, 16  ;;  %v2643_v17 = vunpack.c.l.b16 %v2267_v61  ;;  %v1385_v59 = vrot.slane %v1384_v57, 4 }
 0x117   : > { %3088 = vmatmul.bf16.gmra.mxu1 %v2662_v27  ;;  %3177 = vmatmul.bf16.gmra.mxu2 %v2726_v52  ;;  %v1105_v27 = vld [vmem:[#allocation2 + $0x8c] sm:$0x1]  ;;  %v2642_v20 = vunpack.c.l.b16 %v2257_v62  ;;  %v1402_v15 = vshrl.u32 %v1086_v13, 16  ;;  %v2288_v23 = vshll.u32 %v7150_v58, 16 }
 0x118   : > { %v3368_v47 = vpop.f32.mrf.mxu3  ;;  %v1397_v7 = vshll.u32 %v1105_v27, 16  ;;  %v2284_v62 = vrot.slane %v2282_v46, 4  ;;  %v1405_v27 = vshll.u32 %v1086_v13, 16  ;;  %v1087_v46 = vld [vmem:[#allocation2 + $0x94] sm:$0xf] }
 0x119   : > { %v3369_v45 = vadd.f32 %v3368_v47, %v3136_v10  ;;  %v2511_v10 = vsel %vm6651_vm14, %v2509_v0, %v2510_v63  ;;  %v7152_v47 = vrot.slane %v2278_v24, 5  ;;  %v2663_v61 = vpack.c.b16 %v2643_v17, %v2642_v20 }
 0x11a   : > { %v3138_v52 = vpop.f32.mrf.mxu2  ;;  %v2707_v40 = vunpack.c.l.b16 %v2511_v10  ;;  %v1395_v0 = vrot.slane %v1394_v1, 4  ;;  %v1399_v63 = vrot.slane %v1397_v7, 5  ;;  %v2514_v24 = vrot.slane %v7130_v12, 5 }
 0x11b   : > { %v3457_v2 = vpop.f32.mrf.mxu0  ;;  %v3139_v31 = vadd.f32 %v3138_v52, %v3050_v41  ;;  %v2285_v52 = vor.u32 %v2284_v62, %v7152_v47  ;;  %v1404_v1 = vrot.slane %v1402_v15, 4  ;;  %v1407_v7 = vrot.slane %v1405_v27, 5  ;;  %v6029_v62 = vld [vmem:[%s7857_s3 + $0x1c8] sm:$0xff]  ;;  %v1106_v15 = vld [vmem:[#allocation2 + $0x98] sm:$0x1] }
 0x11c   : > { %v3051_v6 = vpop.f32.mrf.mxu1  ;;  %v7142_v9 = vadd.f32 %v3457_v2, %v3369_v45  ;;  %v2706_v45 = vunpack.c.l.b16 %v2508_v38  ;;  %v1390_v38 = vsel %vm6638_vm13, %v1385_v59, %v7137_v56  ;;  %v2276_v12 = vrot.slane %v2275_v29, 4  ;;  %v6021_v56 = vld [vmem:[%s7857_s3 + $0x188] sm:$0xff]  ;;  %4724 = vmatpush.bf16.msra.mxu3 %v6029_v62 }
 0x11d   : > { %3410 = vmatmul.bf16.gmra.mxu3 %v5934_v30  ;;  %v3052_v11 = vadd.f32 %v3051_v6, %v6980_v50  ;;  %v1400_v6 = vsel %vm6638_vm13, %v1395_v0, %v1399_v63  ;;  %v2290_v14 = vrot.slane %v2288_v23, 5  ;;  %v1411_v18 = vshll.u32 %v1087_v46, 16  ;;  %v7177_v0 = vld [vmem:[#allocation2 + $0xac] sm:$0xf]  ;;  %4635 = vmatpush.bf16.msra.mxu2 %v6021_v56 }
 0x11e   : > { %v2727_v17 = vpack.c.b16 %v2707_v40, %v2706_v45  ;;  %v1415_v13 = vshrl.u32 %v1087_v46, 16  ;;  %v2516_v40 = vrot.slane %v2514_v24, 4  ;;  %v2517_v59 = vrot.slane %v7150_v58, 5 }
 0x11f   : > { %v1408_v27 = vor.u32 %v1407_v7, %v1404_v1  ;;  %v2302_v29 = vshll.u32 %v7177_v0, 16  ;;  %v2281_v58 = vsel %vm6638_vm13, %v2276_v12, %v7152_v47  ;;  %v5957_v47 = vld [vmem:[%s7857_s3 + $0x88] sm:$0xff]  ;;  %v1421_v12 = vshll.u32 %v1106_v15, 16  ;;  %v1088_v15 = vld [vmem:[#allocation2 + $0x9c] sm:$0xf] }
 0x120   : > { %v3371_v41 = vpop.f32.mrf.mxu3  ;;  %3536 = vmatpush.bf16.msra.mxu1 %v5957_v47 }
 0x121   : > { %v3372_v30 = vadd.f32 %v3371_v41, %v3139_v31  ;;  %v2376_v31 = vld [vmem:[#allocation2 + $0x9c] sm:$0xe]  ;;  %v1958_v41 = vld [vmem:[#allocation2 + $0xa8] sm:$0xf] }
 0x122   : > { %v3140_v21 = vpop.f32.mrf.mxu2  ;;  %v5385_v45 = vrot.slane %v2376_v31, 9  ;;  %v1417_v31 = vrot.slane %v1415_v13, 4  ;;  %v7201_v13 = vrot.slane %v2302_v29, 5 }
 0x123   : > { %v3460_v2 = vpop.f32.mrf.mxu0  ;;  %v3141_v20 = vadd.f32 %v3140_v21, %v3052_v11  ;;  %v2296_v11 = vshll.u32 %v1958_v41, 16  ;;  %v7183_v21 = vrot.slane %v1411_v18, 5 }
 0x124   : > { %v3054_v57 = vpop.f32.mrf.mxu1  ;;  %v7161_v10 = vadd.f32 %v3460_v2, %v3372_v30  ;;  %v2293_v30 = vshrl.u32 %v1958_v41, 16  ;;  %v5935_v2 = vld [vmem:[#allocation2 + $0x84] sm:$0xff]  ;;  %v7203_v41 = vld [vmem:[#allocation2 + $0xb0] sm:$0x1] }
 0x125   : > { %v3055_v50 = vadd.f32 %v3054_v57, %v7022_v54  ;;  %v2286_v54 = vrot.slane %v2285_v52, 4  ;;  %v2306_v52 = vshrl.u32 %v7177_v0, 16  ;;  %v2298_v56 = vrot.slane %v2296_v11, 5 }
 0x126   : > { %3499 = vmatmul.bf16.gmra.mxu0 %v1798_v8  ;;  %v7173_v8 = vunpack.c.l.b16 %v1390_v38  ;;  %v2515_v38 = vsel %vm6651_vm14, %v5385_v45, %v2514_v24  ;;  %v2295_v18 = vrot.slane %v2293_v30, 4  ;;  %v2312_v29 = vshll.u32 %v7203_v41, 16 }
 0x127   : > { %3093 = vmatmul.bf16.gmra.mxu1 %v2663_v61  ;;  %3182 = vmatmul.bf16.gmra.mxu2 %v2727_v17  ;;  %v7175_v61 = vunpack.c.l.b16 %v1400_v6  ;;  %v2291_v17 = vsel %vm6638_vm13, %v2286_v54, %v2290_v14  ;;  %v6037_v6 = vld [vmem:[%s7857_s3 + $0x208] sm:$0xff]  ;;  %v2308_v62 = vrot.slane %v2306_v52, 4  ;;  %v2644_v54 = vunpack.c.l.b16 %v2281_v58 }
 0x128   : > { %v3373_v63 = vpop.f32.mrf.mxu3  ;;  %4813 = vmatpush.bf16.msra.mxu0 %v6037_v6  ;;  %v2645_v45 = vunpack.c.l.b16 %v2291_v17  ;;  %v2377_v6 = vld [vmem:[#allocation2 + $0xa8] sm:$0xe] }
 0x129   : > { %v3374_v23 = vadd.f32 %v3373_v63, %v3141_v20  ;;  %v2518_v20 = vsel %vm6651_vm14, %v2516_v40, %v2517_v59  ;;  %v2708_v40 = vunpack.c.l.b16 %v2515_v38  ;;  %v1418_v63 = vor.u32 %v1417_v31, %v7183_v21 }
 0x12a   : > { %v3143_v57 = vpop.f32.mrf.mxu2  ;;  %v2709_v59 = vunpack.c.l.b16 %v2518_v20  ;;  %v2309_v11 = vor.u32 %v2308_v62, %v7201_v13  ;;  %v2664_v52 = vpack.c.b16 %v2645_v45, %v2644_v54  ;;  %v1426_v31 = vshrl.u32 %v1088_v15, 16 }
 0x12b   : > { %v3462_v46 = vpop.f32.mrf.mxu0  ;;  %v3144_v1 = vadd.f32 %v3143_v57, %v3055_v50  ;;  %v1409_v50 = vrot.slane %v1408_v27, 4  ;;  %v1423_v57 = vrot.slane %v1421_v12, 5  ;;  %v1419_v20 = vrot.slane %v1418_v63, 4  ;;  %v1960_v63 = vld [vmem:[#allocation2 + $0xb4] sm:$0xf] }
 0x12c   : > { %v3056_v7 = vpop.f32.mrf.mxu1  ;;  %v7198_v14 = vadd.f32 %v3462_v46, %v3374_v23  ;;  %v2299_v23 = vor.u32 %v2298_v56, %v2295_v18  ;;  %v2728_v46 = vpack.c.b16 %v2709_v59, %v2708_v40  ;;  %v2310_v62 = vrot.slane %v2309_v11, 4 }
 0x12d   : > { %v3057_v24 = vadd.f32 %v3056_v7, %v7041_v25  ;;  %3415 = vmatmul.bf16.gmra.mxu3 %v5935_v2  ;;  %v1799_v25 = vpack.c.b16 %v7175_v61, %v7173_v8  ;;  %v1089_v2 = vld [vmem:[#allocation2 + $0xa0] sm:$0xf]  ;;  %v1414_v27 = vsel %vm6638_vm13, %v1409_v50, %v7183_v21  ;;  %v1429_v8 = vshll.u32 %v1088_v15, 16  ;;  %v7221_v15 = vld [vmem:[#allocation2 + $0xb8] sm:$0xf] }
 0x12e   : > { %v2521_v7 = vrot.slane %v7177_v0, 5  ;;  %v1435_v18 = vshll.u32 %v1089_v2, 16  ;;  %v2314_v12 = vrot.slane %v2312_v29, 5  ;;  %v1439_v54 = vshrl.u32 %v1089_v2, 16 }
 0x12f   : > { %v5386_v45 = vrot.slane %v2377_v6, 9  ;;  %v1428_v40 = vrot.slane %v1426_v31, 4  ;;  %v1431_v21 = vrot.slane %v1429_v8, 5  ;;  %v7218_v59 = vunpack.c.l.b16 %v1414_v27 }
 0x130   : > { %v3376_v30 = vpop.f32.mrf.mxu3  ;;  %v2523_v50 = vrot.slane %v2521_v7, 4  ;;  %v2524_v0 = vrot.slane %v7203_v41, 5  ;;  %v7228_v11 = vrot.slane %v1435_v18, 5  ;;  %v1441_v29 = vrot.slane %v1439_v54, 4 }
 0x131   : > { %v3377_v58 = vadd.f32 %v3376_v30, %v3144_v1  ;;  %v2300_v1 = vrot.slane %v2299_v23, 4  ;;  %v2315_v23 = vsel %vm6638_vm13, %v2310_v62, %v2314_v12  ;;  %v2317_v41 = vshrl.u32 %v1960_v63, 16 }
 0x132   : > { %v3145_v38 = vpop.f32.mrf.mxu2  ;;  %v2326_v31 = vshll.u32 %v7221_v15, 16  ;;  %v2522_v18 = vsel %vm6651_vm14, %v5386_v45, %v2521_v7  ;;  %v1442_v62 = vor.u32 %v1441_v29, %v7228_v11 }
 0x133   : > { %v3465_v17 = vpop.f32.mrf.mxu0  ;;  %v3146_v61 = vadd.f32 %v3145_v38, %v3057_v24  ;;  %v1424_v24 = vsel %vm6638_vm13, %v1419_v20, %v1423_v57  ;;  %v2320_v57 = vshll.u32 %v1960_v63, 16  ;;  %v1432_v20 = vor.u32 %v1431_v21, %v1428_v40  ;;  %v7240_v63 = vld [vmem:[#allocation2 + $0xbc] sm:$0x1] }
 0x134   : > { %v3059_v47 = vpop.f32.mrf.mxu1  ;;  %v7214_v56 = vadd.f32 %v3465_v17, %v3377_v58  ;;  %v1781_v38 = vunpack.c.l.b16 %v1424_v24  ;;  %v2319_v54 = vrot.slane %v2317_v41, 4  ;;  %v2710_v21 = vunpack.c.l.b16 %v2522_v18 }
 0x135   : > { %v3060_v58 = vadd.f32 %v3059_v47, %v6818_v55  ;;  %v2525_v55 = vsel %vm6651_vm14, %v2523_v50, %v2524_v0  ;;  %v2322_v40 = vrot.slane %v2320_v57, 5  ;;  %v2336_v41 = vshll.u32 %v7240_v63, 16  ;;  %v1091_v57 = vld [vmem:[#allocation2 + $0xac] sm:$0xf] }
 0x136   : > { %3504 = vmatmul.bf16.gmra.mxu0 %v1799_v25  ;;  %v2305_v25 = vsel %vm6638_vm13, %v2300_v1, %v7201_v13  ;;  %v2330_v13 = vshrl.u32 %v7221_v15, 16  ;;  %v2647_v1 = vunpack.c.l.b16 %v2315_v23  ;;  %v2711_v24 = vunpack.c.l.b16 %v2525_v55 }
 0x137   : > { %3098 = vmatmul.bf16.gmra.mxu1 %v2664_v52  ;;  %3187 = vmatmul.bf16.gmra.mxu2 %v2728_v46  ;;  %v5936_v52 = vld [vmem:[#allocation2 + $0x90] sm:$0xff]  ;;  %v1107_v46 = vld [vmem:[#allocation2 + $0xa4] sm:$0x1]  ;;  %v2646_v47 = vunpack.c.l.b16 %v2305_v25  ;;  %v1800_v45 = vpack.c.b16 %v1781_v38, %v7218_v59  ;;  %v1443_v25 = vrot.slane %v1442_v62, 4  ;;  %v2528_v59 = vrot.slane %v7221_v15, 5 }
 0x138   : > { %v3378_v30 = vpop.f32.mrf.mxu3  ;;  %v1445_v12 = vshll.u32 %v1107_v46, 16  ;;  %v2332_v7 = vrot.slane %v2330_v13, 4  ;;  %v2323_v46 = vor.u32 %v2322_v40, %v2319_v54  ;;  %v1463_v15 = vshrl.u32 %v1091_v57, 16  ;;  %v6020_v54 = vld [vmem:[%s7857_s3 + $0x180] sm:$0xff] }
 0x139   : > { %v3379_v2 = vadd.f32 %v3378_v30, %v3146_v61  ;;  %v7242_v30 = vrot.slane %v2326_v31, 5  ;;  %v2665_v0 = vpack.c.b16 %v2647_v1, %v2646_v47  ;;  %v2729_v31 = vpack.c.b16 %v2711_v24, %v2710_v21  ;;  %v6028_v40 = vld [vmem:[%s7857_s3 + $0x1c0] sm:$0xff]  ;;  %4636 = vmatpush.bf16.msra.mxu2 %v6020_v54 }
 0x13a   : > { %v3148_v27 = vpop.f32.mrf.mxu2  ;;  %v1447_v23 = vrot.slane %v1445_v12, 5  ;;  %v2324_v62 = vrot.slane %v2323_v46, 4  ;;  %v2338_v12 = vrot.slane %v2336_v41, 5  ;;  %4725 = vmatpush.bf16.msra.mxu3 %v6028_v40 }
 0x13b   : > { %v3467_v17 = vpop.f32.mrf.mxu0  ;;  %v3149_v8 = vadd.f32 %v3148_v27, %v3060_v58  ;;  %v1090_v58 = vld [vmem:[#allocation2 + $0xa8] sm:$0xf]  ;;  %v2333_v13 = vor.u32 %v2332_v7, %v7242_v30  ;;  %v2531_v7 = vrot.slane %v7240_v63, 5 }
 0x13c   : > { %v3061_v6 = vpop.f32.mrf.mxu1  ;;  %v7237_v61 = vadd.f32 %v3467_v17, %v3379_v2  ;;  %v1433_v2 = vrot.slane %v1432_v20, 4  ;;  %v2378_v20 = vld [vmem:[#allocation2 + $0xb4] sm:$0xe]  ;;  %v1450_v55 = vshrl.u32 %v1090_v58, 16  ;;  %v1453_v47 = vshll.u32 %v1090_v58, 16 }
 0x13d   : > { %3420 = vmatmul.bf16.gmra.mxu3 %v5936_v52  ;;  %v3062_v52 = vadd.f32 %v3061_v6, %v6837_v28  ;;  %v1459_v6 = vshll.u32 %v1091_v57, 16  ;;  %v2334_v21 = vrot.slane %v2333_v13, 4  ;;  %v5387_v24 = vrot.slane %v2378_v20, 9 }
 0x13e   : > { %v1438_v28 = vsel %vm6638_vm13, %v1433_v2, %v7228_v11  ;;  %v2530_v11 = vrot.slane %v2528_v59, 4  ;;  %v1455_v2 = vrot.slane %v1453_v47, 5  ;;  %v2329_v47 = vsel %vm6638_vm13, %v2324_v62, %v7242_v30 }
 0x140   : > { %v3381_v50 = vpop.f32.mrf.mxu3 }
 0x141   : > { %v3382_v29 = vadd.f32 %v3381_v50, %v3149_v8  ;;  %v1448_v8 = vsel %vm6638_vm13, %v1443_v25, %v1447_v23  ;;  %v7263_v50 = vunpack.c.l.b16 %v1438_v28  ;;  %v1962_v25 = vld [vmem:[#allocation2 + $0xc0] sm:$0xf]  ;;  %v7267_v23 = vld [vmem:[#allocation2 + $0xc4] sm:$0xf]  ;;  %v2339_v28 = vsel %vm6638_vm13, %v2334_v21, %v2338_v12 }
 0x142   : > { %v3150_v27 = vpop.f32.mrf.mxu2  ;;  %v2344_v46 = vshll.u32 %v1962_v25, 16  ;;  %v2350_v41 = vshll.u32 %v7267_v23, 16  ;;  %v2354_v13 = vshrl.u32 %v7267_v23, 16 }
 0x143   : > { %v3470_v17 = vpop.f32.mrf.mxu0  ;;  %v3151_v38 = vadd.f32 %v3150_v27, %v3062_v52  ;;  %v2341_v52 = vshrl.u32 %v1962_v25, 16  ;;  %v1108_v27 = vld [vmem:[#allocation2 + $0xb0] sm:$0x1]  ;;  %v1979_v25 = vld [vmem:[#allocation2 + $0xc8] sm:$0x1] }
 0x144   : > { %v3064_v18 = vpop.f32.mrf.mxu1  ;;  %v7249_v1 = vadd.f32 %v3470_v17, %v3382_v29  ;;  %v7269_v29 = vrot.slane %v1459_v6, 5  ;;  %v5937_v17 = vld [vmem:[#allocation2 + $0x9c] sm:$0xff]  ;;  %v2346_v62 = vrot.slane %v2344_v46, 5  ;;  %v1469_v40 = vshll.u32 %v1108_v27, 16 }
 0x145   : > { %v3065_v57 = vadd.f32 %v3064_v18, %v6857_v3  ;;  %v2532_v3 = vsel %vm6651_vm14, %v2530_v11, %v2531_v7  ;;  %v6036_v18 = vld [vmem:[%s7857_s3 + $0x200] sm:$0xff]  ;;  %v2343_v30 = vrot.slane %v2341_v52, 4  ;;  %v2356_v21 = vrot.slane %v2354_v13, 4 }
 0x146   : > { %7883 = vst [vmem:[#allocation11_spill] sm:$0xff] %v7249_v1  ;;  %3509 = vmatmul.bf16.gmra.mxu0 %v1800_v45  ;;  %v7265_v45 = vunpack.c.l.b16 %v1448_v8  ;;  %v2529_v8 = vsel %vm6651_vm14, %v5387_v24, %v2528_v59  ;;  %v2352_v59 = vrot.slane %v2350_v41, 5  ;;  %v2648_v24 = vunpack.c.l.b16 %v2329_v47 }
 0x147   : > { %3103 = vmatmul.bf16.gmra.mxu1 %v2665_v0  ;;  %3192 = vmatmul.bf16.gmra.mxu2 %v2729_v31  ;;  %v1452_v0 = vrot.slane %v1450_v55, 4  ;;  %v1465_v31 = vrot.slane %v1463_v15, 4  ;;  %v2649_v11 = vunpack.c.l.b16 %v2339_v28  ;;  %v2713_v1 = vunpack.c.l.b16 %v2532_v3  ;;  %v1092_v28 = vld [vmem:[#allocation2 + $0xb4] sm:$0xf] }
 0x148   : > { %v3383_v58 = vpop.f32.mrf.mxu3  ;;  %4814 = vmatpush.bf16.msra.mxu0 %v6036_v18  ;;  %v1801_v52 = vpack.c.b16 %v7265_v45, %v7263_v50  ;;  %v2347_v46 = vor.u32 %v2346_v62, %v2343_v30  ;;  %v2360_v27 = vshll.u32 %v1979_v25, 16  ;;  %v2379_v18 = vld [vmem:[#allocation2 + $0xc0] sm:$0xe]  ;;  %v2535_v50 = vrot.slane %v7267_v23, 5  ;;  %v1093_v45 = vld [vmem:[#allocation2 + $0xb8] sm:$0xf] }
 0x149   : > { %v3384_v63 = vadd.f32 %v3383_v58, %v3151_v38  ;;  %v5956_v38 = vld [vmem:[%s7857_s3 + $0x80] sm:$0xff]  ;;  %v1456_v12 = vor.u32 %v1455_v2, %v1452_v0  ;;  %v1466_v7 = vor.u32 %v1465_v31, %v7269_v29  ;;  %v2712_v58 = vunpack.c.l.b16 %v2529_v8 }
 0x14a   : > { %v3153_v55 = vpop.f32.mrf.mxu2  ;;  %3537 = vmatpush.bf16.msra.mxu1 %v5956_v38  ;;  %v1471_v0 = vrot.slane %v1469_v40, 5  ;;  %v2357_v2 = vor.u32 %v2356_v21, %v2352_v59  ;;  %v2348_v38 = vrot.slane %v2347_v46, 4  ;;  %v5388_v40 = vrot.slane %v2379_v18, 9  ;;  %v1109_v18 = vld [vmem:[#allocation2 + $0xbc] sm:$0x1] }
 0x14b   : > { %v3472_v20 = vpop.f32.mrf.mxu0  ;;  %v3154_v6 = vadd.f32 %v3153_v55, %v3065_v57  ;;  %v1457_v57 = vrot.slane %v1456_v12, 4  ;;  %v1467_v13 = vrot.slane %v1466_v7, 4  ;;  %v2730_v31 = vpack.c.b16 %v2713_v1, %v2712_v58  ;;  %v6188_v58 = vld [vmem:[#allocation2 + $0x4] sm:$0xf] }
 0x14c   : > { %v3066_v15 = vpop.f32.mrf.mxu1  ;;  %v7289_v54 = vadd.f32 %v3472_v20, %v3384_v63  ;;  %v2358_v62 = vrot.slane %v2357_v2, 4  ;;  %v2362_v12 = vrot.slane %v2360_v27, 5  ;;  %v1483_v21 = vshll.u32 %v1093_v45, 16  ;;  %v5938_v27 = vld [vmem:[#allocation2 + $0xa8] sm:$0xff] }
 0x14d   : > { %3425 = vmatmul.bf16.gmra.mxu3 %v5937_v17  ;;  %v3067_v41 = vadd.f32 %v3066_v15, %v6886_v48  ;;  %v2666_v17 = vpack.c.b16 %v2649_v11, %v2648_v24  ;;  %v1462_v48 = vsel %vm6638_vm13, %v1457_v57, %v7269_v29  ;;  %v1472_v1 = vsel %vm6638_vm13, %v1467_v13, %v1471_v0 }
 0x14e   : > { %v1477_v15 = vshll.u32 %v1092_v28, 16  ;;  %v1487_v24 = vshrl.u32 %v1093_v45, 16  ;;  %v2353_v23 = vsel %vm6638_vm13, %v2348_v38, %v2352_v59  ;;  %v2537_v11 = vrot.slane %v2535_v50, 4  ;;  %v6189_v45 = vld [vmem:[#allocation2 + $0x8] sm:$0x1] }
 0x14f   : > { %v2538_v7 = vrot.slane %v1979_v25, 5  ;;  %v1785_v2 = vunpack.c.l.b16 %v1472_v1  ;;  %v2363_v29 = vsel %vm6638_vm13, %v2358_v62, %v2362_v12  ;;  %v2536_v59 = vsel %vm6651_vm14, %v5388_v40, %v2535_v50  ;;  %v3620_v12 = vld [vmem:[#allocation2 + $0x18] sm:$0xf]  ;;  %v1497_v50 = vld [vmem:[#allocation2] sm:$0xe] }
 0x150   : > { %v3386_v63 = vpop.f32.mrf.mxu3  ;;  %v7310_v25 = vrot.slane %v1483_v21, 5  ;;  %v2651_v38 = vunpack.c.l.b16 %v2363_v29  ;;  %v1569_v62 = vrot.slane %v6189_v45, 5  ;;  %v1493_v21 = vshll.u32 %v1109_v18, 16 }
 0x151   : > { %v3387_v20 = vadd.f32 %v3386_v63, %v3154_v6  ;;  %v1474_v6 = vshrl.u32 %v1092_v28, 16  ;;  %v1784_v63 = vunpack.c.l.b16 %v1462_v48 }
 0x152   : > { %v3155_v47 = vpop.f32.mrf.mxu2 }
 0x153   : > { %v3475_v55 = vpop.f32.mrf.mxu0  ;;  %v3156_v8 = vadd.f32 %v3155_v47, %v3067_v41  ;;  %v1479_v41 = vrot.slane %v1477_v15, 5  ;;  %v1489_v47 = vrot.slane %v1487_v24, 4  ;;  %v1802_v48 = vpack.c.b16 %v1785_v2, %v1784_v63 }
 0x154   : > { %v3069_v3 = vpop.f32.mrf.mxu1  ;;  %v7296_v30 = vadd.f32 %v3475_v55, %v3387_v20  ;;  %v1476_v20 = vrot.slane %v1474_v6, 4  ;;  %v2650_v55 = vunpack.c.l.b16 %v2353_v23  ;;  %v7316_v6 = vld [vmem:[#allocation2 + $0x1c] sm:$0xf]  ;;  %v2714_v15 = vunpack.c.l.b16 %v2536_v59 }
 0x155   : > { %v3070_v0 = vadd.f32 %v3069_v3, %v6926_v44  ;;  %v5293_v24 = vrot.slane %v1497_v50, 9  ;;  %v3678_v2 = vshll.u32 %v7316_v6, 16 }
 0x156   : > { %3514 = vmatmul.bf16.gmra.mxu0 %v1801_v52  ;;  %v1566_v52 = vrot.slane %v6188_v58, 5  ;;  %v1480_v1 = vor.u32 %v1479_v41, %v1476_v20  ;;  %v2667_v23 = vpack.c.b16 %v2651_v38, %v2650_v55  ;;  %v3672_v58 = vshll.u32 %v3620_v12, 16 }
 0x157   : > { %3108 = vmatmul.bf16.gmra.mxu1 %v2666_v17  ;;  %3197 = vmatmul.bf16.gmra.mxu2 %v2730_v31 }
 0x158   : > { %v3388_v46 = vpop.f32.mrf.mxu3  ;;  %v1568_v3 = vrot.slane %v1566_v52, 4  ;;  %v1567_v29 = vsel %vm6651_vm14, %v5293_v24, %v1566_v52  ;;  %v1481_v55 = vrot.slane %v1480_v1, 4  ;;  %v5939_v24 = vld [vmem:[#allocation2 + $0xb4] sm:$0xff] }
 0x159   : > { %v3389_v57 = vadd.f32 %v3388_v46, %v3156_v8  ;;  %v2539_v8 = vsel %vm6651_vm14, %v2537_v11, %v2538_v7  ;;  %v1490_v11 = vor.u32 %v1489_v47, %v7310_v25  ;;  %v3669_v7 = vshrl.u32 %v3620_v12, 16 }
 0x15a   : > { %v3158_v13 = vpop.f32.mrf.mxu2  ;;  %v2715_v40 = vunpack.c.l.b16 %v2539_v8  ;;  %v1570_v63 = vsel %vm6651_vm14, %v1568_v3, %v1569_v62  ;;  %v1820_v20 = vunpack.c.l.b16 %v1567_v29  ;;  %v1495_v3 = vrot.slane %v1493_v21, 5 }
 0x15b   : > { %v3477_v17 = vpop.f32.mrf.mxu0  ;;  %v3159_v31 = vadd.f32 %v3158_v13, %v3070_v0  ;;  %v1821_v41 = vunpack.c.l.b16 %v1570_v63  ;;  %v1491_v18 = vrot.slane %v1490_v11, 4  ;;  %v3671_v45 = vrot.slane %v3669_v7, 4 }
 0x15c   : > { %v3071_v28 = vpop.f32.mrf.mxu1  ;;  %v7314_v44 = vadd.f32 %v3477_v17, %v3389_v57  ;;  %v3682_v57 = vshrl.u32 %v7316_v6, 16  ;;  %v2731_v38 = vpack.c.b16 %v2715_v40, %v2714_v15  ;;  %v3674_v62 = vrot.slane %v3672_v58, 5 }
 0x15d   : > { %3430 = vmatmul.bf16.gmra.mxu3 %v5938_v27  ;;  %v3072_v27 = vadd.f32 %v3071_v28, %v6943_v39  ;;  %v1852_v8 = vpack.c.b16 %v1821_v41, %v1820_v20  ;;  %v7328_v39 = vld [vmem:[#allocation2 + $0x20] sm:$0x1]  ;;  %v1486_v1 = vsel %vm6638_vm13, %v1481_v55, %v7310_v25  ;;  %v1496_v50 = vsel %vm6638_vm13, %v1491_v18, %v1495_v3  ;;  %v4052_v20 = vld [vmem:[#allocation2 + $0x18] sm:$0xe]  ;;  %v7340_v41 = vld [vmem:[#allocation2 + $0x28] sm:$0xf] }
 0x15e   : > { %v3684_v12 = vrot.slane %v3682_v57, 4  ;;  %v3675_v15 = vor.u32 %v3674_v62, %v3671_v45  ;;  %v1786_v63 = vunpack.c.l.b16 %v1486_v1  ;;  %v6190_v45 = vld [vmem:[#allocation2 + $0x10] sm:$0xf]  ;;  %v1498_v1 = vld [vmem:[#allocation2 + $0xc] sm:$0xe] }
 0x15f   : > { %v1573_v62 = vrot.slane %v6190_v45, 5 }
 0x160   : > { %v3391_v46 = vpop.f32.mrf.mxu3  ;;  %v3676_v25 = vrot.slane %v3675_v15, 4  ;;  %v3706_v15 = vshrl.u32 %v7340_v41, 16 }
 0x161   : > { %v3392_v0 = vadd.f32 %v3391_v46, %v3159_v31  ;;  %v3680_v31 = vrot.slane %v3678_v2, 5  ;;  %v1787_v2 = vunpack.c.l.b16 %v1496_v50  ;;  %v3702_v50 = vshll.u32 %v7340_v41, 16 }
 0x162   : > { %v3160_v13 = vpop.f32.mrf.mxu2 }
 0x163   : > { %v3480_v17 = vpop.f32.mrf.mxu0  ;;  %v3161_v59 = vadd.f32 %v3160_v13, %v3072_v27  ;;  %v3622_v27 = vld [vmem:[#allocation2 + $0x24] sm:$0xf]  ;;  %v3681_v55 = vsel %vm6638_vm13, %v3676_v25, %v3680_v31 }
 0x164   : > { %v3074_v47 = vpop.f32.mrf.mxu1  ;;  %v7326_v52 = vadd.f32 %v3480_v17, %v3392_v0  ;;  %v1803_v17 = vpack.c.b16 %v1787_v2, %v1786_v63  ;;  %v1575_v63 = vrot.slane %v1573_v62, 4  ;;  %v6191_v2 = vld [vmem:[#allocation2 + $0x14] sm:$0x1] }
 0x165   : > { %v3075_v21 = vadd.f32 %v3074_v47, %v6976_v5  ;;  %v4118_v5 = vrot.slane %v7316_v6, 5  ;;  %v3696_v47 = vshll.u32 %v3622_v27, 16  ;;  %v5693_v6 = vrot.slane %v4052_v20, 9 }
 0x166   : > { %3519 = vmatmul.bf16.gmra.mxu0 %v1802_v48  ;;  %v3685_v48 = vor.u32 %v3684_v12, %v3680_v31  ;;  %v1576_v25 = vrot.slane %v6191_v2, 5 }
 0x167   : > { %3113 = vmatmul.bf16.gmra.mxu1 %v2667_v23  ;;  %3202 = vmatmul.bf16.gmra.mxu2 %v2731_v38  ;;  %v3688_v23 = vshll.u32 %v7328_v39, 16 }
 0x168   : > { %v3393_v28 = vpop.f32.mrf.mxu3  ;;  %v3686_v57 = vrot.slane %v3685_v48, 4  ;;  %v4120_v48 = vrot.slane %v4118_v5, 4 }
 0x169   : > { %v3394_v40 = vadd.f32 %v3393_v28, %v3161_v59  ;;  %v3690_v0 = vrot.slane %v3688_v23, 5  ;;  %v3693_v59 = vshrl.u32 %v3622_v27, 16  ;;  %v7352_v27 = vld [vmem:[#allocation2 + $0x2c] sm:$0x1] }
 0x16a   : > { %v3163_v7 = vpop.f32.mrf.mxu2 }
 0x16b   : > { %v3482_v11 = vpop.f32.mrf.mxu0  ;;  %v3164_v58 = vadd.f32 %v3163_v7, %v3075_v21  ;;  %v3691_v3 = vsel %vm6638_vm13, %v3686_v57, %v3690_v0  ;;  %v6004_v21 = vld [vmem:[#allocation2 + $0x18] sm:$0xff]  ;;  %v3698_v7 = vrot.slane %v3696_v47, 5  ;;  %v3704_v57 = vrot.slane %v3702_v50, 5 }
 0x16c   : > { %v3076_v46 = vpop.f32.mrf.mxu1  ;;  %v7337_v29 = vadd.f32 %v3482_v11, %v3394_v40  ;;  %v4309_v23 = vunpack.c.l.b16 %v3691_v3  ;;  %v3695_v11 = vrot.slane %v3693_v59, 4  ;;  %v3708_v0 = vrot.slane %v3706_v15, 4 }
 0x16d   : > { %3435 = vmatmul.bf16.gmra.mxu3 %v5939_v24  ;;  %v3077_v18 = vadd.f32 %v3076_v46, %v6998_v33  ;;  %v4308_v24 = vunpack.c.l.b16 %v3681_v55  ;;  %v4121_v33 = vrot.slane %v7328_v39, 5  ;;  %v5294_v46 = vrot.slane %v1498_v1, 9 }
 0x16e   : > { %v4119_v39 = vsel %vm6651_vm14, %v5693_v6, %v4118_v5  ;;  %v3699_v59 = vor.u32 %v3698_v7, %v3695_v11  ;;  %v3709_v45 = vor.u32 %v3708_v0, %v3704_v57  ;;  %v4053_v7 = vld [vmem:[#allocation2 + $0x24] sm:$0xe] }
 0x16f   : > { %v4122_v55 = vsel %vm6651_vm14, %v4120_v48, %v4121_v33  ;;  %v1574_v47 = vsel %vm6651_vm14, %v5294_v46, %v1573_v62  ;;  %v4125_v46 = vrot.slane %v7340_v41, 5  ;;  %v5694_v41 = vrot.slane %v4053_v7, 9 }
 0x170   : > { %v3396_v13 = vpop.f32.mrf.mxu3  ;;  %v4373_v5 = vunpack.c.l.b16 %v4122_v55  ;;  %v1822_v15 = vunpack.c.l.b16 %v1574_v47  ;;  %v3710_v62 = vrot.slane %v3709_v45, 4 }
 0x171   : > { %v3397_v38 = vadd.f32 %v3396_v13, %v3164_v58  ;;  %v4340_v13 = vpack.c.b16 %v4309_v23, %v4308_v24  ;;  %v7366_v24 = vld [vmem:[#allocation2 + $0x34] sm:$0xf]  ;;  %v4127_v45 = vrot.slane %v4125_v46, 4 }
 0x172   : > { %v3165_v28 = vpop.f32.mrf.mxu2 }
 0x173   : > { %v3485_v12 = vpop.f32.mrf.mxu0  ;;  %v3166_v40 = vadd.f32 %v3165_v28, %v3077_v18  ;;  %v4372_v28 = vunpack.c.l.b16 %v4119_v39 }
 0x174   : > { %v3079_v31 = vpop.f32.mrf.mxu1  ;;  %v7350_v58 = vadd.f32 %v3485_v12, %v3397_v38  ;;  %v1577_v38 = vsel %vm6651_vm14, %v1575_v63, %v1576_v25  ;;  %v3712_v12 = vshll.u32 %v7352_v27, 16 }
 0x175   : > { %v4404_v48 = vpack.c.b16 %v4373_v5, %v4372_v28 }
 0x176   : > { %3524 = vmatmul.bf16.gmra.mxu0 %v1803_v17 }
 0x177   : > { %3538 = vmatmul.bf16.vlgmr.msra.gmra.mxu1 %v1852_v8  ;;  %4637 = vmatmul.bf16.vlgmr.msra.gmra.mxu2 %v6004_v21  ;;  %v3080_v8 = vadd.f32 %v3079_v31, %v6835_v26  ;;  %v3700_v26 = vrot.slane %v3699_v59, 4  ;;  %v3624_v31 = vld [vmem:[#allocation2 + $0x30] sm:$0xf]  ;;  %v3714_v21 = vrot.slane %v3712_v12, 5  ;;  %v6192_v59 = vld [vmem:[#allocation2 + $0x1c] sm:$0xf] }
 0x178   : > { %v3398_v20 = vpop.f32.mrf.mxu3  ;;  %v3717_v63 = vshrl.u32 %v3624_v31, 16  ;;  %v3720_v0 = vshll.u32 %v3624_v31, 16 }
 0x179   : > { %v3399_v17 = vadd.f32 %v3398_v20, %v3166_v40  ;;  %v1823_v40 = vunpack.c.l.b16 %v1577_v38  ;;  %v3705_v11 = vsel %vm6638_vm13, %v3700_v26, %v3704_v57  ;;  %v3726_v20 = vshll.u32 %v7366_v24, 16  ;;  %v6005_v38 = vld [vmem:[#allocation2 + $0x24] sm:$0xff]  ;;  %v6193_v26 = vld [vmem:[#allocation2 + $0x20] sm:$0x1] }
 0x17a   : > { %v3168_v3 = vpop.f32.mrf.mxu2  ;;  %v3715_v55 = vsel %vm6638_vm13, %v3710_v62, %v3714_v21  ;;  %v3719_v5 = vrot.slane %v3717_v63, 4  ;;  %v1583_v31 = vrot.slane %v6193_v26, 5  ;;  %v7381_v21 = vld [vmem:[#allocation2 + $0x38] sm:$0x1] }
 0x17b   : > { %v3487_v18 = vpop.f32.mrf.mxu0  ;;  %v3169_v6 = vadd.f32 %v3168_v3, %v3080_v8  ;;  %v1853_v23 = vpack.c.b16 %v1823_v40, %v1822_v15  ;;  %v3730_v8 = vshrl.u32 %v7366_v24, 16  ;;  %v4310_v3 = vunpack.c.l.b16 %v3705_v11 }
 0x17c   : > { %v3081_v1 = vpop.f32.mrf.mxu1  ;;  %v7364_v50 = vadd.f32 %v3487_v18, %v3399_v17  ;;  %v1580_v17 = vrot.slane %v6192_v59, 5  ;;  %v1499_v18 = vld [vmem:[#allocation2 + $0x18] sm:$0xe]  ;;  %v4311_v28 = vunpack.c.l.b16 %v3715_v55 }
 0x17d   : > { %4726 = vmatmul.bf16.vlgmr.msra.gmra.mxu3 %v4340_v13  ;;  %v3082_v25 = vadd.f32 %v3081_v1, %v6855_v16  ;;  %v4128_v16 = vrot.slane %v7352_v27, 5  ;;  %v7379_v1 = vrot.slane %v3726_v20, 5  ;;  %v5295_v15 = vrot.slane %v1499_v18, 9 }
 0x17e   : > { %v1582_v40 = vrot.slane %v1580_v17, 4  ;;  %v3732_v62 = vrot.slane %v3730_v8, 4  ;;  %v4126_v27 = vsel %vm6651_vm14, %v5694_v41, %v4125_v46  ;;  %v4341_v7 = vpack.c.b16 %v4311_v28, %v4310_v3  ;;  %v3626_v8 = vld [vmem:[#allocation2 + $0x3c] sm:$0xf]  ;;  %v7396_v41 = vld [vmem:[#allocation2 + $0x40] sm:$0xf] }
 0x17f   : > { %v3736_v46 = vshll.u32 %v7381_v21, 16  ;;  %v3741_v28 = vshrl.u32 %v3626_v8, 16 }
 0x180   : > { %v3401_v33 = vpop.f32.mrf.mxu3  ;;  %v1584_v20 = vsel %vm6651_vm14, %v1582_v40, %v1583_v31  ;;  %v3754_v40 = vshrl.u32 %v7396_v41, 16 }
 0x181   : > { %v3402_v2 = vadd.f32 %v3401_v33, %v3169_v6  ;;  %v3722_v6 = vrot.slane %v3720_v0, 5  ;;  %v1581_v0 = vsel %vm6651_vm14, %v5295_v15, %v1580_v17  ;;  %v3738_v3 = vrot.slane %v3736_v46, 5 }
 0x182   : > { %v3170_v39 = vpop.f32.mrf.mxu2  ;;  %v3750_v15 = vshll.u32 %v7396_v41, 16  ;;  %v3743_v46 = vrot.slane %v3741_v28, 4 }
 0x183   : > { %v3490_v13 = vpop.f32.mrf.mxu0  ;;  %v3171_v57 = vadd.f32 %v3170_v39, %v3082_v25  ;;  %v3723_v63 = vor.u32 %v3722_v6, %v3719_v5  ;;  %v3744_v6 = vshll.u32 %v3626_v8, 16  ;;  %v3756_v8 = vrot.slane %v3754_v40, 4 }
 0x184   : > { %v3084_v47 = vpop.f32.mrf.mxu1  ;;  %v7377_v12 = vadd.f32 %v3490_v13, %v3402_v2  ;;  %v3733_v13 = vor.u32 %v3732_v62, %v7379_v1 }
 0x185   : > { %v3085_v11 = vadd.f32 %v3084_v47, %v6884_v49  ;;  %v4374_v49 = vunpack.c.l.b16 %v4126_v27  ;;  %v1824_v47 = vunpack.c.l.b16 %v1581_v0  ;;  %v3724_v17 = vrot.slane %v3723_v63, 4  ;;  %v6006_v0 = vld [vmem:[#allocation2 + $0x30] sm:$0xff] }
 0x186   : > { %4815 = vmatmul.bf16.vlgmr.msra.gmra.mxu0 %v4404_v48  ;;  %v4129_v48 = vsel %vm6651_vm14, %v4127_v45, %v4128_v16  ;;  %v3734_v18 = vrot.slane %v3733_v13, 4  ;;  %v4054_v45 = vld [vmem:[#allocation2 + $0x30] sm:$0xe]  ;;  %v4132_v16 = vrot.slane %v7366_v24, 5  ;;  %v4135_v13 = vrot.slane %v7381_v21, 5 }
 0x187   : > { %3543 = vmatmul.bf16.gmra.mxu1 %v1853_v23  ;;  %4642 = vmatmul.bf16.gmra.mxu2 %v6005_v38  ;;  %v1825_v38 = vunpack.c.l.b16 %v1584_v20 }
 0x188   : > { %v3403_v33 = vpop.f32.mrf.mxu3  ;;  %v3739_v24 = vsel %vm6638_vm13, %v3734_v18, %v3738_v3  ;;  %v4134_v20 = vrot.slane %v4132_v16, 4  ;;  %v6195_v18 = vld [vmem:[#allocation2 + $0x2c] sm:$0x1] }
 0x189   : > { %v3404_v23 = vadd.f32 %v3403_v33, %v3171_v57  ;;  %v4375_v57 = vunpack.c.l.b16 %v4129_v48  ;;  %v1854_v33 = vpack.c.b16 %v1825_v38, %v1824_v47  ;;  %v7410_v47 = vld [vmem:[#allocation2 + $0x44] sm:$0x1]  ;;  %v1590_v3 = vrot.slane %v6195_v18, 5 }
 0x18a   : > { %v3173_v25 = vpop.f32.mrf.mxu2  ;;  %v4136_v28 = vsel %vm6651_vm14, %v4134_v20, %v4135_v13  ;;  %v3628_v13 = vld [vmem:[#allocation2 + $0x48] sm:$0xf] }
 0x18b   : > { %v3492_v2 = vpop.f32.mrf.mxu0  ;;  %v3174_v39 = vadd.f32 %v3173_v25, %v3085_v11  ;;  %v4405_v26 = vpack.c.b16 %v4375_v57, %v4374_v49  ;;  %v5695_v11 = vrot.slane %v4054_v45, 9  ;;  %v4313_v57 = vunpack.c.l.b16 %v3739_v24 }
 0x18c   : > { %v3086_v55 = vpop.f32.mrf.mxu1  ;;  %v7394_v59 = vadd.f32 %v3492_v2, %v3404_v23  ;;  %v3729_v23 = vsel %vm6638_vm13, %v3724_v17, %v7379_v1 }
 0x18d   : > { %4731 = vmatmul.bf16.gmra.mxu3 %v4341_v7  ;;  %v3087_v62 = vadd.f32 %v3086_v55, %v6924_v43  ;;  %v6194_v7 = vld [vmem:[#allocation2 + $0x28] sm:$0xf]  ;;  %v1500_v43 = vld [vmem:[#allocation2 + $0x24] sm:$0xe]  ;;  %v3752_v55 = vrot.slane %v3750_v15, 5  ;;  %v4312_v1 = vunpack.c.l.b16 %v3729_v23  ;;  %v4133_v21 = vsel %vm6651_vm14, %v5695_v11, %v4132_v16 }
 0x18e   : > { %v1587_v63 = vrot.slane %v6194_v7, 5  ;;  %v5296_v38 = vrot.slane %v1500_v43, 9  ;;  %v3760_v15 = vshll.u32 %v7410_v47, 16  ;;  %v4377_v23 = vunpack.c.l.b16 %v4136_v28 }
 0x190   : > { %v3406_v5 = vpop.f32.mrf.mxu3  ;;  %v1589_v17 = vrot.slane %v1587_v63, 4 }
 0x191   : > { %v3407_v31 = vadd.f32 %v3406_v5, %v3174_v39  ;;  %v3746_v39 = vrot.slane %v3744_v6, 5  ;;  %v3757_v6 = vor.u32 %v3756_v8, %v3752_v55 }
 0x192   : > { %v3175_v48 = vpop.f32.mrf.mxu2  ;;  %v1591_v16 = vsel %vm6651_vm14, %v1589_v17, %v1590_v3  ;;  %v3768_v17 = vshll.u32 %v3628_v13, 16 }
 0x193   : > { %v3495_v27 = vpop.f32.mrf.mxu0  ;;  %v3176_v2 = vadd.f32 %v3175_v48, %v3087_v62  ;;  %v3747_v5 = vor.u32 %v3746_v39, %v3743_v46  ;;  %v4376_v48 = vunpack.c.l.b16 %v4133_v21  ;;  %v3758_v20 = vrot.slane %v3757_v6, 4  ;;  %v4055_v46 = vld [vmem:[#allocation2 + $0x3c] sm:$0xe]  ;;  %v7425_v39 = vld [vmem:[#allocation2 + $0x4c] sm:$0xf] }
 0x194   : > { %v3089_v25 = vpop.f32.mrf.mxu1  ;;  %v7408_v49 = vadd.f32 %v3495_v27, %v3407_v31  ;;  %v4342_v31 = vpack.c.b16 %v4313_v57, %v4312_v1  ;;  %v1588_v27 = vsel %vm6651_vm14, %v5296_v38, %v1587_v63  ;;  %v4139_v63 = vrot.slane %v7396_v41, 5 }
 0x195   : > { %v4406_v43 = vpack.c.b16 %v4377_v23, %v4376_v48  ;;  %v3765_v38 = vshrl.u32 %v3628_v13, 16  ;;  %v5696_v41 = vrot.slane %v4055_v46, 9  ;;  %v3770_v23 = vrot.slane %v3768_v17, 5  ;;  %v7437_v13 = vld [vmem:[#allocation2 + $0x50] sm:$0x1] }
 0x196   : > { %4820 = vmatmul.bf16.gmra.mxu0 %v4405_v26  ;;  %v3090_v26 = vadd.f32 %v3089_v25, %v6941_v19  ;;  %v1826_v19 = vunpack.c.l.b16 %v1588_v27  ;;  %v1827_v25 = vunpack.c.l.b16 %v1591_v16  ;;  %v4141_v27 = vrot.slane %v4139_v63, 4 }
 0x197   : > { %3548 = vmatmul.bf16.gmra.mxu1 %v1854_v33  ;;  %4647 = vmatmul.bf16.gmra.mxu2 %v6006_v0  ;;  %v3748_v0 = vrot.slane %v3747_v5, 4  ;;  %v4142_v16 = vrot.slane %v7410_v47, 5  ;;  %v4140_v47 = vsel %vm6651_vm14, %v5696_v41, %v4139_v63 }
 0x198   : > { %v3408_v45 = vpop.f32.mrf.mxu3  ;;  %v1855_v21 = vpack.c.b16 %v1827_v25, %v1826_v19 }
 0x199   : > { %v3409_v40 = vadd.f32 %v3408_v45, %v3176_v2  ;;  %v3762_v2 = vrot.slane %v3760_v15, 5  ;;  %v3753_v1 = vsel %vm6638_vm13, %v3748_v0, %v3752_v55  ;;  %v6196_v45 = vld [vmem:[#allocation2 + $0x34] sm:$0xf]  ;;  %v1501_v15 = vld [vmem:[#allocation2 + $0x30] sm:$0xe] }
 0x19a   : > { %v3178_v33 = vpop.f32.mrf.mxu2  ;;  %v1594_v28 = vrot.slane %v6196_v45, 5 }
 0x19b   : > { %v3497_v62 = vpop.f32.mrf.mxu0  ;;  %v3179_v24 = vadd.f32 %v3178_v33, %v3090_v26  ;;  %v3763_v57 = vsel %vm6638_vm13, %v3758_v20, %v3762_v2  ;;  %v3778_v26 = vshrl.u32 %v7425_v39, 16  ;;  %v4314_v33 = vunpack.c.l.b16 %v3753_v1  ;;  %v6197_v20 = vld [vmem:[#allocation2 + $0x38] sm:$0x1] }
 0x19c   : > { %v3091_v11 = vpop.f32.mrf.mxu1  ;;  %v7422_v7 = vadd.f32 %v3497_v62, %v3409_v40  ;;  %v3774_v40 = vshll.u32 %v7425_v39, 16  ;;  %v6007_v62 = vld [vmem:[#allocation2 + $0x3c] sm:$0xff]  ;;  %v4315_v48 = vunpack.c.l.b16 %v3763_v57  ;;  %v1596_v0 = vrot.slane %v1594_v28, 4 }
 0x19d   : > { %4736 = vmatmul.bf16.gmra.mxu3 %v4342_v31  ;;  %v3092_v3 = vadd.f32 %v3091_v11, %v6974_v34  ;;  %v3767_v34 = vrot.slane %v3765_v38, 4  ;;  %v5297_v11 = vrot.slane %v1501_v15, 9  ;;  %v1597_v2 = vrot.slane %v6197_v20, 5 }
 0x19e   : > { %v3776_v19 = vrot.slane %v3774_v40, 5  ;;  %v3780_v25 = vrot.slane %v3778_v26, 4  ;;  %v4143_v1 = vsel %vm6651_vm14, %v4141_v27, %v4142_v16 }
 0x19f   : > { %v3771_v57 = vor.u32 %v3770_v23, %v3767_v34  ;;  %v1595_v17 = vsel %vm6651_vm14, %v5297_v11, %v1594_v28  ;;  %v4379_v63 = vunpack.c.l.b16 %v4143_v1  ;;  %v4056_v23 = vld [vmem:[#allocation2 + $0x48] sm:$0xe]  ;;  %v4146_v11 = vrot.slane %v7425_v39, 5 }
 0x1a0   : > { %v3411_v8 = vpop.f32.mrf.mxu3  ;;  %v3781_v45 = vor.u32 %v3780_v25, %v3776_v19  ;;  %v1828_v26 = vunpack.c.l.b16 %v1595_v17  ;;  %v5697_v39 = vrot.slane %v4056_v23, 9 }
 0x1a1   : > { %v3412_v18 = vadd.f32 %v3411_v8, %v3179_v24  ;;  %v4343_v8 = vpack.c.b16 %v4315_v48, %v4314_v33  ;;  %v7451_v33 = vld [vmem:[#allocation2 + $0x58] sm:$0xf] }
 0x1a2   : > { %v3180_v6 = vpop.f32.mrf.mxu2  ;;  %v3782_v28 = vrot.slane %v3781_v45, 4  ;;  %v4148_v45 = vrot.slane %v4146_v11, 4 }
 0x1a3   : > { %v3500_v5 = vpop.f32.mrf.mxu0  ;;  %v3181_v55 = vadd.f32 %v3180_v6, %v3092_v3  ;;  %v4378_v6 = vunpack.c.l.b16 %v4140_v47 }
 0x1a4   : > { %v3094_v31 = vpop.f32.mrf.mxu1  ;;  %v7435_v24 = vadd.f32 %v3500_v5, %v3412_v18  ;;  %v1598_v18 = vsel %vm6651_vm14, %v1596_v0, %v1597_v2  ;;  %v3784_v5 = vshll.u32 %v7437_v13, 16 }
 0x1a5   : > { %v3095_v38 = vadd.f32 %v3094_v31, %v7008_v4  ;;  %v3772_v4 = vrot.slane %v3771_v57, 4  ;;  %v3630_v31 = vld [vmem:[#allocation2 + $0x54] sm:$0xf]  ;;  %v4407_v27 = vpack.c.b16 %v4379_v63, %v4378_v6  ;;  %v6198_v57 = vld [vmem:[#allocation2 + $0x40] sm:$0xf] }
 0x1a6   : > { %4825 = vmatmul.bf16.gmra.mxu0 %v4406_v43  ;;  %v3789_v0 = vshrl.u32 %v3630_v31, 16  ;;  %v3792_v25 = vshll.u32 %v3630_v31, 16 }
 0x1a7   : > { %3553 = vmatmul.bf16.gmra.mxu1 %v1855_v21  ;;  %4652 = vmatmul.bf16.gmra.mxu2 %v6007_v62  ;;  %v3786_v62 = vrot.slane %v3784_v5, 5  ;;  %v3777_v34 = vsel %vm6638_vm13, %v3772_v4, %v3776_v19  ;;  %v6199_v4 = vld [vmem:[#allocation2 + $0x44] sm:$0x1] }
 0x1a8   : > { %v3413_v46 = vpop.f32.mrf.mxu3  ;;  %v3791_v63 = vrot.slane %v3789_v0, 4  ;;  %v1604_v31 = vrot.slane %v6199_v4, 5 }
 0x1a9   : > { %v3414_v43 = vadd.f32 %v3413_v46, %v3181_v55  ;;  %v1829_v55 = vunpack.c.l.b16 %v1598_v18  ;;  %v3798_v46 = vshll.u32 %v7451_v33, 16  ;;  %v3787_v1 = vsel %vm6638_vm13, %v3782_v28, %v3786_v62  ;;  %v6008_v18 = vld [vmem:[#allocation2 + $0x48] sm:$0xff]  ;;  %v7466_v62 = vld [vmem:[#allocation2 + $0x5c] sm:$0x1] }
 0x1aa   : > { %v3183_v21 = vpop.f32.mrf.mxu2  ;;  %v4317_v6 = vunpack.c.l.b16 %v3787_v1 }
 0x1ab   : > { %v3502_v3 = vpop.f32.mrf.mxu0  ;;  %v3184_v41 = vadd.f32 %v3183_v21, %v3095_v38  ;;  %v1856_v48 = vpack.c.b16 %v1829_v55, %v1828_v26  ;;  %v3802_v38 = vshrl.u32 %v7451_v33, 16  ;;  %v4316_v21 = vunpack.c.l.b16 %v3777_v34 }
 0x1ac   : > { %v3096_v15 = vpop.f32.mrf.mxu1  ;;  %v7449_v40 = vadd.f32 %v3502_v3, %v3414_v43  ;;  %v1601_v43 = vrot.slane %v6198_v57, 5  ;;  %v1502_v3 = vld [vmem:[#allocation2 + $0x3c] sm:$0xe] }
 0x1ad   : > { %4741 = vmatmul.bf16.gmra.mxu3 %v4343_v8  ;;  %v3097_v2 = vadd.f32 %v3096_v15, %v7030_v53  ;;  %v4149_v53 = vrot.slane %v7437_v13, 5  ;;  %v7464_v15 = vrot.slane %v3798_v46, 5  ;;  %v5298_v26 = vrot.slane %v1502_v3, 9 }
 0x1ae   : > { %v1603_v55 = vrot.slane %v1601_v43, 4  ;;  %v3804_v28 = vrot.slane %v3802_v38, 4  ;;  %v4147_v13 = vsel %vm6651_vm14, %v5697_v39, %v4146_v11  ;;  %v4344_v23 = vpack.c.b16 %v4317_v6, %v4316_v21  ;;  %v3632_v38 = vld [vmem:[#allocation2 + $0x60] sm:$0xf]  ;;  %v7481_v39 = vld [vmem:[#allocation2 + $0x64] sm:$0xf] }
 0x1af   : > { %v3808_v11 = vshll.u32 %v7466_v62, 16  ;;  %v3813_v6 = vshrl.u32 %v3632_v38, 16 }
 0x1b0   : > { %v3416_v16 = vpop.f32.mrf.mxu3  ;;  %v1605_v46 = vsel %vm6651_vm14, %v1603_v55, %v1604_v31  ;;  %v3826_v55 = vshrl.u32 %v7481_v39, 16 }
 0x1b1   : > { %v3417_v20 = vadd.f32 %v3416_v16, %v3184_v41  ;;  %v3794_v41 = vrot.slane %v3792_v25, 5  ;;  %v1602_v25 = vsel %vm6651_vm14, %v5298_v26, %v1601_v43  ;;  %v3810_v21 = vrot.slane %v3808_v11, 5 }
 0x1b2   : > { %v3185_v47 = vpop.f32.mrf.mxu2  ;;  %v3822_v26 = vshll.u32 %v7481_v39, 16  ;;  %v3815_v11 = vrot.slane %v3813_v6, 4 }
 0x1b3   : > { %v3505_v8 = vpop.f32.mrf.mxu0  ;;  %v3186_v19 = vadd.f32 %v3185_v47, %v3097_v2  ;;  %v3795_v0 = vor.u32 %v3794_v41, %v3791_v63  ;;  %v3816_v41 = vshll.u32 %v3632_v38, 16  ;;  %v3828_v38 = vrot.slane %v3826_v55, 4 }
 0x1b4   : > { %v3099_v17 = vpop.f32.mrf.mxu1  ;;  %v7462_v5 = vadd.f32 %v3505_v8, %v3417_v20  ;;  %v3805_v8 = vor.u32 %v3804_v28, %v7464_v15 }
 0x1b5   : > { %v3100_v34 = vadd.f32 %v3099_v17, %v6845_v42  ;;  %v4380_v42 = vunpack.c.l.b16 %v4147_v13  ;;  %v1830_v17 = vunpack.c.l.b16 %v1602_v25  ;;  %v3796_v43 = vrot.slane %v3795_v0, 4  ;;  %v6009_v25 = vld [vmem:[#allocation2 + $0x54] sm:$0xff] }
 0x1b6   : > { %4830 = vmatmul.bf16.gmra.mxu0 %v4407_v27  ;;  %v4150_v27 = vsel %vm6651_vm14, %v4148_v45, %v4149_v53  ;;  %v3806_v3 = vrot.slane %v3805_v8, 4  ;;  %v4057_v45 = vld [vmem:[#allocation2 + $0x54] sm:$0xe]  ;;  %v4153_v53 = vrot.slane %v7451_v33, 5  ;;  %v4156_v8 = vrot.slane %v7466_v62, 5 }
 0x1b7   : > { %3558 = vmatmul.bf16.gmra.mxu1 %v1856_v48  ;;  %4657 = vmatmul.bf16.gmra.mxu2 %v6008_v18  ;;  %v1831_v18 = vunpack.c.l.b16 %v1605_v46 }
 0x1b8   : > { %v3418_v16 = vpop.f32.mrf.mxu3  ;;  %v3811_v33 = vsel %vm6638_vm13, %v3806_v3, %v3810_v21  ;;  %v4155_v46 = vrot.slane %v4153_v53, 4  ;;  %v6201_v3 = vld [vmem:[#allocation2 + $0x50] sm:$0x1] }
 0x1b9   : > { %v3419_v48 = vadd.f32 %v3418_v16, %v3186_v19  ;;  %v4381_v19 = vunpack.c.l.b16 %v4150_v27  ;;  %v1857_v16 = vpack.c.b16 %v1831_v18, %v1830_v17  ;;  %v7495_v17 = vld [vmem:[#allocation2 + $0x68] sm:$0x1]  ;;  %v1611_v21 = vrot.slane %v6201_v3, 5 }
 0x1ba   : > { %v3188_v2 = vpop.f32.mrf.mxu2  ;;  %v4157_v6 = vsel %vm6651_vm14, %v4155_v46, %v4156_v8  ;;  %v3634_v8 = vld [vmem:[#allocation2 + $0x6c] sm:$0xf] }
 0x1bb   : > { %v3507_v20 = vpop.f32.mrf.mxu0  ;;  %v3189_v47 = vadd.f32 %v3188_v2, %v3100_v34  ;;  %v4408_v4 = vpack.c.b16 %v4381_v19, %v4380_v42  ;;  %v5698_v34 = vrot.slane %v4057_v45, 9  ;;  %v4319_v19 = vunpack.c.l.b16 %v3811_v33 }
 0x1bc   : > { %v3101_v1 = vpop.f32.mrf.mxu1  ;;  %v7479_v57 = vadd.f32 %v3507_v20, %v3419_v48  ;;  %v3801_v48 = vsel %vm6638_vm13, %v3796_v43, %v7464_v15 }
 0x1bd   : > { %4746 = vmatmul.bf16.gmra.mxu3 %v4344_v23  ;;  %v3102_v28 = vadd.f32 %v3101_v1, %v6878_v37  ;;  %v6200_v23 = vld [vmem:[#allocation2 + $0x4c] sm:$0xf]  ;;  %v1503_v37 = vld [vmem:[#allocation2 + $0x48] sm:$0xe]  ;;  %v3824_v1 = vrot.slane %v3822_v26, 5  ;;  %v4318_v15 = vunpack.c.l.b16 %v3801_v48  ;;  %v4154_v62 = vsel %vm6651_vm14, %v5698_v34, %v4153_v53 }
 0x1be   : > { %v1608_v0 = vrot.slane %v6200_v23, 5  ;;  %v5299_v18 = vrot.slane %v1503_v37, 9  ;;  %v3832_v26 = vshll.u32 %v7495_v17, 16  ;;  %v4383_v48 = vunpack.c.l.b16 %v4157_v6  ;;  %v6202_v6 = vld [vmem:[#allocation2 + $0x58] sm:$0xf] }
 0x1c0   : > { %v3421_v63 = vpop.f32.mrf.mxu3  ;;  %v1610_v43 = vrot.slane %v1608_v0, 4 }
 0x1c1   : > { %v3422_v31 = vadd.f32 %v3421_v63, %v3189_v47  ;;  %v3818_v47 = vrot.slane %v3816_v41, 5  ;;  %v3829_v41 = vor.u32 %v3828_v38, %v3824_v1 }
 0x1c2   : > { %v3190_v27 = vpop.f32.mrf.mxu2  ;;  %v1612_v53 = vsel %vm6651_vm14, %v1610_v43, %v1611_v21  ;;  %v3840_v43 = vshll.u32 %v3634_v8, 16  ;;  %v7884_v21 = vld [vmem:[#allocation6_spill] sm:$0xff] }
 0x1c3   : > { %v3510_v13 = vpop.f32.mrf.mxu0  ;;  %v3191_v20 = vadd.f32 %v3190_v27, %v3102_v28  ;;  %v3819_v63 = vor.u32 %v3818_v47, %v3815_v11  ;;  %v4382_v27 = vunpack.c.l.b16 %v4154_v62  ;;  %v3830_v46 = vrot.slane %v3829_v41, 4  ;;  %v4058_v11 = vld [vmem:[#allocation2 + $0x60] sm:$0xe]  ;;  %v7510_v47 = vld [vmem:[#allocation2 + $0x70] sm:$0xf] }
 0x1c4   : > { %v3104_v2 = vpop.f32.mrf.mxu1  ;;  %v7493_v42 = vadd.f32 %v3510_v13, %v3422_v31  ;;  %v4345_v31 = vpack.c.b16 %v4319_v19, %v4318_v15  ;;  %v1609_v13 = vsel %vm6651_vm14, %v5299_v18, %v1608_v0  ;;  %v4160_v0 = vrot.slane %v7481_v39, 5 }
 0x1c5   : > { %v4409_v37 = vpack.c.b16 %v4383_v48, %v4382_v27  ;;  %v3837_v18 = vshrl.u32 %v3634_v8, 16  ;;  %v5699_v39 = vrot.slane %v4058_v11, 9  ;;  %v4163_v27 = vrot.slane %v7495_v17, 5 }
 0x1c6   : > { %4835 = vmatmul.bf16.gmra.mxu0 %v4408_v4  ;;  %v3105_v4 = vadd.f32 %v3104_v2, %v6909_v22  ;;  %v1832_v22 = vunpack.c.l.b16 %v1609_v13  ;;  %v1833_v2 = vunpack.c.l.b16 %v1612_v53  ;;  %v4162_v53 = vrot.slane %v4160_v0, 4 }
 0x1c7   : > { %3563 = vmatmul.bf16.gmra.mxu1 %v1857_v16  ;;  %4662 = vmatmul.bf16.gmra.mxu2 %v6009_v25  ;;  %v3820_v25 = vrot.slane %v3819_v63, 4  ;;  %v1615_v63 = vrot.slane %v6202_v6, 5  ;;  %v4161_v17 = vsel %vm6651_vm14, %v5699_v39, %v4160_v0 }
 0x1c8   : > { %v3423_v45 = vpop.f32.mrf.mxu3 }
 0x1c9   : > { %v3424_v55 = vadd.f32 %v3423_v45, %v3191_v20  ;;  %v3834_v20 = vrot.slane %v3832_v26, 5  ;;  %v3825_v15 = vsel %vm6638_vm13, %v3820_v25, %v3824_v1  ;;  %v1858_v45 = vpack.c.b16 %v1833_v2, %v1832_v22  ;;  %v6203_v22 = vld [vmem:[#allocation2 + $0x5c] sm:$0x1] }
 0x1ca   : > { %v3193_v16 = vpop.f32.mrf.mxu2  ;;  %v4320_v13 = vunpack.c.l.b16 %v3825_v15  ;;  %v1618_v2 = vrot.slane %v6203_v22, 5  ;;  %v4059_v22 = vld [vmem:[#allocation2 + $0x6c] sm:$0xe] }
 0x1cb   : > { %v3512_v28 = vpop.f32.mrf.mxu0  ;;  %v3194_v33 = vadd.f32 %v3193_v16, %v3105_v4  ;;  %v3835_v19 = vsel %vm6638_vm13, %v3830_v46, %v3834_v20  ;;  %v3846_v4 = vshll.u32 %v7510_v47, 16  ;;  %v6010_v16 = vld [vmem:[#allocation2 + $0x60] sm:$0xff]  ;;  %v1617_v20 = vrot.slane %v1615_v63, 4 }
 0x1cc   : > { %v3106_v34 = vpop.f32.mrf.mxu1  ;;  %v7507_v23 = vadd.f32 %v3512_v28, %v3424_v55  ;;  %v1504_v55 = vld [vmem:[#allocation2 + $0x54] sm:$0xe]  ;;  %v4321_v48 = vunpack.c.l.b16 %v3835_v19  ;;  %v4164_v19 = vsel %vm6651_vm14, %v4162_v53, %v4163_v27  ;;  %v3636_v53 = vld [vmem:[#allocation2 + $0x78] sm:$0xf] }
 0x1cd   : > { %4751 = vmatmul.bf16.gmra.mxu3 %v4345_v31  ;;  %v3107_v62 = vadd.f32 %v3106_v34, %v7884_v21  ;;  %v3850_v31 = vshrl.u32 %v7510_v47, 16  ;;  %v3842_v34 = vrot.slane %v3840_v43, 5  ;;  %v5300_v46 = vrot.slane %v1504_v55, 9  ;;  %v7885_v43 = vld [vmem:[#allocation7_spill] sm:$0xff] }
 0x1ce   : > { %v3848_v8 = vrot.slane %v3846_v4, 5  ;;  %v4346_v21 = vpack.c.b16 %v4321_v48, %v4320_v13  ;;  %v4384_v4 = vunpack.c.l.b16 %v4161_v17  ;;  %v4385_v0 = vunpack.c.l.b16 %v4164_v19  ;;  %v7536_v48 = vld [vmem:[#allocation2 + $0x7c] sm:$0xf]  ;;  %v7887_v17 = vld [vmem:[#allocation8_spill] sm:$0xff] }
 0x1cf   : > { %v3852_v11 = vrot.slane %v3850_v31, 4 }
 0x1d0   : > { %v3426_v38 = vpop.f32.mrf.mxu3 }
 0x1d1   : > { %v3427_v3 = vadd.f32 %v3426_v38, %v3194_v33  ;;  %v3839_v33 = vrot.slane %v3837_v18, 4  ;;  %v7522_v38 = vld [vmem:[#allocation2 + $0x74] sm:$0x1] }
 0x1d2   : > { %v3195_v26 = vpop.f32.mrf.mxu2  ;;  %v3856_v55 = vshll.u32 %v7522_v38, 16 }
 0x1d3   : > { %v3515_v41 = vpop.f32.mrf.mxu0  ;;  %v3196_v1 = vadd.f32 %v3195_v26, %v3107_v62  ;;  %v3843_v18 = vor.u32 %v3842_v34, %v3839_v33  ;;  %v1616_v62 = vsel %vm6651_vm14, %v5300_v46, %v1615_v63  ;;  %v3853_v26 = vor.u32 %v3852_v11, %v3848_v8 }
 0x1d4   : > { %v3109_v28 = vpop.f32.mrf.mxu1  ;;  %v7520_v25 = vadd.f32 %v3515_v41, %v3427_v3  ;;  %v3858_v27 = vrot.slane %v3856_v55, 5  ;;  %v4410_v33 = vpack.c.b16 %v4385_v0, %v4384_v4  ;;  %v3861_v11 = vshrl.u32 %v3636_v53, 16  ;;  %v1505_v55 = vld [vmem:[#allocation2 + $0x60] sm:$0xe] }
 0x1d5   : > { %v3110_v3 = vadd.f32 %v3109_v28, %v7885_v43  ;;  %v3844_v28 = vrot.slane %v3843_v18, 4  ;;  %v3854_v63 = vrot.slane %v3853_v26, 4  ;;  %v3864_v18 = vshll.u32 %v3636_v53, 16  ;;  %v6011_v26 = vld [vmem:[#allocation2 + $0x6c] sm:$0xff] }
 0x1d6   : > { %4840 = vmatmul.bf16.gmra.mxu0 %v4409_v37 }
 0x1d7   : > { %3568 = vmatmul.bf16.gmra.mxu1 %v1858_v45  ;;  %4667 = vmatmul.bf16.gmra.mxu2 %v6010_v16  ;;  %v1619_v45 = vsel %vm6651_vm14, %v1617_v20, %v1618_v2  ;;  %v3849_v20 = vsel %vm6638_vm13, %v3844_v28, %v3848_v8  ;;  %v4167_v2 = vrot.slane %v7510_v47, 5  ;;  %v5700_v47 = vrot.slane %v4059_v22, 9  ;;  %v7549_v22 = vld [vmem:[#allocation2 + $0x80] sm:$0x1] }
 0x1d8   : > { %v3428_v15 = vpop.f32.mrf.mxu3  ;;  %v1835_v13 = vunpack.c.l.b16 %v1619_v45  ;;  %v4322_v4 = vunpack.c.l.b16 %v3849_v20  ;;  %v3866_v28 = vrot.slane %v3864_v18, 5 }
 0x1d9   : > { %v3429_v37 = vadd.f32 %v3428_v15, %v3196_v1  ;;  %v1834_v1 = vunpack.c.l.b16 %v1616_v62  ;;  %v6204_v62 = vld [vmem:[#allocation2 + $0x64] sm:$0xf]  ;;  %v4169_v0 = vrot.slane %v4167_v2, 4 }
 0x1da   : > { %v3198_v41 = vpop.f32.mrf.mxu2  ;;  %v1622_v45 = vrot.slane %v6204_v62, 5 }
 0x1db   : > { %v3517_v6 = vpop.f32.mrf.mxu0  ;;  %v3199_v39 = vadd.f32 %v3198_v41, %v3110_v3  ;;  %v1859_v46 = vpack.c.b16 %v1835_v13, %v1834_v1  ;;  %v3859_v3 = vsel %vm6638_vm13, %v3854_v63, %v3858_v27  ;;  %v3863_v13 = vrot.slane %v3861_v11, 4 }
 0x1dc   : > { %v3111_v31 = vpop.f32.mrf.mxu1  ;;  %v7534_v16 = vadd.f32 %v3517_v6, %v3429_v37  ;;  %v3874_v6 = vshrl.u32 %v7536_v48, 16  ;;  %v4323_v1 = vunpack.c.l.b16 %v3859_v3  ;;  %v5301_v63 = vrot.slane %v1505_v55, 9 }
 0x1dd   : > { %4756 = vmatmul.bf16.gmra.mxu3 %v4346_v21  ;;  %v3112_v19 = vadd.f32 %v3111_v31, %v7887_v17  ;;  %v3870_v21 = vshll.u32 %v7536_v48, 16  ;;  %v1624_v27 = vrot.slane %v1622_v45, 4 }
 0x1de   : > { %7886 = vst [vmem:[#allocation6_spill] sm:$0xff] %v7534_v16  ;;  %v4347_v18 = vpack.c.b16 %v4323_v1, %v4322_v4  ;;  %v1623_v3 = vsel %vm6651_vm14, %v5301_v63, %v1622_v45  ;;  %v7563_v45 = vld [vmem:[#allocation2 + $0x88] sm:$0xf]  ;;  %v7607_v16 = vld [vmem:[#allocation2 + $0x98] sm:$0x1] }
 0x1df   : > { %v3872_v53 = vrot.slane %v3870_v21, 5  ;;  %v3867_v21 = vor.u32 %v3866_v28, %v3863_v13 }
 0x1e0   : > { %v3431_v34 = vpop.f32.mrf.mxu3 }
 0x1e1   : > { %v3432_v15 = vadd.f32 %v3431_v34, %v3199_v39  ;;  %v4170_v39 = vrot.slane %v7522_v38, 5  ;;  %v6205_v34 = vld [vmem:[#allocation2 + $0x68] sm:$0x1]  ;;  %v4168_v38 = vsel %vm6651_vm14, %v5700_v47, %v4167_v2  ;;  %v3868_v1 = vrot.slane %v3867_v21, 4 }
 0x1e2   : > { %v3200_v43 = vpop.f32.mrf.mxu2  ;;  %v1625_v17 = vrot.slane %v6205_v34, 5  ;;  %v4060_v34 = vld [vmem:[#allocation2 + $0x78] sm:$0xe] }
 0x1e3   : > { %v3520_v37 = vpop.f32.mrf.mxu0  ;;  %v3201_v8 = vadd.f32 %v3200_v43, %v3112_v19  ;;  %v3876_v19 = vrot.slane %v3874_v6, 4  ;;  %v3873_v21 = vsel %vm6638_vm13, %v3868_v1, %v3872_v53 }
 0x1e4   : > { %v3114_v41 = vpop.f32.mrf.mxu1  ;;  %v7547_v31 = vadd.f32 %v3520_v37, %v3432_v15  ;;  %v7889_v15 = vld [vmem:[#allocation9_spill] sm:$0xff]  ;;  %v1626_v62 = vsel %vm6651_vm14, %v1624_v27, %v1625_v17  ;;  %v4174_v17 = vrot.slane %v7536_v48, 5  ;;  %v3898_v48 = vshrl.u32 %v7563_v45, 16 }
 0x1e5   : > { %v3115_v11 = vadd.f32 %v3114_v41, %v7889_v15  ;;  %v3877_v6 = vor.u32 %v3876_v19, %v3872_v53  ;;  %v1836_v41 = vunpack.c.l.b16 %v1623_v3  ;;  %v1837_v4 = vunpack.c.l.b16 %v1626_v62  ;;  %v7891_v15 = vld [vmem:[#allocation10_spill] sm:$0xff] }
 0x1e6   : > { %7888 = vst [vmem:[#allocation7_spill] sm:$0xff] %v7547_v31  ;;  %4845 = vmatmul.bf16.gmra.mxu0 %v4410_v33  ;;  %v4171_v33 = vsel %vm6651_vm14, %v4169_v0, %v4170_v39  ;;  %v3638_v39 = vld [vmem:[#allocation2 + $0x84] sm:$0xf]  ;;  %v6206_v3 = vld [vmem:[#allocation2 + $0x70] sm:$0xf]  ;;  %v4324_v53 = vunpack.c.l.b16 %v3873_v21 }
 0x1e7   : > { %3573 = vmatmul.bf16.gmra.mxu1 %v1859_v46  ;;  %4672 = vmatmul.bf16.gmra.mxu2 %v6011_v26  ;;  %v3880_v26 = vshll.u32 %v7549_v22, 16  ;;  %v4387_v0 = vunpack.c.l.b16 %v4171_v33  ;;  %v3878_v13 = vrot.slane %v3877_v6, 4  ;;  %v3885_v19 = vshrl.u32 %v3638_v39, 16 }
 0x1e8   : > { %v3433_v20 = vpop.f32.mrf.mxu3  ;;  %v1860_v33 = vpack.c.b16 %v1837_v4, %v1836_v41  ;;  %v1629_v62 = vrot.slane %v6206_v3, 5  ;;  %v3900_v3 = vrot.slane %v3898_v48, 4 }
 0x1e9   : > { %v3434_v46 = vadd.f32 %v3433_v20, %v3201_v8  ;;  %v4386_v8 = vunpack.c.l.b16 %v4168_v38  ;;  %v3882_v28 = vrot.slane %v3880_v26, 5  ;;  %v3888_v20 = vshll.u32 %v3638_v39, 16 }
 0x1ea   : > { %v3203_v43 = vpop.f32.mrf.mxu2  ;;  %v3887_v41 = vrot.slane %v3885_v19, 4 }
 0x1eb   : > { %v3522_v37 = vpop.f32.mrf.mxu0  ;;  %v3204_v2 = vadd.f32 %v3203_v43, %v3115_v11  ;;  %v4411_v63 = vpack.c.b16 %v4387_v0, %v4386_v8  ;;  %v3894_v11 = vshll.u32 %v7563_v45, 16  ;;  %v3883_v43 = vsel %vm6638_vm13, %v3878_v13, %v3882_v28  ;;  %v1506_v8 = vld [vmem:[#allocation2 + $0x6c] sm:$0xe] }
 0x1ec   : > { %v3116_v47 = vpop.f32.mrf.mxu1  ;;  %v7561_v55 = vadd.f32 %v3522_v37, %v3434_v46  ;;  %v4176_v0 = vrot.slane %v4174_v17, 4  ;;  %v3890_v4 = vrot.slane %v3888_v20, 5  ;;  %v4325_v1 = vunpack.c.l.b16 %v3883_v43 }
 0x1ed   : > { %4761 = vmatmul.bf16.gmra.mxu3 %v4347_v18  ;;  %v3117_v38 = vadd.f32 %v3116_v47, %v7891_v15  ;;  %v5701_v47 = vrot.slane %v4060_v34, 9  ;;  %v4177_v13 = vrot.slane %v7549_v22, 5  ;;  %v3896_v28 = vrot.slane %v3894_v11, 5  ;;  %v7578_v34 = vld [vmem:[#allocation2 + $0x8c] sm:$0x1] }
 0x1ee   : > { %7890 = vst [vmem:[#allocation8_spill] sm:$0xff] %v7561_v55  ;;  %v1631_v15 = vrot.slane %v1629_v62, 4  ;;  %v3891_v19 = vor.u32 %v3890_v4, %v3887_v41  ;;  %v3904_v48 = vshll.u32 %v7578_v34, 16 }
 0x1ef   : > { %v3901_v43 = vor.u32 %v3900_v3, %v3896_v28 }
 0x1f0   : > { %v3436_v27 = vpop.f32.mrf.mxu3  ;;  %v3906_v4 = vrot.slane %v3904_v48, 5 }
 0x1f1   : > { %v3437_v46 = vadd.f32 %v3436_v27, %v3204_v2  ;;  %v6012_v2 = vld [vmem:[#allocation2 + $0x78] sm:$0xff]  ;;  %v5302_v27 = vrot.slane %v1506_v8, 9  ;;  %v3902_v41 = vrot.slane %v3901_v43, 4 }
 0x1f2   : > { %v3205_v37 = vpop.f32.mrf.mxu2 }
 0x1f3   : > { %v3525_v18 = vpop.f32.mrf.mxu0  ;;  %v3206_v6 = vadd.f32 %v3205_v37, %v3117_v38  ;;  %v6207_v38 = vld [vmem:[#allocation2 + $0x74] sm:$0x1] }
 0x1f4   : > { %v7573_v26 = vpop.f32.mrf.mxu1  ;;  %v7575_v39 = vadd.f32 %v3525_v18, %v3437_v46  ;;  %v1632_v37 = vrot.slane %v6207_v38, 5  ;;  %v4348_v46 = vpack.c.b16 %v4325_v1, %v4324_v53  ;;  %v1630_v18 = vsel %vm6651_vm14, %v5302_v27, %v1629_v62  ;;  %v3640_v53 = vld [vmem:[#allocation2 + $0x90] sm:$0xf]  ;;  %v7593_v62 = vld [vmem:[#allocation2 + $0x94] sm:$0xf] }
 0x1f5   : > { %v1838_v8 = vunpack.c.l.b16 %v1630_v18  ;;  %v3909_v3 = vshrl.u32 %v3640_v53, 16 }
 0x1f6   : > { %7892 = vst [vmem:[#allocation9_spill] sm:$0xff] %v7575_v39  ;;  %4850 = vmatmul.bf16.gmra.mxu0 %v4411_v63  ;;  %v4175_v63 = vsel %vm6651_vm14, %v5701_v47, %v4174_v17  ;;  %v1633_v21 = vsel %vm6651_vm14, %v1631_v15, %v1632_v37  ;;  %v3892_v47 = vrot.slane %v3891_v19, 4  ;;  %v4181_v15 = vrot.slane %v7563_v45, 5  ;;  %v4061_v37 = vld [vmem:[#allocation2 + $0x84] sm:$0xe] }
 0x1f7   : > { %3578 = vmatmul.bf16.gmra.mxu1 %v1860_v33  ;;  %4677 = vmatmul.bf16.gmra.mxu2 %v6012_v2  ;;  %v4178_v33 = vsel %vm6651_vm14, %v4176_v0, %v4177_v13  ;;  %v1839_v0 = vunpack.c.l.b16 %v1633_v21  ;;  %v3918_v19 = vshll.u32 %v7593_v62, 16  ;;  %v3922_v21 = vshrl.u32 %v7593_v62, 16  ;;  %v1507_v45 = vld [vmem:[#allocation2 + $0x78] sm:$0xe]  ;;  %v6209_v39 = vld [vmem:[#allocation2 + $0x80] sm:$0x1] }
 0x1f8   : > { %v3438_v55 = vpop.f32.mrf.mxu3  ;;  %v4389_v17 = vunpack.c.l.b16 %v4178_v33  ;;  %v3897_v27 = vsel %vm6638_vm13, %v3892_v47, %v3896_v28  ;;  %v3907_v33 = vsel %vm6638_vm13, %v3902_v41, %v3906_v4  ;;  %v6013_v28 = vld [vmem:[#allocation2 + $0x84] sm:$0xff]  ;;  %v4183_v47 = vrot.slane %v4181_v15, 4 }
 0x1f9   : > { %v3439_v20 = vadd.f32 %v3438_v55, %v3206_v6  ;;  %v4388_v6 = vunpack.c.l.b16 %v4175_v63  ;;  %v1861_v38 = vpack.c.b16 %v1839_v0, %v1838_v8  ;;  %v4184_v8 = vrot.slane %v7578_v34, 5 }
 0x1fa   : > { %v4638_v11 = vpop.f32.mrf.mxu2  ;;  %v4327_v0 = vunpack.c.l.b16 %v3907_v33  ;;  %v7605_v41 = vrot.slane %v3918_v19, 5  ;;  %v5303_v4 = vrot.slane %v1507_v45, 9 }
 0x1fb   : > { %v3527_v22 = vpop.f32.mrf.mxu0  ;;  %v4412_v1 = vpack.c.b16 %v4389_v17, %v4388_v6  ;;  %v4326_v6 = vunpack.c.l.b16 %v3897_v27  ;;  %v5702_v17 = vrot.slane %v4061_v37, 9 }
 0x1fc   : > { %v7589_v2 = vpop.f32.mrf.mxu1  ;;  %v7591_v55 = vadd.f32 %v3527_v22, %v3439_v20  ;;  %v3912_v20 = vshll.u32 %v3640_v53, 16  ;;  %v6208_v22 = vld [vmem:[#allocation2 + $0x7c] sm:$0xf]  ;;  %v3911_v53 = vrot.slane %v3909_v3, 4 }
 0x1fd   : > { %4766 = vmatmul.bf16.gmra.mxu3 %v4348_v46  ;;  %v1636_v18 = vrot.slane %v6208_v22, 5  ;;  %v4182_v34 = vsel %vm6651_vm14, %v5702_v17, %v4181_v15  ;;  %v4349_v3 = vpack.c.b16 %v4327_v0, %v4326_v6  ;;  %v3642_v17 = vld [vmem:[#allocation2 + $0x9c] sm:$0xf] }
 0x1fe   : > { %7893 = vst [vmem:[#allocation10_spill] sm:$0xff] %v7591_v55  ;;  %v3914_v55 = vrot.slane %v3912_v20, 5 }
 0x1ff   : > { %v1638_v22 = vrot.slane %v1636_v18, 4 }
 0x200   : > { %v4727_v13 = vpop.f32.mrf.mxu3  ;;  %v3915_v20 = vor.u32 %v3914_v55, %v3911_v53  ;;  %v4390_v55 = vunpack.c.l.b16 %v4182_v34  ;;  %v3936_v34 = vshll.u32 %v3642_v17, 16 }
 0x201   : > { %v4728_v43 = vadd.f32 %v4727_v13, %v4638_v11  ;;  %v1639_v11 = vrot.slane %v6209_v39, 5  ;;  %v3924_v13 = vrot.slane %v3922_v21, 4  ;;  %v3928_v21 = vshll.u32 %v7607_v16, 16 }
 0x202   : > { %v4640_v63 = vpop.f32.mrf.mxu2 }
 0x203   : > { %v4816_v46 = vpop.f32.mrf.mxu0  ;;  %v1640_v33 = vsel %vm6651_vm14, %v1638_v22, %v1639_v11  ;;  %v3925_v15 = vor.u32 %v3924_v13, %v7605_v41  ;;  %v4062_v13 = vld [vmem:[#allocation2 + $0x90] sm:$0xe] }
 0x204   : > { %v7602_v48 = vpop.f32.mrf.mxu1  ;;  %v4817_v31 = vadd.f32 %v4816_v46, %v4728_v43  ;;  %v1637_v46 = vsel %vm6651_vm14, %v5303_v4, %v1636_v18  ;;  %v1841_v6 = vunpack.c.l.b16 %v1640_v33 }
 0x205   : > { %v1840_v18 = vunpack.c.l.b16 %v1637_v46 }
 0x206   : > { %4855 = vmatmul.bf16.gmra.mxu0 %v4412_v1  ;;  %v4185_v1 = vsel %vm6651_vm14, %v4183_v47, %v4184_v8  ;;  %v7625_v47 = vld [vmem:[#allocation2 + $0xa0] sm:$0xf]  ;;  %v4188_v8 = vrot.slane %v7593_v62, 5 }
 0x207   : > { %3583 = vmatmul.bf16.gmra.mxu1 %v1861_v38  ;;  %4682 = vmatmul.bf16.gmra.mxu2 %v6013_v28  ;;  %v3540_v38 = vadd.f32 %v7573_v26, %v7067_v36  ;;  %v3542_v36 = vadd.f32 %v7589_v2, %v7107_v60  ;;  %v4391_v45 = vunpack.c.l.b16 %v4185_v1  ;;  %v3916_v60 = vrot.slane %v3915_v20, 4 }
 0x208   : > { %v4729_v27 = vpop.f32.mrf.mxu3  ;;  %v3930_v2 = vrot.slane %v3928_v21, 5  ;;  %v3942_v1 = vshll.u32 %v7625_v47, 16  ;;  %v6210_v21 = vld [vmem:[#allocation2 + $0x88] sm:$0xf] }
 0x209   : > { %v4730_v37 = vadd.f32 %v4729_v27, %v4640_v63  ;;  %v4896_v43 = vadd.f32 %v4817_v31, %v3540_v38  ;;  %v3926_v31 = vrot.slane %v3925_v15, 4  ;;  %v3933_v27 = vshrl.u32 %v3642_v17, 16 }
 0x20a   : > { %v4643_v39 = vpop.f32.mrf.mxu2  ;;  %v3946_v38 = vshrl.u32 %v7625_v47, 16  ;;  %v3921_v62 = vsel %vm6638_vm13, %v3916_v60, %v7605_v41  ;;  %v3938_v17 = vrot.slane %v3936_v34, 5 }
 0x20b   : > { %v4818_v19 = vpop.f32.mrf.mxu0  ;;  %v5030_v0 = vmul.f32 %v4896_v43, %v4896_v43  ;;  %v3931_v15 = vsel %vm6638_vm13, %v3926_v31, %v3930_v2  ;;  %v4328_v31 = vunpack.c.l.b16 %v3921_v62 }
 0x20c   : > { %v4819_v26 = vadd.f32 %v4818_v19, %v4730_v37  ;;  %v7623_v63 = vpop.f32.mrf.mxu1  ;;  %v1862_v19 = vpack.c.b16 %v1841_v6, %v1840_v18  ;;  %v1508_v18 = vld [vmem:[#allocation2 + $0x84] sm:$0xe]  ;;  %v3935_v6 = vrot.slane %v3933_v27, 4  ;;  %v3948_v41 = vrot.slane %v3946_v38, 4 }
 0x20d   : > { %4771 = vmatmul.bf16.gmra.mxu3 %v4349_v3  ;;  %v4413_v3 = vpack.c.b16 %v4391_v45, %v4390_v55  ;;  %v6014_v55 = vld [vmem:[#allocation2 + $0x90] sm:$0xff]  ;;  %v4190_v45 = vrot.slane %v4188_v8, 4  ;;  %v4329_v2 = vunpack.c.l.b16 %v3931_v15 }
 0x20e   : > { %v4897_v28 = vadd.f32 %v4819_v26, %v3542_v36  ;;  %v3545_v36 = vadd.f32 %v7602_v48, %v7123_v35  ;;  %v7650_v35 = vld [vmem:[#allocation2 + $0xa4] sm:$0x1]  ;;  %v5304_v48 = vrot.slane %v1508_v18, 9 }
 0x20f   : > { %v4350_v62 = vpack.c.b16 %v4329_v2, %v4328_v31 }
 0x210   : > { %v6047_v53 = vpack.c.bf16 %v4897_v28, %v4896_v43  ;;  %v4992_v4 = vadd.f32 %v4897_v28, %v4896_v43  ;;  %v5031_v22 = vmul.f32 %v4897_v28, %v4897_v28  ;;  %v4732_v11 = vpop.f32.mrf.mxu3  ;;  %v1643_v43 = vrot.slane %v6210_v21, 5 }
 0x211   : > { %v4733_v20 = vadd.f32 %v4732_v11, %v4643_v39  ;;  %v5703_v39 = vrot.slane %v4062_v13, 9  ;;  %v6211_v11 = vld [vmem:[#allocation2 + $0x8c] sm:$0x1] }
 0x212   : > { %6048 = vst [vmem:[%s7632_s15] sm:$0xff] %v6047_v53   ;;  %v5062_v37 = vadd.f32 %v5031_v22, %v5030_v0  ;;  %v4645_v33 = vpop.f32.mrf.mxu2  ;;  %v7647_v0 = vrot.slane %v3942_v1, 5  ;;  %v4191_v53 = vrot.slane %v7607_v16, 5  ;;  %v1645_v22 = vrot.slane %v1643_v43, 4 }
 0x213   : > { %v4821_v46 = vpop.f32.mrf.mxu0  ;;  %v1646_v13 = vrot.slane %v6211_v11, 5  ;;  %v4189_v34 = vsel %vm6651_vm14, %v5703_v39, %v4188_v8  ;;  %v3939_v1 = vor.u32 %v3938_v17, %v3935_v6  ;;  %v3547_v8 = vadd.f32 %v7623_v63, %v7142_v9 }
 0x214   : > { %v4822_v26 = vadd.f32 %v4821_v46, %v4733_v20  ;;  %v7645_v28 = vpop.f32.mrf.mxu1  ;;  %v3949_v38 = vor.u32 %v3948_v41, %v7647_v0  ;;  %v4192_v15 = vsel %vm6651_vm14, %v4190_v45, %v4191_v53  ;;  %v4392_v39 = vunpack.c.l.b16 %v4189_v34  ;;  %v4063_v53 = vld [vmem:[#allocation2 + $0x9c] sm:$0xe] }
 0x215   : > { %v4393_v6 = vunpack.c.l.b16 %v4192_v15  ;;  %v3940_v45 = vrot.slane %v3939_v1, 4 }
 0x216   : > { %4860 = vmatmul.bf16.gmra.mxu0 %v4413_v3  ;;  %v4898_v60 = vadd.f32 %v4822_v26, %v3545_v36  ;;  %v3952_v3 = vshll.u32 %v7650_v35, 16  ;;  %v1647_v26 = vsel %vm6651_vm14, %v1645_v22, %v1646_v13  ;;  %v3950_v17 = vrot.slane %v3949_v38, 4 }
 0x217   : > { %3588 = vmatmul.bf16.gmra.mxu1 %v1862_v19  ;;  %4687 = vmatmul.bf16.gmra.mxu2 %v6014_v55  ;;  %v1843_v2 = vunpack.c.l.b16 %v1647_v26  ;;  %v4414_v34 = vpack.c.b16 %v4393_v6, %v4392_v39  ;;  %v3945_v38 = vsel %vm6638_vm13, %v3940_v45, %v7647_v0  ;;  %v3550_v0 = vadd.f32 %v7645_v28, %v7161_v10 }
 0x218   : > { %v4993_v20 = vadd.f32 %v4992_v4, %v4898_v60  ;;  %v5032_v46 = vmul.f32 %v4898_v60, %v4898_v60  ;;  %v4734_v27 = vpop.f32.mrf.mxu3  ;;  %v1644_v4 = vsel %vm6651_vm14, %v5304_v48, %v1643_v43  ;;  %v3954_v41 = vrot.slane %v3952_v3, 5 }
 0x219   : > { %v4735_v16 = vadd.f32 %v4734_v27, %v4645_v33  ;;  %v7666_v33 = vld [vmem:[#allocation2 + $0xac] sm:$0xf]  ;;  %v1842_v43 = vunpack.c.l.b16 %v1644_v4  ;;  %v4195_v48 = vrot.slane %v7625_v47, 5 }
 0x21a   : > { %v5063_v19 = vadd.f32 %v5062_v37, %v5032_v46  ;;  %v4648_v36 = vpop.f32.mrf.mxu2  ;;  %v3644_v37 = vld [vmem:[#allocation2 + $0xa8] sm:$0xf]  ;;  %v3966_v22 = vshll.u32 %v7666_v33, 16  ;;  %v3970_v27 = vshrl.u32 %v7666_v33, 16  ;;  %v3955_v3 = vsel %vm6638_vm13, %v3950_v17, %v3954_v41  ;;  %v6015_v17 = vld [vmem:[#allocation2 + $0x9c] sm:$0xff] }
 0x21b   : > { %v4823_v21 = vpop.f32.mrf.mxu0  ;;  %v3957_v9 = vshrl.u32 %v3644_v37, 16  ;;  %v3960_v63 = vshll.u32 %v3644_v37, 16  ;;  %v1863_v15 = vpack.c.b16 %v1843_v2, %v1842_v43  ;;  %v4197_v26 = vrot.slane %v4195_v48, 4  ;;  %v7684_v43 = vld [vmem:[#allocation2 + $0xb0] sm:$0x1] }
 0x21c   : > { %v4824_v55 = vadd.f32 %v4823_v21, %v4735_v16  ;;  %v7664_v18 = vpop.f32.mrf.mxu1  ;;  %v5704_v16 = vrot.slane %v4063_v53, 9  ;;  %v6212_v21 = vld [vmem:[#allocation2 + $0x94] sm:$0xf]  ;;  %v4330_v41 = vunpack.c.l.b16 %v3945_v38 }
 0x21d   : > { %4776 = vmatmul.bf16.gmra.mxu3 %v4350_v62  ;;  %v3959_v39 = vrot.slane %v3957_v9, 4  ;;  %v3962_v37 = vrot.slane %v3960_v63, 5  ;;  %v6213_v9 = vld [vmem:[#allocation2 + $0x98] sm:$0x1] }
 0x21e   : > { %v4899_v31 = vadd.f32 %v4824_v55, %v3547_v8  ;;  %v4198_v8 = vrot.slane %v7650_v35, 5  ;;  %v1509_v55 = vld [vmem:[#allocation2 + $0x90] sm:$0xe]  ;;  %v1653_v63 = vrot.slane %v6213_v9, 5  ;;  %v4196_v10 = vsel %vm6651_vm14, %v5704_v16, %v4195_v48  ;;  %v3646_v16 = vld [vmem:[#allocation2 + $0xb4] sm:$0xf] }
 0x21f   : > { %v5305_v35 = vrot.slane %v1509_v55, 9  ;;  %v7698_v55 = vld [vmem:[#allocation2 + $0xb8] sm:$0xf] }
 0x220   : > { %v6052_v11 = vpack.c.bf16 %v4899_v31, %v4898_v60  ;;  %v4994_v13 = vadd.f32 %v4993_v20, %v4899_v31  ;;  %v5033_v46 = vmul.f32 %v4899_v31, %v4899_v31  ;;  %v4737_v1 = vpop.f32.mrf.mxu3  ;;  %v1650_v60 = vrot.slane %v6212_v21, 5 }
 0x221   : > { %v4738_v62 = vadd.f32 %v4737_v1, %v4648_v36  ;;  %v3972_v36 = vrot.slane %v3970_v27, 4  ;;  %v4331_v31 = vunpack.c.l.b16 %v3955_v3  ;;  %v4199_v28 = vsel %vm6651_vm14, %v4197_v26, %v4198_v8 }
 0x222   : > { %6124 = vst [vmem:[%s7632_s15 + $0x8] sm:$0xff] %v6052_v11   ;;  %v5064_v47 = vadd.f32 %v5063_v19, %v5033_v46  ;;  %v4650_v4 = vpop.f32.mrf.mxu2  ;;  %v7682_v19 = vrot.slane %v3966_v22, 5  ;;  %v1652_v53 = vrot.slane %v1650_v60, 4  ;;  %v3963_v22 = vor.u32 %v3962_v37, %v3959_v39 }
 0x223   : > { %v4826_v20 = vpop.f32.mrf.mxu0  ;;  %v4351_v38 = vpack.c.b16 %v4331_v31, %v4330_v41  ;;  %v4395_v26 = vunpack.c.l.b16 %v4199_v28 }
 0x224   : > { %v4827_v6 = vadd.f32 %v4826_v20, %v4738_v62  ;;  %v7680_v45 = vpop.f32.mrf.mxu1  ;;  %v3973_v27 = vor.u32 %v3972_v36, %v7682_v19  ;;  %v1654_v48 = vsel %vm6651_vm14, %v1652_v53, %v1653_v63  ;;  %v4394_v20 = vunpack.c.l.b16 %v4196_v10 }
 0x225   : > { %v3984_v36 = vshll.u32 %v3646_v16, 16 }
 0x226   : > { %4865 = vmatmul.bf16.gmra.mxu0 %v4414_v34  ;;  %v4900_v2 = vadd.f32 %v4827_v6, %v3550_v0  ;;  %v3976_v34 = vshll.u32 %v7684_v43, 16  ;;  %v1845_v6 = vunpack.c.l.b16 %v1654_v48  ;;  %v4415_v31 = vpack.c.b16 %v4395_v26, %v4394_v20  ;;  %v6214_v48 = vld [vmem:[#allocation2 + $0xa0] sm:$0xf]  ;;  %v6016_v26 = vld [vmem:[#allocation2 + $0xa8] sm:$0xff] }
 0x227   : > { %3593 = vmatmul.bf16.gmra.mxu1 %v1863_v15  ;;  %4692 = vmatmul.bf16.gmra.mxu2 %v6015_v17  ;;  %v1651_v15 = vsel %vm6651_vm14, %v5305_v35, %v1650_v60  ;;  %v3981_v17 = vshrl.u32 %v3646_v16, 16  ;;  %v4202_v35 = vrot.slane %v7666_v33, 5  ;;  %v1657_v16 = vrot.slane %v6214_v48, 5 }
 0x228   : > { %v4995_v11 = vadd.f32 %v4994_v13, %v4900_v2  ;;  %v5034_v46 = vmul.f32 %v4900_v2, %v4900_v2  ;;  %v4739_v1 = vpop.f32.mrf.mxu3  ;;  %v3552_v13 = vadd.f32 %v7664_v18, %v7198_v14  ;;  %v3978_v0 = vrot.slane %v3976_v34, 5 }
 0x229   : > { %v4740_v62 = vadd.f32 %v4739_v1, %v4650_v4  ;;  %v3974_v4 = vrot.slane %v3973_v27, 4  ;;  %v1844_v60 = vunpack.c.l.b16 %v1651_v15  ;;  %v3990_v14 = vshll.u32 %v7698_v55, 16 }
 0x22a   : > { %v5065_v3 = vadd.f32 %v5064_v47, %v5034_v46  ;;  %v4653_v8 = vpop.f32.mrf.mxu2  ;;  %v3964_v47 = vrot.slane %v3963_v22, 4  ;;  %v3994_v18 = vshrl.u32 %v7698_v55, 16  ;;  %v3983_v27 = vrot.slane %v3981_v17, 4 }
 0x22b   : > { %v4828_v21 = vpop.f32.mrf.mxu0  ;;  %v1864_v22 = vpack.c.b16 %v1845_v6, %v1844_v60  ;;  %v3979_v46 = vsel %vm6638_vm13, %v3974_v4, %v3978_v0  ;;  %v3986_v34 = vrot.slane %v3984_v36, 5  ;;  %v7711_v15 = vrot.slane %v3990_v14, 5  ;;  %v6215_v14 = vld [vmem:[#allocation2 + $0xa4] sm:$0x1] }
 0x22c   : > { %v4829_v39 = vadd.f32 %v4828_v21, %v4740_v62  ;;  %v7700_v37 = vpop.f32.mrf.mxu1  ;;  %v3969_v10 = vsel %vm6638_vm13, %v3964_v47, %v7682_v19  ;;  %v4064_v62 = vld [vmem:[#allocation2 + $0xa8] sm:$0xe]  ;;  %v3996_v33 = vrot.slane %v3994_v18, 4  ;;  %v3555_v19 = vadd.f32 %v7680_v45, %v7214_v56  ;;  %v511_v56 = vld [vmem:[#allocation2 + $0xcc] sm:$0x1] }
 0x22d   : > { %4781 = vmatmul.bf16.gmra.mxu3 %v4351_v38  ;;  %v5705_v47 = vrot.slane %v4064_v62, 9  ;;  %v4204_v4 = vrot.slane %v4202_v35, 4  ;;  %v4205_v0 = vrot.slane %v7684_v43, 5  ;;  %v3987_v6 = vor.u32 %v3986_v34, %v3983_v27 }
 0x22e   : > { %v4901_v41 = vadd.f32 %v4829_v39, %v3552_v13  ;;  %v7713_v13 = vld [vmem:[#allocation2 + $0xbc] sm:$0x1]  ;;  %v4332_v39 = vunpack.c.l.b16 %v3969_v10  ;;  %v3997_v17 = vor.u32 %v3996_v33, %v7711_v15  ;;  %v1660_v18 = vrot.slane %v6215_v14, 5 }
 0x22f   : > { %v4000_v36 = vshll.u32 %v7713_v13, 16  ;;  %v4206_v34 = vsel %vm6651_vm14, %v4204_v4, %v4205_v0 }
 0x230   : > { %v6057_v53 = vpack.c.bf16 %v4901_v41, %v4900_v2  ;;  %v4996_v9 = vadd.f32 %v4995_v11, %v4901_v41  ;;  %v5035_v63 = vmul.f32 %v4901_v41, %v4901_v41  ;;  %v4742_v28 = vpop.f32.mrf.mxu3  ;;  %v1659_v41 = vrot.slane %v1657_v16, 4 }
 0x231   : > { %v4743_v38 = vadd.f32 %v4742_v28, %v4653_v8  ;;  %v4333_v8 = vunpack.c.l.b16 %v3979_v46  ;;  %v3998_v48 = vrot.slane %v3997_v17, 4 }
 0x232   : > { %6125 = vst [vmem:[%s7632_s15 + $0x10] sm:$0xff] %v6057_v53   ;;  %v5066_v1 = vadd.f32 %v5065_v3, %v5035_v63  ;;  %v4655_v11 = vpop.f32.mrf.mxu2  ;;  %v1510_v3 = vld [vmem:[#allocation2 + $0x9c] sm:$0xe]  ;;  %v512_v63 = vsel %vm6302_vm2, 0, %v511_v56  ;;  %v4065_v56 = vld [vmem:[#allocation2 + $0xb4] sm:$0xe] }
 0x233   : > { %v4831_v2 = vpop.f32.mrf.mxu0  ;;  %v5306_v45 = vrot.slane %v1510_v3, 9  ;;  %513 = vst [vmem:[#allocation2 + $0xcc] sm:$0x1] %v512_v63 }
 0x234   : > { %v4832_v21 = vadd.f32 %v4831_v2, %v4743_v38  ;;  %v7717_v20 = vpop.f32.mrf.mxu1  ;;  %v3988_v38 = vrot.slane %v3987_v6, 4 }
 0x235   : > { %v1658_v2 = vsel %vm6651_vm14, %v5306_v45, %v1657_v16  ;;  %v7736_v16 = vld [vmem:[#allocation2 + $0xc4] sm:$0xf] }
 0x236   : > { %4870 = vmatmul.bf16.gmra.mxu0 %v4415_v31  ;;  %v4902_v60 = vadd.f32 %v4832_v21, %v3555_v19  ;;  %v4352_v31 = vpack.c.b16 %v4333_v8, %v4332_v39  ;;  %v4002_v19 = vrot.slane %v4000_v36, 5  ;;  %v3557_v21 = vadd.f32 %v7700_v37, %v7237_v61 }
 0x237   : > { %3598 = vmatmul.bf16.gmra.mxu1 %v1864_v22  ;;  %4697 = vmatmul.bf16.gmra.mxu2 %v6016_v26  ;;  %v4203_v22 = vsel %vm6651_vm14, %v5705_v47, %v4202_v35  ;;  %v4397_v39 = vunpack.c.l.b16 %v4206_v34  ;;  %v1846_v8 = vunpack.c.l.b16 %v1658_v2  ;;  %v3993_v4 = vsel %vm6638_vm13, %v3988_v38, %v7711_v15  ;;  %v7895_v2 = vld [vmem:[#allocation11_spill] sm:$0xff] }
 0x238   : > { %v4997_v10 = vadd.f32 %v4996_v9, %v4902_v60  ;;  %v5036_v28 = vmul.f32 %v4902_v60, %v4902_v60  ;;  %v4744_v43 = vpop.f32.mrf.mxu3  ;;  %v1661_v9 = vsel %vm6651_vm14, %v1659_v41, %v1660_v18  ;;  %v4396_v26 = vunpack.c.l.b16 %v4203_v22 }
 0x239   : > { %v4745_v27 = vadd.f32 %v4744_v43, %v4655_v11  ;;  %v3648_v11 = vld [vmem:[#allocation2 + $0xc0] sm:$0xf]  ;;  %v1847_v47 = vunpack.c.l.b16 %v1661_v9  ;;  %v4003_v61 = vsel %vm6638_vm13, %v3998_v48, %v4002_v19  ;;  %v4209_v37 = vrot.slane %v7698_v55, 5  ;;  %v6216_v43 = vld [vmem:[#allocation2 + $0xac] sm:$0xf] }
 0x23a   : > { %v5067_v46 = vadd.f32 %v5066_v1, %v5036_v28  ;;  %v4658_v33 = vpop.f32.mrf.mxu2  ;;  %v4005_v0 = vshrl.u32 %v3648_v11, 16  ;;  %v4008_v45 = vshll.u32 %v3648_v11, 16  ;;  %v4416_v41 = vpack.c.b16 %v4397_v39, %v4396_v26  ;;  %v1055_v22 = vld [vmem:[#allocation2 + $0xcc] sm:$0xf] }
 0x23b   : > { %v4833_v62 = vpop.f32.mrf.mxu0  ;;  %v4014_v18 = vshll.u32 %v7736_v16, 16  ;;  %v4018_v53 = vshrl.u32 %v7736_v16, 16  ;;  %v1865_v28 = vpack.c.b16 %v1847_v47, %v1846_v8  ;;  %v5706_v34 = vrot.slane %v4065_v56, 9  ;;  %v7896_v39 = vld [vmem:[#allocation5_spill] sm:$0xff] }
 0x23c   : > { %v4834_v35 = vadd.f32 %v4833_v62, %v4745_v27  ;;  %v7734_v1 = vpop.f32.mrf.mxu1  ;;  %v4211_v38 = vrot.slane %v4209_v37, 4  ;;  %v1511_v62 = vld [vmem:[#allocation2 + $0xa8] sm:$0xe]  ;;  %v3560_v9 = vadd.f32 %v7717_v20, %v7895_v2  ;;  %v1056_v8 = vsel %vm6344_vm8, %v7896_v39, %v1055_v22 }
 0x23d   : > { %4786 = vmatmul.bf16.gmra.mxu3 %v4352_v31  ;;  %v1664_v31 = vrot.slane %v6216_v43, 5  ;;  %v7752_v11 = vrot.slane %v4014_v18, 5  ;;  %v4020_v26 = vrot.slane %v4018_v53, 4  ;;  %1057 = vst [vmem:[#allocation2 + $0xcc] sm:$0xf] %v1056_v8 }
 0x23e   : > { %v4903_v3 = vadd.f32 %v4834_v35, %v3557_v21  ;;  %v6017_v21 = vld [vmem:[#allocation2 + $0xb4] sm:$0xff]  ;;  %v4212_v35 = vrot.slane %v7713_v13, 5  ;;  %v4210_v13 = vsel %vm6651_vm14, %v5706_v34, %v4209_v37 }
 0x23f   : > { %v1666_v20 = vrot.slane %v1664_v31, 4  ;;  %v4021_v53 = vor.u32 %v4020_v26, %v7752_v11  ;;  %v4398_v37 = vunpack.c.l.b16 %v4210_v13 }
 0x240   : > { %v6062_v6 = vpack.c.bf16 %v4903_v3, %v4902_v60  ;;  %v4998_v17 = vadd.f32 %v4997_v10, %v4903_v3  ;;  %v5037_v36 = vmul.f32 %v4903_v3, %v4903_v3  ;;  %v4747_v14 = vpop.f32.mrf.mxu3  ;;  %v4334_v60 = vunpack.c.l.b16 %v3993_v4 }
 0x241   : > { %v4748_v15 = vadd.f32 %v4747_v14, %v4658_v33  ;;  %v4335_v10 = vunpack.c.l.b16 %v4003_v61  ;;  %v4010_v33 = vrot.slane %v4008_v45, 5  ;;  %v5307_v4 = vrot.slane %v1511_v62, 9  ;;  %v6217_v61 = vld [vmem:[#allocation2 + $0xb0] sm:$0x1] }
 0x242   : > { %6126 = vst [vmem:[%s7632_s15 + $0x18] sm:$0xff] %v6062_v6   ;;  %v5068_v63 = vadd.f32 %v5067_v46, %v5037_v36  ;;  %v4660_v27 = vpop.f32.mrf.mxu2  ;;  %v4007_v46 = vrot.slane %v4005_v0, 4  ;;  %v1667_v6 = vrot.slane %v6217_v61, 5  ;;  %v7757_v36 = vld [vmem:[#allocation2 + $0xc8] sm:$0x1] }
 0x243   : > { %v4836_v55 = vpop.f32.mrf.mxu0  ;;  %v4353_v18 = vpack.c.b16 %v4335_v10, %v4334_v60  ;;  %v3562_v60 = vadd.f32 %v7734_v1, %v7289_v54 }
 0x244   : > { %v4837_v48 = vadd.f32 %v4836_v55, %v4748_v15  ;;  %v7749_v19 = vpop.f32.mrf.mxu1  ;;  %v4011_v45 = vor.u32 %v4010_v33, %v4007_v46  ;;  %v4024_v15 = vshll.u32 %v7757_v36, 16  ;;  %v1668_v22 = vsel %vm6651_vm14, %v1666_v20, %v1667_v6  ;;  %v3650_v39 = vld [vmem:[#allocation2 + $0xcc] sm:$0xf]  ;;  %v4066_v6 = vld [vmem:[#allocation2 + $0xc0] sm:$0xe] }
 0x246   : > { %4875 = vmatmul.bf16.gmra.mxu0 %v4416_v41  ;;  %v4904_v47 = vadd.f32 %v4837_v48, %v3560_v9  ;;  %v4213_v41 = vsel %vm6651_vm14, %v4211_v38, %v4212_v35  ;;  %v4012_v2 = vrot.slane %v4011_v45, 4  ;;  %v4026_v48 = vrot.slane %v4024_v15, 5  ;;  %v1512_v45 = vld [vmem:[#allocation2 + $0xb4] sm:$0xe] }
 0x247   : > { %3603 = vmatmul.bf16.gmra.mxu1 %v1865_v28  ;;  %4702 = vmatmul.bf16.gmra.mxu2 %v6017_v21  ;;  %v4399_v38 = vunpack.c.l.b16 %v4213_v41  ;;  %v7773_v21 = vld [vmem:[#allocation2 + $0xd0] sm:$0xf]  ;;  %v4029_v41 = vshrl.u32 %v3650_v39, 16 }
 0x248   : > { %v4999_v0 = vadd.f32 %v4998_v17, %v4904_v47  ;;  %v5038_v56 = vmul.f32 %v4904_v47, %v4904_v47  ;;  %v4749_v14 = vpop.f32.mrf.mxu3  ;;  %v1665_v17 = vsel %vm6651_vm14, %v5307_v4, %v1664_v31  ;;  %v4017_v3 = vsel %vm6638_vm13, %v4012_v2, %v7752_v11 }
 0x249   : > { %v4750_v43 = vadd.f32 %v4749_v14, %v4660_v27  ;;  %v1848_v9 = vunpack.c.l.b16 %v1665_v17  ;;  %v4022_v27 = vrot.slane %v4021_v53, 4  ;;  %v4417_v26 = vpack.c.b16 %v4399_v38, %v4398_v37  ;;  %v6218_v14 = vld [vmem:[#allocation2 + $0xb8] sm:$0xf] }
 0x24a   : > { %v5069_v28 = vadd.f32 %v5068_v63, %v5038_v56  ;;  %v4663_v34 = vpop.f32.mrf.mxu2  ;;  %v1849_v63 = vunpack.c.l.b16 %v1668_v22  ;;  %v4216_v4 = vrot.slane %v7736_v16, 5  ;;  %v4032_v11 = vshll.u32 %v3650_v39, 16 }
 0x24b   : > { %v4838_v55 = vpop.f32.mrf.mxu0  ;;  %v4027_v8 = vsel %vm6638_vm13, %v4022_v27, %v4026_v48  ;;  %v3565_v53 = vadd.f32 %v7749_v19, %v7296_v30  ;;  %v5707_v22 = vrot.slane %v4066_v6, 9  ;;  %v4219_v37 = vrot.slane %v7757_v36, 5 }
 0x24c   : > { %v4839_v10 = vadd.f32 %v4838_v55, %v4750_v43  ;;  %v7771_v62 = vpop.f32.mrf.mxu1  ;;  %v1866_v1 = vpack.c.b16 %v1849_v63, %v1848_v9  ;;  %v6018_v43 = vld [vmem:[#allocation2 + $0xc0] sm:$0xff]  ;;  %v4337_v17 = vunpack.c.l.b16 %v4027_v8  ;;  %v4218_v55 = vrot.slane %v4216_v4, 4  ;;  %v6219_v9 = vld [vmem:[#allocation2 + $0xbc] sm:$0x1] }
 0x24d   : > { %4791 = vmatmul.bf16.gmra.mxu3 %v4353_v18  ;;  %v1671_v18 = vrot.slane %v6218_v14, 5  ;;  %v1674_v63 = vrot.slane %v6219_v9, 5  ;;  %v4031_v27 = vrot.slane %v4029_v41, 4  ;;  %v4034_v30 = vrot.slane %v4032_v11, 5 }
 0x24e   : > { %v4905_v31 = vadd.f32 %v4839_v10, %v3562_v60  ;;  %v5308_v60 = vrot.slane %v1512_v45, 9  ;;  %v4217_v36 = vsel %vm6651_vm14, %v5707_v22, %v4216_v4  ;;  %v3567_v4 = vadd.f32 %v7771_v62, %v7314_v44 }
 0x24f   : > { %v1673_v2 = vrot.slane %v1671_v18, 4  ;;  %v4035_v6 = vor.u32 %v4034_v30, %v4031_v27  ;;  %v4223_v9 = vrot.slane %v7773_v21, 5  ;;  %v6019_v30 = vld [vmem:[#allocation2 + $0xcc] sm:$0xff] }
 0x250   : > { %v6067_v46 = vpack.c.bf16 %v4905_v31, %v4904_v47  ;;  %v5000_v33 = vadd.f32 %v4999_v0, %v4905_v31  ;;  %v5039_v35 = vmul.f32 %v4905_v31, %v4905_v31  ;;  %v4752_v54 = vpop.f32.mrf.mxu3  ;;  %v4038_v47 = vshll.u32 %v7773_v21, 16  ;;  %v7787_v31 = vld [vmem:[#allocation2 + $0xd4] sm:$0x1] }
 0x251   : > { %v4753_v61 = vadd.f32 %v4752_v54, %v4663_v34  ;;  %v4042_v0 = vshrl.u32 %v7773_v21, 16  ;;  %v4220_v54 = vsel %vm6651_vm14, %v4218_v55, %v4219_v37  ;;  %v4036_v11 = vrot.slane %v4035_v6, 4 }
 0x252   : > { %6127 = vst [vmem:[%s7632_s15 + $0x20] sm:$0xff] %v6067_v46   ;;  %v5070_v20 = vadd.f32 %v5069_v28, %v5039_v35  ;;  %v4665_v13 = vpop.f32.mrf.mxu2  ;;  %v4336_v28 = vunpack.c.l.b16 %v4017_v3  ;;  %v4040_v10 = vrot.slane %v4038_v47, 5  ;;  %v4048_v47 = vshll.u32 %v7787_v31, 16 }
 0x253   : > { %v4841_v56 = vpop.f32.mrf.mxu0  ;;  %v4044_v38 = vrot.slane %v4042_v0, 4  ;;  %v4401_v45 = vunpack.c.l.b16 %v4220_v54 }
 0x254   : > { %v4842_v15 = vadd.f32 %v4841_v56, %v4753_v61  ;;  %v3569_v16 = vpop.f32.mrf.mxu1  ;;  %v4354_v35 = vpack.c.b16 %v4337_v17, %v4336_v28  ;;  %v1675_v61 = vsel %vm6651_vm14, %v1673_v2, %v1674_v63  ;;  %v4400_v56 = vunpack.c.l.b16 %v4217_v36 }
 0x255   : > { %v1851_v41 = vunpack.c.l.b16 %v1675_v61 }
 0x256   : > { %4880 = vmatmul.bf16.gmra.mxu0 %v4417_v26  ;;  %v4906_v34 = vadd.f32 %v4842_v15, %v3565_v53  ;;  %v4050_v53 = vrot.slane %v4048_v47, 5  ;;  %v4418_v55 = vpack.c.b16 %v4401_v45, %v4400_v56 }
 0x257   : > { %3608 = vmatmul.bf16.gmra.mxu1 %v1866_v1  ;;  %4707 = vmatmul.bf16.gmra.mxu2 %v6018_v43  ;;  %v4045_v1 = vor.u32 %v4044_v38, %v4040_v10  ;;  %v4041_v38 = vsel %vm6638_vm13, %v4036_v11, %v4040_v10  ;;  %v4226_v10 = vrot.slane %v7787_v31, 5 }
 0x258   : > { %v5001_v19 = vadd.f32 %v5000_v33, %v4906_v34  ;;  %v5040_v48 = vmul.f32 %v4906_v34, %v4906_v34  ;;  %v4754_v46 = vpop.f32.mrf.mxu3  ;;  %v1672_v33 = vsel %vm6651_vm14, %v5308_v60, %v1671_v18 }
 0x259   : > { %v4755_v39 = vadd.f32 %v4754_v46, %v4665_v13  ;;  %v1850_v14 = vunpack.c.l.b16 %v1672_v33  ;;  %v4046_v18 = vrot.slane %v4045_v1, 4  ;;  %v4338_v46 = vunpack.c.l.b16 %v4041_v38 }
 0x25a   : > { %v5071_v26 = vadd.f32 %v5070_v20, %v5040_v48  ;;  %v4668_v8 = vpop.f32.mrf.mxu2 }
 0x25b   : > { %v4843_v3 = vpop.f32.mrf.mxu0  ;;  %v1867_v62 = vpack.c.b16 %v1851_v41, %v1850_v14  ;;  %v4051_v2 = vsel %vm6638_vm13, %v4046_v18, %v4050_v53 }
 0x25c   : > { %v4844_v20 = vadd.f32 %v4843_v3, %v4755_v39  ;;  %v3571_v0 = vpop.f32.mrf.mxu1 }
 0x25d   : > { %4796 = vmatmul.bf16.gmra.mxu3 %v4354_v35  ;;  %v4339_v35 = vunpack.c.l.b16 %v4051_v2  ;;  %v3572_v61 = vadd.f32 %v3571_v0, %v7337_v29 }
 0x25e   : > { %v4907_v13 = vadd.f32 %v4844_v20, %v3567_v4 }
 0x260   : > { %v6072_v15 = vpack.c.bf16 %v4907_v13, %v4906_v34  ;;  %v5002_v43 = vadd.f32 %v5001_v19, %v4907_v13  ;;  %v5041_v28 = vmul.f32 %v4907_v13, %v4907_v13  ;;  %v4757_v17 = vpop.f32.mrf.mxu3  ;;  %v3570_v34 = vadd.f32 %v3569_v16, %v7326_v52  ;;  %v4067_v19 = vld [vmem:[#allocation2 + $0xcc] sm:$0xe] }
 0x261   : > { %v4758_v44 = vadd.f32 %v4757_v17, %v4668_v8  ;;  %v5708_v36 = vrot.slane %v4067_v19, 9  ;;  %v4355_v52 = vpack.c.b16 %v4339_v35, %v4338_v46 }
 0x262   : > { %6128 = vst [vmem:[%s7632_s15 + $0x28] sm:$0xff] %v6072_v15   ;;  %v5072_v22 = vadd.f32 %v5071_v26, %v5041_v28  ;;  %v4670_v60 = vpop.f32.mrf.mxu2  ;;  %v4225_v26 = vrot.slane %v4223_v9, 4 }
 0x263   : > { %v4846_v37 = vpop.f32.mrf.mxu0  ;;  %v4224_v3 = vsel %vm6651_vm14, %v5708_v36, %v4223_v9 }
 0x264   : > { %v4847_v63 = vadd.f32 %v4846_v37, %v4758_v44  ;;  %v3574_v27 = vpop.f32.mrf.mxu1  ;;  %v4227_v8 = vsel %vm6651_vm14, %v4225_v26, %v4226_v10  ;;  %v4402_v4 = vunpack.c.l.b16 %v4224_v3 }
 0x265   : > { %v4403_v20 = vunpack.c.l.b16 %v4227_v8  ;;  %v3575_v15 = vadd.f32 %v3574_v27, %v7350_v58 }
 0x266   : > { %4885 = vmatmul.bf16.gmra.mxu0 %v4418_v55  ;;  %v4908_v48 = vadd.f32 %v4847_v63, %v3570_v34 }
 0x267   : > { %3613 = vmatmul.bf16.gmra.mxu1 %v1867_v62  ;;  %4712 = vmatmul.bf16.gmra.mxu2 %v6019_v30  ;;  %v4419_v11 = vpack.c.b16 %v4403_v20, %v4402_v4 }
 0x268   : > { %v5003_v39 = vadd.f32 %v5002_v43, %v4908_v48  ;;  %v5042_v32 = vmul.f32 %v4908_v48, %v4908_v48  ;;  %v4759_v54 = vpop.f32.mrf.mxu3 }
 0x269   : > { %v4760_v1 = vadd.f32 %v4759_v54, %v4670_v60 }
 0x26a   : > { %v5073_v21 = vadd.f32 %v5072_v22, %v5042_v32  ;;  %v4673_v33 = vpop.f32.mrf.mxu2 }
 0x26b   : > { %v4848_v16 = vpop.f32.mrf.mxu0 }
 0x26c   : > { %v4849_v6 = vadd.f32 %v4848_v16, %v4760_v1  ;;  %v3576_v31 = vpop.f32.mrf.mxu1 }
 0x26d   : > { %4801 = vmatmul.bf16.gmra.mxu3 %v4355_v52  ;;  %v3577_v60 = vadd.f32 %v3576_v31, %v7364_v50 }
 0x26e   : > { %v4909_v47 = vadd.f32 %v4849_v6, %v3572_v61 }
 0x270   : > { %v6077_v56 = vpack.c.bf16 %v4909_v47, %v4908_v48  ;;  %v5004_v13 = vadd.f32 %v5003_v39, %v4909_v47  ;;  %v5043_v45 = vmul.f32 %v4909_v47, %v4909_v47  ;;  %v4762_v14 = vpop.f32.mrf.mxu3 }
 0x271   : > { %v4763_v18 = vadd.f32 %v4762_v14, %v4673_v33 }
 0x272   : > { %6129 = vst [vmem:[%s7632_s15 + $0x30] sm:$0xff] %v6077_v56   ;;  %v5074_v41 = vadd.f32 %v5073_v21, %v5043_v45  ;;  %v4675_v51 = vpop.f32.mrf.mxu2 }
 0x273   : > { %v4851_v53 = vpop.f32.mrf.mxu0 }
 0x274   : > { %v4852_v43 = vadd.f32 %v4851_v53, %v4763_v18  ;;  %v3579_v29 = vpop.f32.mrf.mxu1 }
 0x275   : > { %v3580_v35 = vadd.f32 %v3579_v29, %v7377_v12 }
 0x276   : > { %4890 = vmatmul.bf16.gmra.mxu0 %v4419_v11  ;;  %v4910_v0 = vadd.f32 %v4852_v43, %v3575_v15 }
 0x278   : > { %v5005_v28 = vadd.f32 %v5004_v13, %v4910_v0  ;;  %v5044_v17 = vmul.f32 %v4910_v0, %v4910_v0  ;;  %v4764_v22 = vpop.f32.mrf.mxu3 }
 0x279   : > { %v4765_v44 = vadd.f32 %v4764_v22, %v4675_v51 }
 0x27a   : > { %v5075_v55 = vadd.f32 %v5074_v41, %v5044_v17  ;;  %v4678_v37 = vpop.f32.mrf.mxu2 }
 0x27b   : > { %v4853_v62 = vpop.f32.mrf.mxu0 }
 0x27c   : > { %v4854_v38 = vadd.f32 %v4853_v62, %v4765_v44  ;;  %v3581_v2 = vpop.f32.mrf.mxu1 }
 0x27d   : > { %v3582_v16 = vadd.f32 %v3581_v2, %v7394_v59 }
 0x27e   : > { %v4911_v9 = vadd.f32 %v4854_v38, %v3577_v60 }
 0x280   : > { %v6082_v34 = vpack.c.bf16 %v4911_v9, %v4910_v0  ;;  %v5006_v63 = vadd.f32 %v5005_v28, %v4911_v9  ;;  %v5045_v58 = vmul.f32 %v4911_v9, %v4911_v9  ;;  %v4767_v27 = vpop.f32.mrf.mxu3 }
 0x281   : > { %v4768_v19 = vadd.f32 %v4767_v27, %v4678_v37 }
 0x282   : > { %6130 = vst [vmem:[%s7632_s15 + $0x38] sm:$0xff] %v6082_v34   ;;  %v5076_v30 = vadd.f32 %v5075_v55, %v5045_v58  ;;  %v4680_v46 = vpop.f32.mrf.mxu2 }
 0x283   : > { %v4856_v48 = vpop.f32.mrf.mxu0 }
 0x284   : > { %v4857_v36 = vadd.f32 %v4856_v48, %v4768_v19  ;;  %v3584_v26 = vpop.f32.mrf.mxu1 }
 0x285   : > { %v3585_v13 = vadd.f32 %v3584_v26, %v7408_v49 }
 0x286   : > { %v4912_v10 = vadd.f32 %v4857_v36, %v3580_v35 }
 0x288   : > { %v5007_v39 = vadd.f32 %v5006_v63, %v4912_v10  ;;  %v5046_v50 = vmul.f32 %v4912_v10, %v4912_v10  ;;  %v4769_v32 = vpop.f32.mrf.mxu3 }
 0x289   : > { %v4770_v21 = vadd.f32 %v4769_v32, %v4680_v46 }
 0x28a   : > { %v5077_v54 = vadd.f32 %v5076_v30, %v5046_v50  ;;  %v4683_v52 = vpop.f32.mrf.mxu2 }
 0x28b   : > { %v4858_v1 = vpop.f32.mrf.mxu0 }
 0x28c   : > { %v4859_v3 = vadd.f32 %v4858_v1, %v4770_v21  ;;  %v3586_v8 = vpop.f32.mrf.mxu1 }
 0x28d   : > { %v3587_v29 = vadd.f32 %v3586_v8, %v7422_v7 }
 0x28e   : > { %v4913_v33 = vadd.f32 %v4859_v3, %v3582_v16 }
 0x290   : > { %v6087_v61 = vpack.c.bf16 %v4913_v33, %v4912_v10  ;;  %v5008_v6 = vadd.f32 %v5007_v39, %v4913_v33  ;;  %v5047_v31 = vmul.f32 %v4913_v33, %v4913_v33  ;;  %v4772_v12 = vpop.f32.mrf.mxu3 }
 0x291   : > { %v4773_v4 = vadd.f32 %v4772_v12, %v4683_v52 }
 0x292   : > { %6131 = vst [vmem:[%s7632_s15 + $0x40] sm:$0xff] %v6087_v61   ;;  %v5078_v47 = vadd.f32 %v5077_v54, %v5047_v31  ;;  %v4685_v56 = vpop.f32.mrf.mxu2 }
 0x293   : > { %v4861_v20 = vpop.f32.mrf.mxu0 }
 0x294   : > { %v4862_v45 = vadd.f32 %v4861_v20, %v4773_v4  ;;  %v3589_v14 = vpop.f32.mrf.mxu1 }
 0x295   : > { %v3590_v2 = vadd.f32 %v3589_v14, %v7435_v24 }
 0x296   : > { %v4914_v41 = vadd.f32 %v4862_v45, %v3585_v13 }
 0x298   : > { %v5009_v11 = vadd.f32 %v5008_v6, %v4914_v41  ;;  %v5048_v59 = vmul.f32 %v4914_v41, %v4914_v41  ;;  %v4774_v18 = vpop.f32.mrf.mxu3 }
 0x299   : > { %v4775_v51 = vadd.f32 %v4774_v18, %v4685_v56 }
 0x29a   : > { %v5079_v53 = vadd.f32 %v5078_v47, %v5048_v59  ;;  %v4688_v43 = vpop.f32.mrf.mxu2 }
 0x29b   : > { %v4863_v15 = vpop.f32.mrf.mxu0 }
 0x29c   : > { %v4864_v0 = vadd.f32 %v4863_v15, %v4775_v51  ;;  %v3591_v28 = vpop.f32.mrf.mxu1 }
 0x29d   : > { %v3592_v35 = vadd.f32 %v3591_v28, %v7449_v40 }
 0x29e   : > { %v4915_v17 = vadd.f32 %v4864_v0, %v3587_v29 }
 0x2a0   : > { %v6092_v22 = vpack.c.bf16 %v4915_v17, %v4914_v41  ;;  %v5010_v55 = vadd.f32 %v5009_v11, %v4915_v17  ;;  %v5049_v44 = vmul.f32 %v4915_v17, %v4915_v17  ;;  %v4777_v49 = vpop.f32.mrf.mxu3 }
 0x2a1   : > { %v4778_v37 = vadd.f32 %v4777_v49, %v4688_v43 }
 0x2a2   : > { %6132 = vst [vmem:[%s7632_s15 + $0x48] sm:$0xff] %v6092_v22   ;;  %v5080_v62 = vadd.f32 %v5079_v53, %v5049_v44  ;;  %v4690_v38 = vpop.f32.mrf.mxu2 }
 0x2a3   : > { %v4866_v60 = vpop.f32.mrf.mxu0 }
 0x2a4   : > { %v4867_v9 = vadd.f32 %v4866_v60, %v4778_v37  ;;  %v3594_v34 = vpop.f32.mrf.mxu1 }
 0x2a5   : > { %v3595_v16 = vadd.f32 %v3594_v34, %v7462_v5 }
 0x2a6   : > { %v4916_v63 = vadd.f32 %v4867_v9, %v3590_v2 }
 0x2a8   : > { %v5011_v58 = vadd.f32 %v5010_v55, %v4916_v63  ;;  %v5050_v7 = vmul.f32 %v4916_v63, %v4916_v63  ;;  %v4779_v27 = vpop.f32.mrf.mxu3 }
 0x2a9   : > { %v4780_v19 = vadd.f32 %v4779_v27, %v4690_v38 }
 0x2aa   : > { %v5081_v30 = vadd.f32 %v5080_v62, %v5050_v7  ;;  %v4693_v46 = vpop.f32.mrf.mxu2 }
 0x2ab   : > { %v4868_v48 = vpop.f32.mrf.mxu0 }
 0x2ac   : > { %v4869_v36 = vadd.f32 %v4868_v48, %v4780_v19  ;;  %v3596_v26 = vpop.f32.mrf.mxu1 }
 0x2ad   : > { %v3597_v20 = vadd.f32 %v3596_v26, %v7479_v57 }
 0x2ae   : > { %v4917_v10 = vadd.f32 %v4869_v36, %v3592_v35 }
 0x2b0   : > { %v6097_v39 = vpack.c.bf16 %v4917_v10, %v4916_v63  ;;  %v5012_v50 = vadd.f32 %v5011_v58, %v4917_v10  ;;  %v5051_v32 = vmul.f32 %v4917_v10, %v4917_v10  ;;  %v4782_v24 = vpop.f32.mrf.mxu3 }
 0x2b1   : > { %v4783_v21 = vadd.f32 %v4782_v24, %v4693_v46 }
 0x2b2   : > { %6133 = vst [vmem:[%s7632_s15 + $0x50] sm:$0xff] %v6097_v39   ;;  %v5082_v54 = vadd.f32 %v5081_v30, %v5051_v32  ;;  %v4695_v52 = vpop.f32.mrf.mxu2  ;;  %v7898_v32 = vld [vmem:[#allocation6_spill] sm:$0xff] }
 0x2b3   : > { %v4871_v1 = vpop.f32.mrf.mxu0 }
 0x2b4   : > { %v4872_v3 = vadd.f32 %v4871_v1, %v4783_v21  ;;  %v3599_v8 = vpop.f32.mrf.mxu1 }
 0x2b5   : > { %v3600_v15 = vadd.f32 %v3599_v8, %v7493_v42 }
 0x2b6   : > { %v4918_v33 = vadd.f32 %v4872_v3, %v3595_v16 }
 0x2b8   : > { %v5013_v61 = vadd.f32 %v5012_v50, %v4918_v33  ;;  %v5052_v40 = vmul.f32 %v4918_v33, %v4918_v33  ;;  %v4784_v6 = vpop.f32.mrf.mxu3 }
 0x2b9   : > { %v4785_v12 = vadd.f32 %v4784_v6, %v4695_v52 }
 0x2ba   : > { %v5083_v31 = vadd.f32 %v5082_v54, %v5052_v40  ;;  %v4698_v4 = vpop.f32.mrf.mxu2  ;;  %v7899_v40 = vld [vmem:[#allocation7_spill] sm:$0xff] }
 0x2bb   : > { %v4873_v47 = vpop.f32.mrf.mxu0 }
 0x2bc   : > { %v4874_v56 = vadd.f32 %v4873_v47, %v4785_v12  ;;  %v3601_v13 = vpop.f32.mrf.mxu1 }
 0x2bd   : > { %v3602_v62 = vadd.f32 %v3601_v13, %v7507_v23 }
 0x2be   : > { %v4919_v45 = vadd.f32 %v4874_v56, %v3597_v20 }
 0x2c0   : > { %v6102_v14 = vpack.c.bf16 %v4919_v45, %v4918_v33  ;;  %v5014_v41 = vadd.f32 %v5013_v61, %v4919_v45  ;;  %v5053_v11 = vmul.f32 %v4919_v45, %v4919_v45  ;;  %v4787_v5 = vpop.f32.mrf.mxu3 }
 0x2c1   : > { %v4788_v18 = vadd.f32 %v4787_v5, %v4698_v4 }
 0x2c2   : > { %6134 = vst [vmem:[%s7632_s15 + $0x58] sm:$0xff] %v6102_v14   ;;  %v5084_v59 = vadd.f32 %v5083_v31, %v5053_v11  ;;  %v4700_v51 = vpop.f32.mrf.mxu2 }
 0x2c3   : > { %v4876_v53 = vpop.f32.mrf.mxu0 }
 0x2c4   : > { %v4877_v43 = vadd.f32 %v4876_v53, %v4788_v18  ;;  %v3604_v0 = vpop.f32.mrf.mxu1 }
 0x2c5   : > { %v3605_v30 = vadd.f32 %v3604_v0, %v7520_v25 }
 0x2c6   : > { %v4920_v29 = vadd.f32 %v4877_v43, %v3600_v15 }
 0x2c8   : > { %v5015_v28 = vadd.f32 %v5014_v41, %v4920_v29  ;;  %v5054_v57 = vmul.f32 %v4920_v29, %v4920_v29  ;;  %v4789_v17 = vpop.f32.mrf.mxu3  ;;  %v7900_v41 = vld [vmem:[#allocation8_spill] sm:$0xff] }
 0x2c9   : > { %v4790_v55 = vadd.f32 %v4789_v17, %v4700_v51  ;;  %v7901_v17 = vld [vmem:[#allocation9_spill] sm:$0xff] }
 0x2ca   : > { %v5085_v22 = vadd.f32 %v5084_v59, %v5054_v57  ;;  %v4703_v49 = vpop.f32.mrf.mxu2 }
 0x2cb   : > { %v4878_v44 = vpop.f32.mrf.mxu0 }
 0x2cc   : > { %v4879_v37 = vadd.f32 %v4878_v44, %v4790_v55  ;;  %v3606_v34 = vpop.f32.mrf.mxu1 }
 0x2cd   : > { %v3607_v24 = vadd.f32 %v3606_v34, %v7898_v32 }
 0x2ce   : > { %v4921_v60 = vadd.f32 %v4879_v37, %v3602_v62 }
 0x2d0   : > { %v6107_v38 = vpack.c.bf16 %v4921_v60, %v4920_v29  ;;  %v5016_v2 = vadd.f32 %v5015_v28, %v4921_v60  ;;  %v5055_v9 = vmul.f32 %v4921_v60, %v4921_v60  ;;  %v4792_v42 = vpop.f32.mrf.mxu3 }
 0x2d1   : > { %v4793_v58 = vadd.f32 %v4792_v42, %v4703_v49  ;;  %v7902_v42 = vld [vmem:[#allocation10_spill] sm:$0xff] }
 0x2d2   : > { %6135 = vst [vmem:[%s7632_s15 + $0x60] sm:$0xff] %v6107_v38   ;;  %v5086_v63 = vadd.f32 %v5085_v22, %v5055_v9  ;;  %v4705_v27 = vpop.f32.mrf.mxu2 }
 0x2d3   : > { %v4881_v7 = vpop.f32.mrf.mxu0 }
 0x2d4   : > { %v4882_v19 = vadd.f32 %v4881_v7, %v4793_v58  ;;  %v3609_v10 = vpop.f32.mrf.mxu1 }
 0x2d5   : > { %v3610_v6 = vadd.f32 %v3609_v10, %v7899_v40 }
 0x2d6   : > { %v4922_v48 = vadd.f32 %v4882_v19, %v3605_v30 }
 0x2d8   : > { %v5017_v46 = vadd.f32 %v5016_v2, %v4922_v48  ;;  %v5056_v35 = vmul.f32 %v4922_v48, %v4922_v48  ;;  %v4794_v23 = vpop.f32.mrf.mxu3 }
 0x2d9   : > { %v4795_v26 = vadd.f32 %v4794_v23, %v4705_v27 }
 0x2da   : > { %v5087_v36 = vadd.f32 %v5086_v63, %v5056_v35  ;;  %v4708_v50 = vpop.f32.mrf.mxu2 }
 0x2db   : > { %v4883_v39 = vpop.f32.mrf.mxu0 }
 0x2dc   : > { %v4884_v54 = vadd.f32 %v4883_v39, %v4795_v26  ;;  %v3611_v12 = vpop.f32.mrf.mxu1 }
 0x2dd   : > { %v3612_v11 = vadd.f32 %v3611_v12, %v7900_v41 }
 0x2de   : > { %v4923_v21 = vadd.f32 %v4884_v54, %v3607_v24 }
 0x2e0   : > { %v6112_v1 = vpack.c.bf16 %v4923_v21, %v4922_v48  ;;  %v5018_v52 = vadd.f32 %v5017_v46, %v4923_v21  ;;  %v5057_v16 = vmul.f32 %v4923_v21, %v4923_v21  ;;  %v4797_v3 = vpop.f32.mrf.mxu3 }
 0x2e1   : > { %v4798_v8 = vadd.f32 %v4797_v3, %v4708_v50 }
 0x2e2   : > { %6136 = vst [vmem:[%s7632_s15 + $0x68] sm:$0xff] %v6112_v1   ;;  %v5088_v25 = vadd.f32 %v5087_v36, %v5057_v16  ;;  %v4710_v61 = vpop.f32.mrf.mxu2 }
 0x2e3   : > { %v4886_v33 = vpop.f32.mrf.mxu0 }
 0x2e4   : > { %v4887_v31 = vadd.f32 %v4886_v33, %v4798_v8  ;;  %v3614_v53 = vpop.f32.mrf.mxu1 }
 0x2e5   : > { %v3615_v22 = vadd.f32 %v3614_v53, %v7901_v17 }
 0x2e6   : > { %v4924_v47 = vadd.f32 %v4887_v31, %v3610_v6 }
 0x2e8   : > { %v5019_v4 = vadd.f32 %v5018_v52, %v4924_v47  ;;  %v5058_v20 = vmul.f32 %v4924_v47, %v4924_v47  ;;  %v4799_v56 = vpop.f32.mrf.mxu3 }
 0x2e9   : > { %v4800_v45 = vadd.f32 %v4799_v56, %v4710_v61 }
 0x2ea   : > { %v5089_v13 = vadd.f32 %v5088_v25, %v5058_v20  ;;  %v4713_v59 = vpop.f32.mrf.mxu2 }
 0x2eb   : > { %v4888_v14 = vpop.f32.mrf.mxu0 }
 0x2ec   : > { %v4889_v5 = vadd.f32 %v4888_v14, %v4800_v45  ;;  %v3616_v60 = vpop.f32.mrf.mxu1 }
 0x2ed   : > { %v3617_v63 = vadd.f32 %v3616_v60, %v7902_v42 }
 0x2ee   : > { %v4925_v18 = vadd.f32 %v4889_v5, %v3612_v11 }
 0x2f0   : > { %v6117_v51 = vpack.c.bf16 %v4925_v18, %v4924_v47  ;;  %v5020_v15 = vadd.f32 %v5019_v4, %v4925_v18  ;;  %v5059_v43 = vmul.f32 %v4925_v18, %v4925_v18  ;;  %v4802_v29 = vpop.f32.mrf.mxu3 }
 0x2f1   : > { %v4803_v28 = vadd.f32 %v4802_v29, %v4713_v59 }
 0x2f2   : > { %6137 = vst [vmem:[%s7632_s15 + $0x70] sm:$0xff] %v6117_v51   ;;  %v5090_v0 = vadd.f32 %v5089_v13, %v5059_v43  ;;  %v4715_v49 = vpop.f32.mrf.mxu2 }
 0x2f3   : > { %v4891_v57 = vpop.f32.mrf.mxu0 }
 0x2f4   : > { %v4892_v55 = vadd.f32 %v4891_v57, %v4803_v28 }
 0x2f6   : > { %v4926_v44 = vadd.f32 %v4892_v55, %v3615_v22 }
 0x2f8   : > { %v5021_v62 = vadd.f32 %v5020_v15, %v4926_v44  ;;  %v5060_v37 = vmul.f32 %v4926_v44, %v4926_v44  ;;  %v4804_v38 = vpop.f32.mrf.mxu3 }
 0x2f9   : > { %v4805_v9 = vadd.f32 %v4804_v38, %v4715_v49 }
 0x2fa   : > { %v5091_v2 = vadd.f32 %v5090_v0, %v5060_v37 }
 0x2fb   : > { %v4893_v34 = vpop.f32.mrf.mxu0 }
 0x2fc   : > { %v4894_v58 = vadd.f32 %v4893_v34, %v4805_v9 }
 0x2fe   : > { %v4927_v7 = vadd.f32 %v4894_v58, %v3617_v63 }
 0x300   : > { %v6122_v27 = vpack.c.bf16 %v4927_v7, %v4926_v44  ;;  %v5022_v30 = vadd.f32 %v5021_v62, %v4927_v7  ;;  %v5061_v19 = vmul.f32 %v4927_v7, %v4927_v7 }
 0x302   : > { %6138 = vst [vmem:[%s7632_s15 + $0x78] sm:$0xff] %v6122_v27   ;;  %v5023_v48 = vrot.slane %v5022_v30, 4  ;;  %v5092_v46 = vadd.f32 %v5091_v2, %v5061_v19 }
 0x304   : > { %v5024_v35 = vadd.f32 %v5023_v48, %v5022_v30  ;;  %v5093_v23 = vrot.slane %v5092_v46, 4 }
 0x306   : > { %v5025_v36 = vrot.slane %v5024_v35, 2  ;;  %v5094_v26 = vadd.f32 %v5093_v23, %v5092_v46 }
 0x308   : > { %v5026_v10 = vadd.f32 %v5025_v36, %v5024_v35  ;;  %v5095_v39 = vrot.slane %v5094_v26, 2 }
 0x30a   : > { %v5027_v50 = vrot.slane %v5026_v10, 1  ;;  %v5096_v32 = vadd.f32 %v5095_v39, %v5094_v26 }
 0x30c   : > { %v5028_v24 = vadd.f32 %v5027_v50, %v5026_v10  ;;  %v5097_v54 = vrot.slane %v5096_v32, 1 }
 0x30e   : > { %5029 = vst [vmem:[%s411_s20] sm:$0x1] %v5028_v24  ;;  %v5098_v21 = vadd.f32 %v5097_v54, %v5096_v32 }
 0x310   : > { %5099 = vst [vmem:[%s411_s20 + $0x1] sm:$0x1] %v5098_v21 }
 0x311 PF: > { %s16_s0 = sadd.s32 1, %s6242_s0   ;;  %s7903_s18 = smov %s6238_s19 }
 0x312   : > { %p13_p5 = scmp.ge.s32.totalorder %s16_s0, 4   ;;  %s7904_s19 = smov %s7906_s2 }
 0x314   :  { %15 = sbr.rel (!%p13_p5) target bundleno = 2 (0x2), region = 89 }

// kernel: double_conv.4
= control target key start
LH: loop header
LB: loop body
LE: loop exit
PB: predicated region body
PF: predicated region fallthrough
CT: control target
= control target key end

     0   :  { %s6610_s23 = smov 0   ;;  %s6612_s24 = smov 0   ;;  %s8232_s0 = inlined_call_operand.vmem [shape: bf16[2,16,16,128], index: 0, kind: input, shape index: {}, may-alias: {0,1,2}]   ;;  %s8233_s1 = inlined_call_operand.vmem [shape: bf16[2,16,16,128], index: 1, kind: input, shape index: {}, may-alias: {0,1,2}]   ;;  %s8234_s2 = inlined_call_operand.vmem [shape: bf16[2,16,16,128], index: 2, kind: input, shape index: {}, may-alias: {0,1,2}]   ;;  %s8235_s3 = inlined_call_operand.vmem [shape: bf16[3,384,128], index: 3, kind: input, shape index: {}]   ;;  %s8236_s4 = inlined_call_operand.vmem [shape: f32[1,128], index: 4, kind: input, shape index: {}]   ;;  %s8237_s5 = inlined_call_operand.vmem [shape: f32[1,128], index: 5, kind: input, shape index: {}]   ;;  %s8238_s6 = inlined_call_operand.vmem [shape: bf16[2,16,16,128], index: 6, kind: output, shape index: {0}]   ;;  %s8239_s7 = inlined_call_operand.vmem [shape: f32[2,1,2,128], index: 7, kind: output, shape index: {1}]  }
   0x1   :  { %s6614_s2 = smov 0  }
   0x2 LB: > { %s30_s25 = sadd.s32 1, %s6563_s24  ;;  %p5525_p0 = scmp.ge.s32.totalorder %s6567_s2, 1  ;;  %s6567_s2 = sphi %s6614_s2, %s18_s2   ;;  %s6563_s24 = sphi %s6612_s24, %s8284_s24   ;;  %s6559_s23 = sphi %s6610_s23, %s8283_s23  }
   0x3   : > { %p32_p1 = scmp.ge.s32.totalorder %s30_s25, 2  ;;  %p328_p2 = scmp.lt.s32.totalorder %s6567_s2, 3 }
   0x5   : > { %s8286_s25 = smov (%p32_p1, %s30_s25), 0  ;;  %p329_p3 = pnand %p5525_p0, %p328_p2 }
   0x7   : > { %332 = sbr.rel (%p329_p3) target bundleno = 802 (0x322), region = 44 }
   0xc   : > { %v6229_v0 = vld [vmem:[%s8235_s3 + $0xf8] sm:$0xff]  ;;  %p421_p4 = scmp.lt.s32.totalorder %s6559_s23, 1  ;;  %vm699_vm0 = vcmask 1040384   ;;  %vm700_vm1 = vsmask.f32 256  ;;  %v6228_v1 = vld [vmem:[%s8235_s3 + $0xf0] sm:$0xff] }
   0xd   : > { %3183 = vmatpush.bf16.msra.mxu0 %v6229_v0  ;;  %6460 = vmatpush.bf16.msra.mxu1 %v6229_v0  ;;  %v6639_v2 = vld [vmem:[%s8236_s4] ss:$0 sm:$0xff]  ;;  %vm6644_vm2 = vmand %vm699_vm0, %vm700_vm1  ;;  %v8243_v3 = vmov 0  ;;  %v705_v4 = vld [vmem:[#allocation2 + $0xc] sm:$0x1]  ;;  %vm834_vm5 = vcmask 1043456  }
   0xe   : > { %s8288_s23 = smov (!%p421_p4, %s6559_s23), 1  ;;  %6461 = vmatpush.bf16.msra.mxu2 %v6229_v0  ;;  %6462 = vmatpush.bf16.msra.mxu3 %v6229_v0  ;;  %v8244_v3 = vsel %vm6644_vm2, 4294967295, %v8243_v3  ;;  %vm756_vm3 = vsmask.f32 7938  ;;  %v6658_v5 = vld [vmem:[%s8237_s5] ss:$0 sm:$0xff] }
   0xf   : > { %s6162_s9 = sshll.u32 %s8288_s23, 7  ;;  %8245 = vst [vmem:[#allocation3_spill] sm:$0xff] %v8244_v3  ;;  %v706_v6 = vsel %vm6644_vm2, 0, %v705_v4  ;;  %vm6664_vm4 = vmand %vm699_vm0, %vm756_vm3  ;;  %v761_v8 = vld [vmem:[#allocation2 + $0x14] sm:$0x1]  ;;  %v6227_v9 = vld [vmem:[%s8235_s3 + $0xe8] sm:$0xff] }
  0x10   : > { %s6653_s12 = scalar_lea.vmem %s8233_s1, %s6162_s9  ;;  %707 = vst [vmem:[#allocation2 + $0xc] sm:$0x1] %v706_v6  ;;  %v762_v11 = vsel %vm6664_vm4, 0, %v761_v8  ;;  %v717_v17 = vld [vmem:[#allocation2 + $0x3c] sm:$0x1]  ;;  %v6226_v29 = vld [vmem:[%s8235_s3 + $0xe0] sm:$0xff]  ;;  %vm6718_vm8 = vmand %vm834_vm5, %vm756_vm3  ;;  %s8014_s26 = scalar_lea.vmem %s8238_s6, %s6162_s9 }
  0x11   : > { %3184 = vmatpush.bf16.msra.mxu0 %v6228_v1  ;;  %6463 = vmatpush.bf16.msra.mxu1 %v6228_v1  ;;  %v6287_v10 = vld [vmem:[%s6653_s12] sm:$0xff]   ;;  %763 = vst [vmem:[#allocation2 + $0x14] sm:$0x1] %v762_v11  ;;  %v718_v19 = vsel %vm6644_vm2, 0, %v717_v17  ;;  %v729_v22 = vld [vmem:[#allocation2 + $0x6c] sm:$0x1] }
  0x12   : > { %v6433_v12 = vld [vmem:[%s6653_s12 + $0x20] sm:$0xff]   ;;  %6464 = vmatpush.bf16.msra.mxu2 %v6228_v1  ;;  %6465 = vmatpush.bf16.msra.mxu3 %v6228_v1  ;;  %v6288_v13 = vunpack.c.l.bf16 %v6287_v10  ;;  %v6289_v14 = vunpack.c.h.bf16 %v6287_v10  ;;  %v785_v23 = vld [vmem:[#allocation2 + $0x74] sm:$0x1]  ;;  %719 = vst [vmem:[#allocation2 + $0x3c] sm:$0x1] %v718_v19  ;;  %v730_v32 = vsel %vm6644_vm2, 0, %v729_v22 }
  0x13   : > { %v6304_v15 = vunpack.c.l.bf16 %v6433_v12  ;;  %v6305_v16 = vunpack.c.h.bf16 %v6433_v12  ;;  %v6437_v18 = vld [vmem:[%s6653_s12 + $0x40] sm:$0xff]   ;;  %v786_v33 = vsel %vm6664_vm4, 0, %v785_v23  ;;  %731 = vst [vmem:[#allocation2 + $0x6c] sm:$0x1] %v730_v32  ;;  %v741_v41 = vld [vmem:[#allocation2 + $0x9c] sm:$0x1] }
  0x14   : > { %v6320_v20 = vunpack.c.l.bf16 %v6437_v18  ;;  %v6321_v21 = vunpack.c.h.bf16 %v6437_v18  ;;  %v551_v24 = vmul.f32 %v6639_v2, %v6288_v13  ;;  %v552_v25 = vmul.f32 %v6639_v2, %v6289_v14  ;;  %v6441_v28 = vld [vmem:[%s6653_s12 + $0x60] sm:$0xff]   ;;  %787 = vst [vmem:[#allocation2 + $0x74] sm:$0x1] %v786_v33  ;;  %v6225_v45 = vld [vmem:[%s8235_s3 + $0xd8] sm:$0xff]  ;;  %v6224_v62 = vld [vmem:[%s8235_s3 + $0xd0] sm:$0xff]  ;;  %s5534_s9 = sshll.u32 %s8288_s23, 1 }
  0x15   : > { %v559_v26 = vmul.f32 %v6639_v2, %v6304_v15  ;;  %v560_v27 = vmul.f32 %v6639_v2, %v6305_v16  ;;  %3185 = vmatpush.bf16.msra.mxu0 %v6227_v9  ;;  %6466 = vmatpush.bf16.msra.mxu1 %v6227_v9  ;;  %v6336_v40 = vunpack.c.l.bf16 %v6441_v28  ;;  %vm812_vm6 = vsmask.f32 4368  ;;  %s465_s29 = scalar_lea.vmem %s8239_s7, %s5534_s9 }
  0x16   : > { %v567_v30 = vmul.f32 %v6639_v2, %v6320_v20  ;;  %v568_v31 = vmul.f32 %v6639_v2, %v6321_v21  ;;  %6467 = vmatpush.bf16.msra.mxu2 %v6227_v9  ;;  %6468 = vmatpush.bf16.msra.mxu3 %v6227_v9  ;;  %v583_v34 = vadd.f32 %v6658_v5, %v551_v24  ;;  %v6337_v49 = vunpack.c.h.bf16 %v6441_v28  ;;  %vm6711_vm7 = vmor %vm700_vm1, %vm812_vm6  ;;  %v6223_v24 = vld [vmem:[%s8235_s3 + $0xc8] sm:$0xff] }
  0x17   : > { %v584_v35 = vadd.f32 %v6658_v5, %v552_v25  ;;  %v591_v36 = vadd.f32 %v6658_v5, %v559_v26  ;;  %v592_v37 = vadd.f32 %v6658_v5, %v560_v27  ;;  %v742_v53 = vsel %vm6644_vm2, 0, %v741_v41  ;;  %v1164_v10 = vld [vmem:[#allocation2 + $0xc] sm:$0xf] }
  0x18   : > { %v599_v38 = vadd.f32 %v6658_v5, %v567_v30  ;;  %v600_v39 = vadd.f32 %v6658_v5, %v568_v31  ;;  %v615_v42 = vmax.f32 %v583_v34, 0.0  ;;  %v575_v57 = vmul.f32 %v6639_v2, %v6336_v40  ;;  %743 = vst [vmem:[#allocation2 + $0x9c] sm:$0x1] %v742_v53  ;;  %v1168_v14 = vld [vmem:[#allocation2 + $0x14] sm:$0x1]  ;;  %v6430_v34 = vld [vmem:[%s6653_s12 + $0x8] sm:$0xff]  }
  0x19   : > { %v616_v43 = vmax.f32 %v584_v35, 0.0  ;;  %v623_v44 = vmax.f32 %v591_v36, 0.0  ;;  %3186 = vmatpush.bf16.msra.mxu0 %v6226_v29  ;;  %6469 = vmatpush.bf16.msra.mxu1 %v6226_v29  ;;  %v624_v46 = vmax.f32 %v592_v37, 0.0  ;;  %v576_v12 = vmul.f32 %v6639_v2, %v6337_v49  ;;  %v1192_v23 = vld [vmem:[#allocation2 + $0x3c] sm:$0xf] }
  0x1a   : > { %v631_v47 = vmax.f32 %v599_v38, 0.0  ;;  %v632_v48 = vmax.f32 %v600_v39, 0.0  ;;  %6470 = vmatpush.bf16.msra.mxu2 %v6226_v29  ;;  %6471 = vmatpush.bf16.msra.mxu3 %v6226_v29  ;;  %v647_v50 = vpack.c.bf16 %v615_v42, %v615_v42  ;;  %v8250_v13 = vmov 0  ;;  %v6730_v29 = vld [vmem:[#allocation2 + $0xa4] sm:$0x1] }
  0x1b   : > { %v648_v51 = vpack.c.bf16 %v616_v43, %v616_v43  ;;  %v655_v52 = vpack.c.bf16 %v623_v44, %v623_v44  ;;  %v656_v54 = vpack.c.bf16 %v624_v46, %v624_v46  ;;  %v8251_v13 = vsel %vm6718_vm8, 4294967295, %v8250_v13  ;;  %v6739_v35 = vld [vmem:[#allocation2 + $0x18] sm:$0x1]  ;;  %v1220_v39 = vld [vmem:[#allocation2 + $0x6c] sm:$0xf]  ;;  %v6222_v46 = vld [vmem:[%s8235_s3 + $0xc0] sm:$0xff] }
  0x1c   : > { %v663_v55 = vpack.c.bf16 %v631_v47, %v631_v47  ;;  %v6703_v56 = vpack.c.bf16 %v632_v48, %v632_v48  ;;  %v844_v58 = vshrl.u32 %v647_v50, 16  ;;  %v847_v59 = vshll.u32 %v647_v50, 16  ;;  %8252 = vst [vmem:[#allocation4_spill] sm:$0xff] %v8251_v13  ;;  %v1224_v43 = vld [vmem:[#allocation2 + $0x74] sm:$0x1] }
  0x1d   : > { %v852_v60 = vshrl.u32 %v648_v51, 16  ;;  %v855_v61 = vshll.u32 %v648_v51, 16  ;;  %3187 = vmatpush.bf16.msra.mxu0 %v6225_v45  ;;  %6472 = vmatpush.bf16.msra.mxu1 %v6225_v45  ;;  %v912_v63 = vshrl.u32 %v655_v52, 16  ;;  %v915_v0 = vshll.u32 %v655_v52, 16  ;;  %v6434_v51 = vld [vmem:[%s6653_s12 + $0x28] sm:$0xff]  }
  0x1e   : > { %v920_v1 = vshrl.u32 %v656_v54, 16  ;;  %v923_v4 = vshll.u32 %v656_v54, 16  ;;  %6473 = vmatpush.bf16.msra.mxu2 %v6225_v45  ;;  %6474 = vmatpush.bf16.msra.mxu3 %v6225_v45  ;;  %v846_v8 = vrot.slane %v844_v58, 7  ;;  %v980_v11 = vshrl.u32 %v663_v55, 16 }
  0x1f   : > { %v854_v9 = vrot.slane %v852_v60, 7  ;;  %v914_v15 = vrot.slane %v912_v63, 7  ;;  %v983_v17 = vshll.u32 %v663_v55, 16  ;;  %v988_v18 = vshrl.u32 %v6703_v56, 16  ;;  %v6245_v60 = vld [vmem:[%s8235_s3 + $0x178] sm:$0xff] }
  0x20   : > { %v6722_v16 = vrot.slane %v920_v1, 7  ;;  %v849_v19 = vor.u32 %v847_v59, %v846_v8  ;;  %v850_v20 = vrot.slane %v846_v8, 4  ;;  %v991_v28 = vshll.u32 %v6703_v56, 16  ;;  %v720_v56 = vld [vmem:[#allocation2 + $0x48] sm:$0x1]  ;;  %v6197_v1 = vld [vmem:[%s8235_s3 + $0x78] sm:$0xff] }
  0x21   : > { %v857_v21 = vor.u32 %v855_v61, %v854_v9  ;;  %v859_v22 = vrot.slane %v854_v9, 4  ;;  %3188 = vmatpush.bf16.msra.mxu0 %v6224_v62  ;;  %6475 = vmatpush.bf16.msra.mxu1 %v6224_v62  ;;  %v917_v25 = vor.u32 %v915_v0, %v914_v15  ;;  %v918_v26 = vrot.slane %v914_v15, 4  ;;  %v6189_v61 = vld [vmem:[%s8235_s3 + $0x38] sm:$0xff] }
  0x22   : > { %v925_v27 = vor.u32 %v923_v4, %v6722_v16  ;;  %6476 = vmatpush.bf16.msra.mxu2 %v6224_v62  ;;  %6477 = vmatpush.bf16.msra.mxu3 %v6224_v62  ;;  %v1165_v31 = vsel %vm6718_vm8, %v849_v19, %v1164_v10  ;;  %v982_v33 = vrot.slane %v980_v11, 7  ;;  %v990_v38 = vrot.slane %v988_v18, 7  ;;  %v6237_v0 = vld [vmem:[%s8235_s3 + $0x138] sm:$0xff]  ;;  %v6778_v10 = vld [vmem:[%s6653_s12 + $0x48] sm:$0xff]   ;;  %v6244_v19 = vld [vmem:[%s8235_s3 + $0x170] sm:$0xff] }
  0x23   : > { %v858_v30 = vsel %vm6711_vm7, %v850_v20, %v857_v21  ;;  %v1169_v32 = vsel %vm6644_vm2, %v859_v22, %v1168_v14  ;;  %1166 = vst [vmem:[#allocation2 + $0xc] sm:$0xf] %v1165_v31  ;;  %v1193_v37 = vsel %vm6718_vm8, %v917_v25, %v1192_v23  ;;  %v607_v40 = vadd.f32 %v6658_v5, %v575_v57 }
  0x24   : > { %v926_v36 = vsel %vm6711_vm7, %v918_v26, %v925_v27  ;;  %1167 = vst [vmem:[#allocation2 + $0x10] sm:$0xf] %v858_v30  ;;  %v985_v41 = vor.u32 %v983_v17, %v982_v33  ;;  %v986_v42 = vrot.slane %v982_v33, 4  ;;  %v608_v44 = vadd.f32 %v6658_v5, %v576_v12 }
  0x25   : > { %v798_v45 = vsel %vm6664_vm4, 0, %v6730_v29  ;;  %3189 = vmatpush.bf16.msra.mxu0 %v6223_v24  ;;  %6478 = vmatpush.bf16.msra.mxu1 %v6223_v24  ;;  %1170 = vst [vmem:[#allocation2 + $0x14] sm:$0x1] %v1169_v32  ;;  %v993_v47 = vor.u32 %v991_v28, %v990_v38  ;;  %v995_v48 = vrot.slane %v990_v38, 4  ;;  %v639_v49 = vmax.f32 %v607_v40, 0.0 }
  0x26   : > { %v6292_v50 = vunpack.c.l.bf16 %v6430_v34  ;;  %6479 = vmatpush.bf16.msra.mxu2 %v6223_v24  ;;  %6480 = vmatpush.bf16.msra.mxu3 %v6223_v24  ;;  %1194 = vst [vmem:[#allocation2 + $0x3c] sm:$0xf] %v1193_v37  ;;  %v1221_v52 = vsel %vm6718_vm8, %v985_v41, %v1220_v39  ;;  %v640_v53 = vmax.f32 %v608_v44, 0.0  ;;  %v6293_v54 = vunpack.c.h.bf16 %v6430_v34  ;;  %v6188_v24 = vld [vmem:[%s8235_s3 + $0x30] sm:$0xff]  ;;  %v1248_v29 = vld [vmem:[#allocation2 + $0x9c] sm:$0xf] }
  0x27   : > { %v709_v55 = vsel %vm6644_vm2, 0, %v6739_v35  ;;  %1195 = vst [vmem:[#allocation2 + $0x40] sm:$0xf] %v926_v36  ;;  %v994_v57 = vsel %vm6711_vm7, %v986_v42, %v993_v47  ;;  %v1225_v58 = vsel %vm6644_vm2, %v995_v48, %v1224_v43  ;;  %v671_v59 = vpack.c.bf16 %v639_v49, %v639_v49 }
  0x28   : > { %v553_v62 = vmul.f32 %v6639_v2, %v6292_v50  ;;  %1222 = vst [vmem:[#allocation2 + $0x6c] sm:$0xf] %v1221_v52  ;;  %v672_v63 = vpack.c.bf16 %v640_v53, %v640_v53  ;;  %v554_v4 = vmul.f32 %v6639_v2, %v6293_v54  ;;  %v6308_v8 = vunpack.c.l.bf16 %v6434_v51 }
  0x29   : > { %v6309_v9 = vunpack.c.h.bf16 %v6434_v51  ;;  %3190 = vmatpush.bf16.msra.mxu0 %v6222_v46  ;;  %6481 = vmatpush.bf16.msra.mxu1 %v6222_v46  ;;  %1223 = vst [vmem:[#allocation2 + $0x70] sm:$0xf] %v994_v57  ;;  %v1048_v11 = vshrl.u32 %v671_v59, 16  ;;  %v1051_v12 = vshll.u32 %v671_v59, 16  ;;  %v721_v15 = vsel %vm6644_vm2, 0, %v720_v56 }
  0x2a   : > { %v585_v14 = vadd.f32 %v6658_v5, %v553_v62  ;;  %6482 = vmatpush.bf16.msra.mxu2 %v6222_v46  ;;  %6483 = vmatpush.bf16.msra.mxu3 %v6222_v46  ;;  %1226 = vst [vmem:[#allocation2 + $0x74] sm:$0x1] %v1225_v58  ;;  %v1056_v17 = vshrl.u32 %v672_v63, 16  ;;  %v1059_v18 = vshll.u32 %v672_v63, 16  ;;  %v586_v20 = vadd.f32 %v6658_v5, %v554_v4  ;;  %v732_v46 = vld [vmem:[#allocation2 + $0x78] sm:$0x1] }
  0x2b   : > { %v561_v21 = vmul.f32 %v6639_v2, %v6308_v8  ;;  %v6206_v22 = vld [vmem:[#allocation2 + $0xc] sm:$0xff]  ;;  %799 = vst [vmem:[#allocation2 + $0xa4] sm:$0x1] %v798_v45  ;;  %v1050_v23 = vrot.slane %v1048_v11, 7  ;;  %v562_v26 = vmul.f32 %v6639_v2, %v6309_v9  ;;  %v6324_v27 = vunpack.c.l.bf16 %v6778_v10  ;;  %v788_v56 = vld [vmem:[#allocation2 + $0x80] sm:$0x1] }
  0x2c   : > { %v617_v25 = vmax.f32 %v585_v14, 0.0  ;;  %v1058_v28 = vrot.slane %v1056_v17, 7  ;;  %v618_v30 = vmax.f32 %v586_v20, 0.0  ;;  %710 = vst [vmem:[#allocation2 + $0x18] sm:$0x1] %v709_v55  ;;  %v6325_v32 = vunpack.c.h.bf16 %v6778_v10  ;;  %3191 = vmatmul.bf16.vlgmr.msra.gmra.mxu0 %v6206_v22  ;;  %v6243_v22 = vld [vmem:[%s8235_s3 + $0x168] sm:$0xff] }
  0x2d   : > { %3272 = vmatpush.bf16.msrb.mxu1 %v6237_v0  ;;  %3683 = vmatpush.bf16.msrb.mxu0 %v6197_v1  ;;  %v593_v31 = vadd.f32 %v6658_v5, %v561_v21  ;;  %v1053_v33 = vor.u32 %v1051_v12, %v1050_v23  ;;  %v1054_v34 = vrot.slane %v1050_v23, 4  ;;  %v594_v36 = vadd.f32 %v6658_v5, %v562_v26  ;;  %v744_v8 = vld [vmem:[#allocation2 + $0xa8] sm:$0x1]  ;;  %v800_v14 = vld [vmem:[#allocation2 + $0xb0] sm:$0x1] }
  0x2e   : > { %3361 = vmatpush.bf16.msrb.mxu2 %v6245_v60  ;;  %3594 = vmatpush.bf16.msrb.mxu3 %v6189_v61  ;;  %v649_v35 = vpack.c.bf16 %v617_v25, %v617_v25  ;;  %722 = vst [vmem:[#allocation2 + $0x48] sm:$0x1] %v721_v15  ;;  %v6210_v37 = vld [vmem:[#allocation2 + $0x3c] sm:$0xff]  ;;  %v1061_v38 = vor.u32 %v1059_v18, %v1058_v28  ;;  %v1063_v39 = vrot.slane %v1058_v28, 4  ;;  %v733_v61 = vsel %vm6644_vm2, 0, %v732_v46  ;;  %v6442_v12 = vld [vmem:[%s6653_s12 + $0x68] sm:$0xff]  }
  0x2f   : > { %v650_v40 = vpack.c.bf16 %v618_v30, %v618_v30  ;;  %v625_v41 = vmax.f32 %v593_v31, 0.0  ;;  %v1249_v42 = vsel %vm6718_vm8, %v1053_v33, %v1248_v29  ;;  %v626_v45 = vmax.f32 %v594_v36, 0.0  ;;  %3211 = vmatmul.bf16.vlgmr.msra.gmra.mxu1 %v6210_v37  ;;  %734 = vst [vmem:[#allocation2 + $0x78] sm:$0x1] %v733_v61  ;;  %v6236_v15 = vld [vmem:[%s8235_s3 + $0x130] sm:$0xff]  ;;  %v6187_v23 = vld [vmem:[%s8235_s3 + $0x28] sm:$0xff] }
  0x30   : > { %v861_v43 = vshrl.u32 %v649_v35, 16  ;;  %v864_v44 = vshll.u32 %v649_v35, 16  ;;  %v6214_v47 = vld [vmem:[#allocation2 + $0x6c] sm:$0xff]  ;;  %v1062_v48 = vsel %vm6711_vm7, %v1054_v34, %v1061_v38  ;;  %1250 = vst [vmem:[#allocation2 + $0x9c] sm:$0xf] %v1249_v42  ;;  %v569_v54 = vmul.f32 %v6639_v2, %v6324_v27  ;;  %v6242_v33 = vld [vmem:[%s8235_s3 + $0x160] sm:$0xff] }
  0x31   : > { %v869_v49 = vshrl.u32 %v650_v40, 16  ;;  %v872_v50 = vshll.u32 %v650_v40, 16  ;;  %v657_v51 = vpack.c.bf16 %v625_v41, %v625_v41  ;;  %1251 = vst [vmem:[#allocation2 + $0xa0] sm:$0xf] %v1062_v48  ;;  %v658_v53 = vpack.c.bf16 %v626_v45, %v626_v45  ;;  %3231 = vmatmul.bf16.vlgmr.msra.gmra.mxu2 %v6214_v47  ;;  %3273 = vmatpush.bf16.msrb.mxu1 %v6236_v15  ;;  %v6196_v28 = vld [vmem:[%s8235_s3 + $0x70] sm:$0xff]  ;;  %v6235_v29 = vld [vmem:[%s8235_s3 + $0x128] sm:$0xff] }
  0x32   : > { %3362 = vmatpush.bf16.msrb.mxu2 %v6244_v19  ;;  %3595 = vmatpush.bf16.msrb.mxu3 %v6188_v24  ;;  %v863_v52 = vrot.slane %v861_v43, 7  ;;  %v570_v55 = vmul.f32 %v6639_v2, %v6325_v32  ;;  %v1252_v57 = vld [vmem:[#allocation2 + $0xa4] sm:$0x1]  ;;  %v601_v20 = vadd.f32 %v6658_v5, %v569_v54  ;;  %v789_v27 = vsel %vm6664_vm4, 0, %v788_v56  ;;  %v6431_v34 = vld [vmem:[%s6653_s12 + $0x10] sm:$0xff]   ;;  %v6195_v41 = vld [vmem:[%s8235_s3 + $0x68] sm:$0xff] }
  0x33   : > { %v6802_v58 = vrot.slane %v869_v49, 7  ;;  %v929_v59 = vshrl.u32 %v657_v51, 16  ;;  %v932_v60 = vshll.u32 %v657_v51, 16  ;;  %v1253_v62 = vsel %vm6644_vm2, %v1063_v39, %v1252_v57  ;;  %v1171_v1 = vld [vmem:[#allocation2 + $0x18] sm:$0xf]  ;;  %3684 = vmatpush.bf16.msrb.mxu0 %v6196_v28  ;;  %v6186_v40 = vld [vmem:[%s8235_s3 + $0x20] sm:$0xff] }
  0x34   : > { %v866_v63 = vor.u32 %v864_v44, %v863_v52  ;;  %v867_v0 = vrot.slane %v863_v52, 4  ;;  %v937_v4 = vshrl.u32 %v658_v53, 16  ;;  %1254 = vst [vmem:[#allocation2 + $0xa4] sm:$0x1] %v1253_v62  ;;  %v940_v11 = vshll.u32 %v658_v53, 16  ;;  %v6435_v51 = vld [vmem:[%s6653_s12 + $0x30] sm:$0xff]  }
  0x35   : > { %v874_v9 = vor.u32 %v872_v50, %v6802_v58  ;;  %v931_v10 = vrot.slane %v929_v59, 7  ;;  %v1199_v19 = vld [vmem:[#allocation2 + $0x48] sm:$0xf]  ;;  %v602_v21 = vadd.f32 %v6658_v5, %v570_v55  ;;  %v633_v31 = vmax.f32 %v601_v20, 0.0  ;;  %790 = vst [vmem:[#allocation2 + $0x80] sm:$0x1] %v789_v27  ;;  %3274 = vmatpush.bf16.msrb.mxu1 %v6235_v29 }
  0x36   : > { %v1172_v17 = vsel %vm6718_vm8, %v866_v63, %v1171_v1  ;;  %v6815_v18 = vrot.slane %v937_v4, 7  ;;  %3363 = vmatpush.bf16.msrb.mxu2 %v6243_v22  ;;  %3596 = vmatpush.bf16.msrb.mxu3 %v6187_v23  ;;  %v6340_v37 = vunpack.c.l.bf16 %v6442_v12  ;;  %v6341_v38 = vunpack.c.h.bf16 %v6442_v12  ;;  %v711_v46 = vld [vmem:[#allocation2 + $0x24] sm:$0x1]  ;;  %v1227_v4 = vld [vmem:[#allocation2 + $0x78] sm:$0xf] }
  0x37   : > { %v875_v24 = vsel %vm6711_vm7, %v867_v0, %v874_v9  ;;  %1173 = vst [vmem:[#allocation2 + $0x18] sm:$0xf] %v1172_v17  ;;  %v934_v25 = vor.u32 %v932_v60, %v931_v10  ;;  %v935_v26 = vrot.slane %v931_v10, 4  ;;  %v634_v32 = vmax.f32 %v602_v21, 0.0  ;;  %3685 = vmatpush.bf16.msrb.mxu0 %v6195_v41 }
  0x38   : > { %1174 = vst [vmem:[#allocation2 + $0x1c] sm:$0xf] %v875_v24  ;;  %v942_v30 = vor.u32 %v940_v11, %v6815_v18  ;;  %v6218_v35 = vld [vmem:[#allocation2 + $0x9c] sm:$0xff]  ;;  %v745_v39 = vsel %vm6644_vm2, 0, %v744_v8  ;;  %v665_v43 = vpack.c.bf16 %v633_v31, %v633_v31  ;;  %v801_v45 = vsel %vm6664_vm4, 0, %v800_v14  ;;  %v6439_v24 = vld [vmem:[%s6653_s12 + $0x50] sm:$0xff]  }
  0x39   : > { %v1200_v36 = vsel %vm6718_vm8, %v934_v25, %v1199_v19  ;;  %v666_v44 = vpack.c.bf16 %v634_v32, %v634_v32  ;;  %3251 = vmatmul.bf16.vlgmr.msra.gmra.mxu3 %v6218_v35  ;;  %v577_v47 = vmul.f32 %v6639_v2, %v6340_v37  ;;  %v578_v48 = vmul.f32 %v6639_v2, %v6341_v38 }
  0x3a   : > { %v943_v42 = vsel %vm6711_vm7, %v935_v26, %v942_v30  ;;  %1201 = vst [vmem:[#allocation2 + $0x48] sm:$0xf] %v1200_v36  ;;  %v6296_v49 = vunpack.c.l.bf16 %v6431_v34  ;;  %v6297_v50 = vunpack.c.h.bf16 %v6431_v34  ;;  %v997_v52 = vshrl.u32 %v665_v43, 16  ;;  %3364 = vmatpush.bf16.msrb.mxu2 %v6242_v33  ;;  %3597 = vmatpush.bf16.msrb.mxu3 %v6186_v40  ;;  %v723_v30 = vld [vmem:[#allocation2 + $0x54] sm:$0x1] }
  0x3b   : > { %1202 = vst [vmem:[#allocation2 + $0x4c] sm:$0xf] %v943_v42  ;;  %v1000_v53 = vshll.u32 %v665_v43, 16  ;;  %v1005_v54 = vshrl.u32 %v666_v44, 16  ;;  %v1008_v55 = vshll.u32 %v666_v44, 16  ;;  %v609_v56 = vadd.f32 %v6658_v5, %v577_v47 }
  0x3c   : > { %746 = vst [vmem:[#allocation2 + $0xa8] sm:$0x1] %v745_v39  ;;  %v610_v57 = vadd.f32 %v6658_v5, %v578_v48  ;;  %v555_v59 = vmul.f32 %v6639_v2, %v6296_v49  ;;  %v712_v60 = vsel %vm6644_vm2, 0, %v711_v46  ;;  %v999_v61 = vrot.slane %v997_v52, 7  ;;  %v1231_v19 = vld [vmem:[#allocation2 + $0x80] sm:$0x1] }
  0x3d   : > { %802 = vst [vmem:[#allocation2 + $0xb0] sm:$0x1] %v801_v45  ;;  %v1007_v62 = vrot.slane %v1005_v54, 7  ;;  %v556_v63 = vmul.f32 %v6639_v2, %v6297_v50  ;;  %v6312_v0 = vunpack.c.l.bf16 %v6435_v51  ;;  %v641_v8 = vmax.f32 %v609_v56, 0.0 }
  0x3e   : > { %713 = vst [vmem:[#allocation2 + $0x24] sm:$0x1] %v712_v60  ;;  %v642_v9 = vmax.f32 %v610_v57, 0.0  ;;  %v587_v10 = vadd.f32 %v6658_v5, %v555_v59  ;;  %v6313_v11 = vunpack.c.h.bf16 %v6435_v51  ;;  %v1002_v12 = vor.u32 %v1000_v53, %v999_v61 }
  0x3f   : > { %v6207_v1 = vld [vmem:[#allocation2 + $0x18] sm:$0xff]  ;;  %v1003_v14 = vrot.slane %v999_v61, 4  ;;  %v1010_v15 = vor.u32 %v1008_v55, %v1007_v62  ;;  %v1012_v17 = vrot.slane %v1007_v62, 4  ;;  %v673_v20 = vpack.c.bf16 %v641_v8, %v641_v8 }
  0x40   : > { %3196 = vmatmul.bf16.gmra.mxu0 %v6207_v1  ;;  %v674_v21 = vpack.c.bf16 %v642_v9, %v642_v9  ;;  %v588_v22 = vadd.f32 %v6658_v5, %v556_v63  ;;  %v619_v23 = vmax.f32 %v587_v10, 0.0  ;;  %v1228_v27 = vsel %vm6718_vm8, %v1002_v12, %v1227_v4  ;;  %v735_v63 = vld [vmem:[#allocation2 + $0x84] sm:$0x1] }
  0x41   : > { %v1011_v26 = vsel %vm6711_vm7, %v1003_v14, %v1010_v15  ;;  %v1232_v28 = vsel %vm6644_vm2, %v1012_v17, %v1231_v19  ;;  %v563_v29 = vmul.f32 %v6639_v2, %v6312_v0  ;;  %1229 = vst [vmem:[#allocation2 + $0x78] sm:$0xf] %v1228_v27  ;;  %v1065_v31 = vshrl.u32 %v673_v20, 16  ;;  %v791_v0 = vld [vmem:[#allocation2 + $0x8c] sm:$0x1]  ;;  %v6443_v17 = vld [vmem:[%s6653_s12 + $0x70] sm:$0xff]  }
  0x42   : > { %v6211_v25 = vld [vmem:[#allocation2 + $0x48] sm:$0xff]  ;;  %v1068_v32 = vshll.u32 %v673_v20, 16  ;;  %v1073_v33 = vshrl.u32 %v674_v21, 16  ;;  %v1076_v34 = vshll.u32 %v674_v21, 16  ;;  %1230 = vst [vmem:[#allocation2 + $0x7c] sm:$0xf] %v1011_v26  ;;  %v651_v36 = vpack.c.bf16 %v619_v23, %v619_v23 }
  0x43   : > { %3216 = vmatmul.bf16.gmra.mxu1 %v6211_v25  ;;  %v1255_v35 = vld [vmem:[#allocation2 + $0xa8] sm:$0xf]  ;;  %v564_v37 = vmul.f32 %v6639_v2, %v6313_v11  ;;  %v595_v38 = vadd.f32 %v6658_v5, %v563_v29  ;;  %v6328_v39 = vunpack.c.l.bf16 %v6439_v24  ;;  %1233 = vst [vmem:[#allocation2 + $0x80] sm:$0x1] %v1232_v28  ;;  %v1067_v40 = vrot.slane %v1065_v31, 7  ;;  %v6234_v19 = vld [vmem:[%s8235_s3 + $0x120] sm:$0xff] }
  0x44   : > { %v1075_v41 = vrot.slane %v1073_v33, 7  ;;  %v620_v42 = vmax.f32 %v588_v22, 0.0  ;;  %v724_v43 = vsel %vm6644_vm2, 0, %v723_v30  ;;  %v1259_v44 = vld [vmem:[#allocation2 + $0xb0] sm:$0x1]  ;;  %v878_v45 = vshrl.u32 %v651_v36, 16  ;;  %3275 = vmatpush.bf16.msrb.mxu1 %v6234_v19 }
  0x45   : > { %v881_v46 = vshll.u32 %v651_v36, 16  ;;  %v596_v47 = vadd.f32 %v6658_v5, %v564_v37  ;;  %v627_v48 = vmax.f32 %v595_v38, 0.0  ;;  %v1070_v49 = vor.u32 %v1068_v32, %v1067_v40  ;;  %725 = vst [vmem:[#allocation2 + $0x54] sm:$0x1] %v724_v43  ;;  %v1178_v61 = vld [vmem:[#allocation2 + $0x24] sm:$0xf] }
  0x46   : > { %v1071_v50 = vrot.slane %v1067_v40, 4  ;;  %v1078_v51 = vor.u32 %v1076_v34, %v1075_v41  ;;  %v1080_v52 = vrot.slane %v1075_v41, 4  ;;  %v652_v53 = vpack.c.bf16 %v620_v42, %v620_v42  ;;  %v6185_v25 = vld [vmem:[%s8235_s3 + $0x18] sm:$0xff]  ;;  %v747_v30 = vld [vmem:[#allocation2 + $0xb4] sm:$0x1]  ;;  %v6194_v31 = vld [vmem:[%s8235_s3 + $0x60] sm:$0xff] }
  0x47   : > { %v880_v54 = vrot.slane %v878_v45, 7  ;;  %v628_v55 = vmax.f32 %v596_v47, 0.0  ;;  %v659_v56 = vpack.c.bf16 %v627_v48, %v627_v48  ;;  %v1256_v59 = vsel %vm6718_vm8, %v1070_v49, %v1255_v35  ;;  %v803_v36 = vld [vmem:[#allocation2 + $0xbc] sm:$0x1]  ;;  %3598 = vmatpush.bf16.msrb.mxu3 %v6185_v25  ;;  %3686 = vmatpush.bf16.msrb.mxu0 %v6194_v31  ;;  %v6184_v47 = vld [vmem:[%s8235_s3 + $0x10] sm:$0xff] }
  0x48   : > { %v1079_v57 = vsel %vm6711_vm7, %v1071_v50, %v1078_v51  ;;  %v1260_v60 = vsel %vm6644_vm2, %v1080_v52, %v1259_v44  ;;  %v6329_v62 = vunpack.c.h.bf16 %v6439_v24  ;;  %1257 = vst [vmem:[#allocation2 + $0xa8] sm:$0xf] %v1256_v59  ;;  %v886_v8 = vshrl.u32 %v652_v53, 16  ;;  %v6241_v24 = vld [vmem:[%s8235_s3 + $0x158] sm:$0xff]  ;;  %v714_v59 = vld [vmem:[#allocation2 + $0x30] sm:$0x1] }
  0x49   : > { %v883_v1 = vor.u32 %v881_v46, %v880_v54  ;;  %v884_v4 = vrot.slane %v880_v54, 4  ;;  %v889_v9 = vshll.u32 %v652_v53, 16  ;;  %v6215_v10 = vld [vmem:[#allocation2 + $0x78] sm:$0xff]  ;;  %1258 = vst [vmem:[#allocation2 + $0xac] sm:$0xf] %v1079_v57  ;;  %v660_v11 = vpack.c.bf16 %v628_v55, %v628_v55  ;;  %3365 = vmatpush.bf16.msrb.mxu2 %v6241_v24  ;;  %v6240_v46 = vld [vmem:[%s8235_s3 + $0x150] sm:$0xff] }
  0x4a   : > { %v946_v12 = vshrl.u32 %v659_v56, 16  ;;  %v949_v14 = vshll.u32 %v659_v56, 16  ;;  %v571_v15 = vmul.f32 %v6639_v2, %v6328_v39  ;;  %1261 = vst [vmem:[#allocation2 + $0xb0] sm:$0x1] %v1260_v60  ;;  %v6889_v20 = vrot.slane %v886_v8, 7  ;;  %3236 = vmatmul.bf16.gmra.mxu2 %v6215_v10  ;;  %v6233_v41 = vld [vmem:[%s8235_s3 + $0x118] sm:$0xff] }
  0x4b   : > { %v1179_v21 = vsel %vm6718_vm8, %v883_v1, %v1178_v61  ;;  %v572_v22 = vmul.f32 %v6639_v2, %v6329_v62  ;;  %v736_v23 = vsel %vm6644_vm2, 0, %v735_v63  ;;  %v954_v27 = vshrl.u32 %v660_v11, 16  ;;  %v6193_v48 = vld [vmem:[%s8235_s3 + $0x58] sm:$0xff]  ;;  %3276 = vmatpush.bf16.msrb.mxu1 %v6233_v41  ;;  %3599 = vmatpush.bf16.msrb.mxu3 %v6184_v47 }
  0x4c   : > { %1180 = vst [vmem:[#allocation2 + $0x24] sm:$0xf] %v1179_v21  ;;  %v948_v26 = vrot.slane %v946_v12, 7  ;;  %v957_v28 = vshll.u32 %v660_v11, 16  ;;  %v603_v29 = vadd.f32 %v6658_v5, %v571_v15  ;;  %v891_v32 = vor.u32 %v889_v9, %v6889_v20  ;;  %v1206_v33 = vld [vmem:[#allocation2 + $0x54] sm:$0xf]  ;;  %3687 = vmatpush.bf16.msrb.mxu0 %v6193_v48 }
  0x4d   : > { %v604_v34 = vadd.f32 %v6658_v5, %v572_v22  ;;  %737 = vst [vmem:[#allocation2 + $0x84] sm:$0x1] %v736_v23  ;;  %v792_v35 = vsel %vm6664_vm4, 0, %v791_v0  ;;  %v6910_v39 = vrot.slane %v954_v27, 7  ;;  %v6344_v44 = vunpack.c.l.bf16 %v6443_v17  ;;  %v6432_v52 = vld [vmem:[%s6653_s12 + $0x18] sm:$0xff]   ;;  %3366 = vmatpush.bf16.msrb.mxu2 %v6240_v46 }
  0x4e   : > { %v951_v37 = vor.u32 %v949_v14, %v948_v26  ;;  %v952_v38 = vrot.slane %v948_v26, 4  ;;  %v635_v40 = vmax.f32 %v603_v29, 0.0  ;;  %793 = vst [vmem:[#allocation2 + $0x8c] sm:$0x1] %v792_v35  ;;  %v892_v42 = vsel %vm6711_vm7, %v884_v4, %v891_v32  ;;  %v6436_v0 = vld [vmem:[%s6653_s12 + $0x38] sm:$0xff]  }
  0x4f   : > { %v636_v43 = vmax.f32 %v604_v34, 0.0  ;;  %v6345_v45 = vunpack.c.h.bf16 %v6443_v17  ;;  %1181 = vst [vmem:[#allocation2 + $0x28] sm:$0xf] %v892_v42  ;;  %v959_v49 = vor.u32 %v957_v28, %v6910_v39  ;;  %v579_v55 = vmul.f32 %v6639_v2, %v6344_v44 }
  0x50   : > { %v1207_v50 = vsel %vm6718_vm8, %v951_v37, %v1206_v33  ;;  %v667_v51 = vpack.c.bf16 %v635_v40, %v635_v40  ;;  %v6219_v53 = vld [vmem:[#allocation2 + $0xa8] sm:$0xff]  ;;  %v748_v57 = vsel %vm6644_vm2, 0, %v747_v30  ;;  %v804_v63 = vsel %vm6664_vm4, 0, %v803_v36  ;;  %v6950_v37 = vld [vmem:[%s6653_s12 + $0x58] sm:$0xff]  }
  0x51   : > { %1208 = vst [vmem:[#allocation2 + $0x54] sm:$0xf] %v1207_v50  ;;  %v668_v54 = vpack.c.bf16 %v636_v43, %v636_v43  ;;  %v580_v56 = vmul.f32 %v6639_v2, %v6345_v45  ;;  %v960_v60 = vsel %vm6711_vm7, %v952_v38, %v959_v49  ;;  %3256 = vmatmul.bf16.gmra.mxu3 %v6219_v53  ;;  %v6300_v11 = vunpack.c.l.bf16 %v6432_v52  ;;  %v726_v43 = vld [vmem:[#allocation2 + $0x60] sm:$0x1] }
  0x52   : > { %v1014_v61 = vshrl.u32 %v667_v51, 16  ;;  %v1017_v62 = vshll.u32 %v667_v51, 16  ;;  %749 = vst [vmem:[#allocation2 + $0xb4] sm:$0x1] %v748_v57  ;;  %v611_v8 = vadd.f32 %v6658_v5, %v579_v55  ;;  %v6301_v12 = vunpack.c.h.bf16 %v6432_v52 }
  0x53   : > { %1209 = vst [vmem:[#allocation2 + $0x58] sm:$0xf] %v960_v60  ;;  %v1022_v1 = vshrl.u32 %v668_v54, 16  ;;  %v1025_v4 = vshll.u32 %v668_v54, 16  ;;  %v612_v9 = vadd.f32 %v6658_v5, %v580_v56  ;;  %v715_v14 = vsel %vm6644_vm2, 0, %v714_v59 }
  0x54   : > { %v1016_v10 = vrot.slane %v1014_v61, 7  ;;  %805 = vst [vmem:[#allocation2 + $0xbc] sm:$0x1] %v804_v63  ;;  %v1234_v17 = vld [vmem:[#allocation2 + $0x84] sm:$0xf]  ;;  %v643_v19 = vmax.f32 %v611_v8, 0.0  ;;  %v6316_v22 = vunpack.c.l.bf16 %v6436_v0  ;;  %v557_v26 = vmul.f32 %v6639_v2, %v6300_v11 }
  0x55   : > { %v1024_v15 = vrot.slane %v1022_v1, 7  ;;  %v644_v21 = vmax.f32 %v612_v9, 0.0  ;;  %v1238_v25 = vld [vmem:[#allocation2 + $0x8c] sm:$0x1]  ;;  %v558_v27 = vmul.f32 %v6639_v2, %v6301_v12  ;;  %716 = vst [vmem:[#allocation2 + $0x30] sm:$0x1] %v715_v14  ;;  %v6317_v36 = vunpack.c.h.bf16 %v6436_v0 }
  0x56   : > { %v1019_v23 = vor.u32 %v1017_v62, %v1016_v10  ;;  %v1020_v24 = vrot.slane %v1016_v10, 4  ;;  %v6208_v28 = vld [vmem:[#allocation2 + $0x24] sm:$0xff]  ;;  %v675_v31 = vpack.c.bf16 %v643_v19, %v643_v19  ;;  %v589_v34 = vadd.f32 %v6658_v5, %v557_v26  ;;  %v738_v12 = vld [vmem:[#allocation2 + $0x90] sm:$0x1]  ;;  %v6511_v26 = vld [vmem:[%s8236_s4] ss:$0 sm:$0xff] }
  0x57   : > { %v1027_v29 = vor.u32 %v1025_v4, %v1024_v15  ;;  %v1029_v30 = vrot.slane %v1024_v15, 4  ;;  %v676_v32 = vpack.c.bf16 %v644_v21, %v644_v21  ;;  %v590_v35 = vadd.f32 %v6658_v5, %v558_v27  ;;  %3201 = vmatmul.bf16.gmra.mxu0 %v6208_v28  ;;  %v794_v21 = vld [vmem:[#allocation2 + $0x98] sm:$0x1]  ;;  %v6232_v28 = vld [vmem:[%s8235_s3 + $0x110] sm:$0xff] }
  0x58   : > { %v1235_v33 = vsel %vm6718_vm8, %v1019_v23, %v1234_v17  ;;  %v1082_v41 = vshrl.u32 %v675_v31, 16  ;;  %v1085_v42 = vshll.u32 %v675_v31, 16  ;;  %v621_v47 = vmax.f32 %v589_v34, 0.0  ;;  %v750_v34 = vld [vmem:[#allocation2 + $0xc0] sm:$0x1]  ;;  %3277 = vmatpush.bf16.msrb.mxu1 %v6232_v28 }
  0x59   : > { %v1028_v38 = vsel %vm6711_vm7, %v1020_v24, %v1027_v29  ;;  %1236 = vst [vmem:[#allocation2 + $0x84] sm:$0xf] %v1235_v33  ;;  %v1239_v40 = vsel %vm6644_vm2, %v1029_v30, %v1238_v25  ;;  %v1090_v45 = vshrl.u32 %v676_v32, 16  ;;  %v1093_v46 = vshll.u32 %v676_v32, 16  ;;  %v1262_v54 = vld [vmem:[#allocation2 + $0xb4] sm:$0xf] }
  0x5a   : > { %v6212_v44 = vld [vmem:[#allocation2 + $0x54] sm:$0xff]  ;;  %1237 = vst [vmem:[#allocation2 + $0x88] sm:$0xf] %v1028_v38  ;;  %v565_v48 = vmul.f32 %v6639_v2, %v6316_v22  ;;  %v1084_v49 = vrot.slane %v1082_v41, 7  ;;  %v622_v50 = vmax.f32 %v590_v35, 0.0  ;;  %v566_v51 = vmul.f32 %v6639_v2, %v6317_v36  ;;  %v6239_v29 = vld [vmem:[%s8235_s3 + $0x148] sm:$0xff] }
  0x5b   : > { %1240 = vst [vmem:[#allocation2 + $0x8c] sm:$0x1] %v1239_v40  ;;  %v6332_v52 = vunpack.c.l.bf16 %v6950_v37  ;;  %3221 = vmatmul.bf16.gmra.mxu1 %v6212_v44  ;;  %v1092_v53 = vrot.slane %v1090_v45, 7  ;;  %v653_v55 = vpack.c.bf16 %v621_v47, %v621_v47  ;;  %v727_v57 = vsel %vm6644_vm2, 0, %v726_v43  ;;  %v1266_v61 = vld [vmem:[#allocation2 + $0xbc] sm:$0x1]  ;;  %3367 = vmatpush.bf16.msrb.mxu2 %v6239_v29 }
  0x5c   : > { %v597_v56 = vadd.f32 %v6658_v5, %v565_v48  ;;  %v1087_v59 = vor.u32 %v1085_v42, %v1084_v49  ;;  %v1088_v60 = vrot.slane %v1084_v49, 4  ;;  %v654_v62 = vpack.c.bf16 %v622_v50, %v622_v50  ;;  %728 = vst [vmem:[#allocation2 + $0x60] sm:$0x1] %v727_v57  ;;  %v1185_v17 = vld [vmem:[#allocation2 + $0x30] sm:$0xf]  ;;  %v6183_v35 = vld [vmem:[%s8235_s3 + $0x8] sm:$0xff] }
  0x5d   : > { %v598_v63 = vadd.f32 %v6658_v5, %v566_v51  ;;  %v1095_v0 = vor.u32 %v1093_v46, %v1092_v53  ;;  %v1097_v2 = vrot.slane %v1092_v53, 4  ;;  %v895_v1 = vshrl.u32 %v653_v55, 16  ;;  %v6192_v36 = vld [vmem:[%s8235_s3 + $0x50] sm:$0xff]  ;;  %v6444_v41 = vld [vmem:[%s6653_s12 + $0x78] sm:$0xff]   ;;  %v6231_v42 = vld [vmem:[%s8235_s3 + $0x108] sm:$0xff]  ;;  %3600 = vmatpush.bf16.msrb.mxu3 %v6183_v35 }
  0x5e   : > { %v898_v4 = vshll.u32 %v653_v55, 16  ;;  %v1263_v8 = vsel %vm6718_vm8, %v1087_v59, %v1262_v54  ;;  %v903_v9 = vshrl.u32 %v654_v62, 16  ;;  %v906_v10 = vshll.u32 %v654_v62, 16  ;;  %v806_v47 = vld [vmem:[#allocation2 + $0xc8] sm:$0x1]  ;;  %v6238_v48 = vld [vmem:[%s8235_s3 + $0x140] sm:$0xff]  ;;  %3688 = vmatpush.bf16.msrb.mxu0 %v6192_v36  ;;  %3278 = vmatpush.bf16.msrb.mxu1 %v6231_v42 }
  0x5f   : > { %v629_v11 = vmax.f32 %v597_v56, 0.0  ;;  %v1096_v14 = vsel %vm6711_vm7, %v1088_v60, %v1095_v0  ;;  %1264 = vst [vmem:[#allocation2 + $0xb4] sm:$0xf] %v1263_v8  ;;  %v1267_v15 = vsel %vm6644_vm2, %v1097_v2, %v1266_v61  ;;  %v897_v5 = vrot.slane %v895_v1, 7  ;;  %v6182_v49 = vld [vmem:[%s8235_s3] sm:$0xff]  ;;  %v6191_v55 = vld [vmem:[%s8235_s3 + $0x48] sm:$0xff]  ;;  %3368 = vmatpush.bf16.msrb.mxu2 %v6238_v48 }
  0x60   : > { %v630_v19 = vmax.f32 %v598_v63, 0.0  ;;  %1265 = vst [vmem:[#allocation2 + $0xb8] sm:$0xf] %v1096_v14  ;;  %v6969_v23 = vrot.slane %v903_v9, 7  ;;  %v6333_v25 = vunpack.c.h.bf16 %v6950_v37  ;;  %v573_v27 = vmul.f32 %v6511_v26, %v6332_v52  ;;  %v6512_v52 = vld [vmem:[%s8237_s5] ss:$0 sm:$0xff] }
  0x61   : > { %v6216_v22 = vld [vmem:[#allocation2 + $0x84] sm:$0xff]  ;;  %v661_v24 = vpack.c.bf16 %v629_v11, %v629_v11  ;;  %1268 = vst [vmem:[#allocation2 + $0xbc] sm:$0x1] %v1267_v15  ;;  %v900_v30 = vor.u32 %v898_v4, %v897_v5  ;;  %v901_v31 = vrot.slane %v897_v5, 4  ;;  %v739_v33 = vsel %vm6644_vm2, 0, %v738_v12  ;;  %3601 = vmatpush.bf16.msrb.mxu3 %v6182_v49 }
  0x62   : > { %v662_v32 = vpack.c.bf16 %v630_v19, %v630_v19  ;;  %3241 = vmatmul.bf16.gmra.mxu2 %v6216_v22  ;;  %v908_v37 = vor.u32 %v906_v10, %v6969_v23  ;;  %740 = vst [vmem:[#allocation2 + $0x90] sm:$0x1] %v739_v33  ;;  %v574_v46 = vmul.f32 %v6511_v26, %v6333_v25  ;;  %v795_v54 = vsel %vm6664_vm4, 0, %v794_v21  ;;  %v6230_v1 = vld [vmem:[%s8235_s3 + $0x100] sm:$0xff] }
  0x63   : > { %v963_v38 = vshrl.u32 %v661_v24, 16  ;;  %v966_v40 = vshll.u32 %v661_v24, 16  ;;  %v1186_v43 = vsel %vm6718_vm8, %v900_v30, %v1185_v17  ;;  %v605_v53 = vadd.f32 %v6512_v52, %v573_v27  ;;  %v1213_v57 = vld [vmem:[#allocation2 + $0x60] sm:$0xf]  ;;  %796 = vst [vmem:[#allocation2 + $0x98] sm:$0x1] %v795_v54  ;;  %3689 = vmatpush.bf16.msrb.mxu0 %v6191_v55  ;;  %3279 = vmatpush.bf16.msrb.mxu1 %v6230_v1 }
  0x64   : > { %v971_v44 = vshrl.u32 %v662_v32, 16  ;;  %v974_v45 = vshll.u32 %v662_v32, 16  ;;  %v909_v50 = vsel %vm6711_vm7, %v901_v31, %v908_v37  ;;  %1187 = vst [vmem:[#allocation2 + $0x30] sm:$0xf] %v1186_v43  ;;  %v606_v59 = vadd.f32 %v6512_v52, %v574_v46  ;;  %v6190_v5 = vld [vmem:[%s8235_s3 + $0x40] sm:$0xff] }
  0x65   : > { %v965_v51 = vrot.slane %v963_v38, 7  ;;  %1188 = vst [vmem:[#allocation2 + $0x34] sm:$0xf] %v909_v50  ;;  %v6348_v60 = vunpack.c.l.bf16 %v6444_v41  ;;  %v6349_v61 = vunpack.c.h.bf16 %v6444_v41  ;;  %v637_v0 = vmax.f32 %v605_v53, 0.0  ;;  %v2174_v17 = vld [vmem:[#allocation2 + $0xc] sm:$0xf] }
  0x66   : > { %v7012_v56 = vrot.slane %v971_v44, 7  ;;  %v751_v2 = vsel %vm6644_vm2, 0, %v750_v34  ;;  %v638_v9 = vmax.f32 %v606_v59, 0.0  ;;  %v807_v15 = vsel %vm6664_vm4, 0, %v806_v47  ;;  %v7029_v24 = vld [vmem:[#allocation2 + $0x10] sm:$0xf] }
  0x67   : > { %v968_v62 = vor.u32 %v966_v40, %v965_v51  ;;  %v969_v63 = vrot.slane %v965_v51, 4  ;;  %v6220_v4 = vld [vmem:[#allocation2 + $0xb4] sm:$0xff]  ;;  %v581_v10 = vmul.f32 %v6511_v26, %v6348_v60  ;;  %752 = vst [vmem:[#allocation2 + $0xc0] sm:$0x1] %v751_v2  ;;  %v669_v12 = vpack.c.bf16 %v637_v0, %v637_v0  ;;  %3690 = vmatpush.bf16.msrb.mxu0 %v6190_v5  ;;  %v758_v5 = vld [vmem:[#allocation2 + $0x8] sm:$0x1] }
  0x68   : > { %v976_v8 = vor.u32 %v974_v45, %v7012_v56  ;;  %v582_v14 = vmul.f32 %v6511_v26, %v6349_v61  ;;  %3261 = vmatmul.bf16.gmra.mxu3 %v6220_v4  ;;  %v670_v21 = vpack.c.bf16 %v638_v9, %v638_v9  ;;  %vm1352_vm9 = vsmask.f32 3328  ;;  %808 = vst [vmem:[#allocation2 + $0xc8] sm:$0x1] %v807_v15  ;;  %v702_v15 = vld [vmem:[#allocation2] sm:$0x1] }
  0x69   : > { %v1214_v11 = vsel %vm6718_vm8, %v968_v62, %v1213_v57  ;;  %v613_v22 = vadd.f32 %v6512_v52, %v581_v10  ;;  %v1031_v25 = vshrl.u32 %v669_v12, 16  ;;  %v1034_v26 = vshll.u32 %v669_v12, 16  ;;  %v1241_v38 = vld [vmem:[#allocation2 + $0x90] sm:$0xf]  ;;  %v7035_v57 = vld [vmem:[#allocation2 + $0x14] sm:$0x1] }
  0x6a   : > { %v977_v19 = vsel %vm6711_vm7, %v969_v63, %v976_v8  ;;  %1215 = vst [vmem:[#allocation2 + $0x60] sm:$0xf] %v1214_v11  ;;  %v614_v27 = vadd.f32 %v6512_v52, %v582_v14  ;;  %vm1353_vm10 = vsmask.f32 7440  ;;  %v1039_v28 = vshrl.u32 %v670_v21, 16 }
  0x6b   : > { %1216 = vst [vmem:[#allocation2 + $0x64] sm:$0xf] %v977_v19  ;;  %v1042_v29 = vshll.u32 %v670_v21, 16  ;;  %v645_v30 = vmax.f32 %v613_v22, 0.0  ;;  %v2223_v31 = vshrl.u32 %v2174_v17, 16  ;;  %v1033_v33 = vrot.slane %v1031_v25, 7  ;;  %vm7046_vm11 = vmor %vm1352_vm9, %vm1353_vm10 }
  0x6c   : > { %v6209_v32 = vld [vmem:[#allocation2 + $0x30] sm:$0xff]  ;;  %v646_v34 = vmax.f32 %v614_v27, 0.0  ;;  %v2226_v35 = vshll.u32 %v2174_v17, 16  ;;  %v2232_v36 = vshll.u32 %v7029_v24, 16  ;;  %v1041_v37 = vrot.slane %v1039_v28, 7 }
  0x6d   : > { %v677_v40 = vpack.c.bf16 %v645_v30, %v645_v30  ;;  %v2225_v41 = vrot.slane %v2223_v31, 4  ;;  %v2236_v42 = vshrl.u32 %v7029_v24, 16  ;;  %3206 = vmatmul.bf16.gmra.mxu0 %v6209_v32  ;;  %v1036_v43 = vor.u32 %v1034_v26, %v1033_v33  ;;  %v1245_v45 = vld [vmem:[#allocation2 + $0x98] sm:$0x1]  ;;  %v2606_v25 = vld [vmem:[#allocation2 + $0xc] sm:$0xe] }
  0x6e   : > { %v1037_v44 = vrot.slane %v1033_v33, 4  ;;  %v678_v46 = vpack.c.bf16 %v646_v34, %v646_v34  ;;  %v2228_v47 = vrot.slane %v2226_v35, 5  ;;  %v1044_v48 = vor.u32 %v1042_v29, %v1041_v37  ;;  %v1269_v55 = vld [vmem:[#allocation2 + $0xc0] sm:$0xf]  ;;  %v809_v26 = vld [vmem:[#allocation2 + $0xd4] sm:$0x1] }
  0x6f   : > { %v1046_v49 = vrot.slane %v1041_v37, 4  ;;  %v1099_v50 = vshrl.u32 %v677_v40, 16  ;;  %v1102_v51 = vshll.u32 %v677_v40, 16  ;;  %v1242_v52 = vsel %vm6718_vm8, %v1036_v43, %v1241_v38  ;;  %v1273_v1 = vld [vmem:[#allocation2 + $0xc8] sm:$0x1] }
  0x70   : > { %v1107_v53 = vshrl.u32 %v678_v46, 16  ;;  %v1110_v54 = vshll.u32 %v678_v46, 16  ;;  %v2229_v59 = vor.u32 %v2228_v47, %v2225_v41  ;;  %v1045_v61 = vsel %vm6711_vm7, %v1037_v44, %v1044_v48  ;;  %1243 = vst [vmem:[#allocation2 + $0x90] sm:$0xf] %v1242_v52  ;;  %v764_v29 = vld [vmem:[#allocation2 + $0x20] sm:$0x1] }
  0x71   : > { %v1246_v62 = vsel %vm6644_vm2, %v1046_v49, %v1245_v45  ;;  %v1101_v63 = vrot.slane %v1099_v50, 7  ;;  %v2234_v0 = vrot.slane %v2232_v36, 5  ;;  %1244 = vst [vmem:[#allocation2 + $0x94] sm:$0xf] %v1045_v61  ;;  %v2238_v9 = vrot.slane %v2236_v42, 4  ;;  %v6269_v36 = vld [vmem:[%s8235_s3 + $0x1b8] sm:$0xff] }
  0x72   : > { %v6213_v60 = vld [vmem:[#allocation2 + $0x60] sm:$0xff]  ;;  %v1109_v2 = vrot.slane %v1107_v53, 7  ;;  %1247 = vst [vmem:[#allocation2 + $0x98] sm:$0x1] %v1246_v62  ;;  %v2242_v10 = vshll.u32 %v7035_v57, 16  ;;  %v2230_v14 = vrot.slane %v2229_v59, 4  ;;  %4871 = vmatpush.bf16.msra.mxu2 %v6269_v36 }
  0x73   : > { %3226 = vmatmul.bf16.gmra.mxu1 %v6213_v60  ;;  %v1104_v4 = vor.u32 %v1102_v51, %v1101_v63  ;;  %v1105_v8 = vrot.slane %v1101_v63, 4  ;;  %v2239_v21 = vor.u32 %v2238_v9, %v2234_v0  ;;  %vm1803_vm12 = vcmask 1042432   ;;  %v6277_v42 = vld [vmem:[%s8235_s3 + $0x1f8] sm:$0xff] }
  0x74   : > { %v1112_v11 = vor.u32 %v1110_v54, %v1109_v2  ;;  %v1114_v12 = vrot.slane %v1109_v2, 4  ;;  %v2244_v22 = vrot.slane %v2242_v10, 5  ;;  %vm1804_vm13 = vcmask 1046532   ;;  %v6205_v44 = vld [vmem:[%s8235_s3 + $0xb8] sm:$0xff]  ;;  %4960 = vmatpush.bf16.msra.mxu3 %v6277_v42 }
  0x75   : > { %v1270_v17 = vsel %vm6718_vm8, %v1104_v4, %v1269_v55  ;;  %v2240_v30 = vrot.slane %v2239_v21, 4  ;;  %v2672_v31 = vrot.slane %v7029_v24, 5  ;;  %v703_v32 = vsel %vm6644_vm2, 0, %v702_v15  ;;  %v6285_v45 = vld [vmem:[%s8235_s3 + $0x238] sm:$0xff]  ;;  %vm7085_vm14 = vmor %vm1803_vm12, %vm1804_vm13  ;;  %3772 = vmatpush.bf16.msra.mxu1 %v6205_v44 }
  0x76   : > { %v1113_v27 = vsel %vm6711_vm7, %v1105_v8, %v1112_v11  ;;  %1271 = vst [vmem:[#allocation2 + $0xc0] sm:$0xf] %v1270_v17  ;;  %v1274_v28 = vsel %vm6644_vm2, %v1114_v12, %v1273_v1  ;;  %v2235_v33 = vsel %vm7046_vm11, %v2230_v14, %v2234_v0  ;;  %v759_v34 = vsel %vm6664_vm4, 0, %v758_v5  ;;  %v2176_v51 = vld [vmem:[#allocation2 + $0x18] sm:$0xf]  ;;  %5049 = vmatpush.bf16.msra.mxu0 %v6285_v45 }
  0x77   : > { %1272 = vst [vmem:[#allocation2 + $0xc4] sm:$0xf] %v1113_v27  ;;  %v810_v35 = vsel %vm6664_vm4, 0, %v809_v26  ;;  %v2245_v24 = vsel %vm7046_vm11, %v2240_v30, %v2244_v22  ;;  %v5615_v38 = vrot.slane %v2606_v25, 9  ;;  %v6569_v40 = vmov 0  }
  0x78   : > { %1275 = vst [vmem:[#allocation2 + $0xc8] sm:$0x1] %v1274_v28  ;;  %v6217_v37 = vld [vmem:[#allocation2 + $0x90] sm:$0xff]  ;;  %v7068_v41 = vrot.slane %v6569_v40, 7  ;;  %v2675_v43 = vrot.slane %v7035_v57, 5  ;;  %v765_v46 = vsel %vm6664_vm4, 0, %v764_v29  ;;  %v2862_v47 = vunpack.c.l.b16 %v2235_v33 }
  0x79   : > { %704 = vst [vmem:[#allocation2] sm:$0x1] %v703_v32  ;;  %3246 = vmatmul.bf16.gmra.mxu2 %v6217_v37  ;;  %v2863_v48 = vunpack.c.l.b16 %v2245_v24  ;;  %v2674_v49 = vrot.slane %v2672_v31, 4  ;;  %v2177_v53 = vld [vmem:[#allocation2 + $0x1c] sm:$0xf]  ;;  %v2247_v54 = vshrl.u32 %v2176_v51, 16  ;;  %v2673_v2 = vsel %vm7085_vm14, %v5615_v38, %v2672_v31 }
  0x7a   : > { %8255 = vst [vmem:[#allocation5_spill] sm:$0xff] %v7068_v41  ;;  %v821_v50 = vrot.slane %v7068_v41, 4  ;;  %v2250_v55 = vshll.u32 %v2176_v51, 16  ;;  %v2256_v59 = vshll.u32 %v2177_v53, 16  ;;  %v2260_v60 = vshrl.u32 %v2177_v53, 16 }
  0x7b   : > { %760 = vst [vmem:[#allocation2 + $0x8] sm:$0x1] %v759_v34  ;;  %v2249_v62 = vrot.slane %v2247_v54, 4  ;;  %v2894_v0 = vpack.c.b16 %v2863_v48, %v2862_v47  ;;  %v2676_v1 = vsel %vm7085_vm14, %v2674_v49, %v2675_v43  ;;  %v876_v4 = vrot.slane %v6802_v58, 4  ;;  %v2607_v9 = vld [vmem:[#allocation2 + $0x18] sm:$0xe] }
  0x7c   : > { %811 = vst [vmem:[#allocation2 + $0xd4] sm:$0x1] %v810_v35  ;;  %v829_v57 = vsel %vm6711_vm7, %v821_v50, %v7068_v41  ;;  %v2252_v63 = vrot.slane %v2250_v55, 5  ;;  %v893_v8 = vrot.slane %v6889_v20, 4  ;;  %v2258_v14 = vrot.slane %v2256_v59, 5 }
  0x7d   : > { %766 = vst [vmem:[#allocation2 + $0x20] sm:$0x1] %v765_v46  ;;  %v2262_v15 = vrot.slane %v2260_v60, 4  ;;  %v2926_v5 = vunpack.c.l.b16 %v2673_v2  ;;  %v2927_v17 = vunpack.c.l.b16 %v2676_v1  ;;  %v1306_v22 = vld [vmem:[#allocation2 + $0xc] sm:$0xf]  ;;  %v5616_v27 = vrot.slane %v2607_v9, 9 }
  0x7e   : > { %v6221_v61 = vld [vmem:[#allocation2 + $0xc0] sm:$0xff]  ;;  %839 = vst [vmem:[#allocation2 + $0x4] sm:$0xf] %v829_v57  ;;  %v2253_v12 = vor.u32 %v2252_v63, %v2249_v62  ;;  %v2679_v28 = vrot.slane %v2177_v53, 5  ;;  %v1307_v30 = vld [vmem:[#allocation2 + $0x10] sm:$0xf] }
  0x7f   : > { %1300 = vst [vmem:[#allocation2 + $0xd0] sm:$0xf] %v829_v57  ;;  %3266 = vmatmul.bf16.gmra.mxu3 %v6221_v61  ;;  %v767_v31 = vld [vmem:[#allocation2 + $0x2c] sm:$0x1]  ;;  %v2263_v34 = vor.u32 %v2262_v15, %v2258_v14  ;;  %v1380_v35 = vshrl.u32 %v1306_v22, 16  ;;  %v2958_v36 = vpack.c.b16 %v2927_v17, %v2926_v5  ;;  %v1383_v38 = vshll.u32 %v1306_v22, 16 }
  0x80   : > { %v836_v6 = vld [vmem:[#allocation2] sm:$0xf]  ;;  %v2254_v33 = vrot.slane %v2253_v12, 4  ;;  %v2681_v40 = vrot.slane %v2679_v28, 4  ;;  %v1389_v42 = vshll.u32 %v1307_v30, 16  ;;  %v1393_v43 = vshrl.u32 %v1307_v30, 16 }
  0x81   : > { %v837_v10 = vsel %vm6718_vm8, %v7068_v41, %v836_v6  ;;  %v768_v44 = vsel %vm6664_vm4, 0, %v767_v31  ;;  %v2178_v47 = vld [vmem:[#allocation2 + $0x24] sm:$0xf]  ;;  %v7113_v51 = vsel %vm7085_vm14, %v5616_v27, %v2679_v28  ;;  %v1337_v53 = vld [vmem:[#allocation2 + $0x14] sm:$0x1]  ;;  %v1382_v54 = vrot.slane %v1380_v35, 4 }
  0x82   : > { %v840_v11 = vld [vmem:[#allocation2 + $0x8] sm:$0x1]  ;;  %838 = vst [vmem:[#allocation2] sm:$0xf] %v837_v10  ;;  %v2259_v49 = vsel %vm7046_vm11, %v2254_v33, %v2258_v14  ;;  %v1385_v61 = vrot.slane %v1383_v38, 5  ;;  %v7115_v63 = vrot.slane %v1389_v42, 5 }
  0x83   : > { %v841_v21 = vsel %vm6644_vm2, %v821_v50, %v840_v11  ;;  %v1301_v58 = vld [vmem:[#allocation2 + $0xd4] sm:$0x1]  ;;  %3280 = vmatmul.bf16.vlgmr.msrb.gmra.mxu1 %v2894_v0  ;;  %769 = vst [vmem:[#allocation2 + $0x2c] sm:$0x1] %v768_v44  ;;  %v1395_v0 = vrot.slane %v1393_v43, 4  ;;  %v2271_v1 = vshrl.u32 %v2178_v47, 16  ;;  %v2864_v12 = vunpack.c.l.b16 %v2259_v49 }
  0x84   : > { %v1302_v25 = vsel %vm6644_vm2, %v821_v50, %v1301_v58  ;;  %842 = vst [vmem:[#allocation2 + $0x8] sm:$0x1] %v841_v21  ;;  %v1175_v26 = vld [vmem:[#allocation2 + $0x20] sm:$0x1]  ;;  %v2264_v50 = vrot.slane %v2263_v34, 4  ;;  %v1399_v17 = vshll.u32 %v1337_v53, 16  ;;  %v1386_v58 = vor.u32 %v1385_v61, %v1382_v54 }
  0x85   : > { %1303 = vst [vmem:[#allocation2 + $0xd4] sm:$0x1] %v1302_v25  ;;  %v1176_v29 = vsel %vm6644_vm2, %v876_v4, %v1175_v26  ;;  %v1305_v32 = vld [vmem:[#allocation2 + $0x4] sm:$0xf]  ;;  %v7117_v2 = vld [vmem:[#allocation2 + $0x28] sm:$0xf]  ;;  %v1396_v34 = vor.u32 %v1395_v0, %v7115_v63  ;;  %v2928_v43 = vunpack.c.l.b16 %v7113_v51 }
  0x86   : > { %1177 = vst [vmem:[#allocation2 + $0x20] sm:$0x1] %v1176_v29  ;;  %v1365_v37 = vshll.u32 %v1305_v32, 16  ;;  %v1369_v24 = vshrl.u32 %v1305_v32, 16  ;;  %v2274_v22 = vshll.u32 %v2178_v47, 16  ;;  %v2280_v25 = vshll.u32 %v7117_v2, 16 }
  0x87   : > { %v2273_v29 = vrot.slane %v2271_v1, 4  ;;  %v2284_v30 = vshrl.u32 %v7117_v2, 16  ;;  %v1387_v47 = vrot.slane %v1386_v58, 4  ;;  %v1401_v20 = vrot.slane %v1399_v17, 5  ;;  %v6268_v61 = vld [vmem:[%s8235_s3 + $0x1b0] sm:$0xff] }
  0x88   : > { %v1367_v45 = vrot.slane %v1365_v37, 5  ;;  %v1371_v46 = vrot.slane %v1369_v24, 4  ;;  %v2276_v37 = vrot.slane %v2274_v22, 5  ;;  %v2282_v24 = vrot.slane %v2280_v25, 5  ;;  %v6204_v0 = vld [vmem:[%s8235_s3 + $0xb0] sm:$0xff]  ;;  %4872 = vmatpush.bf16.msra.mxu2 %v6268_v61 }
  0x89   : > { %v1304_v48 = vld [vmem:[#allocation2] sm:$0xf]  ;;  %3369 = vmatmul.bf16.vlgmr.msrb.gmra.mxu2 %v2958_v36  ;;  %v1392_v51 = vsel %vm7046_vm11, %v1387_v47, %v7115_v63  ;;  %v6284_v63 = vld [vmem:[%s8235_s3 + $0x230] sm:$0xff]  ;;  %3773 = vmatpush.bf16.msra.mxu1 %v6204_v0  ;;  %v910_v22 = vrot.slane %v6969_v23, 4  ;;  %v1310_v0 = vld [vmem:[#allocation2 + $0x24] sm:$0xf] }
  0x8a   : > { %v1356_v57 = vshrl.u32 %v1304_v48, 16  ;;  %v1359_v59 = vshll.u32 %v1304_v48, 16  ;;  %v1372_v60 = vor.u32 %v1371_v46, %v1367_v45  ;;  %v6166_v4 = vld [vmem:[#allocation2] sm:$0xff]  ;;  %v1182_v28 = vld [vmem:[#allocation2 + $0x2c] sm:$0x1]  ;;  %v2277_v48 = vor.u32 %v2276_v37, %v2273_v29  ;;  %5050 = vmatpush.bf16.msra.mxu0 %v6284_v63 }
  0x8b   : > { %v1336_v55 = vld [vmem:[#allocation2 + $0x8] sm:$0x1]  ;;  %v1183_v36 = vsel %vm6644_vm2, %v893_v8, %v1182_v28  ;;  %v6167_v25 = vld [vmem:[#allocation2 + $0xc] sm:$0xff] }
  0x8c   : > { %v1375_v62 = vshll.u32 %v1336_v55, 16  ;;  %v1358_v6 = vrot.slane %v1356_v57, 4  ;;  %v1361_v9 = vrot.slane %v1359_v59, 5  ;;  %v1373_v10 = vrot.slane %v1372_v60, 4  ;;  %1184 = vst [vmem:[#allocation2 + $0x2c] sm:$0x1] %v1183_v36 }
  0x8d   : > { %v2207_v11 = vld [vmem:[#allocation2 + $0x20] sm:$0x1]  ;;  %v2278_v54 = vrot.slane %v2277_v48, 4  ;;  %v1308_v55 = vld [vmem:[#allocation2 + $0x18] sm:$0xf] }
  0x8e   : > { %v1377_v14 = vrot.slane %v1375_v62, 5  ;;  %v2266_v15 = vshll.u32 %v2207_v11, 16  ;;  %v2682_v5 = vrot.slane %v2207_v11, 5  ;;  %v1362_v21 = vor.u32 %v1361_v9, %v1358_v6  ;;  %v770_v57 = vld [vmem:[#allocation2 + $0x38] sm:$0x1]  ;;  %v6276_v62 = vld [vmem:[%s8235_s3 + $0x1f0] sm:$0xff] }
  0x8f   : > { %3602 = vmatmul.bf16.vlgmr.msrb.gmra.mxu3 %v6166_v4  ;;  %v1309_v59 = vld [vmem:[#allocation2 + $0x1c] sm:$0xf]  ;;  %v2608_v60 = vld [vmem:[#allocation2 + $0x24] sm:$0xe]  ;;  %v2686_v4 = vrot.slane %v7117_v2, 5  ;;  %v1404_v6 = vshrl.u32 %v1308_v55, 16 }
  0x90   : > { %v1378_v26 = vsel %vm7046_vm11, %v1373_v10, %v1377_v14  ;;  %v2268_v27 = vrot.slane %v2266_v15, 5  ;;  %v1363_v31 = vrot.slane %v1362_v21, 4  ;;  %v2683_v33 = vsel %vm7085_vm14, %v2681_v40, %v2682_v5  ;;  %v2180_v10 = vld [vmem:[#allocation2 + $0x30] sm:$0xf]  ;;  %4961 = vmatpush.bf16.msra.mxu3 %v6276_v62 }
  0x91   : > { %v1999_v32 = vunpack.c.l.b16 %v1378_v26  ;;  %v2286_v40 = vrot.slane %v2284_v30, 4  ;;  %v2929_v46 = vunpack.c.l.b16 %v2683_v33  ;;  %v771_v9 = vsel %vm6664_vm4, 0, %v770_v57  ;;  %v2609_v63 = vld [vmem:[#allocation2 + $0x30] sm:$0xe] }
  0x92   : > { %v2269_v35 = vsel %vm7046_vm11, %v2264_v50, %v2268_v27  ;;  %v1368_v38 = vsel %vm7046_vm11, %v1363_v31, %v1367_v45  ;;  %v1397_v50 = vrot.slane %v1396_v34, 4  ;;  %v1407_v15 = vshll.u32 %v1308_v55, 16  ;;  %772 = vst [vmem:[#allocation2 + $0x38] sm:$0x1] %v771_v9 }
  0x93   : > { %v2865_v42 = vunpack.c.l.b16 %v2269_v35  ;;  %v1998_v44 = vunpack.c.l.b16 %v1368_v38  ;;  %v2287_v8 = vor.u32 %v2286_v40, %v2282_v24  ;;  %v2959_v45 = vpack.c.b16 %v2929_v46, %v2928_v43  ;;  %v2208_v11 = vld [vmem:[#allocation2 + $0x2c] sm:$0x1] }
  0x94   : > { %v1402_v1 = vsel %vm7046_vm11, %v1397_v50, %v1401_v20  ;;  %v1413_v5 = vshll.u32 %v1309_v59, 16  ;;  %v2290_v17 = vshll.u32 %v2208_v11, 16  ;;  %v1417_v2 = vshrl.u32 %v1309_v59, 16 }
  0x95   : > { %v2895_v49 = vpack.c.b16 %v2865_v42, %v2864_v12  ;;  %v2030_v53 = vpack.c.b16 %v1999_v32, %v1998_v44  ;;  %v2283_v12 = vsel %vm7046_vm11, %v2278_v54, %v2282_v24  ;;  %v2288_v14 = vrot.slane %v2287_v8, 4  ;;  %v7158_v32 = vld [vmem:[#allocation2 + $0x34] sm:$0xf]  ;;  %v1338_v24 = vld [vmem:[#allocation2 + $0x20] sm:$0x1] }
  0x96   : > { %v2295_v21 = vshrl.u32 %v2180_v10, 16  ;;  %v2298_v58 = vshll.u32 %v2180_v10, 16  ;;  %v2000_v26 = vunpack.c.l.b16 %v1392_v51  ;;  %v2001_v27 = vunpack.c.l.b16 %v1402_v1 }
  0x97   : > { %3285 = vmatmul.bf16.gmra.mxu1 %v2895_v49  ;;  %3691 = vmatmul.bf16.vlgmr.msrb.gmra.mxu0 %v2030_v53  ;;  %v2292_v28 = vrot.slane %v2290_v17, 5  ;;  %v5617_v29 = vrot.slane %v2608_v60, 9  ;;  %v2688_v30 = vrot.slane %v2686_v4, 4  ;;  %v2689_v31 = vrot.slane %v2208_v11, 5  ;;  %v773_v53 = vld [vmem:[#allocation2 + $0x44] sm:$0x1] }
  0x98   : > { %v2866_v33 = vunpack.c.l.b16 %v2283_v12  ;;  %v1406_v34 = vrot.slane %v1404_v6, 4  ;;  %v1409_v35 = vrot.slane %v1407_v15, 5  ;;  %v7160_v36 = vrot.slane %v1413_v5, 5  ;;  %v2182_v11 = vld [vmem:[#allocation2 + $0x3c] sm:$0xf] }
  0x99   : > { %3374 = vmatmul.bf16.gmra.mxu2 %v2959_v45  ;;  %v2293_v37 = vsel %vm7046_vm11, %v2288_v14, %v2292_v28  ;;  %v1419_v23 = vrot.slane %v1417_v2, 4  ;;  %v2297_v38 = vrot.slane %v2295_v21, 4  ;;  %v2300_v42 = vrot.slane %v2298_v58, 5  ;;  %v1189_v20 = vld [vmem:[#allocation2 + $0x38] sm:$0x1] }
  0x9a   : > { %v2867_v43 = vunpack.c.l.b16 %v2293_v37  ;;  %v2304_v40 = vshll.u32 %v7158_v32, 16  ;;  %v2308_v44 = vshrl.u32 %v7158_v32, 16  ;;  %v2687_v46 = vsel %vm7085_vm14, %v5617_v29, %v2686_v4  ;;  %v7175_v12 = vld [vmem:[#allocation2 + $0x40] sm:$0xf]  ;;  %v1311_v5 = vld [vmem:[#allocation2 + $0x28] sm:$0xf] }
  0x9b   : > { %v2690_v47 = vsel %vm7085_vm14, %v2688_v30, %v2689_v31  ;;  %v2031_v48 = vpack.c.b16 %v2001_v27, %v2000_v26  ;;  %v1410_v49 = vor.u32 %v1409_v35, %v1406_v34  ;;  %v1423_v50 = vshll.u32 %v1338_v24, 16  ;;  %v6168_v30 = vld [vmem:[#allocation2 + $0x18] sm:$0xff] }
  0x9c   : > { %v2896_v54 = vpack.c.b16 %v2867_v43, %v2866_v33  ;;  %v1420_v8 = vor.u32 %v1419_v23, %v7160_v36  ;;  %v1190_v55 = vsel %vm6644_vm2, %v910_v22, %v1189_v20  ;;  %v2301_v57 = vor.u32 %v2300_v42, %v2297_v38  ;;  %v1339_v20 = vld [vmem:[#allocation2 + $0x2c] sm:$0x1] }
  0x9d   : > { %v2930_v59 = vunpack.c.l.b16 %v2687_v46  ;;  %v2931_v45 = vunpack.c.l.b16 %v2690_v47  ;;  %1191 = vst [vmem:[#allocation2 + $0x38] sm:$0x1] %v1190_v55  ;;  %v2306_v51 = vrot.slane %v2304_v40, 5  ;;  %v2310_v60 = vrot.slane %v2308_v44, 4 }
  0x9e   : > { %v774_v61 = vsel %vm6664_vm4, 0, %v773_v53  ;;  %v1411_v62 = vrot.slane %v1410_v49, 4  ;;  %v1421_v1 = vrot.slane %v1420_v8, 4  ;;  %v1425_v4 = vrot.slane %v1423_v50, 5  ;;  %v776_v8 = vld [vmem:[#allocation2 + $0x50] sm:$0x1] }
  0x9f   : > { %3607 = vmatmul.bf16.gmra.mxu3 %v6167_v25  ;;  %775 = vst [vmem:[#allocation2 + $0x44] sm:$0x1] %v774_v61  ;;  %v2302_v6 = vrot.slane %v2301_v57, 4  ;;  %v2960_v9 = vpack.c.b16 %v2931_v45, %v2930_v59  ;;  %v2311_v10 = vor.u32 %v2310_v60, %v2306_v51  ;;  %v927_v14 = vrot.slane %v6722_v16, 4 }
  0xa0   : > { %v2693_v15 = vrot.slane %v7158_v32, 5  ;;  %v1428_v17 = vshrl.u32 %v1310_v0, 16  ;;  %v1431_v2 = vshll.u32 %v1310_v0, 16  ;;  %v1416_v21 = vsel %vm7046_vm11, %v1411_v62, %v7160_v36 }
  0xa1   : > { %v5618_v58 = vrot.slane %v2609_v63, 9  ;;  %v2319_v22 = vshrl.u32 %v2182_v11, 16  ;;  %v2322_v25 = vshll.u32 %v2182_v11, 16  ;;  %v1426_v26 = vsel %vm7046_vm11, %v1421_v1, %v1425_v4  ;;  %v1312_v11 = vld [vmem:[#allocation2 + $0x30] sm:$0xf] }
  0xa2   : > { %v2307_v28 = vsel %vm7046_vm11, %v2302_v6, %v2306_v51  ;;  %v2328_v16 = vshll.u32 %v7175_v12, 16  ;;  %v2332_v29 = vshrl.u32 %v7175_v12, 16  ;;  %v2312_v31 = vrot.slane %v2311_v10, 4 }
  0xa3   : > { %v1437_v33 = vshll.u32 %v1311_v5, 16  ;;  %v1441_v34 = vshrl.u32 %v1311_v5, 16  ;;  %v2695_v35 = vrot.slane %v2693_v15, 4  ;;  %v1430_v37 = vrot.slane %v1428_v17, 4  ;;  %v1313_v17 = vld [vmem:[#allocation2 + $0x34] sm:$0xf] }
  0xa4   : > { %v2209_v27 = vld [vmem:[#allocation2 + $0x38] sm:$0x1]  ;;  %v1433_v24 = vrot.slane %v1431_v2, 5  ;;  %v2321_v43 = vrot.slane %v2319_v22, 4  ;;  %v2324_v40 = vrot.slane %v2322_v25, 5  ;;  %v2002_v44 = vunpack.c.l.b16 %v1416_v21 }
  0xa5   : > { %v2314_v32 = vshll.u32 %v2209_v27, 16  ;;  %v2696_v36 = vrot.slane %v2209_v27, 5  ;;  %v2868_v46 = vunpack.c.l.b16 %v2307_v28  ;;  %v7190_v47 = vrot.slane %v2328_v16, 5  ;;  %v2610_v22 = vld [vmem:[#allocation2 + $0x3c] sm:$0xe] }
  0xa6   : > { %v1196_v23 = vld [vmem:[#allocation2 + $0x44] sm:$0x1]  ;;  %v2003_v49 = vunpack.c.l.b16 %v1426_v26  ;;  %v7194_v53 = vrot.slane %v1437_v33, 5  ;;  %v2694_v57 = vsel %vm7085_vm14, %v5618_v58, %v2693_v15  ;;  %v1434_v45 = vor.u32 %v1433_v24, %v1430_v37  ;;  %v6283_v33 = vld [vmem:[%s8235_s3 + $0x228] sm:$0xff] }
  0xa7   : > { %3290 = vmatmul.bf16.gmra.mxu1 %v2896_v54  ;;  %3696 = vmatmul.bf16.gmra.mxu0 %v2031_v48  ;;  %v2316_v38 = vrot.slane %v2314_v32, 5  ;;  %v1197_v42 = vsel %vm6644_vm2, %v927_v14, %v1196_v23  ;;  %v2334_v48 = vrot.slane %v2332_v29, 4  ;;  %v1443_v54 = vrot.slane %v1441_v34, 4  ;;  %v6275_v29 = vld [vmem:[%s8235_s3 + $0x1e8] sm:$0xff] }
  0xa8   : > { %1198 = vst [vmem:[#allocation2 + $0x44] sm:$0x1] %v1197_v42  ;;  %v2697_v59 = vsel %vm7085_vm14, %v2695_v35, %v2696_v36  ;;  %v2325_v51 = vor.u32 %v2324_v40, %v2321_v43  ;;  %v1447_v61 = vshll.u32 %v1339_v20, 16  ;;  %v777_v0 = vsel %vm6664_vm4, 0, %v776_v8  ;;  %v2184_v34 = vld [vmem:[#allocation2 + $0x48] sm:$0xf]  ;;  %4962 = vmatpush.bf16.msra.mxu3 %v6275_v29  ;;  %5051 = vmatpush.bf16.msra.mxu0 %v6283_v33 }
  0xa9   : > { %3379 = vmatmul.bf16.gmra.mxu2 %v2960_v9  ;;  %v2317_v50 = vsel %vm7046_vm11, %v2312_v31, %v2316_v38  ;;  %v2335_v62 = vor.u32 %v2334_v48, %v7190_v47  ;;  %v2032_v1 = vpack.c.b16 %v2003_v49, %v2002_v44  ;;  %v2932_v4 = vunpack.c.l.b16 %v2694_v57  ;;  %778 = vst [vmem:[#allocation2 + $0x50] sm:$0x1] %v777_v0  ;;  %v7226_v24 = vld [vmem:[#allocation2 + $0x4c] sm:$0xf] }
  0xaa   : > { %v2869_v55 = vunpack.c.l.b16 %v2317_v50  ;;  %v2933_v6 = vunpack.c.l.b16 %v2697_v59  ;;  %v1444_v63 = vor.u32 %v1443_v54, %v7194_v53  ;;  %v944_v9 = vrot.slane %v6815_v18, 4  ;;  %v6267_v18 = vld [vmem:[%s8235_s3 + $0x1a8] sm:$0xff]  ;;  %v1340_v59 = vld [vmem:[#allocation2 + $0x38] sm:$0x1] }
  0xab   : > { %v1435_v14 = vrot.slane %v1434_v45, 4  ;;  %v2326_v5 = vrot.slane %v2325_v51, 4  ;;  %v1449_v2 = vrot.slane %v1447_v61, 5  ;;  %v2336_v21 = vrot.slane %v2335_v62, 4  ;;  %4873 = vmatpush.bf16.msra.mxu2 %v6267_v18 }
  0xac   : > { %v2897_v60 = vpack.c.b16 %v2869_v55, %v2868_v46  ;;  %v7205_v10 = vpop.f32.mrf.mxu1  ;;  %v2700_v25 = vrot.slane %v7175_v12, 5  ;;  %v2961_v26 = vpack.c.b16 %v2933_v6, %v2932_v4  ;;  %v1445_v27 = vrot.slane %v1444_v63, 4  ;;  %v6169_v46 = vld [vmem:[#allocation2 + $0x24] sm:$0xff]  ;;  %v779_v6 = vld [vmem:[#allocation2 + $0x5c] sm:$0x1] }
  0xad   : > { %v1452_v28 = vshrl.u32 %v1312_v11, 16  ;;  %v1455_v16 = vshll.u32 %v1312_v11, 16  ;;  %v1461_v32 = vshll.u32 %v1313_v17, 16  ;;  %v1465_v12 = vshrl.u32 %v1313_v17, 16 }
  0xae   : > { %v1440_v35 = vsel %vm7046_vm11, %v1435_v14, %v7194_v53  ;;  %v2331_v36 = vsel %vm7046_vm11, %v2326_v5, %v7190_v47  ;;  %v5619_v37 = vrot.slane %v2610_v22, 9  ;;  %v2343_v23 = vshrl.u32 %v2184_v34, 16 }
  0xaf   : > { %3612 = vmatmul.bf16.gmra.mxu3 %v6168_v30  ;;  %v2210_v15 = vld [vmem:[#allocation2 + $0x44] sm:$0x1]  ;;  %v6203_v30 = vld [vmem:[%s8235_s3 + $0xa8] sm:$0xff]  ;;  %v2346_v43 = vshll.u32 %v2184_v34, 16  ;;  %v2352_v40 = vshll.u32 %v7226_v24, 16  ;;  %v2356_v44 = vshrl.u32 %v7226_v24, 16  ;;  %v1450_v47 = vsel %vm7046_vm11, %v1445_v27, %v1449_v2  ;;  %v7252_v27 = vpop.f32.mrf.mxu0 }
  0xb0   : > { %v2338_v58 = vshll.u32 %v2210_v15, 16  ;;  %3774 = vmatpush.bf16.msra.mxu1 %v6203_v30  ;;  %v1203_v42 = vld [vmem:[#allocation2 + $0x50] sm:$0x1]  ;;  %v2702_v48 = vrot.slane %v2700_v25, 4  ;;  %v1454_v49 = vrot.slane %v1452_v28, 4  ;;  %v2703_v20 = vrot.slane %v2210_v15, 5 }
  0xb1   : > { %v1204_v50 = vsel %vm6644_vm2, %v944_v9, %v1203_v42  ;;  %v1457_v53 = vrot.slane %v1455_v16, 5  ;;  %v7236_v54 = vrot.slane %v1461_v32, 5  ;;  %v1467_v8 = vrot.slane %v1465_v12, 4  ;;  %v2611_v30 = vld [vmem:[#allocation2 + $0x48] sm:$0xe] }
  0xb2   : > { %v2340_v31 = vrot.slane %v2338_v58, 5  ;;  %1205 = vst [vmem:[#allocation2 + $0x50] sm:$0x1] %v1204_v50  ;;  %v2870_v55 = vunpack.c.l.b16 %v2331_v36  ;;  %v2345_v51 = vrot.slane %v2343_v23, 4  ;;  %v7240_v61 = vrot.slane %v2352_v40, 5 }
  0xb3   : > { %v2358_v62 = vrot.slane %v2356_v44, 4  ;;  %v2004_v0 = vunpack.c.l.b16 %v1440_v35  ;;  %v2701_v4 = vsel %vm7085_vm14, %v5619_v37, %v2700_v25  ;;  %v2704_v63 = vsel %vm7085_vm14, %v2702_v48, %v2703_v20  ;;  %v1314_v32 = vld [vmem:[#allocation2 + $0x3c] sm:$0xf]  ;;  %v1315_v35 = vld [vmem:[#allocation2 + $0x40] sm:$0xf] }
  0xb4   : > { %v2341_v38 = vsel %vm7046_vm11, %v2336_v21, %v2340_v31  ;;  %v7238_v45 = vpop.f32.mrf.mxu1  ;;  %v1458_v9 = vor.u32 %v1457_v53, %v1454_v49  ;;  %v1468_v11 = vor.u32 %v1467_v8, %v7236_v54  ;;  %v1471_v14 = vshll.u32 %v1340_v59, 16  ;;  %v7247_v5 = vpop.f32.mrf.mxu2 }
  0xb5   : > { %v2871_v57 = vunpack.c.l.b16 %v2341_v38  ;;  %v2359_v2 = vor.u32 %v2358_v62, %v7240_v61  ;;  %v780_v21 = vsel %vm6664_vm4, 0, %v779_v6  ;;  %v2934_v22 = vunpack.c.l.b16 %v2701_v4  ;;  %v2186_v38 = vld [vmem:[#allocation2 + $0x54] sm:$0xf] }
  0xb6   : > { %v2935_v25 = vunpack.c.l.b16 %v2704_v63  ;;  %781 = vst [vmem:[#allocation2 + $0x5c] sm:$0x1] %v780_v21  ;;  %v1459_v28 = vrot.slane %v1458_v9, 4  ;;  %v1469_v16 = vrot.slane %v1468_v11, 4  ;;  %v1473_v18 = vrot.slane %v1471_v14, 5  ;;  %v6170_v62 = vld [vmem:[#allocation2 + $0x30] sm:$0xff] }
  0xb7   : > { %3295 = vmatmul.bf16.gmra.mxu1 %v2897_v60  ;;  %3701 = vmatmul.bf16.gmra.mxu0 %v2032_v1  ;;  %v2348_v60 = vrot.slane %v2346_v43, 5  ;;  %v2005_v1 = vunpack.c.l.b16 %v1450_v47  ;;  %v2898_v15 = vpack.c.b16 %v2871_v57, %v2870_v55  ;;  %v2707_v31 = vrot.slane %v7226_v24, 5  ;;  %v7282_v14 = vpop.f32.mrf.mxu0 }
  0xb8   : > { %v2360_v33 = vrot.slane %v2359_v2, 4  ;;  %v961_v36 = vrot.slane %v6910_v39, 4  ;;  %v2962_v37 = vpack.c.b16 %v2935_v25, %v2934_v22  ;;  %v1464_v42 = vsel %vm7046_vm11, %v1459_v28, %v7236_v54 }
  0xb9   : > { %3384 = vmatmul.bf16.gmra.mxu2 %v2961_v26  ;;  %v2349_v17 = vor.u32 %v2348_v60, %v2345_v51  ;;  %v2033_v58 = vpack.c.b16 %v2005_v1, %v2004_v0  ;;  %v2211_v26 = vld [vmem:[#allocation2 + $0x50] sm:$0x1]  ;;  %v1474_v24 = vsel %vm7046_vm11, %v1469_v16, %v1473_v18  ;;  %v1476_v40 = vshrl.u32 %v1314_v32, 16  ;;  %v782_v60 = vld [vmem:[#allocation2 + $0x68] sm:$0x1] }
  0xba   : > { %v2362_v29 = vshll.u32 %v2211_v26, 16  ;;  %v1479_v44 = vshll.u32 %v1314_v32, 16  ;;  %v5620_v47 = vrot.slane %v2611_v30, 9  ;;  %v2709_v39 = vrot.slane %v2707_v31, 4 }
  0xbb   : > { %v2350_v12 = vrot.slane %v2349_v17, 4  ;;  %v1485_v48 = vshll.u32 %v1315_v35, 16  ;;  %v1489_v49 = vshrl.u32 %v1315_v35, 16  ;;  %v2710_v53 = vrot.slane %v2211_v26, 5 }
  0xbc   : > { %v2364_v34 = vrot.slane %v2362_v29, 5  ;;  %v7256_v23 = vpop.f32.mrf.mxu3  ;;  %v2367_v8 = vshrl.u32 %v2186_v38, 16  ;;  %v2370_v57 = vshll.u32 %v2186_v38, 16  ;;  %v2006_v0 = vunpack.c.l.b16 %v1464_v42  ;;  %v7276_v1 = vpop.f32.mrf.mxu2 }
  0xbd   : > { %v2355_v50 = vsel %vm7046_vm11, %v2350_v12, %v7240_v61  ;;  %v1210_v54 = vld [vmem:[#allocation2 + $0x5c] sm:$0x1]  ;;  %v1478_v61 = vrot.slane %v1476_v40, 4  ;;  %v1481_v4 = vrot.slane %v1479_v44, 5  ;;  %v2007_v6 = vunpack.c.l.b16 %v1474_v24 }
  0xbe   : > { %v2365_v20 = vsel %vm7046_vm11, %v2360_v33, %v2364_v34  ;;  %v1211_v55 = vsel %vm6644_vm2, %v961_v36, %v1210_v54  ;;  %v7278_v63 = vrot.slane %v1485_v48, 5  ;;  %v1491_v9 = vrot.slane %v1489_v49, 4  ;;  %v2612_v48 = vld [vmem:[#allocation2 + $0x54] sm:$0xe]  ;;  %v1316_v49 = vld [vmem:[#allocation2 + $0x48] sm:$0xf] }
  0xbf   : > { %3617 = vmatmul.bf16.gmra.mxu3 %v6169_v46  ;;  %v7265_v46 = vld [vmem:[#allocation2 + $0x58] sm:$0xf]  ;;  %1212 = vst [vmem:[#allocation2 + $0x5c] sm:$0x1] %v1211_v55  ;;  %v783_v11 = vsel %vm6664_vm4, 0, %v782_v60  ;;  %v2873_v17 = vunpack.c.l.b16 %v2365_v20  ;;  %v2708_v2 = vsel %vm7085_vm14, %v5620_v47, %v2707_v31  ;;  %v2711_v21 = vsel %vm7085_vm14, %v2709_v39, %v2710_v53  ;;  %v6266_v54 = vld [vmem:[%s8235_s3 + $0x1a0] sm:$0xff] }
  0xc0   : > { %v7263_v43 = vpop.f32.mrf.mxu1  ;;  %v2376_v59 = vshll.u32 %v7265_v46, 16  ;;  %v2380_v51 = vshrl.u32 %v7265_v46, 16  ;;  %784 = vst [vmem:[#allocation2 + $0x68] sm:$0x1] %v783_v11  ;;  %v2369_v22 = vrot.slane %v2367_v8, 4  ;;  %v2372_v25 = vrot.slane %v2370_v57, 5  ;;  %4874 = vmatpush.bf16.msra.mxu2 %v6266_v54 }
  0xc1   : > { %v1482_v7 = vor.u32 %v1481_v4, %v1478_v61  ;;  %v1492_v18 = vor.u32 %v1491_v9, %v7278_v63  ;;  %v2936_v32 = vunpack.c.l.b16 %v2708_v2  ;;  %v2937_v31 = vunpack.c.l.b16 %v2711_v21  ;;  %v6274_v8 = vld [vmem:[%s8235_s3 + $0x1e0] sm:$0xff] }
  0xc2   : > { %v7288_v26 = vrot.slane %v2376_v59, 5  ;;  %v2382_v28 = vrot.slane %v2380_v51, 4  ;;  %v978_v33 = vrot.slane %v7012_v56, 4  ;;  %v2034_v34 = vpack.c.b16 %v2007_v6, %v2006_v0  ;;  %v6202_v55 = vld [vmem:[%s8235_s3 + $0xa0] sm:$0xff]  ;;  %v7313_v59 = vpop.f32.mrf.mxu0  ;;  %4963 = vmatpush.bf16.msra.mxu3 %v6274_v8 }
  0xc3   : > { %v2373_v36 = vor.u32 %v2372_v25, %v2369_v22  ;;  %v1483_v38 = vrot.slane %v1482_v7, 4  ;;  %v1493_v24 = vrot.slane %v1492_v18, 4  ;;  %v2963_v47 = vpack.c.b16 %v2937_v31, %v2936_v32  ;;  %v2188_v0 = vld [vmem:[#allocation2 + $0x60] sm:$0xf]  ;;  %v7324_v9 = vld [vmem:[#allocation2 + $0x64] sm:$0xf]  ;;  %3775 = vmatpush.bf16.msra.mxu1 %v6202_v55 }
  0xc4   : > { %v7290_v16 = vpop.f32.mrf.mxu3  ;;  %v2714_v60 = vrot.slane %v7265_v46, 5  ;;  %v5621_v4 = vrot.slane %v2612_v48, 9  ;;  %v1500_v6 = vshrl.u32 %v1316_v49, 16  ;;  %v2391_v11 = vshrl.u32 %v2188_v0, 16 }
  0xc5   : > { %v2374_v56 = vrot.slane %v2373_v36, 4  ;;  %v1488_v51 = vsel %vm7046_vm11, %v1483_v38, %v7278_v63  ;;  %v2394_v46 = vshll.u32 %v2188_v0, 16  ;;  %v2400_v63 = vshll.u32 %v7324_v9, 16 }
  0xc6   : > { %v7296_v35 = vld [vmem:[#allocation2 + $0x5c] sm:$0x1]  ;;  %v2008_v7 = vunpack.c.l.b16 %v1488_v51  ;;  %v2715_v31 = vsel %vm7085_vm14, %v5621_v4, %v2714_v60  ;;  %v1318_v4 = vld [vmem:[#allocation2 + $0x54] sm:$0xf] }
  0xc7   : > { %3300 = vmatmul.bf16.gmra.mxu1 %v2898_v15  ;;  %3706 = vmatmul.bf16.gmra.mxu0 %v2033_v58  ;;  %v2872_v15 = vunpack.c.l.b16 %v2355_v50  ;;  %v1341_v58 = vld [vmem:[#allocation2 + $0x44] sm:$0x1]  ;;  %v2386_v42 = vshll.u32 %v7296_v35, 16  ;;  %v1217_v44 = vld [vmem:[#allocation2 + $0x68] sm:$0x1]  ;;  %v2379_v21 = vsel %vm7046_vm11, %v2374_v56, %v7288_v26  ;;  %v2938_v54 = vunpack.c.l.b16 %v2715_v31 }
  0xc8   : > { %v1495_v29 = vshll.u32 %v1341_v58, 16  ;;  %v7293_v12 = vpop.f32.mrf.mxu1  ;;  %v1317_v50 = vld [vmem:[#allocation2 + $0x4c] sm:$0xf]  ;;  %v1218_v57 = vsel %vm6644_vm2, %v978_v33, %v1217_v44  ;;  %v2393_v33 = vrot.slane %v2391_v11, 4  ;;  %v2874_v36 = vunpack.c.l.b16 %v2379_v21 }
  0xc9   : > { %3389 = vmatmul.bf16.gmra.mxu2 %v2962_v37  ;;  %v2899_v30 = vpack.c.b16 %v2873_v17, %v2872_v15  ;;  %v2383_v37 = vor.u32 %v2382_v28, %v7288_v26  ;;  %v2388_v53 = vrot.slane %v2386_v42, 5  ;;  %1219 = vst [vmem:[#allocation2 + $0x68] sm:$0x1] %v1218_v57  ;;  %v1503_v15 = vshll.u32 %v1316_v49, 16  ;;  %v6171_v28 = vld [vmem:[#allocation2 + $0x3c] sm:$0xff] }
  0xca   : > { %v1497_v40 = vrot.slane %v1495_v29, 5  ;;  %v2404_v17 = vshrl.u32 %v7324_v9, 16  ;;  %v1509_v22 = vshll.u32 %v1317_v50, 16  ;;  %v1513_v25 = vshrl.u32 %v1317_v50, 16  ;;  %v1342_v49 = vld [vmem:[#allocation2 + $0x50] sm:$0x1] }
  0xcb   : > { %v2384_v20 = vrot.slane %v2383_v37, 4  ;;  %v2716_v29 = vrot.slane %v2714_v60, 4  ;;  %v2402_v37 = vrot.slane %v2400_v63, 5  ;;  %v1502_v42 = vrot.slane %v1500_v6, 4  ;;  %v2190_v31 = vld [vmem:[#allocation2 + $0x6c] sm:$0xf] }
  0xcc   : > { %v1498_v61 = vsel %vm7046_vm11, %v1493_v24, %v1497_v40  ;;  %v2406_v38 = vrot.slane %v2404_v17, 4  ;;  %v1505_v24 = vrot.slane %v1503_v15, 5  ;;  %v7340_v40 = vrot.slane %v1509_v22, 5  ;;  %v2613_v22 = vld [vmem:[#allocation2 + $0x60] sm:$0xe] }
  0xcd   : > { %v7300_v39 = vpop.f32.mrf.mxu2  ;;  %v2389_v58 = vsel %vm7046_vm11, %v2384_v20, %v2388_v53  ;;  %v2009_v32 = vunpack.c.l.b16 %v1498_v61  ;;  %v1515_v44 = vrot.slane %v1513_v25, 4  ;;  %v7348_v20 = vpop.f32.mrf.mxu0  ;;  %v2721_v25 = vrot.slane %v7324_v9, 5 }
  0xce   : > { %v2875_v26 = vunpack.c.l.b16 %v2389_v58  ;;  %v2407_v8 = vor.u32 %v2406_v38, %v2402_v37  ;;  %v1506_v51 = vor.u32 %v1505_v24, %v1502_v42  ;;  %v2418_v38 = vshll.u32 %v2190_v31, 16 }
  0xcf   : > { %3622 = vmatmul.bf16.gmra.mxu3 %v6170_v62  ;;  %v6282_v62 = vld [vmem:[%s8235_s3 + $0x220] sm:$0xff]  ;;  %v2035_v50 = vpack.c.b16 %v2009_v32, %v2008_v7  ;;  %v1516_v60 = vor.u32 %v1515_v44, %v7340_v40  ;;  %v1527_v7 = vshll.u32 %v1318_v4, 16  ;;  %v5622_v24 = vrot.slane %v2613_v22, 9 }
  0xd0   : > { %5052 = vmatpush.bf16.msra.mxu0 %v6282_v62  ;;  %v2900_v53 = vpack.c.b16 %v2875_v26, %v2874_v36  ;;  %v1519_v62 = vshll.u32 %v1342_v49, 16  ;;  %v2408_v11 = vrot.slane %v2407_v8, 4  ;;  %v1507_v17 = vrot.slane %v1506_v51, 4  ;;  %v6172_v49 = vld [vmem:[#allocation2 + $0x48] sm:$0xff] }
  0xd1   : > { %v1517_v21 = vrot.slane %v1516_v60, 4  ;;  %v2415_v26 = vshrl.u32 %v2190_v31, 16 }
  0xd2   : > { %v1521_v58 = vrot.slane %v1519_v62, 5  ;;  %v1512_v9 = vsel %vm7046_vm11, %v1507_v17, %v7340_v40  ;;  %v1343_v40 = vld [vmem:[#allocation2 + $0x5c] sm:$0x1]  ;;  %v2420_v62 = vrot.slane %v2418_v38, 5  ;;  %v2722_v17 = vsel %vm7085_vm14, %v5622_v24, %v2721_v25 }
  0xd3   : > { %v2417_v60 = vrot.slane %v2415_v26, 4  ;;  %v2940_v26 = vunpack.c.l.b16 %v2722_v17 }
  0xd4   : > { %v7328_v2 = vpop.f32.mrf.mxu3 }
  0xd5   : > { %8258 = vst [vmem:[#allocation6_spill] sm:$0xff] %v7328_v2  ;;  %v7344_v48 = vpop.f32.mrf.mxu2 }
  0xd7   : > { %3305 = vmatmul.bf16.gmra.mxu1 %v2899_v30  ;;  %3711 = vmatmul.bf16.gmra.mxu0 %v2034_v34  ;;  %v2717_v30 = vrot.slane %v7296_v35, 5  ;;  %v2396_v34 = vrot.slane %v2394_v46, 5  ;;  %v1319_v46 = vld [vmem:[#allocation2 + $0x58] sm:$0xf] }
  0xd8   : > { %v7335_v18 = vpop.f32.mrf.mxu1  ;;  %v1537_v32 = vshrl.u32 %v1319_v46, 16 }
  0xd9   : > { %3394 = vmatmul.bf16.gmra.mxu2 %v2963_v47  ;;  %v7342_v47 = vld [vmem:[#allocation2 + $0x68] sm:$0x1]  ;;  %v2718_v35 = vsel %vm7085_vm14, %v2716_v29, %v2717_v30  ;;  %v2397_v56 = vor.u32 %v2396_v34, %v2393_v33  ;;  %v1533_v30 = vshll.u32 %v1319_v46, 16  ;;  %v7359_v33 = vld [vmem:[#allocation2 + $0x70] sm:$0xf] }
  0xda   : > { %v2410_v55 = vshll.u32 %v7342_v47, 16  ;;  %v2939_v57 = vunpack.c.l.b16 %v2718_v35  ;;  %v2424_v42 = vshll.u32 %v7359_v33, 16  ;;  %v2428_v44 = vshrl.u32 %v7359_v33, 16  ;;  %v7372_v35 = vpop.f32.mrf.mxu0 }
  0xdb   : > { %v2398_v61 = vrot.slane %v2397_v56, 4  ;;  %v2724_v56 = vrot.slane %v7342_v47, 5  ;;  %v1539_v51 = vrot.slane %v1537_v32, 4 }
  0xdc   : > { %v7352_v0 = vpop.f32.mrf.mxu3  ;;  %v2412_v15 = vrot.slane %v2410_v55, 5  ;;  %v2964_v63 = vpack.c.b16 %v2939_v57, %v2938_v54  ;;  %v1529_v54 = vrot.slane %v1527_v7, 5  ;;  %v7375_v57 = vrot.slane %v1533_v30, 5  ;;  %v1320_v7 = vld [vmem:[#allocation2 + $0x60] sm:$0xf] }
  0xdd   : > { %8259 = vst [vmem:[#allocation7_spill] sm:$0xff] %v7352_v0  ;;  %v2403_v29 = vsel %vm7046_vm11, %v2398_v61, %v2402_v37  ;;  %v1522_v37 = vsel %vm7046_vm11, %v1517_v21, %v1521_v58  ;;  %v7377_v61 = vrot.slane %v2424_v42, 5  ;;  %v2421_v30 = vor.u32 %v2420_v62, %v2417_v60  ;;  %v6273_v60 = vld [vmem:[%s8235_s3 + $0x1d8] sm:$0xff] }
  0xde   : > { %v2413_v36 = vsel %vm7046_vm11, %v2408_v11, %v2412_v15  ;;  %v2876_v8 = vunpack.c.l.b16 %v2403_v29  ;;  %v2010_v11 = vunpack.c.l.b16 %v1512_v9  ;;  %v2011_v15 = vunpack.c.l.b16 %v1522_v37  ;;  %4964 = vmatpush.bf16.msra.mxu3 %v6273_v60 }
  0xdf   : > { %3627 = vmatmul.bf16.gmra.mxu3 %v6171_v28  ;;  %v1524_v28 = vshrl.u32 %v1318_v4, 16  ;;  %v2877_v55 = vunpack.c.l.b16 %v2413_v36  ;;  %v2430_v4 = vrot.slane %v2428_v44, 4  ;;  %v1540_v22 = vor.u32 %v1539_v51, %v7375_v57  ;;  %v1321_v44 = vld [vmem:[#allocation2 + $0x64] sm:$0xf] }
  0xe0   : > { %v7354_v6 = vpop.f32.mrf.mxu1  ;;  %v2036_v36 = vpack.c.b16 %v2011_v15, %v2010_v11  ;;  %v1557_v11 = vshll.u32 %v1321_v44, 16  ;;  %v1561_v15 = vshrl.u32 %v1321_v44, 16 }
  0xe1   : > { %v2901_v29 = vpack.c.b16 %v2877_v55, %v2876_v8  ;;  %v2431_v32 = vor.u32 %v2430_v4, %v7377_v61  ;;  %v1541_v37 = vrot.slane %v1540_v22, 4  ;;  %v2614_v8 = vld [vmem:[#allocation2 + $0x6c] sm:$0xe]  ;;  %v2728_v55 = vrot.slane %v7359_v33, 5 }
  0xe5   : > { %v7361_v34 = vpop.f32.mrf.mxu2 }
  0xe7   : > { %3310 = vmatmul.bf16.gmra.mxu1 %v2900_v53  ;;  %3716 = vmatmul.bf16.gmra.mxu0 %v2035_v50  ;;  %v2723_v50 = vrot.slane %v2721_v25, 4  ;;  %v1526_v53 = vrot.slane %v1524_v28, 4  ;;  %v1543_v28 = vshll.u32 %v1343_v40, 16  ;;  %v1548_v25 = vshrl.u32 %v1320_v7, 16  ;;  %v6265_v40 = vld [vmem:[%s8235_s3 + $0x198] sm:$0xff] }
  0xe8   : > { %4875 = vmatpush.bf16.msra.mxu2 %v6265_v40  ;;  %v1344_v40 = vld [vmem:[#allocation2 + $0x68] sm:$0x1] }
  0xe9   : > { %3399 = vmatmul.bf16.gmra.mxu2 %v2964_v63  ;;  %v7381_v63 = vld [vmem:[#allocation2 + $0x74] sm:$0x1]  ;;  %v2725_v21 = vsel %vm7085_vm14, %v2723_v50, %v2724_v56  ;;  %v1530_v58 = vor.u32 %v1529_v54, %v1526_v53  ;;  %v1545_v24 = vrot.slane %v1543_v28, 5  ;;  %v7394_v50 = vpop.f32.mrf.mxu0  ;;  %v2422_v56 = vrot.slane %v2421_v30, 4  ;;  %v2192_v28 = vld [vmem:[#allocation2 + $0x78] sm:$0xf] }
  0xea   : > { %v2434_v31 = vshll.u32 %v7381_v63, 16  ;;  %v2941_v38 = vunpack.c.l.b16 %v2725_v21  ;;  %v2432_v53 = vrot.slane %v2431_v32, 4  ;;  %v1550_v4 = vrot.slane %v1548_v25, 4  ;;  %v6173_v25 = vld [vmem:[#allocation2 + $0x54] sm:$0xff] }
  0xeb   : > { %v7379_v46 = vpop.f32.mrf.mxu3  ;;  %v1531_v9 = vrot.slane %v1530_v58, 4  ;;  %v1546_v21 = vsel %vm7046_vm11, %v1541_v37, %v1545_v24  ;;  %v5623_v58 = vrot.slane %v2614_v8, 9  ;;  %v2730_v32 = vrot.slane %v2728_v55, 4  ;;  %v6201_v37 = vld [vmem:[%s8235_s3 + $0x98] sm:$0xff] }
  0xec   : > { %8260 = vst [vmem:[#allocation8_spill] sm:$0xff] %v7379_v46  ;;  %v2436_v54 = vrot.slane %v2434_v31, 5  ;;  %v2965_v51 = vpack.c.b16 %v2941_v38, %v2940_v26  ;;  %v2439_v31 = vshrl.u32 %v2192_v28, 16  ;;  %v2013_v24 = vunpack.c.l.b16 %v1546_v21  ;;  %3776 = vmatpush.bf16.msra.mxu1 %v6201_v37 }
  0xed   : > { %v7392_v42 = vpop.f32.mrf.mxu2  ;;  %v1536_v33 = vsel %vm7046_vm11, %v1531_v9, %v7375_v57  ;;  %v2731_v57 = vrot.slane %v7381_v63, 5  ;;  %v1559_v63 = vrot.slane %v1557_v11, 5  ;;  %v2729_v8 = vsel %vm7085_vm14, %v5623_v58, %v2728_v55 }
  0xee   : > { %v2437_v30 = vsel %vm7046_vm11, %v2432_v53, %v2436_v54  ;;  %v2012_v9 = vunpack.c.l.b16 %v1536_v33  ;;  %v2441_v60 = vrot.slane %v2439_v31, 4  ;;  %v2942_v58 = vunpack.c.l.b16 %v2729_v8 }
  0xef   : > { %3632 = vmatmul.bf16.gmra.mxu3 %v6172_v49  ;;  %v1551_v49 = vshll.u32 %v1320_v7, 16  ;;  %v7412_v7 = vld [vmem:[#allocation2 + $0x7c] sm:$0xf]  ;;  %v2879_v54 = vunpack.c.l.b16 %v2437_v30  ;;  %v1322_v30 = vld [vmem:[#allocation2 + $0x6c] sm:$0xf] }
  0xf0   : > { %v7383_v47 = vpop.f32.mrf.mxu1  ;;  %v2448_v26 = vshll.u32 %v7412_v7, 16  ;;  %v2452_v38 = vshrl.u32 %v7412_v7, 16  ;;  %v2735_v8 = vrot.slane %v7412_v7, 5 }
  0xf1   : > { %v1553_v22 = vrot.slane %v1551_v49, 5  ;;  %v1563_v49 = vrot.slane %v1561_v15, 4  ;;  %v7436_v15 = vld [vmem:[#allocation2 + $0x80] sm:$0x1] }
  0xf2   : > { %v2454_v21 = vrot.slane %v2452_v38, 4  ;;  %v1323_v38 = vld [vmem:[#allocation2 + $0x70] sm:$0xf] }
  0xf3   : > { %v7405_v17 = vpop.f32.mrf.mxu3  ;;  %v1554_v44 = vor.u32 %v1553_v22, %v1550_v4  ;;  %v7434_v4 = vpop.f32.mrf.mxu0  ;;  %v1564_v22 = vor.u32 %v1563_v49, %v1559_v63 }
  0xf4   : > { %8261 = vst [vmem:[#allocation9_spill] sm:$0xff] %v7405_v17 }
  0xf5   : > { %v1565_v41 = vrot.slane %v1564_v22, 4  ;;  %v2615_v22 = vld [vmem:[#allocation2 + $0x78] sm:$0xe] }
  0xf7   : > { %3315 = vmatmul.bf16.gmra.mxu1 %v2901_v29  ;;  %3721 = vmatmul.bf16.gmra.mxu0 %v2036_v36  ;;  %v2427_v29 = vsel %vm7046_vm11, %v2422_v56, %v7377_v61  ;;  %v2442_v36 = vshll.u32 %v2192_v28, 16  ;;  %v6281_v61 = vld [vmem:[%s8235_s3 + $0x218] sm:$0xff]  ;;  %v2450_v28 = vrot.slane %v2448_v26, 5  ;;  %v2458_v26 = vshll.u32 %v7436_v15, 16 }
  0xf8   : > { %v7403_v62 = vpop.f32.mrf.mxu1  ;;  %v2878_v53 = vunpack.c.l.b16 %v2427_v29  ;;  %5053 = vmatpush.bf16.msra.mxu0 %v6281_v61  ;;  %v1567_v29 = vshll.u32 %v1344_v40, 16  ;;  %v1572_v61 = vshrl.u32 %v1322_v30, 16 }
  0xf9   : > { %3404 = vmatmul.bf16.gmra.mxu2 %v2965_v51  ;;  %v2732_v51 = vsel %vm7085_vm14, %v2730_v32, %v2731_v57  ;;  %v2444_v33 = vrot.slane %v2442_v36, 5  ;;  %v1555_v32 = vrot.slane %v1554_v44, 4  ;;  %v2037_v57 = vpack.c.b16 %v2013_v24, %v2012_v9 }
  0xfa   : > { %v2902_v55 = vpack.c.b16 %v2879_v54, %v2878_v53  ;;  %v2943_v13 = vunpack.c.l.b16 %v2732_v51  ;;  %v2455_v36 = vor.u32 %v2454_v21, %v2450_v28  ;;  %v1569_v3 = vrot.slane %v1567_v29, 5  ;;  %v2194_v29 = vld [vmem:[#allocation2 + $0x84] sm:$0xf] }
  0xfb   : > { %v2445_v31 = vor.u32 %v2444_v33, %v2441_v60  ;;  %v1560_v53 = vsel %vm7046_vm11, %v1555_v32, %v1559_v63  ;;  %v2460_v44 = vrot.slane %v2458_v26, 5  ;;  %v1581_v54 = vshll.u32 %v1323_v38, 16 }
  0xfc   : > { %v7428_v56 = vpop.f32.mrf.mxu2  ;;  %v2966_v49 = vpack.c.b16 %v2943_v13, %v2942_v58  ;;  %v2456_v24 = vrot.slane %v2455_v36, 4  ;;  %v1574_v51 = vrot.slane %v1572_v61, 4  ;;  %v1585_v60 = vshrl.u32 %v1323_v38, 16  ;;  %v7448_v13 = vld [vmem:[#allocation2 + $0x88] sm:$0xf] }
  0xfd   : > { %v2446_v9 = vrot.slane %v2445_v31, 4  ;;  %v1570_v33 = vsel %vm7046_vm11, %v1565_v41, %v1569_v3  ;;  %v2014_v63 = vunpack.c.l.b16 %v1560_v53  ;;  %v2466_v58 = vshll.u32 %v2194_v29, 16  ;;  %v6174_v31 = vld [vmem:[#allocation2 + $0x60] sm:$0xff] }
  0xfe   : > { %v2472_v3 = vshll.u32 %v7448_v13, 16  ;;  %v2476_v41 = vshrl.u32 %v7448_v13, 16  ;;  %v2015_v36 = vunpack.c.l.b16 %v1570_v33  ;;  %v5624_v26 = vrot.slane %v2615_v22, 9 }
  0xff   : > { %3637 = vmatmul.bf16.gmra.mxu3 %v6173_v25  ;;  %v1575_v25 = vshll.u32 %v1322_v30, 16  ;;  %v7450_v30 = vpop.f32.mrf.mxu0  ;;  %v2451_v7 = vsel %vm7046_vm11, %v2446_v9, %v2450_v28  ;;  %v2737_v38 = vrot.slane %v2735_v8, 4  ;;  %v2738_v61 = vrot.slane %v7436_v15, 5 }
 0x100   : > { %v3281_v11 = vpop.f32.mrf.mxu1  ;;  %v2880_v9 = vunpack.c.l.b16 %v2451_v7  ;;  %v7464_v0 = vrot.slane %v2472_v3, 5  ;;  %v2478_v33 = vrot.slane %v2476_v41, 4  ;;  %v2736_v15 = vsel %vm7085_vm14, %v5624_v26, %v2735_v8 }
 0x101   : > { %v1577_v40 = vrot.slane %v1575_v25, 5  ;;  %v3282_v25 = vadd.f32 %v3281_v11, %v7252_v27  ;;  %v2739_v27 = vsel %vm7085_vm14, %v2737_v38, %v2738_v61  ;;  %v7470_v11 = vld [vmem:[#allocation2 + $0x8c] sm:$0x1]  ;;  %v2038_v22 = vpack.c.b16 %v2015_v36, %v2014_v63 }
 0x102   : > { %v7438_v37 = vpop.f32.mrf.mxu3  ;;  %v2944_v41 = vunpack.c.l.b16 %v2736_v15  ;;  %v2479_v8 = vor.u32 %v2478_v33, %v7464_v0  ;;  %v2482_v26 = vshll.u32 %v7470_v11, 16 }
 0x103   : > { %8262 = vst [vmem:[#allocation10_spill] sm:$0xff] %v7438_v37  ;;  %v1578_v53 = vor.u32 %v1577_v40, %v1574_v51  ;;  %v2468_v37 = vrot.slane %v2466_v58, 5  ;;  %v1324_v40 = vld [vmem:[#allocation2 + $0x78] sm:$0xf] }
 0x104   : > { %v7441_v17 = vpop.f32.mrf.mxu2 }
 0x105   : > { %v1579_v58 = vrot.slane %v1578_v53, 4  ;;  %v2616_v53 = vld [vmem:[#allocation2 + $0x84] sm:$0xe] }
 0x107   : > { %3320 = vmatmul.bf16.gmra.mxu1 %v2902_v55  ;;  %3726 = vmatmul.bf16.gmra.mxu0 %v2037_v57  ;;  %v2463_v55 = vshrl.u32 %v2194_v29, 16  ;;  %v2461_v57 = vsel %vm7046_vm11, %v2456_v24, %v2460_v44  ;;  %v1587_v29 = vrot.slane %v1585_v60, 4  ;;  %v1345_v24 = vld [vmem:[#allocation2 + $0x74] sm:$0x1]  ;;  %v1325_v60 = vld [vmem:[#allocation2 + $0x7c] sm:$0xf] }
 0x108   : > { %v3283_v21 = vpop.f32.mrf.mxu1  ;;  %v1591_v51 = vshll.u32 %v1345_v24, 16 }
 0x109   : > { %3409 = vmatmul.bf16.gmra.mxu2 %v2966_v49  ;;  %v7462_v49 = vrot.slane %v1581_v54, 5  ;;  %v2465_v44 = vrot.slane %v2463_v55, 4  ;;  %v3284_v24 = vadd.f32 %v3283_v21, %v7282_v14  ;;  %v6264_v14 = vld [vmem:[%s8235_s3 + $0x190] sm:$0xff] }
 0x10a   : > { %v7452_v32 = vpop.f32.mrf.mxu3  ;;  %v1593_v63 = vrot.slane %v1591_v51, 5  ;;  %v6272_v21 = vld [vmem:[%s8235_s3 + $0x1d0] sm:$0xff]  ;;  %4876 = vmatpush.bf16.msra.mxu2 %v6264_v14 }
 0x10b   : > { %8263 = vst [vmem:[#allocation11_spill] sm:$0xff] %v7452_v32  ;;  %v2881_v32 = vunpack.c.l.b16 %v2461_v57  ;;  %v1588_v54 = vor.u32 %v1587_v29, %v7462_v49  ;;  %v2469_v7 = vor.u32 %v2468_v37, %v2465_v44  ;;  %v1605_v29 = vshll.u32 %v1325_v60, 16  ;;  %4965 = vmatpush.bf16.msra.mxu3 %v6272_v21 }
 0x10c   : > { %v3370_v28 = vpop.f32.mrf.mxu2 }
 0x10d   : > { %v3371_v46 = vadd.f32 %v3370_v28, %v3282_v25  ;;  %v2903_v55 = vpack.c.b16 %v2881_v32, %v2880_v9  ;;  %v1596_v25 = vshrl.u32 %v1324_v40, 16  ;;  %v1599_v28 = vshll.u32 %v1324_v40, 16 }
 0x10e   : > { %v1589_v2 = vrot.slane %v1588_v54, 4  ;;  %v1609_v32 = vshrl.u32 %v1325_v60, 16  ;;  %v2470_v37 = vrot.slane %v2469_v7, 4  ;;  %v2742_v9 = vrot.slane %v7448_v13, 5  ;;  %v2196_v7 = vld [vmem:[#allocation2 + $0x90] sm:$0xf] }
 0x10f   : > { %3642 = vmatmul.bf16.gmra.mxu3 %v6174_v31  ;;  %v2945_v31 = vunpack.c.l.b16 %v2739_v27  ;;  %v2484_v27 = vrot.slane %v2482_v26, 5  ;;  %v1598_v54 = vrot.slane %v1596_v25, 4  ;;  %v1601_v51 = vrot.slane %v1599_v28, 5  ;;  %v1346_v26 = vld [vmem:[#allocation2 + $0x80] sm:$0x1] }
 0x110   : > { %v7485_v40 = vrot.slane %v1605_v29, 5  ;;  %v1584_v13 = vsel %vm7046_vm11, %v1579_v58, %v7462_v49  ;;  %v1594_v60 = vsel %vm7046_vm11, %v1589_v2, %v1593_v63  ;;  %v6175_v63 = vld [vmem:[#allocation2 + $0x6c] sm:$0xff] }
 0x111   : > { %v2967_v15 = vpack.c.b16 %v2945_v31, %v2944_v41  ;;  %v2475_v41 = vsel %vm7046_vm11, %v2470_v37, %v7464_v0  ;;  %v2744_v31 = vrot.slane %v2742_v9, 4  ;;  %v2016_v0 = vunpack.c.l.b16 %v1584_v13  ;;  %v6280_v37 = vld [vmem:[%s8235_s3 + $0x210] sm:$0xff] }
 0x112   : > { %v3603_v57 = vpop.f32.mrf.mxu3  ;;  %v2882_v14 = vunpack.c.l.b16 %v2475_v41  ;;  %5054 = vmatpush.bf16.msra.mxu0 %v6280_v37 }
 0x113   : > { %v3604_v61 = vadd.f32 %v3603_v57, %v3371_v46  ;;  %v2480_v46 = vrot.slane %v2479_v8, 4  ;;  %v7492_v57 = vld [vmem:[#allocation2 + $0x94] sm:$0xf]  ;;  %v2745_v8 = vrot.slane %v7470_v11, 5 }
 0x114   : > { %v3286_v3 = vpop.f32.mrf.mxu1  ;;  %v3692_v38 = vpop.f32.mrf.mxu0  ;;  %v2496_v25 = vshll.u32 %v7492_v57, 16  ;;  %v2500_v28 = vshrl.u32 %v7492_v57, 16  ;;  %v6200_v11 = vld [vmem:[%s8235_s3 + $0x90] sm:$0xff] }
 0x115   : > { %v3372_v36 = vpop.f32.mrf.mxu2  ;;  %v7477_v44 = vadd.f32 %v3692_v38, %v3604_v61  ;;  %v2487_v38 = vshrl.u32 %v2196_v7, 16  ;;  %v2485_v2 = vsel %vm7046_vm11, %v2480_v46, %v2484_v27  ;;  %v2490_v61 = vshll.u32 %v2196_v7, 16  ;;  %3777 = vmatpush.bf16.msra.mxu1 %v6200_v11 }
 0x116   : > { %v3373_v33 = vadd.f32 %v3372_v36, %v3284_v24  ;;  %v1602_v36 = vor.u32 %v1601_v51, %v1598_v54  ;;  %v2883_v21 = vunpack.c.l.b16 %v2485_v2  ;;  %v2746_v54 = vsel %vm7085_vm14, %v2744_v31, %v2745_v8 }
 0x117   : > { %3325 = vmatmul.bf16.gmra.mxu1 %v2903_v55  ;;  %8264 = vst [vmem:[#allocation12_spill] sm:$0xff] %v7477_v44  ;;  %3731 = vmatmul.bf16.gmra.mxu0 %v2038_v22  ;;  %v5625_v22 = vrot.slane %v2616_v53, 9  ;;  %v1611_v55 = vrot.slane %v1609_v32, 4  ;;  %v2017_v32 = vunpack.c.l.b16 %v1594_v60  ;;  %v3287_v53 = vadd.f32 %v3286_v3, %v7313_v59  ;;  %v7516_v3 = vld [vmem:[#allocation2 + $0x98] sm:$0x1] }
 0x118   : > { %v2489_v51 = vrot.slane %v2487_v38, 4  ;;  %v2492_v60 = vrot.slane %v2490_v61, 5  ;;  %v7514_v7 = vrot.slane %v2496_v25, 5  ;;  %v2502_v59 = vrot.slane %v2500_v28, 4 }
 0x119   : > { %3414 = vmatmul.bf16.gmra.mxu2 %v2967_v15  ;;  %v2743_v15 = vsel %vm7085_vm14, %v5625_v22, %v2742_v9  ;;  %v1612_v46 = vor.u32 %v1611_v55, %v7485_v40  ;;  %v2947_v22 = vunpack.c.l.b16 %v2746_v54  ;;  %v1603_v55 = vrot.slane %v1602_v36, 4  ;;  %v1327_v36 = vld [vmem:[#allocation2 + $0x88] sm:$0xf] }
 0x11a   : > { %v3605_v49 = vpop.f32.mrf.mxu3  ;;  %v2946_v9 = vunpack.c.l.b16 %v2743_v15  ;;  %v2904_v41 = vpack.c.b16 %v2883_v21, %v2882_v14  ;;  %v2039_v31 = vpack.c.b16 %v2017_v32, %v2016_v0  ;;  %v2493_v11 = vor.u32 %v2492_v60, %v2489_v51 }
 0x11b   : > { %v3606_v24 = vadd.f32 %v3605_v49, %v3373_v33  ;;  %v1615_v33 = vshll.u32 %v1346_v26, 16  ;;  %v1326_v26 = vld [vmem:[#allocation2 + $0x84] sm:$0xf]  ;;  %v1613_v49 = vrot.slane %v1612_v46, 4  ;;  %v2503_v61 = vor.u32 %v2502_v59, %v7514_v7  ;;  %v2198_v59 = vld [vmem:[#allocation2 + $0x9c] sm:$0xf] }
 0x11c   : > { %v3288_v58 = vpop.f32.mrf.mxu1  ;;  %v3694_v29 = vpop.f32.mrf.mxu0  ;;  %v2506_v25 = vshll.u32 %v7516_v3, 16  ;;  %v1620_v37 = vshrl.u32 %v1326_v26, 16  ;;  %v1623_v15 = vshll.u32 %v1326_v26, 16  ;;  %v2968_v46 = vpack.c.b16 %v2947_v22, %v2946_v9  ;;  %v7531_v9 = vld [vmem:[#allocation2 + $0xa0] sm:$0xf] }
 0x11d   : > { %v3375_v27 = vpop.f32.mrf.mxu2  ;;  %v1617_v2 = vrot.slane %v1615_v33, 5  ;;  %v7518_v44 = vadd.f32 %v3694_v29, %v3606_v24  ;;  %v1608_v29 = vsel %vm7046_vm11, %v1603_v55, %v7485_v40  ;;  %v2494_v33 = vrot.slane %v2493_v11, 4 }
 0x11e   : > { %v3376_v13 = vadd.f32 %v3375_v27, %v3287_v53  ;;  %v3289_v53 = vadd.f32 %v3288_v58, %v7348_v20  ;;  %v2504_v14 = vrot.slane %v2503_v61, 4  ;;  %v2508_v21 = vrot.slane %v2506_v25, 5  ;;  %v2617_v20 = vld [vmem:[#allocation2 + $0x90] sm:$0xe]  ;;  %v6176_v25 = vld [vmem:[#allocation2 + $0x78] sm:$0xff] }
 0x11f   : > { %3647 = vmatmul.bf16.gmra.mxu3 %v6175_v63  ;;  %v1618_v24 = vsel %vm7046_vm11, %v1613_v49, %v1617_v2  ;;  %v2749_v58 = vrot.slane %v7492_v57, 5  ;;  %v1622_v54 = vrot.slane %v1620_v37, 4  ;;  %v1629_v51 = vshll.u32 %v1327_v36, 16 }
 0x120   : > { %v1633_v60 = vshrl.u32 %v1327_v36, 16  ;;  %v7533_v40 = vunpack.c.l.b16 %v1608_v29  ;;  %v2019_v22 = vunpack.c.l.b16 %v1618_v24  ;;  %v2511_v55 = vshrl.u32 %v2198_v59, 16  ;;  %v1347_v24 = vld [vmem:[#allocation2 + $0x8c] sm:$0x1] }
 0x121   : > { %v2514_v26 = vshll.u32 %v2198_v59, 16  ;;  %v2499_v2 = vsel %vm7046_vm11, %v2494_v33, %v7514_v7  ;;  %v2509_v57 = vsel %vm7046_vm11, %v2504_v14, %v2508_v21  ;;  %v2752_v37 = vrot.slane %v7516_v3, 5  ;;  %v7550_v3 = vld [vmem:[#allocation2 + $0xa4] sm:$0x1] }
 0x122   : > { %v3608_v8 = vpop.f32.mrf.mxu3  ;;  %v2885_v29 = vunpack.c.l.b16 %v2509_v57  ;;  %v2513_v33 = vrot.slane %v2511_v55, 4 }
 0x123   : > { %v3609_v63 = vadd.f32 %v3608_v8, %v3376_v13  ;;  %v1625_v13 = vrot.slane %v1623_v15, 5  ;;  %v2524_v8 = vshrl.u32 %v7531_v9, 16  ;;  %v1631_v15 = vrot.slane %v1629_v51, 5 }
 0x124   : > { %v3291_v38 = vpop.f32.mrf.mxu1  ;;  %v3697_v28 = vpop.f32.mrf.mxu0  ;;  %v2516_v14 = vrot.slane %v2514_v26, 5  ;;  %v1639_v51 = vshll.u32 %v1347_v24, 16  ;;  %v2756_v24 = vrot.slane %v7531_v9, 5 }
 0x125   : > { %v3377_v27 = vpop.f32.mrf.mxu2  ;;  %v7528_v0 = vadd.f32 %v3697_v28, %v3609_v63  ;;  %v5626_v28 = vrot.slane %v2617_v20, 9  ;;  %v2751_v63 = vrot.slane %v2749_v58, 4  ;;  %v1626_v36 = vor.u32 %v1625_v13, %v1622_v54  ;;  %v1328_v13 = vld [vmem:[#allocation2 + $0x90] sm:$0xf] }
 0x126   : > { %v3378_v32 = vadd.f32 %v3377_v27, %v3289_v53  ;;  %v3292_v53 = vadd.f32 %v3291_v38, %v7372_v35  ;;  %v1635_v27 = vrot.slane %v1633_v60, 4  ;;  %v2040_v60 = vpack.c.b16 %v2019_v22, %v7533_v40 }
 0x127   : > { %3330 = vmatmul.bf16.gmra.mxu1 %v2904_v41  ;;  %3736 = vmatmul.bf16.gmra.mxu0 %v2039_v31  ;;  %v2520_v31 = vshll.u32 %v7531_v9, 16  ;;  %v2750_v20 = vsel %vm7085_vm14, %v5626_v28, %v2749_v58  ;;  %v2753_v35 = vsel %vm7085_vm14, %v2751_v63, %v2752_v37  ;;  %v1627_v38 = vrot.slane %v1626_v36, 4 }
 0x128   : > { %v1636_v54 = vor.u32 %v1635_v27, %v1631_v15  ;;  %v2517_v26 = vor.u32 %v2516_v14, %v2513_v33  ;;  %v2948_v57 = vunpack.c.l.b16 %v2750_v20  ;;  %v2530_v58 = vshll.u32 %v7550_v3, 16  ;;  %v1329_v27 = vld [vmem:[#allocation2 + $0x94] sm:$0xf]  ;;  %v6271_v20 = vld [vmem:[%s8235_s3 + $0x1c8] sm:$0xff] }
 0x129   : > { %3419 = vmatmul.bf16.gmra.mxu2 %v2968_v46  ;;  %v2884_v46 = vunpack.c.l.b16 %v2499_v2  ;;  %v7544_v59 = vrot.slane %v2520_v31, 5  ;;  %v2949_v31 = vunpack.c.l.b16 %v2753_v35  ;;  %v1644_v63 = vshrl.u32 %v1328_v13, 16  ;;  %4966 = vmatpush.bf16.msra.mxu3 %v6271_v20 }
 0x12a   : > { %v3610_v41 = vpop.f32.mrf.mxu3  ;;  %v1647_v37 = vshll.u32 %v1328_v13, 16  ;;  %v1632_v36 = vsel %vm7046_vm11, %v1627_v38, %v1631_v15  ;;  %v1637_v40 = vrot.slane %v1636_v54, 4  ;;  %v1641_v22 = vrot.slane %v1639_v51, 5  ;;  %v6263_v15 = vld [vmem:[%s8235_s3 + $0x188] sm:$0xff] }
 0x12b   : > { %v3611_v61 = vadd.f32 %v3610_v41, %v3378_v32  ;;  %v2526_v32 = vrot.slane %v2524_v8, 4  ;;  %v2905_v55 = vpack.c.b16 %v2885_v29, %v2884_v46  ;;  %v2518_v46 = vrot.slane %v2517_v26, 4  ;;  %v2618_v29 = vld [vmem:[#allocation2 + $0x9c] sm:$0xe]  ;;  %4877 = vmatpush.bf16.msra.mxu2 %v6263_v15  ;;  %v2200_v13 = vld [vmem:[#allocation2 + $0xa8] sm:$0xf] }
 0x12c   : > { %v3293_v49 = vpop.f32.mrf.mxu1  ;;  %v3699_v11 = vpop.f32.mrf.mxu0  ;;  %v1646_v35 = vrot.slane %v1644_v63, 4  ;;  %v1649_v38 = vrot.slane %v1647_v37, 5  ;;  %v1653_v9 = vshll.u32 %v1329_v27, 16  ;;  %v5627_v54 = vrot.slane %v2618_v29, 9  ;;  %v1348_v15 = vld [vmem:[#allocation2 + $0x98] sm:$0x1] }
 0x12d   : > { %v3380_v7 = vpop.f32.mrf.mxu2  ;;  %v2527_v8 = vor.u32 %v2526_v32, %v7544_v59  ;;  %v7559_v33 = vadd.f32 %v3699_v11, %v3611_v61  ;;  %v2969_v32 = vpack.c.b16 %v2949_v31, %v2948_v57  ;;  %v1642_v11 = vsel %vm7046_vm11, %v1637_v40, %v1641_v22 }
 0x12e   : > { %v3381_v21 = vadd.f32 %v3380_v7, %v3292_v53  ;;  %v3294_v53 = vadd.f32 %v3293_v49, %v7394_v50  ;;  %v2532_v49 = vrot.slane %v2530_v58, 5  ;;  %v7571_v61 = vunpack.c.l.b16 %v1632_v36  ;;  %v6177_v36 = vld [vmem:[#allocation2 + $0x84] sm:$0xff] }
 0x12f   : > { %3652 = vmatmul.bf16.gmra.mxu3 %v6176_v25  ;;  %v2528_v50 = vrot.slane %v2527_v8, 4  ;;  %v1657_v51 = vshrl.u32 %v1329_v27, 16  ;;  %v2758_v26 = vrot.slane %v2756_v24, 4  ;;  %v2535_v57 = vshrl.u32 %v2200_v13, 16  ;;  %v6279_v27 = vld [vmem:[%s8235_s3 + $0x208] sm:$0xff] }
 0x130   : > { %v2021_v40 = vunpack.c.l.b16 %v1642_v11  ;;  %v1650_v22 = vor.u32 %v1649_v38, %v1646_v35  ;;  %v1655_v29 = vrot.slane %v1653_v9, 5  ;;  %5055 = vmatpush.bf16.msra.mxu0 %v6279_v27  ;;  %v1663_v9 = vshll.u32 %v1348_v15, 16 }
 0x131   : > { %v2533_v58 = vsel %vm7046_vm11, %v2528_v50, %v2532_v49  ;;  %v2537_v20 = vrot.slane %v2535_v57, 4 }
 0x132   : > { %v3613_v41 = vpop.f32.mrf.mxu3  ;;  %v2887_v49 = vunpack.c.l.b16 %v2533_v58 }
 0x133   : > { %v3614_v28 = vadd.f32 %v3613_v41, %v3381_v21  ;;  %v2759_v41 = vrot.slane %v7550_v3, 5  ;;  %v6199_v3 = vld [vmem:[%s8235_s3 + $0x88] sm:$0xff] }
 0x134   : > { %v3296_v2 = vpop.f32.mrf.mxu1  ;;  %v3702_v25 = vpop.f32.mrf.mxu0  ;;  %3778 = vmatpush.bf16.msra.mxu1 %v6199_v3 }
 0x135   : > { %v3382_v7 = vpop.f32.mrf.mxu2  ;;  %v7561_v14 = vadd.f32 %v3702_v25, %v3614_v28  ;;  %v2538_v25 = vshll.u32 %v2200_v13, 16 }
 0x136   : > { %v3383_v21 = vadd.f32 %v3382_v7, %v3294_v53  ;;  %v3297_v7 = vadd.f32 %v3296_v2, %v7434_v4  ;;  %v7597_v2 = vld [vmem:[#allocation2 + $0xb0] sm:$0x1] }
 0x137   : > { %3335 = vmatmul.bf16.gmra.mxu1 %v2905_v55  ;;  %3741 = vmatmul.bf16.gmra.mxu0 %v2040_v60  ;;  %v7573_v60 = vld [vmem:[#allocation2 + $0xac] sm:$0xf]  ;;  %v2523_v55 = vsel %vm7046_vm11, %v2518_v46, %v7544_v59  ;;  %v2757_v46 = vsel %vm7085_vm14, %v5627_v54, %v2756_v24  ;;  %v2540_v38 = vrot.slane %v2538_v25, 5  ;;  %v1330_v54 = vld [vmem:[#allocation2 + $0x9c] sm:$0xf]  ;;  %v2554_v25 = vshll.u32 %v7597_v2, 16 }
 0x138   : > { %v2544_v28 = vshll.u32 %v7573_v60, 16  ;;  %v2548_v63 = vshrl.u32 %v7573_v60, 16  ;;  %v2886_v50 = vunpack.c.l.b16 %v2523_v55  ;;  %v2950_v13 = vunpack.c.l.b16 %v2757_v46 }
 0x139   : > { %3424 = vmatmul.bf16.gmra.mxu2 %v2969_v32  ;;  %v2541_v57 = vor.u32 %v2540_v38, %v2537_v20  ;;  %v1671_v3 = vshll.u32 %v1330_v54, 16  ;;  %v2556_v15 = vrot.slane %v2554_v25, 5  ;;  %v2619_v20 = vld [vmem:[#allocation2 + $0xa8] sm:$0xe] }
 0x13a   : > { %v3615_v31 = vpop.f32.mrf.mxu3  ;;  %v7595_v11 = vrot.slane %v2544_v28, 5  ;;  %v2550_v4 = vrot.slane %v2548_v63, 4 }
 0x13b   : > { %v3616_v53 = vadd.f32 %v3615_v31, %v3383_v21  ;;  %v1659_v21 = vrot.slane %v1657_v51, 4  ;;  %v2906_v51 = vpack.c.b16 %v2887_v49, %v2886_v50  ;;  %v1651_v31 = vrot.slane %v1650_v22, 4 }
 0x13c   : > { %v3298_v8 = vpop.f32.mrf.mxu1  ;;  %v3704_v37 = vpop.f32.mrf.mxu0  ;;  %v2551_v58 = vor.u32 %v2550_v4, %v7595_v11  ;;  %v2542_v49 = vrot.slane %v2541_v57, 4  ;;  %v1673_v4 = vrot.slane %v1671_v3, 5  ;;  %v2766_v3 = vrot.slane %v7597_v2, 5 }
 0x13d   : > { %v3299_v59 = vadd.f32 %v3298_v8, %v7450_v30  ;;  %v3385_v32 = vpop.f32.mrf.mxu2  ;;  %v2760_v30 = vsel %vm7085_vm14, %v2758_v26, %v2759_v41  ;;  %v1660_v24 = vor.u32 %v1659_v21, %v1655_v29  ;;  %v2041_v26 = vpack.c.b16 %v2021_v40, %v7571_v61  ;;  %v1331_v61 = vld [vmem:[#allocation2 + $0xa0] sm:$0xf] }
 0x13e   : > { %v3386_v35 = vadd.f32 %v3385_v32, %v3297_v7  ;;  %v2951_v55 = vunpack.c.l.b16 %v2760_v30  ;;  %v1665_v7 = vrot.slane %v1663_v9, 5  ;;  %v1656_v22 = vsel %vm7046_vm11, %v1651_v31, %v1655_v29 }
 0x13f   : > { %3657 = vmatmul.bf16.gmra.mxu3 %v6177_v36  ;;  %v1668_v36 = vshrl.u32 %v1330_v54, 16  ;;  %v1661_v27 = vrot.slane %v1660_v24, 4  ;;  %v7604_v40 = vadd.f32 %v3704_v37, %v3616_v53  ;;  %v2552_v30 = vrot.slane %v2551_v58, 4  ;;  %v2202_v54 = vld [vmem:[#allocation2 + $0xb4] sm:$0xf] }
 0x140   : > { %v2970_v46 = vpack.c.b16 %v2951_v55, %v2950_v13  ;;  %v1677_v9 = vshll.u32 %v1331_v61, 16  ;;  %v1681_v29 = vshrl.u32 %v1331_v61, 16  ;;  %v7611_v37 = vld [vmem:[#allocation2 + $0xb8] sm:$0xf]  ;;  %v2022_v53 = vunpack.c.l.b16 %v1656_v22 }
 0x141   : > { %v1670_v38 = vrot.slane %v1668_v36, 4  ;;  %v1666_v24 = vsel %vm7046_vm11, %v1661_v27, %v1665_v7  ;;  %v2559_v13 = vshrl.u32 %v2202_v54, 16  ;;  %v2572_v57 = vshrl.u32 %v7611_v37, 16  ;;  %v1349_v7 = vld [vmem:[#allocation2 + $0xa4] sm:$0x1] }
 0x142   : > { %v3618_v41 = vpop.f32.mrf.mxu3  ;;  %v1687_v2 = vshll.u32 %v1349_v7, 16 }
 0x143   : > { %v3619_v63 = vadd.f32 %v3618_v41, %v3386_v35  ;;  %v2763_v35 = vrot.slane %v7573_v60, 5  ;;  %v2547_v60 = vsel %vm7046_vm11, %v2542_v49, %v7595_v11  ;;  %v2568_v41 = vshll.u32 %v7611_v37, 16 }
 0x144   : > { %v3301_v8 = vpop.f32.mrf.mxu1  ;;  %v3707_v28 = vpop.f32.mrf.mxu0  ;;  %v1683_v11 = vrot.slane %v1681_v29, 4  ;;  %v2888_v61 = vunpack.c.l.b16 %v2547_v60 }
 0x145   : > { %v3387_v21 = vpop.f32.mrf.mxu2  ;;  %v7606_v32 = vadd.f32 %v3707_v28, %v3619_v63  ;;  %v6178_v28 = vld [vmem:[#allocation2 + $0x90] sm:$0xff]  ;;  %v2023_v63 = vunpack.c.l.b16 %v1666_v24  ;;  %v2765_v36 = vrot.slane %v2763_v35, 4  ;;  %v3302_v27 = vadd.f32 %v3301_v8, %v7205_v10  ;;  %v7630_v8 = vld [vmem:[#allocation2 + $0xbc] sm:$0x1] }
 0x146   : > { %v3388_v50 = vadd.f32 %v3387_v21, %v3299_v59  ;;  %v2562_v59 = vshll.u32 %v2202_v54, 16  ;;  %v1674_v21 = vor.u32 %v1673_v4, %v1670_v38  ;;  %v7626_v24 = vrot.slane %v2568_v41, 5  ;;  %v1332_v4 = vld [vmem:[#allocation2 + $0xa8] sm:$0xf] }
 0x147   : > { %3340 = vmatmul.bf16.gmra.mxu1 %v2906_v51  ;;  %3746 = vmatmul.bf16.gmra.mxu0 %v2041_v26  ;;  %v5628_v51 = vrot.slane %v2619_v20, 9  ;;  %v2557_v26 = vsel %vm7046_vm11, %v2552_v30, %v2556_v15  ;;  %v2561_v30 = vrot.slane %v2559_v13, 4  ;;  %v2574_v54 = vrot.slane %v2572_v57, 4 }
 0x148   : > { %v2889_v49 = vunpack.c.l.b16 %v2557_v26  ;;  %v2564_v15 = vrot.slane %v2562_v59, 5  ;;  %v2767_v10 = vsel %vm7085_vm14, %v2765_v36, %v2766_v3  ;;  %v2578_v41 = vshll.u32 %v7630_v8, 16 }
 0x149   : > { %3429 = vmatmul.bf16.gmra.mxu2 %v2970_v46  ;;  %v7622_v46 = vrot.slane %v1677_v9, 5  ;;  %v2042_v9 = vpack.c.b16 %v2023_v63, %v2022_v53  ;;  %v2575_v26 = vor.u32 %v2574_v54, %v7626_v24  ;;  %v1689_v36 = vrot.slane %v1687_v2, 5  ;;  %v2620_v53 = vld [vmem:[#allocation2 + $0xb4] sm:$0xe] }
 0x14a   : > { %v3620_v55 = vpop.f32.mrf.mxu3  ;;  %v2907_v29 = vpack.c.b16 %v2889_v49, %v2888_v61  ;;  %v2565_v59 = vor.u32 %v2564_v15, %v2561_v30  ;;  %v1692_v3 = vshrl.u32 %v1332_v4, 16  ;;  %v2770_v63 = vrot.slane %v7611_v37, 5  ;;  %v6270_v37 = vld [vmem:[%s8235_s3 + $0x1c0] sm:$0xff] }
 0x14b   : > { %v3621_v25 = vadd.f32 %v3620_v55, %v3388_v50  ;;  %v2764_v50 = vsel %vm7085_vm14, %v5628_v51, %v2763_v35  ;;  %v1684_v38 = vor.u32 %v1683_v11, %v7622_v46  ;;  %v2953_v35 = vunpack.c.l.b16 %v2767_v10  ;;  %4967 = vmatpush.bf16.msra.mxu3 %v6270_v37 }
 0x14c   : > { %v3303_v31 = vpop.f32.mrf.mxu1  ;;  %v3709_v58 = vpop.f32.mrf.mxu0  ;;  %v2952_v13 = vunpack.c.l.b16 %v2764_v50  ;;  %v1675_v51 = vrot.slane %v1674_v21, 4  ;;  %v2566_v49 = vrot.slane %v2565_v59, 4  ;;  %v2576_v50 = vrot.slane %v2575_v26, 4 }
 0x14d   : > { %v3390_v22 = vpop.f32.mrf.mxu2  ;;  %v3304_v7 = vadd.f32 %v3303_v31, %v7238_v45  ;;  %v1685_v11 = vrot.slane %v1684_v38, 4  ;;  %v7637_v21 = vadd.f32 %v3709_v58, %v3621_v25  ;;  %v2580_v54 = vrot.slane %v2578_v41, 5  ;;  %v6262_v45 = vld [vmem:[%s8235_s3 + $0x180] sm:$0xff] }
 0x14e   : > { %v3391_v20 = vadd.f32 %v3390_v22, %v3302_v27  ;;  %v1695_v27 = vshll.u32 %v1332_v4, 16  ;;  %v1333_v22 = vld [vmem:[#allocation2 + $0xac] sm:$0xf]  ;;  %v5629_v31 = vrot.slane %v2620_v53, 9  ;;  %v1694_v10 = vrot.slane %v1692_v3, 4  ;;  %4878 = vmatpush.bf16.msra.mxu2 %v6262_v45  ;;  %v6179_v3 = vld [vmem:[#allocation2 + $0x9c] sm:$0xff] }
 0x14f   : > { %3662 = vmatmul.bf16.gmra.mxu3 %v6178_v28  ;;  %v1701_v58 = vshll.u32 %v1333_v22, 16  ;;  %v1680_v25 = vsel %vm7046_vm11, %v1675_v51, %v7622_v46  ;;  %v1690_v38 = vsel %vm7046_vm11, %v1685_v11, %v1689_v36  ;;  %v2772_v4 = vrot.slane %v2770_v63, 4  ;;  %v6278_v53 = vld [vmem:[%s8235_s3 + $0x200] sm:$0xff]  ;;  %v1350_v45 = vld [vmem:[#allocation2 + $0xb0] sm:$0x1] }
 0x150   : > { %v1697_v2 = vrot.slane %v1695_v27, 5  ;;  %v2571_v59 = vsel %vm7046_vm11, %v2566_v49, %v7626_v24  ;;  %v2581_v51 = vsel %vm7046_vm11, %v2576_v50, %v2580_v54  ;;  %v2024_v27 = vunpack.c.l.b16 %v1680_v25  ;;  %v6198_v24 = vld [vmem:[%s8235_s3 + $0x80] sm:$0xff]  ;;  %5056 = vmatpush.bf16.msra.mxu0 %v6278_v53 }
 0x151   : > { %v2890_v50 = vunpack.c.l.b16 %v2571_v59  ;;  %v2891_v54 = vunpack.c.l.b16 %v2581_v51  ;;  %3779 = vmatpush.bf16.msra.mxu1 %v6198_v24 }
 0x152   : > { %v3623_v55 = vpop.f32.mrf.mxu3  ;;  %v1698_v11 = vor.u32 %v1697_v2, %v1694_v10 }
 0x153   : > { %v3624_v28 = vadd.f32 %v3623_v55, %v3391_v20  ;;  %v2971_v20 = vpack.c.b16 %v2953_v35, %v2952_v13  ;;  %v7653_v13 = vld [vmem:[#allocation2 + $0xc4] sm:$0xf]  ;;  %v1705_v55 = vshrl.u32 %v1333_v22, 16 }
 0x154   : > { %v3306_v60 = vpop.f32.mrf.mxu1  ;;  %v3712_v57 = vpop.f32.mrf.mxu0 }
 0x155   : > { %v3392_v61 = vpop.f32.mrf.mxu2  ;;  %v7639_v30 = vadd.f32 %v3712_v57, %v3624_v28  ;;  %v2596_v57 = vshrl.u32 %v7653_v13, 16  ;;  %v3307_v22 = vadd.f32 %v3306_v60, %v7263_v43  ;;  %v1707_v37 = vrot.slane %v1705_v55, 4  ;;  %v7675_v60 = vld [vmem:[#allocation2 + $0xc8] sm:$0x1] }
 0x156   : > { %v3393_v15 = vadd.f32 %v3392_v61, %v3304_v7  ;;  %v2025_v7 = vunpack.c.l.b16 %v1690_v38  ;;  %v2771_v61 = vsel %vm7085_vm14, %v5629_v31, %v2770_v63 }
 0x157   : > { %3345 = vmatmul.bf16.gmra.mxu1 %v2907_v29  ;;  %3751 = vmatmul.bf16.gmra.mxu0 %v2042_v9  ;;  %v2773_v9 = vrot.slane %v7630_v8, 5  ;;  %v2204_v29 = vld [vmem:[#allocation2 + $0xc0] sm:$0xf]  ;;  %v2592_v8 = vshll.u32 %v7653_v13, 16  ;;  %v2598_v43 = vrot.slane %v2596_v57, 4  ;;  %v2954_v63 = vunpack.c.l.b16 %v2771_v61 }
 0x158   : > { %v2583_v35 = vshrl.u32 %v2204_v29, 16  ;;  %v2586_v41 = vshll.u32 %v2204_v29, 16  ;;  %v2043_v59 = vpack.c.b16 %v2025_v7, %v2024_v27  ;;  %v7679_v57 = vld [vmem:[#allocation2 + $0x4] sm:$0xf] }
 0x159   : > { %3434 = vmatmul.bf16.gmra.mxu2 %v2971_v20  ;;  %v2774_v49 = vsel %vm7085_vm14, %v2772_v4, %v2773_v9  ;;  %v7673_v38 = vrot.slane %v2592_v8, 5  ;;  %v1711_v4 = vshll.u32 %v1350_v45, 16  ;;  %v1699_v9 = vrot.slane %v1698_v11, 4 }
 0x15a   : > { %v3625_v26 = vpop.f32.mrf.mxu3  ;;  %v2585_v10 = vrot.slane %v2583_v35, 4  ;;  %v2588_v25 = vrot.slane %v2586_v41, 5  ;;  %v2955_v31 = vunpack.c.l.b16 %v2774_v49  ;;  %v2602_v41 = vshll.u32 %v7675_v60, 16  ;;  %v1334_v49 = vld [vmem:[#allocation2 + $0xb4] sm:$0xf] }
 0x15b   : > { %v3626_v36 = vadd.f32 %v3625_v26, %v3393_v15  ;;  %v1703_v15 = vrot.slane %v1701_v58, 5  ;;  %v2908_v58 = vpack.c.b16 %v2891_v54, %v2890_v50  ;;  %v2599_v35 = vor.u32 %v2598_v43, %v7673_v38 }
 0x15c   : > { %v3308_v46 = vpop.f32.mrf.mxu1  ;;  %v3714_v28 = vpop.f32.mrf.mxu0  ;;  %v2589_v51 = vor.u32 %v2588_v25, %v2585_v10  ;;  %v1713_v61 = vrot.slane %v1711_v4, 5  ;;  %v2604_v10 = vrot.slane %v2602_v41, 5  ;;  %v1716_v25 = vshrl.u32 %v1334_v49, 16 }
 0x15d   : > { %v3395_v20 = vpop.f32.mrf.mxu2  ;;  %v1708_v29 = vor.u32 %v1707_v37, %v1703_v15  ;;  %v3309_v53 = vadd.f32 %v3308_v46, %v7293_v12  ;;  %v1704_v27 = vsel %vm7046_vm11, %v1699_v9, %v1703_v15  ;;  %v2600_v37 = vrot.slane %v2599_v35, 4  ;;  %v1335_v46 = vld [vmem:[#allocation2 + $0xb8] sm:$0xf] }
 0x15e   : > { %v3396_v2 = vadd.f32 %v3395_v20, %v3307_v22  ;;  %v2972_v22 = vpack.c.b16 %v2955_v31, %v2954_v63  ;;  %v7685_v20 = vadd.f32 %v3714_v28, %v3626_v36  ;;  %v2590_v45 = vrot.slane %v2589_v51, 4 }
 0x15f   : > { %3667 = vmatmul.bf16.gmra.mxu3 %v6179_v3  ;;  %v1808_v3 = vrot.slane %v7679_v57, 5  ;;  %v1709_v7 = vrot.slane %v1708_v29, 4  ;;  %v2777_v12 = vrot.slane %v7653_v13, 5  ;;  %v1719_v43 = vshll.u32 %v1334_v49, 16 }
 0x160   : > { %v2026_v31 = vunpack.c.l.b16 %v1704_v27  ;;  %v2595_v4 = vsel %vm7046_vm11, %v2590_v45, %v7673_v38  ;;  %v1725_v13 = vshll.u32 %v1335_v46, 16  ;;  %v2780_v35 = vrot.slane %v7675_v60, 5  ;;  %v1351_v45 = vld [vmem:[#allocation2 + $0xbc] sm:$0x1] }
 0x161   : > { %v1810_v63 = vrot.slane %v1808_v3, 4  ;;  %v1714_v15 = vsel %vm7046_vm11, %v1709_v7, %v1713_v61  ;;  %v2779_v51 = vrot.slane %v2777_v12, 4  ;;  %v1729_v41 = vshrl.u32 %v1335_v46, 16 }
 0x162   : > { %v3628_v26 = vpop.f32.mrf.mxu3  ;;  %v1718_v57 = vrot.slane %v1716_v25, 4  ;;  %v3862_v25 = vld [vmem:[#allocation2 + $0x18] sm:$0xf] }
 0x163   : > { %v3629_v24 = vadd.f32 %v3628_v26, %v3396_v2  ;;  %v2621_v2 = vld [vmem:[#allocation2 + $0xc0] sm:$0xe]  ;;  %v6180_v26 = vld [vmem:[#allocation2 + $0xa8] sm:$0xff] }
 0x164   : > { %v3311_v55 = vpop.f32.mrf.mxu1  ;;  %v3717_v8 = vpop.f32.mrf.mxu0  ;;  %v5630_v9 = vrot.slane %v2621_v2, 9 }
 0x165   : > { %v3397_v11 = vpop.f32.mrf.mxu2  ;;  %v7687_v50 = vadd.f32 %v3717_v8, %v3629_v24  ;;  %v3312_v8 = vadd.f32 %v3311_v55, %v7335_v18  ;;  %v2027_v24 = vunpack.c.l.b16 %v1714_v15  ;;  %v2781_v18 = vsel %vm7085_vm14, %v2779_v51, %v2780_v35 }
 0x166   : > { %v3398_v54 = vadd.f32 %v3397_v11, %v3309_v53  ;;  %v1721_v53 = vrot.slane %v1719_v43, 5  ;;  %v2892_v11 = vunpack.c.l.b16 %v2595_v4  ;;  %v2778_v60 = vsel %vm7085_vm14, %v5630_v9, %v2777_v12 }
 0x167   : > { %3350 = vmatmul.bf16.gmra.mxu1 %v2908_v58  ;;  %3756 = vmatmul.bf16.gmra.mxu0 %v2043_v59  ;;  %v2605_v58 = vsel %vm7046_vm11, %v2600_v37, %v2604_v10  ;;  %v1739_v37 = vld [vmem:[#allocation2] sm:$0xe]  ;;  %v1731_v55 = vrot.slane %v1729_v41, 4  ;;  %v2044_v2 = vpack.c.b16 %v2027_v24, %v2026_v31  ;;  %v1735_v15 = vshll.u32 %v1351_v45, 16 }
 0x168   : > { %v2893_v27 = vunpack.c.l.b16 %v2605_v58  ;;  %v5535_v10 = vrot.slane %v1739_v37, 9  ;;  %v1722_v46 = vor.u32 %v1721_v53, %v1718_v57  ;;  %v7709_v58 = vld [vmem:[#allocation2 + $0x1c] sm:$0xf]  ;;  %v2956_v9 = vunpack.c.l.b16 %v2778_v60 }
 0x169   : > { %3439 = vmatmul.bf16.gmra.mxu2 %v2972_v22  ;;  %v6514_v22 = vld [vmem:[#allocation2 + $0x8] sm:$0x1]  ;;  %v3911_v41 = vshrl.u32 %v3862_v25, 16 }
 0x16a   : > { %v3630_v28 = vpop.f32.mrf.mxu3  ;;  %v1811_v61 = vrot.slane %v6514_v22, 5  ;;  %v2909_v43 = vpack.c.b16 %v2893_v27, %v2892_v11  ;;  %v1723_v11 = vrot.slane %v1722_v46, 4 }
 0x16b   : > { %v3631_v59 = vadd.f32 %v3630_v28, %v3398_v54  ;;  %v1727_v54 = vrot.slane %v1725_v13, 5  ;;  %v1809_v28 = vsel %vm7085_vm14, %v5535_v10, %v1808_v3  ;;  %v3920_v3 = vshll.u32 %v7709_v58, 16 }
 0x16c   : > { %v3313_v36 = vpop.f32.mrf.mxu1  ;;  %v3719_v29 = vpop.f32.mrf.mxu0  ;;  %v1812_v4 = vsel %vm7085_vm14, %v1810_v63, %v1811_v61  ;;  %v3924_v63 = vshrl.u32 %v7709_v58, 16  ;;  %v3913_v45 = vrot.slane %v3911_v41, 4 }
 0x16d   : > { %v3400_v38 = vpop.f32.mrf.mxu2  ;;  %v7699_v7 = vadd.f32 %v3719_v29, %v3631_v59  ;;  %v2957_v29 = vunpack.c.l.b16 %v2781_v18  ;;  %v2062_v59 = vunpack.c.l.b16 %v1809_v28  ;;  %v1732_v35 = vor.u32 %v1731_v55, %v1727_v54 }
 0x16e   : > { %v3401_v49 = vadd.f32 %v3400_v38, %v3312_v8  ;;  %v3914_v8 = vshll.u32 %v3862_v25, 16  ;;  %v3314_v24 = vadd.f32 %v3313_v36, %v7354_v6  ;;  %v3922_v60 = vrot.slane %v3920_v3, 5  ;;  %v7716_v6 = vld [vmem:[#allocation2 + $0x20] sm:$0x1] }
 0x16f   : > { %3672 = vmatmul.bf16.gmra.mxu3 %v6180_v26  ;;  %v2063_v26 = vunpack.c.l.b16 %v1812_v4  ;;  %v2973_v38 = vpack.c.b16 %v2957_v29, %v2956_v9  ;;  %v1733_v27 = vrot.slane %v1732_v35, 4  ;;  %v3926_v18 = vrot.slane %v3924_v63, 4  ;;  %v4294_v63 = vld [vmem:[#allocation2 + $0x18] sm:$0xe] }
 0x170   : > { %v3916_v37 = vrot.slane %v3914_v8, 5  ;;  %v4360_v8 = vrot.slane %v7709_v58, 5 }
 0x171   : > { %v2094_v57 = vpack.c.b16 %v2063_v26, %v2062_v59  ;;  %v3927_v4 = vor.u32 %v3926_v18, %v3922_v60 }
 0x172   : > { %v3633_v13 = vpop.f32.mrf.mxu3  ;;  %v3917_v28 = vor.u32 %v3916_v37, %v3913_v45 }
 0x173   : > { %v3634_v31 = vadd.f32 %v3633_v13, %v3401_v49  ;;  %v1737_v49 = vrot.slane %v1735_v15, 5  ;;  %v3930_v13 = vshll.u32 %v7716_v6, 16  ;;  %v3928_v35 = vrot.slane %v3927_v4, 4 }
 0x174   : > { %v3316_v12 = vpop.f32.mrf.mxu1  ;;  %v3722_v51 = vpop.f32.mrf.mxu0 }
 0x175   : > { %v3402_v53 = vpop.f32.mrf.mxu2  ;;  %v7714_v22 = vadd.f32 %v3722_v51, %v3634_v31  ;;  %v1738_v46 = vsel %vm7046_vm11, %v1733_v27, %v1737_v49  ;;  %v3317_v15 = vadd.f32 %v3316_v12, %v7383_v47  ;;  %v3918_v31 = vrot.slane %v3917_v28, 4  ;;  %v1740_v49 = vld [vmem:[#allocation2 + $0xc] sm:$0xe] }
 0x176   : > { %v3403_v61 = vadd.f32 %v3402_v53, %v3314_v24  ;;  %v2029_v59 = vunpack.c.l.b16 %v1738_v46  ;;  %v3932_v41 = vrot.slane %v3930_v13, 5  ;;  %v7727_v24 = vld [vmem:[#allocation2 + $0x28] sm:$0xf]  ;;  %v6515_v53 = vld [vmem:[#allocation2 + $0x10] sm:$0xf]  ;;  %v4363_v46 = vrot.slane %v7716_v6, 5 }
 0x177   : > { %3355 = vmatmul.bf16.gmra.mxu1 %v2909_v43  ;;  %3761 = vmatmul.bf16.gmra.mxu0 %v2044_v2  ;;  %v6181_v43 = vld [vmem:[#allocation2 + $0xb4] sm:$0xff]  ;;  %v1728_v2 = vsel %vm7046_vm11, %v1723_v11, %v1727_v54  ;;  %v3864_v54 = vld [vmem:[#allocation2 + $0x24] sm:$0xf]  ;;  %v3923_v27 = vsel %vm7046_vm11, %v3918_v31, %v3922_v60  ;;  %v5536_v4 = vrot.slane %v1740_v49, 9 }
 0x178   : > { %v2028_v29 = vunpack.c.l.b16 %v1728_v2  ;;  %v3935_v45 = vshrl.u32 %v3864_v54, 16  ;;  %v3938_v37 = vshll.u32 %v3864_v54, 16  ;;  %v3933_v58 = vsel %vm7046_vm11, %v3928_v35, %v3932_v41 }
 0x179   : > { %3444 = vmatmul.bf16.gmra.mxu2 %v2973_v38  ;;  %v4362_v2 = vrot.slane %v4360_v8, 4 }
 0x17a   : > { %v3635_v36 = vpop.f32.mrf.mxu3  ;;  %v2045_v3 = vpack.c.b16 %v2029_v59, %v2028_v29  ;;  %v4551_v29 = vunpack.c.l.b16 %v3933_v58  ;;  %v3937_v59 = vrot.slane %v3935_v45, 4 }
 0x17b   : > { %v3636_v25 = vadd.f32 %v3635_v36, %v3403_v61  ;;  %v1815_v61 = vrot.slane %v6515_v53, 5  ;;  %v3944_v36 = vshll.u32 %v7727_v24, 16 }
 0x17c   : > { %v3318_v55 = vpop.f32.mrf.mxu1  ;;  %v3724_v10 = vpop.f32.mrf.mxu0 }
 0x17d   : > { %v3405_v9 = vpop.f32.mrf.mxu2  ;;  %v7724_v51 = vadd.f32 %v3724_v10, %v3636_v25  ;;  %v3319_v18 = vadd.f32 %v3318_v55, %v7403_v62  ;;  %v3948_v10 = vshrl.u32 %v7727_v24, 16  ;;  %v1817_v62 = vrot.slane %v1815_v61, 4  ;;  %v6516_v55 = vld [vmem:[#allocation2 + $0x14] sm:$0x1] }
 0x17e   : > { %v3406_v26 = vadd.f32 %v3405_v9, %v3317_v15  ;;  %v6246_v15 = vld [vmem:[#allocation2 + $0x18] sm:$0xff]  ;;  %v1818_v13 = vrot.slane %v6516_v55, 5  ;;  %v4550_v9 = vunpack.c.l.b16 %v3923_v27  ;;  %v3946_v31 = vrot.slane %v3944_v36, 5 }
 0x17f   : > { %3677 = vmatmul.bf16.gmra.mxu3 %v6181_v43  ;;  %v5935_v43 = vrot.slane %v4294_v63, 9  ;;  %v3950_v35 = vrot.slane %v3948_v10, 4 }
 0x181   : > { %v4361_v6 = vsel %vm7085_vm14, %v5935_v43, %v4360_v8  ;;  %v3951_v45 = vor.u32 %v3950_v35, %v3946_v31 }
 0x182   : > { %v3638_v47 = vpop.f32.mrf.mxu3  ;;  %v4614_v36 = vunpack.c.l.b16 %v4361_v6 }
 0x183   : > { %v3639_v11 = vadd.f32 %v3638_v47, %v3406_v26  ;;  %v3940_v26 = vrot.slane %v3938_v37, 5  ;;  %v1819_v47 = vsel %vm7085_vm14, %v1817_v62, %v1818_v13  ;;  %v4295_v13 = vld [vmem:[#allocation2 + $0x24] sm:$0xe] }
 0x184   : > { %v3321_v12 = vpop.f32.mrf.mxu1  ;;  %v3727_v38 = vpop.f32.mrf.mxu0  ;;  %v2065_v58 = vunpack.c.l.b16 %v1819_v47 }
 0x185   : > { %v3407_v25 = vpop.f32.mrf.mxu2  ;;  %v7737_v28 = vadd.f32 %v3727_v38, %v3639_v11  ;;  %v4582_v38 = vpack.c.b16 %v4551_v29, %v4550_v9  ;;  %v4364_v11 = vsel %vm7085_vm14, %v4362_v2, %v4363_v46  ;;  %v3941_v27 = vor.u32 %v3940_v26, %v3937_v59  ;;  %v6517_v9 = vld [vmem:[#allocation2 + $0x1c] sm:$0xf] }
 0x186   : > { %v3408_v60 = vadd.f32 %v3407_v25, %v3319_v18  ;;  %v3322_v49 = vadd.f32 %v3321_v12, %v7247_v5  ;;  %v4367_v46 = vrot.slane %v7727_v24, 5  ;;  %v7754_v5 = vld [vmem:[#allocation2 + $0x34] sm:$0xf]  ;;  %v1822_v29 = vrot.slane %v6517_v9, 5 }
 0x187   : > { %3780 = vmatmul.bf16.vlgmr.msra.gmra.mxu1 %v2094_v57  ;;  %3766 = vmatmul.bf16.gmra.mxu0 %v2045_v3  ;;  %v7739_v57 = vld [vmem:[#allocation2 + $0x2c] sm:$0x1]  ;;  %v1816_v3 = vsel %vm7085_vm14, %v5536_v4, %v1815_v61  ;;  %v4615_v61 = vunpack.c.l.b16 %v4364_v11  ;;  %v3942_v43 = vrot.slane %v3941_v27, 4  ;;  %v3866_v4 = vld [vmem:[#allocation2 + $0x30] sm:$0xf]  ;;  %v5936_v11 = vrot.slane %v4295_v13, 9 }
 0x188   : > { %v3954_v37 = vshll.u32 %v7739_v57, 16  ;;  %v2064_v18 = vunpack.c.l.b16 %v1816_v3  ;;  %v3959_v6 = vshrl.u32 %v3866_v4, 16  ;;  %v3962_v3 = vshll.u32 %v3866_v4, 16 }
 0x189   : > { %4879 = vmatmul.bf16.vlgmr.msra.gmra.mxu2 %v6246_v15  ;;  %v4646_v12 = vpack.c.b16 %v4615_v61, %v4614_v36  ;;  %v3947_v35 = vsel %vm7046_vm11, %v3942_v43, %v3946_v31  ;;  %v4369_v27 = vrot.slane %v4367_v46, 4 }
 0x18a   : > { %v3640_v41 = vpop.f32.mrf.mxu3  ;;  %v3956_v15 = vrot.slane %v3954_v37, 5  ;;  %v2095_v2 = vpack.c.b16 %v2065_v58, %v2064_v18  ;;  %v6247_v37 = vld [vmem:[#allocation2 + $0x24] sm:$0xff]  ;;  %v4552_v58 = vunpack.c.l.b16 %v3947_v35  ;;  %v3961_v61 = vrot.slane %v3959_v6, 4 }
 0x18b   : > { %v3641_v53 = vadd.f32 %v3640_v41, %v3408_v60  ;;  %v3952_v60 = vrot.slane %v3951_v45, 4  ;;  %v1741_v41 = vld [vmem:[#allocation2 + $0x18] sm:$0xe] }
 0x18c   : > { %v3323_v54 = vpop.f32.mrf.mxu1  ;;  %v3729_v63 = vpop.f32.mrf.mxu0 }
 0x18d   : > { %v3410_v8 = vpop.f32.mrf.mxu2  ;;  %v7751_v25 = vadd.f32 %v3729_v63, %v3641_v53  ;;  %v3324_v47 = vadd.f32 %v3323_v54, %v7276_v1  ;;  %v3957_v24 = vsel %vm7046_vm11, %v3952_v60, %v3956_v15  ;;  %v3968_v63 = vshll.u32 %v7754_v5, 16  ;;  %v6518_v54 = vld [vmem:[#allocation2 + $0x20] sm:$0x1]  ;;  %v7766_v15 = vld [vmem:[#allocation2 + $0x38] sm:$0x1] }
 0x18e   : > { %v3411_v10 = vadd.f32 %v3410_v8, %v3322_v49  ;;  %v3972_v53 = vshrl.u32 %v7754_v5, 16  ;;  %v4370_v49 = vrot.slane %v7739_v57, 5  ;;  %v5537_v8 = vrot.slane %v1741_v41, 9 }
 0x18f   : > { %4968 = vmatmul.bf16.vlgmr.msra.gmra.mxu3 %v4582_v38  ;;  %v1824_v1 = vrot.slane %v1822_v29, 4  ;;  %v1825_v18 = vrot.slane %v6518_v54, 5  ;;  %v4553_v36 = vunpack.c.l.b16 %v3957_v24  ;;  %v3970_v43 = vrot.slane %v3968_v63, 5 }
 0x190   : > { %v3974_v60 = vrot.slane %v3972_v53, 4  ;;  %v4368_v57 = vsel %vm7085_vm14, %v5936_v11, %v4367_v46 }
 0x191   : > { %v4616_v63 = vunpack.c.l.b16 %v4368_v57 }
 0x192   : > { %v3643_v62 = vpop.f32.mrf.mxu3  ;;  %v3975_v6 = vor.u32 %v3974_v60, %v3970_v43 }
 0x193   : > { %v3644_v26 = vadd.f32 %v3643_v62, %v3411_v10  ;;  %v3964_v10 = vrot.slane %v3962_v3, 5  ;;  %v1826_v62 = vsel %vm7085_vm14, %v1824_v1, %v1825_v18  ;;  %v3978_v3 = vshll.u32 %v7766_v15, 16  ;;  %v4296_v18 = vld [vmem:[#allocation2 + $0x30] sm:$0xe] }
 0x194   : > { %v3326_v55 = vpop.f32.mrf.mxu1  ;;  %v3732_v59 = vpop.f32.mrf.mxu0  ;;  %v2067_v24 = vunpack.c.l.b16 %v1826_v62 }
 0x195   : > { %v3412_v38 = vpop.f32.mrf.mxu2  ;;  %v7764_v45 = vadd.f32 %v3732_v59, %v3644_v26  ;;  %v4583_v59 = vpack.c.b16 %v4553_v36, %v4552_v58  ;;  %v4371_v26 = vsel %vm7085_vm14, %v4369_v27, %v4370_v49  ;;  %v3965_v35 = vor.u32 %v3964_v10, %v3961_v61  ;;  %v6519_v58 = vld [vmem:[#allocation2 + $0x28] sm:$0xf] }
 0x196   : > { %v3413_v31 = vadd.f32 %v3412_v38, %v3324_v47  ;;  %v3327_v41 = vadd.f32 %v3326_v55, %v7300_v39  ;;  %v4374_v49 = vrot.slane %v7754_v5, 5  ;;  %v7781_v39 = vld [vmem:[#allocation2 + $0x40] sm:$0xf]  ;;  %v1829_v36 = vrot.slane %v6519_v58, 5 }
 0x197   : > { %3785 = vmatmul.bf16.gmra.mxu1 %v2095_v2  ;;  %5057 = vmatmul.bf16.vlgmr.msra.gmra.mxu0 %v4646_v12  ;;  %v1823_v12 = vsel %vm7085_vm14, %v5537_v8, %v1822_v29  ;;  %v4617_v29 = vunpack.c.l.b16 %v4371_v26  ;;  %v3966_v11 = vrot.slane %v3965_v35, 4  ;;  %v3868_v8 = vld [vmem:[#allocation2 + $0x3c] sm:$0xf]  ;;  %v5937_v26 = vrot.slane %v4296_v18, 9 }
 0x198   : > { %v2066_v47 = vunpack.c.l.b16 %v1823_v12  ;;  %v3983_v57 = vshrl.u32 %v3868_v8, 16  ;;  %v3986_v12 = vshll.u32 %v3868_v8, 16  ;;  %v4376_v35 = vrot.slane %v4374_v49, 4 }
 0x199   : > { %4884 = vmatmul.bf16.gmra.mxu2 %v6247_v37  ;;  %v3980_v37 = vrot.slane %v3978_v3, 5  ;;  %v4647_v55 = vpack.c.b16 %v4617_v29, %v4616_v63  ;;  %v3971_v60 = vsel %vm7046_vm11, %v3966_v11, %v3970_v43  ;;  %v6248_v3 = vld [vmem:[#allocation2 + $0x30] sm:$0xff] }
 0x19a   : > { %v3645_v4 = vpop.f32.mrf.mxu3  ;;  %v2096_v27 = vpack.c.b16 %v2067_v24, %v2066_v47  ;;  %v4554_v24 = vunpack.c.l.b16 %v3971_v60  ;;  %v3985_v29 = vrot.slane %v3983_v57, 4 }
 0x19b   : > { %v3646_v9 = vadd.f32 %v3645_v4, %v3413_v31  ;;  %v3976_v31 = vrot.slane %v3975_v6, 4  ;;  %v1742_v4 = vld [vmem:[#allocation2 + $0x24] sm:$0xe] }
 0x19c   : > { %v3328_v2 = vpop.f32.mrf.mxu1  ;;  %v3734_v13 = vpop.f32.mrf.mxu0 }
 0x19d   : > { %v3415_v46 = vpop.f32.mrf.mxu2  ;;  %v7778_v38 = vadd.f32 %v3734_v13, %v3646_v9  ;;  %v3329_v62 = vadd.f32 %v3328_v2, %v7344_v48  ;;  %v3981_v5 = vsel %vm7046_vm11, %v3976_v31, %v3980_v37  ;;  %v3992_v13 = vshll.u32 %v7781_v39, 16  ;;  %v6520_v2 = vld [vmem:[#allocation2 + $0x2c] sm:$0x1]  ;;  %v7793_v37 = vld [vmem:[#allocation2 + $0x44] sm:$0x1] }
 0x19e   : > { %v3416_v53 = vadd.f32 %v3415_v46, %v3327_v41  ;;  %v3996_v9 = vshrl.u32 %v7781_v39, 16  ;;  %v4377_v41 = vrot.slane %v7766_v15, 5  ;;  %v5538_v46 = vrot.slane %v1742_v4, 9 }
 0x19f   : > { %4973 = vmatmul.bf16.gmra.mxu3 %v4583_v59  ;;  %v1831_v48 = vrot.slane %v1829_v36, 4  ;;  %v1832_v47 = vrot.slane %v6520_v2, 5  ;;  %v4555_v63 = vunpack.c.l.b16 %v3981_v5  ;;  %v3994_v11 = vrot.slane %v3992_v13, 5 }
 0x1a0   : > { %v3998_v31 = vrot.slane %v3996_v9, 4  ;;  %v4375_v15 = vsel %vm7085_vm14, %v5937_v26, %v4374_v49 }
 0x1a1   : > { %v4618_v13 = vunpack.c.l.b16 %v4375_v15 }
 0x1a2   : > { %v3648_v1 = vpop.f32.mrf.mxu3  ;;  %v3999_v57 = vor.u32 %v3998_v31, %v3994_v11 }
 0x1a3   : > { %v3649_v10 = vadd.f32 %v3648_v1, %v3416_v53  ;;  %v3988_v53 = vrot.slane %v3986_v12, 5  ;;  %v1833_v1 = vsel %vm7085_vm14, %v1831_v48, %v1832_v47  ;;  %v4002_v12 = vshll.u32 %v7793_v37, 16  ;;  %v4297_v47 = vld [vmem:[#allocation2 + $0x3c] sm:$0xe] }
 0x1a4   : > { %v3331_v54 = vpop.f32.mrf.mxu1  ;;  %v3737_v61 = vpop.f32.mrf.mxu0  ;;  %v2069_v5 = vunpack.c.l.b16 %v1833_v1 }
 0x1a5   : > { %v3417_v59 = vpop.f32.mrf.mxu2  ;;  %v7791_v6 = vadd.f32 %v3737_v61, %v3649_v10  ;;  %v4584_v61 = vpack.c.b16 %v4555_v63, %v4554_v24  ;;  %v4378_v10 = vsel %vm7085_vm14, %v4376_v35, %v4377_v41  ;;  %v3989_v60 = vor.u32 %v3988_v53, %v3985_v29  ;;  %v6521_v24 = vld [vmem:[#allocation2 + $0x34] sm:$0xf] }
 0x1a6   : > { %v3418_v43 = vadd.f32 %v3417_v59, %v3329_v62  ;;  %v3332_v4 = vadd.f32 %v3331_v54, %v7361_v34  ;;  %v4381_v41 = vrot.slane %v7781_v39, 5  ;;  %v7808_v34 = vld [vmem:[#allocation2 + $0x4c] sm:$0xf]  ;;  %v1836_v63 = vrot.slane %v6521_v24, 5 }
 0x1a7   : > { %3790 = vmatmul.bf16.gmra.mxu1 %v2096_v27  ;;  %5062 = vmatmul.bf16.gmra.mxu0 %v4647_v55  ;;  %v1830_v55 = vsel %vm7085_vm14, %v5538_v46, %v1829_v36  ;;  %v4619_v36 = vunpack.c.l.b16 %v4378_v10  ;;  %v3990_v26 = vrot.slane %v3989_v60, 4  ;;  %v3870_v46 = vld [vmem:[#allocation2 + $0x48] sm:$0xf]  ;;  %v5938_v10 = vrot.slane %v4297_v47, 9 }
 0x1a8   : > { %v2068_v62 = vunpack.c.l.b16 %v1830_v55  ;;  %v4007_v15 = vshrl.u32 %v3870_v46, 16  ;;  %v4010_v55 = vshll.u32 %v3870_v46, 16  ;;  %v4383_v60 = vrot.slane %v4381_v41, 4 }
 0x1a9   : > { %4889 = vmatmul.bf16.gmra.mxu2 %v6248_v3  ;;  %v4004_v3 = vrot.slane %v4002_v12, 5  ;;  %v4648_v54 = vpack.c.b16 %v4619_v36, %v4618_v13  ;;  %v3995_v31 = vsel %vm7046_vm11, %v3990_v26, %v3994_v11  ;;  %v6249_v12 = vld [vmem:[#allocation2 + $0x3c] sm:$0xff] }
 0x1aa   : > { %v3650_v8 = vpop.f32.mrf.mxu3  ;;  %v2097_v35 = vpack.c.b16 %v2069_v5, %v2068_v62  ;;  %v4556_v5 = vunpack.c.l.b16 %v3995_v31  ;;  %v4009_v36 = vrot.slane %v4007_v15, 4 }
 0x1ab   : > { %v3651_v58 = vadd.f32 %v3650_v8, %v3418_v43  ;;  %v4000_v43 = vrot.slane %v3999_v57, 4  ;;  %v1743_v8 = vld [vmem:[#allocation2 + $0x30] sm:$0xe] }
 0x1ac   : > { %v3333_v27 = vpop.f32.mrf.mxu1  ;;  %v3739_v18 = vpop.f32.mrf.mxu0 }
 0x1ad   : > { %v3420_v49 = vpop.f32.mrf.mxu2  ;;  %v7805_v59 = vadd.f32 %v3739_v18, %v3651_v58  ;;  %v3334_v1 = vadd.f32 %v3333_v27, %v7392_v42  ;;  %v4005_v39 = vsel %vm7046_vm11, %v4000_v43, %v4004_v3  ;;  %v4016_v18 = vshll.u32 %v7808_v34, 16  ;;  %v6522_v27 = vld [vmem:[#allocation2 + $0x38] sm:$0x1]  ;;  %v7820_v3 = vld [vmem:[#allocation2 + $0x50] sm:$0x1] }
 0x1ae   : > { %v3421_v9 = vadd.f32 %v3420_v49, %v3332_v4  ;;  %v4020_v58 = vshrl.u32 %v7808_v34, 16  ;;  %v4384_v4 = vrot.slane %v7793_v37, 5  ;;  %v5539_v49 = vrot.slane %v1743_v8, 9 }
 0x1af   : > { %4978 = vmatmul.bf16.gmra.mxu3 %v4584_v61  ;;  %v1838_v42 = vrot.slane %v1836_v63, 4  ;;  %v1839_v62 = vrot.slane %v6522_v27, 5  ;;  %v4557_v13 = vunpack.c.l.b16 %v4005_v39  ;;  %v4018_v26 = vrot.slane %v4016_v18, 5 }
 0x1b0   : > { %v4022_v43 = vrot.slane %v4020_v58, 4  ;;  %v4382_v37 = vsel %vm7085_vm14, %v5938_v10, %v4381_v41 }
 0x1b1   : > { %v4620_v18 = vunpack.c.l.b16 %v4382_v37 }
 0x1b2   : > { %v3653_v48 = vpop.f32.mrf.mxu3  ;;  %v4023_v15 = vor.u32 %v4022_v43, %v4018_v26 }
 0x1b3   : > { %v3654_v53 = vadd.f32 %v3653_v48, %v3421_v9  ;;  %v4012_v9 = vrot.slane %v4010_v55, 5  ;;  %v1840_v48 = vsel %vm7085_vm14, %v1838_v42, %v1839_v62  ;;  %v4026_v55 = vshll.u32 %v7820_v3, 16  ;;  %v4298_v62 = vld [vmem:[#allocation2 + $0x48] sm:$0xe] }
 0x1b4   : > { %v3336_v2 = vpop.f32.mrf.mxu1  ;;  %v3742_v29 = vpop.f32.mrf.mxu0  ;;  %v2071_v39 = vunpack.c.l.b16 %v1840_v48 }
 0x1b5   : > { %v3422_v61 = vpop.f32.mrf.mxu2  ;;  %v7818_v57 = vadd.f32 %v3742_v29, %v3654_v53  ;;  %v4585_v29 = vpack.c.b16 %v4557_v13, %v4556_v5  ;;  %v4385_v53 = vsel %vm7085_vm14, %v4383_v60, %v4384_v4  ;;  %v4013_v31 = vor.u32 %v4012_v9, %v4009_v36  ;;  %v6523_v5 = vld [vmem:[#allocation2 + $0x40] sm:$0xf] }
 0x1b6   : > { %v3423_v11 = vadd.f32 %v3422_v61, %v3334_v1  ;;  %v3337_v8 = vadd.f32 %v3336_v2, %v7428_v56  ;;  %v4388_v4 = vrot.slane %v7808_v34, 5  ;;  %v7835_v56 = vld [vmem:[#allocation2 + $0x58] sm:$0xf]  ;;  %v1843_v13 = vrot.slane %v6523_v5, 5 }
 0x1b7   : > { %3795 = vmatmul.bf16.gmra.mxu1 %v2097_v35  ;;  %5067 = vmatmul.bf16.gmra.mxu0 %v4648_v54  ;;  %v1837_v54 = vsel %vm7085_vm14, %v5539_v49, %v1836_v63  ;;  %v4621_v63 = vunpack.c.l.b16 %v4385_v53  ;;  %v4014_v10 = vrot.slane %v4013_v31, 4  ;;  %v3872_v49 = vld [vmem:[#allocation2 + $0x54] sm:$0xf]  ;;  %v5939_v53 = vrot.slane %v4298_v62, 9 }
 0x1b8   : > { %v2070_v1 = vunpack.c.l.b16 %v1837_v54  ;;  %v4031_v37 = vshrl.u32 %v3872_v49, 16  ;;  %v4034_v54 = vshll.u32 %v3872_v49, 16  ;;  %v4390_v31 = vrot.slane %v4388_v4, 4 }
 0x1b9   : > { %4894 = vmatmul.bf16.gmra.mxu2 %v6249_v12  ;;  %v4028_v12 = vrot.slane %v4026_v55, 5  ;;  %v4649_v2 = vpack.c.b16 %v4621_v63, %v4620_v18  ;;  %v4019_v43 = vsel %vm7046_vm11, %v4014_v10, %v4018_v26  ;;  %v6250_v55 = vld [vmem:[#allocation2 + $0x48] sm:$0xff] }
 0x1ba   : > { %v3655_v46 = vpop.f32.mrf.mxu3  ;;  %v2098_v60 = vpack.c.b16 %v2071_v39, %v2070_v1  ;;  %v4558_v39 = vunpack.c.l.b16 %v4019_v43  ;;  %v4033_v63 = vrot.slane %v4031_v37, 4 }
 0x1bb   : > { %v3656_v24 = vadd.f32 %v3655_v46, %v3423_v11  ;;  %v4024_v11 = vrot.slane %v4023_v15, 4  ;;  %v1744_v46 = vld [vmem:[#allocation2 + $0x3c] sm:$0xe] }
 0x1bc   : > { %v3338_v35 = vpop.f32.mrf.mxu1  ;;  %v3744_v47 = vpop.f32.mrf.mxu0 }
 0x1bd   : > { %v3425_v41 = vpop.f32.mrf.mxu2  ;;  %v7832_v61 = vadd.f32 %v3744_v47, %v3656_v24  ;;  %v3339_v48 = vadd.f32 %v3338_v35, %v7441_v17  ;;  %v4029_v34 = vsel %vm7046_vm11, %v4024_v11, %v4028_v12  ;;  %v4040_v47 = vshll.u32 %v7835_v56, 16  ;;  %v6524_v35 = vld [vmem:[#allocation2 + $0x44] sm:$0x1]  ;;  %v7847_v12 = vld [vmem:[#allocation2 + $0x5c] sm:$0x1] }
 0x1be   : > { %v3426_v58 = vadd.f32 %v3425_v41, %v3337_v8  ;;  %v4044_v24 = vshrl.u32 %v7835_v56, 16  ;;  %v4391_v8 = vrot.slane %v7820_v3, 5  ;;  %v5540_v41 = vrot.slane %v1744_v46, 9 }
 0x1bf   : > { %4983 = vmatmul.bf16.gmra.mxu3 %v4585_v29  ;;  %v1845_v17 = vrot.slane %v1843_v13, 4  ;;  %v1846_v1 = vrot.slane %v6524_v35, 5  ;;  %v4559_v18 = vunpack.c.l.b16 %v4029_v34  ;;  %v4042_v10 = vrot.slane %v4040_v47, 5 }
 0x1c0   : > { %v4046_v11 = vrot.slane %v4044_v24, 4  ;;  %v4389_v3 = vsel %vm7085_vm14, %v5939_v53, %v4388_v4 }
 0x1c1   : > { %v4622_v47 = vunpack.c.l.b16 %v4389_v3 }
 0x1c2   : > { %v3658_v42 = vpop.f32.mrf.mxu3  ;;  %v4047_v37 = vor.u32 %v4046_v11, %v4042_v10 }
 0x1c3   : > { %v3659_v9 = vadd.f32 %v3658_v42, %v3426_v58  ;;  %v4036_v58 = vrot.slane %v4034_v54, 5  ;;  %v1847_v42 = vsel %vm7085_vm14, %v1845_v17, %v1846_v1  ;;  %v4050_v54 = vshll.u32 %v7847_v12, 16  ;;  %v4299_v1 = vld [vmem:[#allocation2 + $0x54] sm:$0xe] }
 0x1c4   : > { %v3341_v27 = vpop.f32.mrf.mxu1  ;;  %v3747_v36 = vpop.f32.mrf.mxu0  ;;  %v2073_v34 = vunpack.c.l.b16 %v1847_v42 }
 0x1c5   : > { %v3427_v29 = vpop.f32.mrf.mxu2  ;;  %v7845_v15 = vadd.f32 %v3747_v36, %v3659_v9  ;;  %v4586_v36 = vpack.c.b16 %v4559_v18, %v4558_v39  ;;  %v4392_v9 = vsel %vm7085_vm14, %v4390_v31, %v4391_v8  ;;  %v4037_v43 = vor.u32 %v4036_v58, %v4033_v63  ;;  %v6525_v39 = vld [vmem:[#allocation2 + $0x4c] sm:$0xf] }
 0x1c6   : > { %v3428_v26 = vadd.f32 %v3427_v29, %v3339_v48  ;;  %v3342_v46 = vadd.f32 %v3341_v27, %v7256_v23  ;;  %v4395_v8 = vrot.slane %v7835_v56, 5  ;;  %v7862_v23 = vld [vmem:[#allocation2 + $0x64] sm:$0xf]  ;;  %v1850_v18 = vrot.slane %v6525_v39, 5 }
 0x1c7   : > { %3800 = vmatmul.bf16.gmra.mxu1 %v2098_v60  ;;  %5072 = vmatmul.bf16.gmra.mxu0 %v4649_v2  ;;  %v1844_v2 = vsel %vm7085_vm14, %v5540_v41, %v1843_v13  ;;  %v4623_v13 = vunpack.c.l.b16 %v4392_v9  ;;  %v4038_v53 = vrot.slane %v4037_v43, 4  ;;  %v3874_v41 = vld [vmem:[#allocation2 + $0x60] sm:$0xf]  ;;  %v5940_v9 = vrot.slane %v4299_v1, 9 }
 0x1c8   : > { %v2072_v48 = vunpack.c.l.b16 %v1844_v2  ;;  %v4055_v3 = vshrl.u32 %v3874_v41, 16  ;;  %v4058_v2 = vshll.u32 %v3874_v41, 16  ;;  %v4397_v43 = vrot.slane %v4395_v8, 4 }
 0x1c9   : > { %4899 = vmatmul.bf16.gmra.mxu2 %v6250_v55  ;;  %v4052_v55 = vrot.slane %v4050_v54, 5  ;;  %v4650_v27 = vpack.c.b16 %v4623_v13, %v4622_v47  ;;  %v4043_v11 = vsel %vm7046_vm11, %v4038_v53, %v4042_v10  ;;  %v6251_v54 = vld [vmem:[#allocation2 + $0x54] sm:$0xff] }
 0x1ca   : > { %v3660_v49 = vpop.f32.mrf.mxu3  ;;  %v2099_v31 = vpack.c.b16 %v2073_v34, %v2072_v48  ;;  %v4560_v34 = vunpack.c.l.b16 %v4043_v11  ;;  %v4057_v13 = vrot.slane %v4055_v3, 4 }
 0x1cb   : > { %v3661_v5 = vadd.f32 %v3660_v49, %v3428_v26  ;;  %v4048_v26 = vrot.slane %v4047_v37, 4  ;;  %v1745_v49 = vld [vmem:[#allocation2 + $0x48] sm:$0xe] }
 0x1cc   : > { %v3343_v60 = vpop.f32.mrf.mxu1  ;;  %v3749_v62 = vpop.f32.mrf.mxu0 }
 0x1cd   : > { %v3430_v4 = vpop.f32.mrf.mxu2  ;;  %v7859_v29 = vadd.f32 %v3749_v62, %v3661_v5  ;;  %v3344_v42 = vadd.f32 %v3343_v60, %v7290_v16  ;;  %v4053_v56 = vsel %vm7046_vm11, %v4048_v26, %v4052_v55  ;;  %v4064_v62 = vshll.u32 %v7862_v23, 16  ;;  %v6526_v60 = vld [vmem:[#allocation2 + $0x50] sm:$0x1]  ;;  %v7874_v55 = vld [vmem:[#allocation2 + $0x68] sm:$0x1] }
 0x1ce   : > { %v3431_v24 = vadd.f32 %v3430_v4, %v3342_v46  ;;  %v4068_v5 = vshrl.u32 %v7862_v23, 16  ;;  %v4398_v46 = vrot.slane %v7847_v12, 5  ;;  %v5541_v4 = vrot.slane %v1745_v49, 9  ;;  %v8265_v49 = vld [vmem:[#allocation6_spill] sm:$0xff] }
 0x1cf   : > { %4988 = vmatmul.bf16.gmra.mxu3 %v4586_v36  ;;  %v1852_v16 = vrot.slane %v1850_v18, 4  ;;  %v1853_v48 = vrot.slane %v6526_v60, 5  ;;  %v4561_v47 = vunpack.c.l.b16 %v4053_v56  ;;  %v4066_v53 = vrot.slane %v4064_v62, 5 }
 0x1d0   : > { %v4070_v26 = vrot.slane %v4068_v5, 4  ;;  %v4396_v12 = vsel %vm7085_vm14, %v5940_v9, %v4395_v8 }
 0x1d1   : > { %v4624_v5 = vunpack.c.l.b16 %v4396_v12 }
 0x1d2   : > { %v3663_v17 = vpop.f32.mrf.mxu3 }
 0x1d3   : > { %v3664_v58 = vadd.f32 %v3663_v17, %v3431_v24  ;;  %v4060_v24 = vrot.slane %v4058_v2, 5  ;;  %v1854_v17 = vsel %vm7085_vm14, %v1852_v16, %v1853_v48  ;;  %v4071_v2 = vor.u32 %v4070_v26, %v4066_v53  ;;  %v3876_v16 = vld [vmem:[#allocation2 + $0x6c] sm:$0xf] }
 0x1d4   : > { %v3346_v35 = vpop.f32.mrf.mxu1  ;;  %v3752_v63 = vpop.f32.mrf.mxu0  ;;  %v2075_v62 = vunpack.c.l.b16 %v1854_v17  ;;  %v4079_v17 = vshrl.u32 %v3876_v16, 16 }
 0x1d5   : > { %v3432_v36 = vpop.f32.mrf.mxu2  ;;  %v7872_v37 = vadd.f32 %v3752_v63, %v3664_v58  ;;  %v4587_v63 = vpack.c.b16 %v4561_v47, %v4560_v34  ;;  %v4399_v58 = vsel %vm7085_vm14, %v4397_v43, %v4398_v46  ;;  %v4061_v11 = vor.u32 %v4060_v24, %v4057_v13  ;;  %v4300_v47 = vld [vmem:[#allocation2 + $0x60] sm:$0xe]  ;;  %v6527_v13 = vld [vmem:[#allocation2 + $0x58] sm:$0xf] }
 0x1d6   : > { %v3433_v10 = vadd.f32 %v3432_v36, %v3344_v42  ;;  %v3347_v3 = vadd.f32 %v3346_v35, %v8265_v49  ;;  %v4074_v42 = vshll.u32 %v7874_v55, 16  ;;  %v4402_v46 = vrot.slane %v7862_v23, 5  ;;  %v7889_v35 = vld [vmem:[#allocation2 + $0x70] sm:$0xf] }
 0x1d7   : > { %3805 = vmatmul.bf16.gmra.mxu1 %v2099_v31  ;;  %5077 = vmatmul.bf16.gmra.mxu0 %v4650_v27  ;;  %v1851_v27 = vsel %vm7085_vm14, %v5541_v4, %v1850_v18  ;;  %v4625_v18 = vunpack.c.l.b16 %v4399_v58  ;;  %v1857_v24 = vrot.slane %v6527_v13, 5  ;;  %v4088_v58 = vshll.u32 %v7889_v35, 16 }
 0x1d8   : > { %v2074_v56 = vunpack.c.l.b16 %v1851_v27  ;;  %v4076_v4 = vrot.slane %v4074_v42, 5  ;;  %v1746_v27 = vld [vmem:[#allocation2 + $0x54] sm:$0xe]  ;;  %v4405_v42 = vrot.slane %v7874_v55, 5 }
 0x1d9   : > { %4904 = vmatmul.bf16.gmra.mxu2 %v6251_v54  ;;  %v4072_v54 = vrot.slane %v4071_v2, 4  ;;  %v4651_v60 = vpack.c.b16 %v4625_v18, %v4624_v5  ;;  %v4404_v2 = vrot.slane %v4402_v46, 4  ;;  %v6528_v5 = vld [vmem:[#allocation2 + $0x5c] sm:$0x1] }
 0x1da   : > { %v3665_v41 = vpop.f32.mrf.mxu3  ;;  %v2100_v43 = vpack.c.b16 %v2075_v62, %v2074_v56  ;;  %v6252_v56 = vld [vmem:[#allocation2 + $0x60] sm:$0xff]  ;;  %v5542_v62 = vrot.slane %v1746_v27, 9  ;;  %v1860_v18 = vrot.slane %v6528_v5, 5 }
 0x1db   : > { %v3666_v39 = vadd.f32 %v3665_v41, %v3433_v10  ;;  %v4062_v10 = vrot.slane %v4061_v11, 4  ;;  %v4077_v23 = vsel %vm7046_vm11, %v4072_v54, %v4076_v4  ;;  %v4092_v11 = vshrl.u32 %v7889_v35, 16 }
 0x1dc   : > { %v3348_v31 = vpop.f32.mrf.mxu1  ;;  %v3754_v1 = vpop.f32.mrf.mxu0  ;;  %v4081_v54 = vrot.slane %v4079_v17, 4  ;;  %v1858_v13 = vsel %vm7085_vm14, %v5542_v62, %v1857_v24  ;;  %v4406_v17 = vsel %vm7085_vm14, %v4404_v2, %v4405_v42  ;;  %v4409_v42 = vrot.slane %v7889_v35, 5 }
 0x1dd   : > { %v3435_v8 = vpop.f32.mrf.mxu2  ;;  %v7886_v9 = vadd.f32 %v3754_v1, %v3666_v39  ;;  %v4067_v12 = vsel %vm7046_vm11, %v4062_v10, %v4066_v53  ;;  %v4082_v1 = vshll.u32 %v3876_v16, 16  ;;  %v8266_v39 = vld [vmem:[#allocation7_spill] sm:$0xff]  ;;  %v4563_v10 = vunpack.c.l.b16 %v4077_v23 }
 0x1de   : > { %v3436_v36 = vadd.f32 %v3435_v8, %v3347_v3  ;;  %v5941_v3 = vrot.slane %v4300_v47, 9  ;;  %v7901_v16 = vrot.slane %v4088_v58, 5 }
 0x1df   : > { %4993 = vmatmul.bf16.gmra.mxu3 %v4587_v63  ;;  %v3349_v63 = vadd.f32 %v3348_v31, %v8266_v39  ;;  %v1859_v31 = vrot.slane %v1857_v24, 4  ;;  %v4084_v4 = vrot.slane %v4082_v1, 5  ;;  %v8267_v39 = vld [vmem:[#allocation8_spill] sm:$0xff]  ;;  %v3878_v24 = vld [vmem:[#allocation2 + $0x78] sm:$0xf] }
 0x1e0   : > { %v4403_v55 = vsel %vm7085_vm14, %v5941_v3, %v4402_v46 }
 0x1e1   : > { %v4085_v1 = vor.u32 %v4084_v4, %v4081_v54  ;;  %v4626_v3 = vunpack.c.l.b16 %v4403_v55  ;;  %v4106_v54 = vshll.u32 %v3878_v24, 16 }
 0x1e2   : > { %v3668_v48 = vpop.f32.mrf.mxu3 }
 0x1e3   : > { %v3669_v41 = vadd.f32 %v3668_v48, %v3436_v36  ;;  %v4562_v36 = vunpack.c.l.b16 %v4067_v12  ;;  %v7903_v48 = vld [vmem:[#allocation2 + $0x74] sm:$0x1]  ;;  %v4086_v2 = vrot.slane %v4085_v1, 4  ;;  %v4411_v1 = vrot.slane %v4409_v42, 4 }
 0x1e4   : > { %v3351_v34 = vpop.f32.mrf.mxu1  ;;  %v3757_v26 = vpop.f32.mrf.mxu0  ;;  %v4098_v46 = vshll.u32 %v7903_v48, 16 }
 0x1e5   : > { %v3437_v49 = vpop.f32.mrf.mxu2  ;;  %v7899_v8 = vadd.f32 %v3757_v26, %v3669_v41  ;;  %v1861_v26 = vsel %vm7085_vm14, %v1859_v31, %v1860_v18  ;;  %v4588_v27 = vpack.c.b16 %v4563_v10, %v4562_v36  ;;  %v7916_v31 = vld [vmem:[#allocation2 + $0x7c] sm:$0xf]  ;;  %v4301_v18 = vld [vmem:[#allocation2 + $0x6c] sm:$0xe]  ;;  %v4103_v36 = vshrl.u32 %v3878_v24, 16 }
 0x1e6   : > { %v3438_v53 = vadd.f32 %v3437_v49, %v3349_v63  ;;  %v3352_v63 = vadd.f32 %v3351_v34, %v8267_v39  ;;  %v2077_v49 = vunpack.c.l.b16 %v1861_v26  ;;  %v4100_v5 = vrot.slane %v4098_v46, 5  ;;  %v6529_v26 = vld [vmem:[#allocation2 + $0x64] sm:$0xf]  ;;  %v1747_v39 = vld [vmem:[#allocation2 + $0x60] sm:$0xe] }
 0x1e7   : > { %3810 = vmatmul.bf16.gmra.mxu1 %v2100_v43  ;;  %5082 = vmatmul.bf16.gmra.mxu0 %v4651_v60  ;;  %v4094_v43 = vrot.slane %v4092_v11, 4  ;;  %v2076_v11 = vunpack.c.l.b16 %v1858_v13  ;;  %v4112_v4 = vshll.u32 %v7916_v31, 16  ;;  %v4091_v35 = vsel %vm7046_vm11, %v4086_v2, %v7901_v16  ;;  %v6253_v2 = vld [vmem:[#allocation2 + $0x6c] sm:$0xff] }
 0x1e8   : > { %v4108_v24 = vrot.slane %v4106_v54, 5 }
 0x1e9   : > { %4909 = vmatmul.bf16.gmra.mxu2 %v6252_v56  ;;  %v4095_v23 = vor.u32 %v4094_v43, %v7901_v16  ;;  %v4627_v56 = vunpack.c.l.b16 %v4406_v17  ;;  %v2101_v10 = vpack.c.b16 %v2077_v49, %v2076_v11  ;;  %v4116_v43 = vshrl.u32 %v7916_v31, 16 }
 0x1ea   : > { %v3670_v47 = vpop.f32.mrf.mxu3  ;;  %v5942_v17 = vrot.slane %v4301_v18, 9  ;;  %v4105_v11 = vrot.slane %v4103_v36, 4  ;;  %v5543_v18 = vrot.slane %v1747_v39, 9 }
 0x1eb   : > { %v3671_v12 = vadd.f32 %v3670_v47, %v3438_v53  ;;  %v4096_v34 = vrot.slane %v4095_v23, 4  ;;  %v4652_v47 = vpack.c.b16 %v4627_v56, %v4626_v3  ;;  %v4114_v3 = vrot.slane %v4112_v4, 5 }
 0x1ec   : > { %v3353_v60 = vpop.f32.mrf.mxu1  ;;  %v3759_v41 = vpop.f32.mrf.mxu0  ;;  %v4118_v56 = vrot.slane %v4116_v43, 4  ;;  %v4109_v36 = vor.u32 %v4108_v24, %v4105_v11 }
 0x1ed   : > { %v3440_v58 = vpop.f32.mrf.mxu2  ;;  %v7918_v53 = vadd.f32 %v3759_v41, %v3671_v12  ;;  %v1864_v41 = vrot.slane %v6529_v26, 5  ;;  %v4101_v46 = vsel %vm7046_vm11, %v4096_v34, %v4100_v5  ;;  %v6530_v26 = vld [vmem:[#allocation2 + $0x68] sm:$0x1]  ;;  %v7932_v34 = vld [vmem:[#allocation2 + $0x80] sm:$0x1] }
 0x1ee   : > { %v3441_v62 = vadd.f32 %v3440_v58, %v3352_v63  ;;  %v8269_v63 = vld [vmem:[#allocation9_spill] sm:$0xff]  ;;  %v4412_v58 = vrot.slane %v7903_v48, 5  ;;  %v4410_v48 = vsel %vm7085_vm14, %v5942_v17, %v4409_v42  ;;  %v8270_v42 = vld [vmem:[#allocation10_spill] sm:$0xff] }
 0x1ef   : > { %8268 = vst [vmem:[#allocation6_spill] sm:$0xff] %v7918_v53  ;;  %4998 = vmatmul.bf16.gmra.mxu3 %v4588_v27  ;;  %v3354_v23 = vadd.f32 %v3353_v60, %v8269_v63  ;;  %v1867_v60 = vrot.slane %v6530_v26, 5  ;;  %v4564_v63 = vunpack.c.l.b16 %v4091_v35  ;;  %v4565_v53 = vunpack.c.l.b16 %v4101_v46  ;;  %v7947_v26 = vld [vmem:[#allocation2 + $0x88] sm:$0xf] }
 0x1f0   : > { %v4413_v5 = vsel %vm7085_vm14, %v4411_v1, %v4412_v58  ;;  %v1865_v4 = vsel %vm7085_vm14, %v5543_v18, %v1864_v41 }
 0x1f1   : > { %v4589_v39 = vpack.c.b16 %v4565_v53, %v4564_v63  ;;  %v4629_v1 = vunpack.c.l.b16 %v4413_v5  ;;  %v2078_v58 = vunpack.c.l.b16 %v1865_v4 }
 0x1f2   : > { %v3673_v55 = vpop.f32.mrf.mxu3 }
 0x1f3   : > { %v3674_v27 = vadd.f32 %v3673_v55, %v3441_v62  ;;  %v1866_v55 = vrot.slane %v1864_v41, 4 }
 0x1f4   : > { %v3356_v13 = vpop.f32.mrf.mxu1  ;;  %v3762_v12 = vpop.f32.mrf.mxu0 }
 0x1f5   : > { %v3442_v49 = vpop.f32.mrf.mxu2  ;;  %v7930_v62 = vadd.f32 %v3762_v12, %v3674_v27  ;;  %v1868_v43 = vsel %vm7085_vm14, %v1866_v55, %v1867_v60  ;;  %v4122_v12 = vshll.u32 %v7932_v34, 16  ;;  %v3357_v17 = vadd.f32 %v3356_v13, %v8270_v42  ;;  %v4302_v13 = vld [vmem:[#allocation2 + $0x78] sm:$0xe] }
 0x1f6   : > { %v3443_v16 = vadd.f32 %v3442_v49, %v3354_v23  ;;  %v4628_v23 = vunpack.c.l.b16 %v4410_v48  ;;  %v2079_v11 = vunpack.c.l.b16 %v1868_v43  ;;  %v4110_v49 = vrot.slane %v4109_v36, 4  ;;  %v6531_v36 = vld [vmem:[#allocation2 + $0x70] sm:$0xf] }
 0x1f7   : > { %3815 = vmatmul.bf16.gmra.mxu1 %v2101_v10  ;;  %5087 = vmatmul.bf16.gmra.mxu0 %v4652_v47  ;;  %v4119_v47 = vor.u32 %v4118_v56, %v4114_v3  ;;  %v4124_v41 = vrot.slane %v4122_v12, 5  ;;  %v3880_v56 = vld [vmem:[#allocation2 + $0x84] sm:$0xf]  ;;  %v4416_v55 = vrot.slane %v7916_v31, 5  ;;  %v1748_v31 = vld [vmem:[#allocation2 + $0x6c] sm:$0xe] }
 0x1f8   : > { %v4653_v53 = vpack.c.b16 %v4629_v1, %v4628_v23  ;;  %v4115_v48 = vsel %vm7046_vm11, %v4110_v49, %v4114_v3  ;;  %v4127_v4 = vshrl.u32 %v3880_v56, 16  ;;  %v4130_v12 = vshll.u32 %v3880_v56, 16  ;;  %v6532_v56 = vld [vmem:[#allocation2 + $0x74] sm:$0x1] }
 0x1f9   : > { %4914 = vmatmul.bf16.gmra.mxu2 %v6253_v2  ;;  %v4120_v2 = vrot.slane %v4119_v47, 4  ;;  %v4418_v23 = vrot.slane %v4416_v55, 4  ;;  %v4566_v3 = vunpack.c.l.b16 %v4115_v48 }
 0x1fa   : > { %v3675_v10 = vpop.f32.mrf.mxu3 }
 0x1fb   : > { %v3676_v35 = vadd.f32 %v3675_v10, %v3443_v16  ;;  %v2102_v16 = vpack.c.b16 %v2079_v11, %v2078_v58  ;;  %v4125_v5 = vsel %vm7046_vm11, %v4120_v2, %v4124_v41  ;;  %v1871_v10 = vrot.slane %v6531_v36, 5 }
 0x1fc   : > { %v3358_v54 = vpop.f32.mrf.mxu1  ;;  %v3764_v27 = vpop.f32.mrf.mxu0  ;;  %v4419_v58 = vrot.slane %v7932_v34, 5  ;;  %v5544_v2 = vrot.slane %v1748_v31, 9  ;;  %v4129_v36 = vrot.slane %v4127_v4, 4 }
 0x1fd   : > { %v3445_v46 = vpop.f32.mrf.mxu2  ;;  %v7944_v18 = vadd.f32 %v3764_v27, %v3676_v35  ;;  %v4136_v27 = vshll.u32 %v7947_v26, 16  ;;  %v4140_v35 = vshrl.u32 %v7947_v26, 16  ;;  %v1873_v41 = vrot.slane %v1871_v10, 4 }
 0x1fe   : > { %v3446_v24 = vadd.f32 %v3445_v46, %v3357_v17  ;;  %v5943_v17 = vrot.slane %v4302_v13, 9  ;;  %v4567_v46 = vunpack.c.l.b16 %v4125_v5 }
 0x1ff   : > { %8271 = vst [vmem:[#allocation7_spill] sm:$0xff] %v7944_v18  ;;  %5003 = vmatmul.bf16.gmra.mxu3 %v4589_v39  ;;  %v8272_v39 = vld [vmem:[#allocation11_spill] sm:$0xff]  ;;  %v4132_v18 = vrot.slane %v4130_v12, 5  ;;  %v4142_v13 = vrot.slane %v4140_v35, 4 }
 0x200   : > { %v3359_v42 = vadd.f32 %v3358_v54, %v8272_v39  ;;  %v4138_v54 = vrot.slane %v4136_v27, 5  ;;  %v7961_v39 = vld [vmem:[#allocation2 + $0x8c] sm:$0x1]  ;;  %v4590_v34 = vpack.c.b16 %v4567_v46, %v4566_v3 }
 0x201   : > { %v4133_v12 = vor.u32 %v4132_v18, %v4129_v36 }
 0x202   : > { %v3678_v60 = vpop.f32.mrf.mxu3  ;;  %v4143_v27 = vor.u32 %v4142_v13, %v4138_v54 }
 0x203   : > { %v3679_v47 = vadd.f32 %v3678_v60, %v3446_v24  ;;  %v6254_v24 = vld [vmem:[#allocation2 + $0x78] sm:$0xff]  ;;  %v1874_v60 = vrot.slane %v6532_v56, 5 }
 0x204   : > { %v7949_v63 = vpop.f32.mrf.mxu1  ;;  %v3767_v43 = vpop.f32.mrf.mxu0  ;;  %v6533_v56 = vld [vmem:[#allocation2 + $0x7c] sm:$0xf] }
 0x205   : > { %v3447_v1 = vpop.f32.mrf.mxu2  ;;  %v7959_v11 = vadd.f32 %v3767_v43, %v3679_v47  ;;  %v1872_v43 = vsel %vm7085_vm14, %v5544_v2, %v1871_v10  ;;  %v1875_v4 = vsel %vm7085_vm14, %v1873_v41, %v1874_v60  ;;  %v4144_v10 = vrot.slane %v4143_v27, 4  ;;  %v3882_v2 = vld [vmem:[#allocation2 + $0x90] sm:$0xf] }
 0x206   : > { %v3448_v49 = vadd.f32 %v3447_v1, %v3359_v42  ;;  %v2080_v42 = vunpack.c.l.b16 %v1872_v43  ;;  %v4423_v41 = vrot.slane %v7947_v26, 5  ;;  %v1878_v60 = vrot.slane %v6533_v56, 5  ;;  %v6255_v56 = vld [vmem:[#allocation2 + $0x84] sm:$0xff] }
 0x207   : > { %3820 = vmatmul.bf16.gmra.mxu1 %v2102_v16  ;;  %8273 = vst [vmem:[#allocation8_spill] sm:$0xff] %v7959_v11  ;;  %5092 = vmatmul.bf16.gmra.mxu0 %v4653_v53  ;;  %v4417_v16 = vsel %vm7085_vm14, %v5943_v17, %v4416_v55  ;;  %v4420_v53 = vsel %vm7085_vm14, %v4418_v23, %v4419_v58  ;;  %v4146_v55 = vshll.u32 %v7961_v39, 16  ;;  %v2081_v17 = vunpack.c.l.b16 %v1875_v4  ;;  %v4303_v23 = vld [vmem:[#allocation2 + $0x84] sm:$0xe] }
 0x208   : > { %v4630_v1 = vunpack.c.l.b16 %v4417_v16  ;;  %v4631_v3 = vunpack.c.l.b16 %v4420_v53  ;;  %v4134_v58 = vrot.slane %v4133_v12, 4  ;;  %v5944_v16 = vrot.slane %v4303_v23, 9  ;;  %v1749_v53 = vld [vmem:[#allocation2 + $0x78] sm:$0xe]  ;;  %v6534_v23 = vld [vmem:[#allocation2 + $0x80] sm:$0x1] }
 0x209   : > { %4919 = vmatmul.bf16.gmra.mxu2 %v6254_v24  ;;  %v4148_v24 = vrot.slane %v4146_v55, 5  ;;  %v2103_v18 = vpack.c.b16 %v2081_v17, %v2080_v42  ;;  %v4151_v43 = vshrl.u32 %v3882_v2, 16  ;;  %v4154_v4 = vshll.u32 %v3882_v2, 16 }
 0x20a   : > { %v3680_v48 = vpop.f32.mrf.mxu3  ;;  %v4654_v36 = vpack.c.b16 %v4631_v3, %v4630_v1  ;;  %v4425_v55 = vrot.slane %v4423_v41, 4  ;;  %v4426_v42 = vrot.slane %v7961_v39, 5  ;;  %v5545_v1 = vrot.slane %v1749_v53, 9 }
 0x20b   : > { %v3681_v31 = vadd.f32 %v3680_v48, %v3448_v49  ;;  %v7977_v49 = vld [vmem:[#allocation2 + $0x94] sm:$0xf]  ;;  %v4149_v26 = vsel %vm7046_vm11, %v4144_v10, %v4148_v24  ;;  %v1880_v3 = vrot.slane %v1878_v60, 4  ;;  %v1881_v2 = vrot.slane %v6534_v23, 5 }
 0x20c   : > { %v7967_v5 = vpop.f32.mrf.mxu1  ;;  %v3769_v47 = vpop.f32.mrf.mxu0  ;;  %v4164_v12 = vshrl.u32 %v7977_v49, 16  ;;  %v4156_v10 = vrot.slane %v4154_v4, 5  ;;  %v4424_v24 = vsel %vm7085_vm14, %v5944_v16, %v4423_v41  ;;  %v4427_v39 = vsel %vm7085_vm14, %v4425_v55, %v4426_v42 }
 0x20d   : > { %v4880_v35 = vpop.f32.mrf.mxu2  ;;  %v7974_v46 = vadd.f32 %v3769_v47, %v3681_v31  ;;  %v4139_v47 = vsel %vm7046_vm11, %v4134_v58, %v4138_v54  ;;  %v4160_v31 = vshll.u32 %v7977_v49, 16  ;;  %v4569_v58 = vunpack.c.l.b16 %v4149_v26 }
 0x20e   : > { %v4568_v54 = vunpack.c.l.b16 %v4139_v47  ;;  %v1882_v53 = vsel %vm7085_vm14, %v1880_v3, %v1881_v2  ;;  %v4632_v16 = vunpack.c.l.b16 %v4424_v24 }
 0x20f   : > { %8274 = vst [vmem:[#allocation9_spill] sm:$0xff] %v7974_v46  ;;  %5008 = vmatmul.bf16.gmra.mxu3 %v4590_v34  ;;  %v4153_v46 = vrot.slane %v4151_v43, 4  ;;  %v7990_v11 = vrot.slane %v4160_v31, 5  ;;  %v8275_v43 = vld [vmem:[#allocation12_spill] sm:$0xff]  ;;  %v2083_v3 = vunpack.c.l.b16 %v1882_v53 }
 0x210   : > { %v3782_v4 = vadd.f32 %v7949_v63, %v8275_v43  ;;  %v4591_v41 = vpack.c.b16 %v4569_v58, %v4568_v54  ;;  %v3784_v63 = vadd.f32 %v7967_v5, %v7518_v44  ;;  %v6535_v43 = vld [vmem:[#allocation2 + $0x88] sm:$0xf] }
 0x212   : > { %v4969_v13 = vpop.f32.mrf.mxu3 }
 0x213   : > { %v4970_v27 = vadd.f32 %v4969_v13, %v4880_v35  ;;  %v4166_v35 = vrot.slane %v4164_v12, 4 }
 0x214   : > { %v7979_v48 = vpop.f32.mrf.mxu1  ;;  %v5058_v34 = vpop.f32.mrf.mxu0 }
 0x215   : > { %v4882_v17 = vpop.f32.mrf.mxu2  ;;  %v5059_v13 = vadd.f32 %v5058_v34, %v4970_v27  ;;  %v4157_v34 = vor.u32 %v4156_v10, %v4153_v46  ;;  %v4633_v27 = vunpack.c.l.b16 %v4427_v39  ;;  %v4167_v55 = vor.u32 %v4166_v35, %v7990_v11  ;;  %v4304_v35 = vld [vmem:[#allocation2 + $0x90] sm:$0xe] }
 0x216   : > { %v4430_v46 = vrot.slane %v7977_v49, 5 }
 0x217   : > { %3825 = vmatmul.bf16.gmra.mxu1 %v2103_v18  ;;  %5097 = vmatmul.bf16.gmra.mxu0 %v4654_v36  ;;  %v7994_v18 = vld [vmem:[#allocation2 + $0x98] sm:$0x1]  ;;  %v1879_v36 = vsel %vm7085_vm14, %v5545_v1, %v1878_v60  ;;  %v5138_v42 = vadd.f32 %v5059_v13, %v3782_v4  ;;  %v4158_v54 = vrot.slane %v4157_v34, 4  ;;  %v4168_v10 = vrot.slane %v4167_v55, 4  ;;  %v1750_v55 = vld [vmem:[#allocation2 + $0x84] sm:$0xe] }
 0x218   : > { %v4170_v60 = vshll.u32 %v7994_v18, 16  ;;  %v2082_v1 = vunpack.c.l.b16 %v1879_v36  ;;  %v1885_v4 = vrot.slane %v6535_v43, 5 }
 0x219   : > { %4924 = vmatmul.bf16.gmra.mxu2 %v6255_v56  ;;  %v3884_v56 = vld [vmem:[#allocation2 + $0x9c] sm:$0xf]  ;;  %v5272_v39 = vmul.f32 %v5138_v42, %v5138_v42  ;;  %v4163_v34 = vsel %vm7046_vm11, %v4158_v54, %v7990_v11 }
 0x21a   : > { %v4971_v47 = vpop.f32.mrf.mxu3  ;;  %v4172_v24 = vrot.slane %v4170_v60, 5  ;;  %v2104_v44 = vpack.c.b16 %v2083_v3, %v2082_v1  ;;  %v4175_v5 = vshrl.u32 %v3884_v56, 16  ;;  %v4178_v13 = vshll.u32 %v3884_v56, 16 }
 0x21b   : > { %v4972_v12 = vadd.f32 %v4971_v47, %v4882_v17  ;;  %v4655_v17 = vpack.c.b16 %v4633_v27, %v4632_v16  ;;  %v8016_v47 = vld [vmem:[#allocation2 + $0xa0] sm:$0xf]  ;;  %v4433_v27 = vrot.slane %v7994_v18, 5  ;;  %v5546_v18 = vrot.slane %v1750_v55, 9 }
 0x21c   : > { %v8002_v26 = vpop.f32.mrf.mxu1  ;;  %v5060_v31 = vpop.f32.mrf.mxu0  ;;  %v4180_v56 = vrot.slane %v4178_v13, 5  ;;  %v4188_v11 = vshrl.u32 %v8016_v47, 16 }
 0x21d   : > { %v5061_v23 = vadd.f32 %v5060_v31, %v4972_v12  ;;  %v4885_v2 = vpop.f32.mrf.mxu2  ;;  %v5945_v31 = vrot.slane %v4304_v35, 9  ;;  %v4432_v12 = vrot.slane %v4430_v46, 4 }
 0x21f   : > { %v5139_v58 = vadd.f32 %v5061_v23, %v3784_v63  ;;  %5013 = vmatmul.bf16.gmra.mxu3 %v4591_v41  ;;  %v4173_v63 = vsel %vm7046_vm11, %v4168_v10, %v4172_v24  ;;  %v4177_v23 = vrot.slane %v4175_v5, 4  ;;  %v4431_v10 = vsel %vm7085_vm14, %v5945_v31, %v4430_v46  ;;  %v8035_v5 = vld [vmem:[#allocation2 + $0xa4] sm:$0x1] }
 0x220   : > { %v4434_v24 = vsel %vm7085_vm14, %v4432_v12, %v4433_v27  ;;  %v4634_v46 = vunpack.c.l.b16 %v4431_v10 }
 0x221   : > { %v6353_v36 = vpack.c.bf16 %v5139_v58, %v5138_v42  ;;  %v5234_v53 = vadd.f32 %v5139_v58, %v5138_v42  ;;  %v5273_v49 = vmul.f32 %v5139_v58, %v5139_v58  ;;  %v3787_v42 = vadd.f32 %v7979_v48, %v7528_v0  ;;  %v6256_v0 = vld [vmem:[#allocation2 + $0x90] sm:$0xff] }
 0x222   : > { %v4974_v41 = vpop.f32.mrf.mxu3  ;;  %v4184_v58 = vshll.u32 %v8016_v47, 16  ;;  %v4570_v48 = vunpack.c.l.b16 %v4163_v34  ;;  %v4181_v13 = vor.u32 %v4180_v56, %v4177_v23  ;;  %v4635_v23 = vunpack.c.l.b16 %v4434_v24 }
 0x223   : > { %6354 = vst [vmem:[%s8014_s26] sm:$0xff] %v6353_v36   ;;  %v5304_v60 = vadd.f32 %v5273_v49, %v5272_v39  ;;  %v4975_v3 = vadd.f32 %v4974_v41, %v4885_v2  ;;  %v1887_v36 = vrot.slane %v1885_v4, 4  ;;  %v6536_v39 = vld [vmem:[#allocation2 + $0x8c] sm:$0x1]  ;;  %v4571_v2 = vunpack.c.l.b16 %v4173_v63 }
 0x224   : > { %v8018_v16 = vpop.f32.mrf.mxu1  ;;  %v5063_v1 = vpop.f32.mrf.mxu0  ;;  %v1888_v49 = vrot.slane %v6536_v39, 5  ;;  %v4186_v41 = vrot.slane %v4184_v58, 5  ;;  %v4194_v56 = vshll.u32 %v8035_v5, 16 }
 0x225   : > { %v5064_v54 = vadd.f32 %v5063_v1, %v4975_v3  ;;  %v4887_v35 = vpop.f32.mrf.mxu2  ;;  %v4592_v3 = vpack.c.b16 %v4571_v2, %v4570_v48  ;;  %v8046_v48 = vld [vmem:[#allocation2 + $0xac] sm:$0xf] }
 0x226   : > { %v1889_v34 = vsel %vm7085_vm14, %v1887_v36, %v1888_v49  ;;  %v4656_v49 = vpack.c.b16 %v4635_v23, %v4634_v46  ;;  %v4196_v10 = vrot.slane %v4194_v56, 5 }
 0x227   : > { %3830 = vmatmul.bf16.gmra.mxu1 %v2104_v44  ;;  %5102 = vmatmul.bf16.gmra.mxu0 %v4655_v17  ;;  %v5140_v43 = vadd.f32 %v5064_v54, %v3787_v42  ;;  %v4190_v44 = vrot.slane %v4188_v11, 4  ;;  %v1886_v17 = vsel %vm7085_vm14, %v5546_v18, %v1885_v4  ;;  %v2085_v58 = vunpack.c.l.b16 %v1889_v34 }
 0x228   : > { %v4182_v11 = vrot.slane %v4181_v13, 4  ;;  %v3789_v4 = vadd.f32 %v8002_v26, %v7559_v33  ;;  %v6537_v33 = vld [vmem:[#allocation2 + $0x94] sm:$0xf] }
 0x229   : > { %v5235_v55 = vadd.f32 %v5234_v53, %v5140_v43  ;;  %v5274_v1 = vmul.f32 %v5140_v43, %v5140_v43  ;;  %4929 = vmatmul.bf16.gmra.mxu2 %v6256_v0  ;;  %v2084_v53 = vunpack.c.l.b16 %v1886_v17  ;;  %v4191_v54 = vor.u32 %v4190_v44, %v4186_v41  ;;  %v3886_v0 = vld [vmem:[#allocation2 + $0xa8] sm:$0xf] }
 0x22a   : > { %v4976_v42 = vpop.f32.mrf.mxu3  ;;  %v1892_v26 = vrot.slane %v6537_v33, 5  ;;  %v4202_v46 = vshll.u32 %v3886_v0, 16 }
 0x22b   : > { %v5305_v12 = vadd.f32 %v5304_v60, %v5274_v1  ;;  %v4977_v63 = vadd.f32 %v4976_v42, %v4887_v35  ;;  %v2105_v60 = vpack.c.b16 %v2085_v58, %v2084_v53  ;;  %v4187_v35 = vsel %vm7046_vm11, %v4182_v11, %v4186_v41  ;;  %v4305_v1 = vld [vmem:[#allocation2 + $0x9c] sm:$0xe]  ;;  %v1751_v42 = vld [vmem:[#allocation2 + $0x90] sm:$0xe] }
 0x22c   : > { %v8041_v31 = vpop.f32.mrf.mxu1  ;;  %v5065_v27 = vpop.f32.mrf.mxu0  ;;  %v4192_v2 = vrot.slane %v4191_v54, 4  ;;  %v4572_v58 = vunpack.c.l.b16 %v4187_v35  ;;  %v5946_v11 = vrot.slane %v4305_v1, 9  ;;  %v4440_v35 = vrot.slane %v8035_v5, 5 }
 0x22d   : > { %v5066_v18 = vadd.f32 %v5065_v27, %v4977_v63  ;;  %v4890_v36 = vpop.f32.mrf.mxu2  ;;  %v4208_v27 = vshll.u32 %v8046_v48, 16  ;;  %v4212_v63 = vshrl.u32 %v8046_v48, 16 }
 0x22e   : > { %v4197_v53 = vsel %vm7046_vm11, %v4192_v2, %v4196_v10  ;;  %v8063_v2 = vld [vmem:[#allocation2 + $0xb0] sm:$0x1] }
 0x22f   : > { %v5141_v39 = vadd.f32 %v5066_v18, %v3789_v4  ;;  %5018 = vmatmul.bf16.gmra.mxu3 %v4592_v3  ;;  %v4199_v3 = vshrl.u32 %v3886_v0, 16  ;;  %v5547_v18 = vrot.slane %v1751_v42, 9  ;;  %v6538_v0 = vld [vmem:[#allocation2 + $0x98] sm:$0x1]  ;;  %v4214_v33 = vrot.slane %v4212_v63, 4 }
 0x230   : > { %v4218_v63 = vshll.u32 %v8063_v2, 16 }
 0x231   : > { %v6358_v24 = vpack.c.bf16 %v5141_v39, %v5140_v43  ;;  %v5236_v13 = vadd.f32 %v5235_v55, %v5141_v39  ;;  %v5275_v44 = vmul.f32 %v5141_v39, %v5141_v39  ;;  %v4437_v43 = vrot.slane %v8016_v47, 5 }
 0x232   : > { %v4979_v17 = vpop.f32.mrf.mxu3  ;;  %v3792_v55 = vadd.f32 %v8018_v16, %v7561_v14  ;;  %v1894_v39 = vrot.slane %v1892_v26, 4  ;;  %v8060_v47 = vrot.slane %v4208_v27, 5  ;;  %v4573_v16 = vunpack.c.l.b16 %v4197_v53 }
 0x233   : > { %6445 = vst [vmem:[%s8014_s26 + $0x8] sm:$0xff] %v6358_v24   ;;  %v5306_v41 = vadd.f32 %v5305_v12, %v5275_v44  ;;  %v4980_v56 = vadd.f32 %v4979_v17, %v4890_v36  ;;  %v1895_v24 = vrot.slane %v6538_v0, 5  ;;  %v6257_v12 = vld [vmem:[#allocation2 + $0x9c] sm:$0xff]  ;;  %v4201_v36 = vrot.slane %v4199_v3, 4 }
 0x234   : > { %v8050_v34 = vpop.f32.mrf.mxu1  ;;  %v5068_v23 = vpop.f32.mrf.mxu0  ;;  %v4204_v44 = vrot.slane %v4202_v46, 5  ;;  %v4439_v17 = vrot.slane %v4437_v43, 4  ;;  %v1893_v1 = vsel %vm7085_vm14, %v5547_v18, %v1892_v26  ;;  %v4438_v3 = vsel %vm7085_vm14, %v5946_v11, %v4437_v43  ;;  %v3888_v18 = vld [vmem:[#allocation2 + $0xb4] sm:$0xf] }
 0x235   : > { %v5069_v54 = vadd.f32 %v5068_v23, %v4980_v56  ;;  %v4892_v4 = vpop.f32.mrf.mxu2  ;;  %v4215_v5 = vor.u32 %v4214_v33, %v8060_v47  ;;  %v2086_v53 = vunpack.c.l.b16 %v1893_v1  ;;  %v3794_v43 = vadd.f32 %v8041_v31, %v7604_v40  ;;  %v6539_v1 = vld [vmem:[#allocation2 + $0xa0] sm:$0xf] }
 0x236   : > { %v4205_v27 = vor.u32 %v4204_v44, %v4201_v36  ;;  %v4441_v26 = vsel %vm7085_vm14, %v4439_v17, %v4440_v35  ;;  %v4220_v44 = vrot.slane %v4218_v63, 5  ;;  %v4226_v33 = vshll.u32 %v3888_v18, 16 }
 0x237   : > { %3835 = vmatmul.bf16.gmra.mxu1 %v2105_v60  ;;  %5107 = vmatmul.bf16.gmra.mxu0 %v4656_v49  ;;  %v5142_v14 = vadd.f32 %v5069_v54, %v3792_v55  ;;  %v1896_v49 = vsel %vm7085_vm14, %v1894_v39, %v1895_v24  ;;  %v4593_v55 = vpack.c.b16 %v4573_v16, %v4572_v58  ;;  %v4636_v39 = vunpack.c.l.b16 %v4438_v3  ;;  %v8079_v24 = vld [vmem:[#allocation2 + $0xb8] sm:$0xf] }
 0x238   : > { %v2087_v54 = vunpack.c.l.b16 %v1896_v49  ;;  %v4206_v36 = vrot.slane %v4205_v27, 4  ;;  %v4223_v58 = vshrl.u32 %v3888_v18, 16  ;;  %v4232_v17 = vshll.u32 %v8079_v24, 16 }
 0x239   : > { %v5237_v10 = vadd.f32 %v5236_v13, %v5142_v14  ;;  %v5276_v60 = vmul.f32 %v5142_v14, %v5142_v14  ;;  %4934 = vmatmul.bf16.gmra.mxu2 %v6257_v12  ;;  %v4637_v12 = vunpack.c.l.b16 %v4441_v26  ;;  %v4236_v35 = vshrl.u32 %v8079_v24, 16  ;;  %v4306_v26 = vld [vmem:[#allocation2 + $0xa8] sm:$0xe] }
 0x23a   : > { %v4981_v42 = vpop.f32.mrf.mxu3  ;;  %v2106_v16 = vpack.c.b16 %v2087_v54, %v2086_v53  ;;  %v1899_v49 = vrot.slane %v6539_v1, 5  ;;  %v4225_v53 = vrot.slane %v4223_v58, 4  ;;  %v4228_v54 = vrot.slane %v4226_v33, 5 }
 0x23b   : > { %v5307_v13 = vadd.f32 %v5306_v41, %v5276_v60  ;;  %v4982_v56 = vadd.f32 %v4981_v42, %v4892_v4  ;;  %v4216_v41 = vrot.slane %v4215_v5, 4  ;;  %v4657_v42 = vpack.c.b16 %v4637_v12, %v4636_v39 }
 0x23c   : > { %v8071_v46 = vpop.f32.mrf.mxu1  ;;  %v5070_v23 = vpop.f32.mrf.mxu0  ;;  %v4211_v5 = vsel %vm7046_vm11, %v4206_v36, %v8060_v47  ;;  %v3797_v18 = vadd.f32 %v8050_v34, %v7606_v32  ;;  %v1901_v36 = vrot.slane %v1899_v49, 4  ;;  %v5947_v58 = vrot.slane %v4306_v26, 9 }
 0x23d   : > { %v5071_v11 = vadd.f32 %v5070_v23, %v4982_v56  ;;  %v4895_v0 = vpop.f32.mrf.mxu2  ;;  %v4221_v63 = vsel %vm7046_vm11, %v4216_v41, %v4220_v44  ;;  %v4444_v23 = vrot.slane %v8046_v48, 5  ;;  %v1752_v56 = vld [vmem:[#allocation2 + $0x9c] sm:$0xe]  ;;  %v6540_v48 = vld [vmem:[#allocation2 + $0xa4] sm:$0x1]  ;;  %v4447_v34 = vrot.slane %v8063_v2, 5 }
 0x23e   : > { %v5548_v12 = vrot.slane %v1752_v56, 9  ;;  %v1902_v41 = vrot.slane %v6540_v48, 5  ;;  %v8096_v44 = vld [vmem:[#allocation2 + $0xbc] sm:$0x1] }
 0x23f   : > { %v5143_v4 = vadd.f32 %v5071_v11, %v3794_v43  ;;  %5023 = vmatmul.bf16.gmra.mxu3 %v4593_v55  ;;  %v8094_v43 = vrot.slane %v4232_v17, 5  ;;  %v4238_v11 = vrot.slane %v4236_v35, 4  ;;  %v4446_v33 = vrot.slane %v4444_v23, 4 }
 0x240   : > { %v4229_v17 = vor.u32 %v4228_v54, %v4225_v53  ;;  %v4242_v1 = vshll.u32 %v8096_v44, 16 }
 0x241   : > { %v6363_v40 = vpack.c.bf16 %v5143_v4, %v5142_v14  ;;  %v5238_v31 = vadd.f32 %v5237_v10, %v5143_v4  ;;  %v5277_v60 = vmul.f32 %v5143_v4, %v5143_v4  ;;  %v4575_v4 = vunpack.c.l.b16 %v4221_v63 }
 0x242   : > { %v4984_v3 = vpop.f32.mrf.mxu3  ;;  %v1903_v63 = vsel %vm7085_vm14, %v1901_v36, %v1902_v41  ;;  %v3799_v36 = vadd.f32 %v8071_v46, %v7637_v21  ;;  %v4451_v21 = vrot.slane %v8079_v24, 5 }
 0x243   : > { %6446 = vst [vmem:[%s8014_s26 + $0x10] sm:$0xff] %v6363_v40   ;;  %v5308_v14 = vadd.f32 %v5307_v13, %v5277_v60  ;;  %v4985_v55 = vadd.f32 %v4984_v3, %v4895_v0  ;;  %v6258_v13 = vld [vmem:[#allocation2 + $0xa8] sm:$0xff]  ;;  %v4574_v0 = vunpack.c.l.b16 %v4211_v5  ;;  %v4239_v60 = vor.u32 %v4238_v11, %v8094_v43 }
 0x244   : > { %v8083_v27 = vpop.f32.mrf.mxu1  ;;  %v5073_v10 = vpop.f32.mrf.mxu0  ;;  %v753_v40 = vld [vmem:[#allocation2 + $0xcc] sm:$0x1]  ;;  %v1900_v5 = vsel %vm7085_vm14, %v5548_v12, %v1899_v49  ;;  %v2089_v49 = vunpack.c.l.b16 %v1903_v63  ;;  %v4244_v12 = vrot.slane %v4242_v1, 5 }
 0x245   : > { %v5074_v47 = vadd.f32 %v5073_v10, %v4985_v55  ;;  %v4897_v39 = vpop.f32.mrf.mxu2  ;;  %v4594_v2 = vpack.c.b16 %v4575_v4, %v4574_v0  ;;  %v4445_v10 = vsel %vm7085_vm14, %v5947_v58, %v4444_v23  ;;  %v2088_v11 = vunpack.c.l.b16 %v1900_v5  ;;  %v3890_v0 = vld [vmem:[#allocation2 + $0xc0] sm:$0xf] }
 0x246   : > { %v4247_v35 = vshrl.u32 %v3890_v0, 16  ;;  %v4250_v63 = vshll.u32 %v3890_v0, 16  ;;  %v8131_v0 = vld [vmem:[#allocation2 + $0xc8] sm:$0x1] }
 0x247   : > { %3840 = vmatmul.bf16.gmra.mxu1 %v2106_v16  ;;  %5112 = vmatmul.bf16.gmra.mxu0 %v4657_v42  ;;  %v5144_v32 = vadd.f32 %v5074_v47, %v3797_v18  ;;  %v754_v16 = vsel %vm6644_vm2, 0, %v753_v40  ;;  %v4230_v18 = vrot.slane %v4229_v17, 4  ;;  %v4240_v47 = vrot.slane %v4239_v60, 4  ;;  %v4307_v17 = vld [vmem:[#allocation2 + $0xb4] sm:$0xe] }
 0x248   : > { %755 = vst [vmem:[#allocation2 + $0xcc] sm:$0x1] %v754_v16 }
 0x249   : > { %v5239_v3 = vadd.f32 %v5238_v31, %v5144_v32  ;;  %v5278_v42 = vmul.f32 %v5144_v32, %v5144_v32  ;;  %4939 = vmatmul.bf16.gmra.mxu2 %v6258_v13  ;;  %v4448_v31 = vsel %vm7085_vm14, %v4446_v33, %v4447_v34  ;;  %v4638_v13 = vunpack.c.l.b16 %v4445_v10 }
 0x24a   : > { %v4986_v56 = vpop.f32.mrf.mxu3  ;;  %v4639_v23 = vunpack.c.l.b16 %v4448_v31  ;;  %v4235_v58 = vsel %vm7046_vm11, %v4230_v18, %v8094_v43  ;;  %v4245_v33 = vsel %vm7046_vm11, %v4240_v47, %v4244_v12  ;;  %v5948_v18 = vrot.slane %v4307_v17, 9 }
 0x24b   : > { %v5309_v26 = vadd.f32 %v5308_v14, %v5278_v42  ;;  %v4987_v54 = vadd.f32 %v4986_v56, %v4897_v39  ;;  %v8115_v14 = vld [vmem:[#allocation2 + $0xc4] sm:$0xf]  ;;  %v2107_v39 = vpack.c.b16 %v2089_v49, %v2088_v11  ;;  %v6541_v42 = vld [vmem:[#allocation2 + $0xac] sm:$0xf]  ;;  %v4577_v31 = vunpack.c.l.b16 %v4245_v33 }
 0x24c   : > { %v8109_v55 = vpop.f32.mrf.mxu1  ;;  %v5075_v53 = vpop.f32.mrf.mxu0  ;;  %v4658_v16 = vpack.c.b16 %v4639_v23, %v4638_v13  ;;  %v1906_v5 = vrot.slane %v6541_v42, 5  ;;  %v4256_v56 = vshll.u32 %v8115_v14, 16  ;;  %v4260_v24 = vshrl.u32 %v8115_v14, 16  ;;  %v6542_v13 = vld [vmem:[#allocation2 + $0xb0] sm:$0x1] }
 0x24d   : > { %v5076_v48 = vadd.f32 %v5075_v53, %v4987_v54  ;;  %v4900_v41 = vpop.f32.mrf.mxu2  ;;  %v1753_v53 = vld [vmem:[#allocation2 + $0xa8] sm:$0xe]  ;;  %v4576_v54 = vunpack.c.l.b16 %v4235_v58  ;;  %v4453_v47 = vrot.slane %v4451_v21, 4  ;;  %v4454_v12 = vrot.slane %v8096_v44, 5 }
 0x24e   : > { %v1909_v23 = vrot.slane %v6542_v13, 5  ;;  %v4252_v33 = vrot.slane %v4250_v63, 5 }
 0x24f   : > { %v5145_v4 = vadd.f32 %v5076_v48, %v3799_v36  ;;  %5028 = vmatmul.bf16.gmra.mxu3 %v4594_v2  ;;  %v4249_v36 = vrot.slane %v4247_v35, 4  ;;  %v5549_v48 = vrot.slane %v1753_v53, 9  ;;  %v4595_v17 = vpack.c.b16 %v4577_v31, %v4576_v54 }
 0x250   : > { %v4452_v35 = vsel %vm7085_vm14, %v5948_v18, %v4451_v21 }
 0x251   : > { %v6368_v46 = vpack.c.bf16 %v5145_v4, %v5144_v32  ;;  %v5240_v40 = vadd.f32 %v5239_v3, %v5145_v4  ;;  %v5279_v34 = vmul.f32 %v5145_v4, %v5145_v4  ;;  %v1297_v32 = vld [vmem:[#allocation2 + $0xcc] sm:$0xf]  ;;  %v3802_v3 = vadd.f32 %v8083_v27, %v7639_v30  ;;  %v4308_v30 = vld [vmem:[#allocation2 + $0xc0] sm:$0xe] }
 0x252   : > { %v4989_v60 = vpop.f32.mrf.mxu3  ;;  %v8277_v4 = vld [vmem:[#allocation5_spill] sm:$0xff] }
 0x253   : > { %6447 = vst [vmem:[%s8014_s26 + $0x18] sm:$0xff] %v6368_v46   ;;  %v5310_v43 = vadd.f32 %v5309_v26, %v5279_v34  ;;  %v4990_v10 = vadd.f32 %v4989_v60, %v4900_v41  ;;  %v6259_v26 = vld [vmem:[#allocation2 + $0xb4] sm:$0xff]  ;;  %v1908_v41 = vrot.slane %v1906_v5, 4  ;;  %v1298_v27 = vsel %vm6718_vm8, %v8277_v4, %v1297_v32 }
 0x254   : > { %v8123_v1 = vpop.f32.mrf.mxu1  ;;  %v5078_v2 = vpop.f32.mrf.mxu0  ;;  %v4258_v46 = vrot.slane %v4256_v56, 5  ;;  %1299 = vst [vmem:[#allocation2 + $0xcc] sm:$0xf] %v1298_v27  ;;  %v4455_v60 = vsel %vm7085_vm14, %v4453_v47, %v4454_v12  ;;  %v3804_v32 = vadd.f32 %v8109_v55, %v7685_v20  ;;  %v4458_v27 = vrot.slane %v8115_v14, 5 }
 0x255   : > { %v5079_v11 = vadd.f32 %v5078_v2, %v4990_v10  ;;  %v4902_v49 = vpop.f32.mrf.mxu2  ;;  %v1907_v2 = vsel %vm7085_vm14, %v5549_v48, %v1906_v5  ;;  %v1910_v63 = vsel %vm7085_vm14, %v1908_v41, %v1909_v23  ;;  %v4641_v47 = vunpack.c.l.b16 %v4455_v60  ;;  %v8149_v23 = vld [vmem:[#allocation2 + $0xd0] sm:$0xf] }
 0x256   : > { %v2090_v31 = vunpack.c.l.b16 %v1907_v2  ;;  %v2091_v18 = vunpack.c.l.b16 %v1910_v63  ;;  %v4280_v63 = vshll.u32 %v8149_v23, 16  ;;  %v3807_v14 = vadd.f32 %v8123_v1, %v7687_v50 }
 0x257   : > { %3845 = vmatmul.bf16.gmra.mxu1 %v2107_v39  ;;  %5117 = vmatmul.bf16.gmra.mxu0 %v4658_v16  ;;  %v5146_v58 = vadd.f32 %v5079_v11, %v3802_v3  ;;  %v4262_v39 = vrot.slane %v4260_v24, 4  ;;  %v4253_v24 = vor.u32 %v4252_v33, %v4249_v36  ;;  %v4640_v11 = vunpack.c.l.b16 %v4452_v35  ;;  %v6543_v33 = vld [vmem:[#allocation2 + $0xb8] sm:$0xf] }
 0x258   : > { %v2108_v36 = vpack.c.b16 %v2091_v18, %v2090_v31 }
 0x259   : > { %v5241_v34 = vadd.f32 %v5240_v40, %v5146_v58  ;;  %v5280_v44 = vmul.f32 %v5146_v58, %v5146_v58  ;;  %4944 = vmatmul.bf16.gmra.mxu2 %v6259_v26  ;;  %v4266_v40 = vshll.u32 %v8131_v0, 16  ;;  %v4263_v21 = vor.u32 %v4262_v39, %v4258_v46 }
 0x25a   : > { %v4991_v16 = vpop.f32.mrf.mxu3  ;;  %v4254_v12 = vrot.slane %v4253_v24, 4  ;;  %v4659_v20 = vpack.c.b16 %v4641_v47, %v4640_v11  ;;  %v1913_v39 = vrot.slane %v6543_v33, 5  ;;  %v6260_v24 = vld [vmem:[#allocation2 + $0xc0] sm:$0xff]  ;;  %v4460_v11 = vrot.slane %v4458_v27, 4 }
 0x25b   : > { %v5311_v56 = vadd.f32 %v5310_v43, %v5280_v44  ;;  %v4992_v53 = vadd.f32 %v4991_v16, %v4902_v49  ;;  %v4264_v26 = vrot.slane %v4263_v21, 4  ;;  %v4268_v48 = vrot.slane %v4266_v40, 5  ;;  %v3892_v13 = vld [vmem:[#allocation2 + $0xcc] sm:$0xf]  ;;  %v1754_v16 = vld [vmem:[#allocation2 + $0xb4] sm:$0xe] }
 0x25c   : > { %v8140_v42 = vpop.f32.mrf.mxu1  ;;  %v5080_v10 = vpop.f32.mrf.mxu0  ;;  %v4271_v60 = vshrl.u32 %v3892_v13, 16  ;;  %v4274_v2 = vshll.u32 %v3892_v13, 16  ;;  %v4284_v40 = vshrl.u32 %v8149_v23, 16  ;;  %v5550_v21 = vrot.slane %v1754_v16, 9 }
 0x25d   : > { %v5081_v3 = vadd.f32 %v5080_v10, %v4992_v53  ;;  %v4905_v54 = vpop.f32.mrf.mxu2  ;;  %v5949_v53 = vrot.slane %v4308_v30, 9  ;;  %v4461_v47 = vrot.slane %v8131_v0, 5 }
 0x25e   : > { %v4286_v50 = vrot.slane %v4284_v40, 4 }
 0x25f   : > { %v5147_v5 = vadd.f32 %v5081_v3, %v3804_v32  ;;  %5033 = vmatmul.bf16.gmra.mxu3 %v4595_v17  ;;  %v1915_v32 = vrot.slane %v1913_v39, 4  ;;  %v6544_v3 = vld [vmem:[#allocation2 + $0xbc] sm:$0x1] }
 0x261   : > { %v6373_v43 = vpack.c.bf16 %v5147_v5, %v5146_v58  ;;  %v5242_v41 = vadd.f32 %v5241_v34, %v5147_v5  ;;  %v5281_v49 = vmul.f32 %v5147_v5, %v5147_v5  ;;  %v4259_v58 = vsel %vm7046_vm11, %v4254_v12, %v4258_v46 }
 0x262   : > { %v4994_v55 = vpop.f32.mrf.mxu3  ;;  %v4269_v34 = vsel %vm7046_vm11, %v4264_v26, %v4268_v48  ;;  %v4578_v46 = vunpack.c.l.b16 %v4259_v58  ;;  %v4273_v5 = vrot.slane %v4271_v60, 4  ;;  %v4276_v12 = vrot.slane %v4274_v2, 5 }
 0x263   : > { %6448 = vst [vmem:[%s8014_s26 + $0x20] sm:$0xff] %v6373_v43   ;;  %v5312_v44 = vadd.f32 %v5311_v56, %v5281_v49  ;;  %v4995_v35 = vadd.f32 %v4994_v55, %v4905_v54  ;;  %v1916_v54 = vrot.slane %v6544_v3, 5  ;;  %v4579_v18 = vunpack.c.l.b16 %v4269_v34  ;;  %v8164_v43 = vld [vmem:[#allocation2 + $0xd4] sm:$0x1] }
 0x264   : > { %v8151_v4 = vpop.f32.mrf.mxu1  ;;  %v5083_v17 = vpop.f32.mrf.mxu0  ;;  %v4282_v26 = vrot.slane %v4280_v63, 5  ;;  %v4290_v34 = vshll.u32 %v8164_v43, 16 }
 0x265   : > { %v5084_v10 = vadd.f32 %v5083_v17, %v4995_v35  ;;  %v4907_v56 = vpop.f32.mrf.mxu2  ;;  %v1917_v0 = vsel %vm7085_vm14, %v1915_v32, %v1916_v54  ;;  %v4596_v17 = vpack.c.b16 %v4579_v18, %v4578_v46  ;;  %v4277_v35 = vor.u32 %v4276_v12, %v4273_v5 }
 0x266   : > { %v4287_v58 = vor.u32 %v4286_v50, %v4282_v26  ;;  %v2093_v2 = vunpack.c.l.b16 %v1917_v0 }
 0x267   : > { %3850 = vmatmul.bf16.gmra.mxu1 %v2108_v36  ;;  %5122 = vmatmul.bf16.gmra.mxu0 %v4659_v20  ;;  %v5148_v31 = vadd.f32 %v5084_v10, %v3807_v14  ;;  %v4459_v36 = vsel %vm7085_vm14, %v5949_v53, %v4458_v27  ;;  %v1914_v20 = vsel %vm7085_vm14, %v5550_v21, %v1913_v39  ;;  %v4278_v14 = vrot.slane %v4277_v35, 4 }
 0x268   : > { %v3809_v27 = vadd.f32 %v8140_v42, %v7699_v7  ;;  %v2092_v39 = vunpack.c.l.b16 %v1914_v20  ;;  %v4642_v63 = vunpack.c.l.b16 %v4459_v36  ;;  %v4288_v10 = vrot.slane %v4287_v58, 4 }
 0x269   : > { %v5243_v1 = vadd.f32 %v5242_v41, %v5148_v31  ;;  %v5282_v48 = vmul.f32 %v5148_v31, %v5148_v31  ;;  %4949 = vmatmul.bf16.gmra.mxu2 %v6260_v24  ;;  %v4462_v41 = vsel %vm7085_vm14, %v4460_v11, %v4461_v47  ;;  %v4465_v7 = vrot.slane %v8149_v23, 5  ;;  %v4309_v47 = vld [vmem:[#allocation2 + $0xcc] sm:$0xe] }
 0x26a   : > { %v4996_v49 = vpop.f32.mrf.mxu3  ;;  %v2109_v21 = vpack.c.b16 %v2093_v2, %v2092_v39  ;;  %v4283_v5 = vsel %vm7046_vm11, %v4278_v14, %v4282_v26  ;;  %v5950_v23 = vrot.slane %v4309_v47, 9 }
 0x26b   : > { %v5313_v55 = vadd.f32 %v5312_v44, %v5282_v48  ;;  %v4997_v33 = vadd.f32 %v4996_v49, %v4907_v56  ;;  %v4643_v44 = vunpack.c.l.b16 %v4462_v41  ;;  %v4292_v56 = vrot.slane %v4290_v34, 5  ;;  %v6261_v48 = vld [vmem:[#allocation2 + $0xcc] sm:$0xff] }
 0x26c   : > { %v3813_v13 = vpop.f32.mrf.mxu1  ;;  %v5085_v30 = vpop.f32.mrf.mxu0  ;;  %v4467_v49 = vrot.slane %v4465_v7, 4  ;;  %v4580_v20 = vunpack.c.l.b16 %v4283_v5  ;;  %v4466_v19 = vsel %vm7085_vm14, %v5950_v23, %v4465_v7 }
 0x26d   : > { %v5086_v16 = vadd.f32 %v5085_v30, %v4997_v33  ;;  %v4910_v60 = vpop.f32.mrf.mxu2  ;;  %v4660_v32 = vpack.c.b16 %v4643_v44, %v4642_v63  ;;  %v4293_v12 = vsel %vm7046_vm11, %v4288_v10, %v4292_v56  ;;  %v3814_v34 = vadd.f32 %v3813_v13, %v7724_v51 }
 0x26e   : > { %v4581_v0 = vunpack.c.l.b16 %v4293_v12 }
 0x26f   : > { %v5149_v40 = vadd.f32 %v5086_v16, %v3809_v27  ;;  %5038 = vmatmul.bf16.gmra.mxu3 %v4596_v17  ;;  %v4644_v16 = vunpack.c.l.b16 %v4466_v19 }
 0x270   : > { %v4597_v35 = vpack.c.b16 %v4581_v0, %v4580_v20 }
 0x271   : > { %v6378_v53 = vpack.c.bf16 %v5149_v40, %v5148_v31  ;;  %v5244_v24 = vadd.f32 %v5243_v1, %v5149_v40  ;;  %v5283_v46 = vmul.f32 %v5149_v40, %v5149_v40  ;;  %v3812_v31 = vadd.f32 %v8151_v4, %v7714_v22 }
 0x272   : > { %v4999_v3 = vpop.f32.mrf.mxu3 }
 0x273   : > { %6449 = vst [vmem:[%s8014_s26 + $0x28] sm:$0xff] %v6378_v53   ;;  %v5314_v42 = vadd.f32 %v5313_v55, %v5283_v46  ;;  %v5000_v11 = vadd.f32 %v4999_v3, %v4910_v60  ;;  %v4468_v55 = vrot.slane %v8164_v43, 5 }
 0x274   : > { %v3816_v54 = vpop.f32.mrf.mxu1  ;;  %v5088_v18 = vpop.f32.mrf.mxu0 }
 0x275   : > { %v5089_v50 = vadd.f32 %v5088_v18, %v5000_v11  ;;  %v4912_v1 = vpop.f32.mrf.mxu2  ;;  %v4469_v58 = vsel %vm7085_vm14, %v4467_v49, %v4468_v55  ;;  %v3817_v52 = vadd.f32 %v3816_v54, %v7737_v28 }
 0x276   : > { %v4645_v60 = vunpack.c.l.b16 %v4469_v58 }
 0x277   : > { %3855 = vmatmul.bf16.gmra.mxu1 %v2109_v21  ;;  %5127 = vmatmul.bf16.gmra.mxu0 %v4660_v32  ;;  %v5150_v36 = vadd.f32 %v5089_v50, %v3812_v31 }
 0x278   : > { %v4661_v40 = vpack.c.b16 %v4645_v60, %v4644_v16 }
 0x279   : > { %v5245_v30 = vadd.f32 %v5244_v24, %v5150_v36  ;;  %v5284_v26 = vmul.f32 %v5150_v36, %v5150_v36  ;;  %4954 = vmatmul.bf16.gmra.mxu2 %v6261_v48 }
 0x27a   : > { %v5001_v33 = vpop.f32.mrf.mxu3 }
 0x27b   : > { %v5315_v4 = vadd.f32 %v5314_v42, %v5284_v26  ;;  %v5002_v41 = vadd.f32 %v5001_v33, %v4912_v1 }
 0x27c   : > { %v3818_v22 = vpop.f32.mrf.mxu1  ;;  %v5090_v17 = vpop.f32.mrf.mxu0 }
 0x27d   : > { %v5091_v27 = vadd.f32 %v5090_v17, %v5002_v41  ;;  %v4915_v43 = vpop.f32.mrf.mxu2  ;;  %v3819_v47 = vadd.f32 %v3818_v22, %v7751_v25 }
 0x27f   : > { %v5151_v39 = vadd.f32 %v5091_v27, %v3814_v34  ;;  %5043 = vmatmul.bf16.gmra.mxu3 %v4597_v35 }
 0x281   : > { %v6383_v2 = vpack.c.bf16 %v5151_v39, %v5150_v36  ;;  %v5246_v63 = vadd.f32 %v5245_v30, %v5151_v39  ;;  %v5285_v44 = vmul.f32 %v5151_v39, %v5151_v39 }
 0x282   : > { %v5004_v14 = vpop.f32.mrf.mxu3 }
 0x283   : > { %6450 = vst [vmem:[%s8014_s26 + $0x30] sm:$0xff] %v6383_v2   ;;  %v5316_v56 = vadd.f32 %v5315_v4, %v5285_v44  ;;  %v5005_v24 = vadd.f32 %v5004_v14, %v4915_v43 }
 0x284   : > { %v3821_v10 = vpop.f32.mrf.mxu1  ;;  %v5093_v53 = vpop.f32.mrf.mxu0 }
 0x285   : > { %v5094_v46 = vadd.f32 %v5093_v53, %v5005_v24  ;;  %v4917_v51 = vpop.f32.mrf.mxu2  ;;  %v3822_v20 = vadd.f32 %v3821_v10, %v7764_v45 }
 0x287   : > { %5132 = vmatmul.bf16.gmra.mxu0 %v4661_v40  ;;  %v5152_v13 = vadd.f32 %v5094_v46, %v3817_v52 }
 0x289   : > { %v5247_v21 = vadd.f32 %v5246_v63, %v5152_v13  ;;  %v5286_v32 = vmul.f32 %v5152_v13, %v5152_v13 }
 0x28a   : > { %v5006_v3 = vpop.f32.mrf.mxu3 }
 0x28b   : > { %v5317_v42 = vadd.f32 %v5316_v56, %v5286_v32  ;;  %v5007_v11 = vadd.f32 %v5006_v3, %v4917_v51 }
 0x28c   : > { %v3823_v7 = vpop.f32.mrf.mxu1  ;;  %v5095_v18 = vpop.f32.mrf.mxu0 }
 0x28d   : > { %v5096_v5 = vadd.f32 %v5095_v18, %v5007_v11  ;;  %v4920_v12 = vpop.f32.mrf.mxu2  ;;  %v3824_v41 = vadd.f32 %v3823_v7, %v7778_v38 }
 0x28f   : > { %v5153_v31 = vadd.f32 %v5096_v5, %v3819_v47 }
 0x291   : > { %v6388_v50 = vpack.c.bf16 %v5153_v31, %v5152_v13  ;;  %v5248_v1 = vadd.f32 %v5247_v21, %v5153_v31  ;;  %v5287_v28 = vmul.f32 %v5153_v31, %v5153_v31 }
 0x292   : > { %v5009_v54 = vpop.f32.mrf.mxu3 }
 0x293   : > { %6451 = vst [vmem:[%s8014_s26 + $0x38] sm:$0xff] %v6388_v50   ;;  %v5318_v23 = vadd.f32 %v5317_v42, %v5287_v28  ;;  %v5010_v36 = vadd.f32 %v5009_v54, %v4920_v12 }
 0x294   : > { %v3826_v48 = vpop.f32.mrf.mxu1  ;;  %v5098_v49 = vpop.f32.mrf.mxu0 }
 0x295   : > { %v5099_v0 = vadd.f32 %v5098_v49, %v5010_v36  ;;  %v4922_v55 = vpop.f32.mrf.mxu2  ;;  %v3827_v44 = vadd.f32 %v3826_v48, %v7791_v6 }
 0x297   : > { %v5154_v30 = vadd.f32 %v5099_v0, %v3822_v20 }
 0x299   : > { %v5249_v26 = vadd.f32 %v5248_v1, %v5154_v30  ;;  %v5288_v25 = vmul.f32 %v5154_v30, %v5154_v30 }
 0x29a   : > { %v5011_v33 = vpop.f32.mrf.mxu3 }
 0x29b   : > { %v5319_v22 = vadd.f32 %v5318_v23, %v5288_v25  ;;  %v5012_v17 = vadd.f32 %v5011_v33, %v4922_v55 }
 0x29c   : > { %v3828_v19 = vpop.f32.mrf.mxu1  ;;  %v5100_v4 = vpop.f32.mrf.mxu0 }
 0x29d   : > { %v5101_v35 = vadd.f32 %v5100_v4, %v5012_v17  ;;  %v4925_v58 = vpop.f32.mrf.mxu2  ;;  %v3829_v13 = vadd.f32 %v3828_v19, %v7805_v59 }
 0x29f   : > { %v5155_v34 = vadd.f32 %v5101_v35, %v3824_v41 }
 0x2a1   : > { %v6393_v27 = vpack.c.bf16 %v5155_v34, %v5154_v30  ;;  %v5250_v43 = vadd.f32 %v5249_v26, %v5155_v34  ;;  %v5289_v16 = vmul.f32 %v5155_v34, %v5155_v34 }
 0x2a2   : > { %v5014_v45 = vpop.f32.mrf.mxu3 }
 0x2a3   : > { %6452 = vst [vmem:[%s8014_s26 + $0x40] sm:$0xff] %v6393_v27   ;;  %v5320_v39 = vadd.f32 %v5319_v22, %v5289_v16  ;;  %v5015_v63 = vadd.f32 %v5014_v45, %v4925_v58 }
 0x2a4   : > { %v3831_v60 = vpop.f32.mrf.mxu1  ;;  %v5103_v2 = vpop.f32.mrf.mxu0 }
 0x2a5   : > { %v5104_v40 = vadd.f32 %v5103_v2, %v5015_v63  ;;  %v4927_v14 = vpop.f32.mrf.mxu2  ;;  %v3832_v31 = vadd.f32 %v3831_v60, %v7818_v57 }
 0x2a7   : > { %v5156_v10 = vadd.f32 %v5104_v40, %v3827_v44 }
 0x2a9   : > { %v5251_v56 = vadd.f32 %v5250_v43, %v5156_v10  ;;  %v5290_v38 = vmul.f32 %v5156_v10, %v5156_v10 }
 0x2aa   : > { %v5016_v53 = vpop.f32.mrf.mxu3 }
 0x2ab   : > { %v5321_v52 = vadd.f32 %v5320_v39, %v5290_v38  ;;  %v5017_v51 = vadd.f32 %v5016_v53, %v4927_v14 }
 0x2ac   : > { %v3833_v24 = vpop.f32.mrf.mxu1  ;;  %v5105_v46 = vpop.f32.mrf.mxu0 }
 0x2ad   : > { %v5106_v21 = vadd.f32 %v5105_v46, %v5017_v51  ;;  %v4930_v32 = vpop.f32.mrf.mxu2  ;;  %v3834_v0 = vadd.f32 %v3833_v24, %v7832_v61 }
 0x2af   : > { %v5157_v3 = vadd.f32 %v5106_v21, %v3829_v13 }
 0x2b1   : > { %v6398_v7 = vpack.c.bf16 %v5157_v3, %v5156_v10  ;;  %v5252_v42 = vadd.f32 %v5251_v56, %v5157_v3  ;;  %v5291_v18 = vmul.f32 %v5157_v3, %v5157_v3 }
 0x2b2   : > { %v5019_v6 = vpop.f32.mrf.mxu3 }
 0x2b3   : > { %6453 = vst [vmem:[%s8014_s26 + $0x48] sm:$0xff] %v6398_v7   ;;  %v5322_v47 = vadd.f32 %v5321_v52, %v5291_v18  ;;  %v5020_v12 = vadd.f32 %v5019_v6, %v4930_v32 }
 0x2b4   : > { %v3836_v11 = vpop.f32.mrf.mxu1  ;;  %v5108_v5 = vpop.f32.mrf.mxu0 }
 0x2b5   : > { %v5109_v50 = vadd.f32 %v5108_v5, %v5020_v12  ;;  %v4932_v1 = vpop.f32.mrf.mxu2  ;;  %v3837_v35 = vadd.f32 %v3836_v11, %v7845_v15 }
 0x2b7   : > { %v5158_v28 = vadd.f32 %v5109_v50, %v3832_v31 }
 0x2b9   : > { %v5253_v54 = vadd.f32 %v5252_v42, %v5158_v28  ;;  %v5292_v59 = vmul.f32 %v5158_v28, %v5158_v28 }
 0x2ba   : > { %v5021_v48 = vpop.f32.mrf.mxu3 }
 0x2bb   : > { %v5323_v49 = vadd.f32 %v5322_v47, %v5292_v59  ;;  %v5022_v20 = vadd.f32 %v5021_v48, %v4932_v1 }
 0x2bc   : > { %v3838_v23 = vpop.f32.mrf.mxu1  ;;  %v5110_v36 = vpop.f32.mrf.mxu0 }
 0x2bd   : > { %v5111_v55 = vadd.f32 %v5110_v36, %v5022_v20  ;;  %v4935_v30 = vpop.f32.mrf.mxu2  ;;  %v3839_v2 = vadd.f32 %v3838_v23, %v7859_v29 }
 0x2bf   : > { %v5159_v26 = vadd.f32 %v5111_v55, %v3834_v0 }
 0x2c1   : > { %v6403_v25 = vpack.c.bf16 %v5159_v26, %v5158_v28  ;;  %v5254_v33 = vadd.f32 %v5253_v54, %v5159_v26  ;;  %v5293_v19 = vmul.f32 %v5159_v26, %v5159_v26 }
 0x2c2   : > { %v5024_v57 = vpop.f32.mrf.mxu3 }
 0x2c3   : > { %6454 = vst [vmem:[%s8014_s26 + $0x50] sm:$0xff] %v6403_v25   ;;  %v5324_v22 = vadd.f32 %v5323_v49, %v5293_v19  ;;  %v5025_v17 = vadd.f32 %v5024_v57, %v4935_v30  ;;  %v8279_v19 = vld [vmem:[#allocation6_spill] sm:$0xff] }
 0x2c4   : > { %v5113_v4 = vpop.f32.mrf.mxu0  ;;  %v3841_v41 = vpop.f32.mrf.mxu1 }
 0x2c5   : > { %v5114_v58 = vadd.f32 %v5113_v4, %v5025_v17  ;;  %v4937_v34 = vpop.f32.mrf.mxu2  ;;  %v3842_v46 = vadd.f32 %v3841_v41, %v7872_v37 }
 0x2c7   : > { %v5160_v27 = vadd.f32 %v5114_v58, %v3837_v35 }
 0x2c9   : > { %v5255_v43 = vadd.f32 %v5254_v33, %v5160_v27  ;;  %v5294_v61 = vmul.f32 %v5160_v27, %v5160_v27 }
 0x2ca   : > { %v5026_v16 = vpop.f32.mrf.mxu3 }
 0x2cb   : > { %v5325_v45 = vadd.f32 %v5324_v22, %v5294_v61  ;;  %v5027_v39 = vadd.f32 %v5026_v16, %v4937_v34 }
 0x2cc   : > { %v5115_v60 = vpop.f32.mrf.mxu0  ;;  %v3843_v40 = vpop.f32.mrf.mxu1 }
 0x2cd   : > { %v5116_v63 = vadd.f32 %v5115_v60, %v5027_v39  ;;  %v4940_v44 = vpop.f32.mrf.mxu2  ;;  %v3844_v11 = vadd.f32 %v3843_v40, %v7886_v9 }
 0x2cf   : > { %v5161_v14 = vadd.f32 %v5116_v63, %v3839_v2 }
 0x2d1   : > { %v6408_v10 = vpack.c.bf16 %v5161_v14, %v5160_v27  ;;  %v5256_v56 = vadd.f32 %v5255_v43, %v5161_v14  ;;  %v5295_v38 = vmul.f32 %v5161_v14, %v5161_v14 }
 0x2d2   : > { %v5029_v15 = vpop.f32.mrf.mxu3 }
 0x2d3   : > { %6455 = vst [vmem:[%s8014_s26 + $0x58] sm:$0xff] %v6408_v10   ;;  %v5326_v53 = vadd.f32 %v5325_v45, %v5295_v38  ;;  %v5030_v52 = vadd.f32 %v5029_v15, %v4940_v44 }
 0x2d4   : > { %v5118_v24 = vpop.f32.mrf.mxu0  ;;  %v3846_v32 = vpop.f32.mrf.mxu1 }
 0x2d5   : > { %v5119_v51 = vadd.f32 %v5118_v24, %v5030_v52  ;;  %v4942_v13 = vpop.f32.mrf.mxu2  ;;  %v3847_v23 = vadd.f32 %v3846_v32, %v7899_v8 }
 0x2d7   : > { %v5162_v21 = vadd.f32 %v5119_v51, %v3842_v46 }
 0x2d9   : > { %v5257_v29 = vadd.f32 %v5256_v56, %v5162_v21  ;;  %v5296_v3 = vmul.f32 %v5162_v21, %v5162_v21  ;;  %v8280_v56 = vld [vmem:[#allocation7_spill] sm:$0xff] }
 0x2da   : > { %v5031_v7 = vpop.f32.mrf.mxu3 }
 0x2db   : > { %v5327_v42 = vadd.f32 %v5326_v53, %v5296_v3  ;;  %v5032_v6 = vadd.f32 %v5031_v7, %v4942_v13  ;;  %v8281_v3 = vld [vmem:[#allocation8_spill] sm:$0xff] }
 0x2dc   : > { %v5120_v18 = vpop.f32.mrf.mxu0  ;;  %v3848_v28 = vpop.f32.mrf.mxu1 }
 0x2dd   : > { %v5121_v47 = vadd.f32 %v5120_v18, %v5032_v6  ;;  %v4945_v5 = vpop.f32.mrf.mxu2  ;;  %v3849_v57 = vadd.f32 %v3848_v28, %v8279_v19 }
 0x2df   : > { %v5163_v12 = vadd.f32 %v5121_v47, %v3844_v11 }
 0x2e1   : > { %v6413_v31 = vpack.c.bf16 %v5163_v12, %v5162_v21  ;;  %v5258_v50 = vadd.f32 %v5257_v29, %v5163_v12  ;;  %v5297_v1 = vmul.f32 %v5163_v12, %v5163_v12 }
 0x2e2   : > { %v5034_v37 = vpop.f32.mrf.mxu3 }
 0x2e3   : > { %6456 = vst [vmem:[%s8014_s26 + $0x60] sm:$0xff] %v6413_v31   ;;  %v5328_v54 = vadd.f32 %v5327_v42, %v5297_v1  ;;  %v5035_v48 = vadd.f32 %v5034_v37, %v4945_v5  ;;  %v8282_v37 = vld [vmem:[#allocation9_spill] sm:$0xff] }
 0x2e4   : > { %v5123_v59 = vpop.f32.mrf.mxu0  ;;  %v3851_v33 = vpop.f32.mrf.mxu1 }
 0x2e5   : > { %v5124_v49 = vadd.f32 %v5123_v59, %v5035_v48  ;;  %v4947_v36 = vpop.f32.mrf.mxu2  ;;  %v3852_v61 = vadd.f32 %v3851_v33, %v7930_v62 }
 0x2e7   : > { %v5164_v20 = vadd.f32 %v5124_v49, %v3847_v23 }
 0x2e9   : > { %v5259_v0 = vadd.f32 %v5258_v50, %v5164_v20  ;;  %v5298_v9 = vmul.f32 %v5164_v20, %v5164_v20 }
 0x2ea   : > { %v5036_v55 = vpop.f32.mrf.mxu3 }
 0x2eb   : > { %v5329_v30 = vadd.f32 %v5328_v54, %v5298_v9  ;;  %v5037_v25 = vadd.f32 %v5036_v55, %v4947_v36 }
 0x2ec   : > { %v5125_v26 = vpop.f32.mrf.mxu0  ;;  %v3853_v60 = vpop.f32.mrf.mxu1 }
 0x2ed   : > { %v5126_v22 = vadd.f32 %v5125_v26, %v5037_v25  ;;  %v4950_v4 = vpop.f32.mrf.mxu2  ;;  %v3854_v38 = vadd.f32 %v3853_v60, %v8280_v56 }
 0x2ef   : > { %v5165_v17 = vadd.f32 %v5126_v22, %v3849_v57 }
 0x2f1   : > { %v6418_v41 = vpack.c.bf16 %v5165_v17, %v5164_v20  ;;  %v5260_v35 = vadd.f32 %v5259_v0, %v5165_v17  ;;  %v5299_v58 = vmul.f32 %v5165_v17, %v5165_v17 }
 0x2f2   : > { %v5039_v8 = vpop.f32.mrf.mxu3 }
 0x2f3   : > { %6457 = vst [vmem:[%s8014_s26 + $0x68] sm:$0xff] %v6418_v41   ;;  %v5330_v34 = vadd.f32 %v5329_v30, %v5299_v58  ;;  %v5040_v43 = vadd.f32 %v5039_v8, %v4950_v4 }
 0x2f4   : > { %v5128_v27 = vpop.f32.mrf.mxu0  ;;  %v3856_v52 = vpop.f32.mrf.mxu1 }
 0x2f5   : > { %v5129_v16 = vadd.f32 %v5128_v27, %v5040_v43  ;;  %v4952_v45 = vpop.f32.mrf.mxu2  ;;  %v3857_v7 = vadd.f32 %v3856_v52, %v8281_v3 }
 0x2f7   : > { %v5166_v39 = vadd.f32 %v5129_v16, %v3852_v61 }
 0x2f9   : > { %v5261_v2 = vadd.f32 %v5260_v35, %v5166_v39  ;;  %v5300_v63 = vmul.f32 %v5166_v39, %v5166_v39 }
 0x2fa   : > { %v5041_v44 = vpop.f32.mrf.mxu3 }
 0x2fb   : > { %v5331_v40 = vadd.f32 %v5330_v34, %v5300_v63  ;;  %v5042_v10 = vadd.f32 %v5041_v44, %v4952_v45 }
 0x2fc   : > { %v5130_v14 = vpop.f32.mrf.mxu0  ;;  %v3858_v5 = vpop.f32.mrf.mxu1 }
 0x2fd   : > { %v5131_v15 = vadd.f32 %v5130_v14, %v5042_v10  ;;  %v4955_v53 = vpop.f32.mrf.mxu2  ;;  %v3859_v28 = vadd.f32 %v3858_v5, %v8282_v37 }
 0x2ff   : > { %v5167_v24 = vadd.f32 %v5131_v15, %v3854_v38 }
 0x301   : > { %v6423_v46 = vpack.c.bf16 %v5167_v24, %v5166_v39  ;;  %v5262_v51 = vadd.f32 %v5261_v2, %v5167_v24  ;;  %v5301_v62 = vmul.f32 %v5167_v24, %v5167_v24 }
 0x302   : > { %v5044_v13 = vpop.f32.mrf.mxu3 }
 0x303   : > { %6458 = vst [vmem:[%s8014_s26 + $0x70] sm:$0xff] %v6423_v46   ;;  %v5332_v21 = vadd.f32 %v5331_v40, %v5301_v62  ;;  %v5045_v29 = vadd.f32 %v5044_v13, %v4955_v53 }
 0x304   : > { %v5133_v32 = vpop.f32.mrf.mxu0 }
 0x305   : > { %v5134_v42 = vadd.f32 %v5133_v32, %v5045_v29  ;;  %v4957_v6 = vpop.f32.mrf.mxu2 }
 0x307   : > { %v5168_v18 = vadd.f32 %v5134_v42, %v3857_v7 }
 0x309   : > { %v5263_v11 = vadd.f32 %v5262_v51, %v5168_v18  ;;  %v5302_v47 = vmul.f32 %v5168_v18, %v5168_v18 }
 0x30a   : > { %v5046_v12 = vpop.f32.mrf.mxu3 }
 0x30b   : > { %v5333_v31 = vadd.f32 %v5332_v21, %v5302_v47  ;;  %v5047_v50 = vadd.f32 %v5046_v12, %v4957_v6 }
 0x30c   : > { %v5135_v1 = vpop.f32.mrf.mxu0 }
 0x30d   : > { %v5136_v54 = vadd.f32 %v5135_v1, %v5047_v50 }
 0x30f   : > { %v5169_v59 = vadd.f32 %v5136_v54, %v3859_v28 }
 0x311   : > { %v6428_v48 = vpack.c.bf16 %v5169_v59, %v5168_v18  ;;  %v5264_v23 = vadd.f32 %v5263_v11, %v5169_v59  ;;  %v5303_v49 = vmul.f32 %v5169_v59, %v5169_v59 }
 0x313   : > { %6459 = vst [vmem:[%s8014_s26 + $0x78] sm:$0xff] %v6428_v48   ;;  %v5265_v36 = vrot.slane %v5264_v23, 4  ;;  %v5334_v20 = vadd.f32 %v5333_v31, %v5303_v49 }
 0x315   : > { %v5266_v0 = vadd.f32 %v5265_v36, %v5264_v23  ;;  %v5335_v9 = vrot.slane %v5334_v20, 4 }
 0x317   : > { %v5267_v55 = vrot.slane %v5266_v0, 2  ;;  %v5336_v30 = vadd.f32 %v5335_v9, %v5334_v20 }
 0x319   : > { %v5268_v26 = vadd.f32 %v5267_v55, %v5266_v0  ;;  %v5337_v25 = vrot.slane %v5336_v30, 2 }
 0x31b   : > { %v5269_v33 = vrot.slane %v5268_v26, 1  ;;  %v5338_v19 = vadd.f32 %v5337_v25, %v5336_v30 }
 0x31d   : > { %v5270_v57 = vadd.f32 %v5269_v33, %v5268_v26  ;;  %v5339_v22 = vrot.slane %v5338_v19, 1 }
 0x31f   : > { %5271 = vst [vmem:[%s465_s29] sm:$0x1] %v5270_v57  ;;  %v5340_v4 = vadd.f32 %v5339_v22, %v5338_v19 }
 0x321   : > { %5341 = vst [vmem:[%s465_s29 + $0x1] sm:$0x1] %v5340_v4 }
 0x322 PF: > { %s18_s2 = sadd.s32 1, %s6567_s2   ;;  %s8283_s23 = smov %s6563_s24 }
 0x323   : > { %p15_p5 = scmp.ge.s32.totalorder %s18_s2, 4   ;;  %s8284_s24 = smov %s8286_s25 }
 0x325   :  { %17 = sbr.rel (!%p15_p5) target bundleno = 2 (0x2), region = 97 }

</bundles_post_ra>
